<compile_context>
chip_gen: v7x
topology: tpu7x:2x2x1
jax: 0.10.0
libtpu: 0.0.40
codegen_flags: <defaults>
</compile_context>

<pallas_src>
import functools
import jax
import jax.numpy as jnp
from jax.experimental import pallas as pl
from jax.experimental.pallas import tpu as pltpu


# ----------------------------------------------------------------------------
# Small helpers
# ----------------------------------------------------------------------------

_GEMM_LANE_TILES = (2048, 1024, 512, 256, 128)
_ROW_TILES = (512, 256, 128, 64, 32, 16, 8)


def _pick_tile(n, candidates):
    """Largest candidate that divides n; fall back to the full extent."""
    for c in candidates:
        if c <= n and n % c == 0:
            return c
    return n


# ----------------------------------------------------------------------------
# Pallas kernels
# ----------------------------------------------------------------------------

def _gmm_bias_kernel(w_ref, c_ref, b_ref, o_ref):
    # w: (Og, K) bf16, c: (K, tn) bf16, b: (Og, 1) f32 -> o: (Og, tn) f32
    o_ref[...] = (
        jnp.dot(w_ref[...], c_ref[...], preferred_element_type=jnp.float32)
        + b_ref[...]
    )


def _gn_lrelu_kernel(x_ref, g_ref, b_ref, o_ref):
    # x: (Cg, HW) f32, gamma/beta: (Cg, 1) f32; per-(n, group) normalization
    x = x_ref[...]
    mean = jnp.mean(x, keepdims=True)
    var = jnp.mean(jnp.square(x - mean), keepdims=True)
    xn = (x - mean) * jax.lax.rsqrt(var + 1e-5)
    y = xn * g_ref[...] + b_ref[...]
    o_ref[...] = jnp.where(y > 0, y, 0.2 * y)          # LeakyReLU(0.2)


def _spectral_mix_kernel(xr_ref, xi_ref, wr_ref, wi_ref, or_ref, oi_ref):
    # complex pointwise multiply; weights are (1, L) and broadcast over rows
    xr, xi = xr_ref[...], xi_ref[...]
    wr, wi = wr_ref[...], wi_ref[...]
    or_ref[...] = xr * wr - xi * wi
    oi_ref[...] = xr * wi + xi * wr


def _residual_gelu_kernel(x_ref, y_ref, o_ref):
    # TODO(synk): tanh-approximate GELU (PyTorch nn.GELU default is erf form).
    y = y_ref[...]
    g = 0.5 * y * (1.0 + jnp.tanh(0.7978845608028654 * (y + 0.044715 * y * y * y)))
    o_ref[...] = x_ref[...] + g


def _final_combine_kernel(p_ref, s_ref, o_ref):
    o_ref[...] = 0.05 * p_ref[...] + s_ref[...]


# ----------------------------------------------------------------------------
# Conv = im2col (XLA glue) + grouped, lane-dense Pallas GEMM
# ----------------------------------------------------------------------------

def im2col_T(x, kh, kw, stride, padding, groups):
    """Return col^T of shape (groups, Cin_g*kh*kw, N*OH*OW) so the GEMM's
    lane axis is the spatial dim."""
    N, C, H, W = x.shape
    xp = jnp.pad(x, ((0, 0), (0, 0), (padding, padding), (padding, padding)))
    OH = (H + 2 * padding - kh) // stride + 1
    OW = (W + 2 * padding - kw) // stride + 1
    taps = []
    for i in range(kh):
        for j in range(kw):
            taps.append(
                xp[:, :, i:i + stride * (OH - 1) + 1:stride,
                         j:j + stride * (OW - 1) + 1:stride]
            )
    col = jnp.stack(taps, axis=0).reshape(kh, kw, N, C, OH, OW)
    # -> (C, kh, kw, N, OH, OW); K ordered (Cin_g, kh, kw), M ordered (N, OH, OW)
    col = col.transpose(3, 0, 1, 2, 4, 5)
    Cin_g = C // groups
    return col.reshape(groups, Cin_g * kh * kw, N * OH * OW), OH, OW


def grouped_matmul_bias(w3, colT, b3):
    """(G, Og, K) @ (G, K, M) + (G, Og, 1) -> (G, Og, M), single pallas_call."""
    G, Og, K = w3.shape
    _, _, M = colT.shape
    tn = _pick_tile(M, _GEMM_LANE_TILES)
    return pl.pallas_call(
        _gmm_bias_kernel,
        out_shape=jax.ShapeDtypeStruct((G, Og, M), jnp.float32),
        grid=(G, M // tn),
        in_specs=[
            pl.BlockSpec((None, Og, K), lambda g, m: (g, 0, 0)),
            pl.BlockSpec((None, K, tn), lambda g, m: (g, 0, m)),
            pl.BlockSpec((None, Og, 1), lambda g, m: (g, 0, 0)),
        ],
        out_specs=pl.BlockSpec((None, Og, tn), lambda g, m: (g, 0, m)),
        compiler_params=pltpu.CompilerParams(
            dimension_semantics=("parallel", "parallel")),
    )(w3.astype(jnp.bfloat16), colT.astype(jnp.bfloat16), b3)


def conv2d(x, weight, bias, stride=1, padding=0, groups=1):
    """PyTorch-style Conv2d. weight: (C_out, C_in/groups, kh, kw), NCHW x.
    All groups handled in one Pallas call (group is a grid axis)."""
    # TODO(synk): im2col is still built in XLA glue; a fully in-kernel tap
    # accumulation (grid over kh*kw) would further cut HBM traffic.
    N, C, H, W = x.shape
    C_out, Cin_g, kh, kw = weight.shape
    colT, OH, OW = im2col_T(x, kh, kw, stride, padding, groups)
    Og = C_out // groups
    w3 = weight.reshape(groups, Og, Cin_g * kh * kw)
    b3 = bias.reshape(groups, Og, 1).astype(jnp.float32)
    out = grouped_matmul_bias(w3, colT, b3)                 # (G, Og, M)
    out = out.reshape(groups, Og, N, OH, OW).transpose(2, 0, 1, 3, 4)
    return out.reshape(N, C_out, OH, OW)


def conv_transpose2d(x, weight, bias, stride):
    """PyTorch ConvTranspose2d(k=3, padding=1, output_padding=stride//2).
    weight: (C_in, C_out, 3, 3)."""
    N, C, H, W = x.shape
    if stride == 2:
        xd = jnp.zeros((N, C, 2 * H - 1, 2 * W - 1), x.dtype)
        xd = xd.at[:, :, ::2, ::2].set(x)
        xp = jnp.pad(xd, ((0, 0), (0, 0), (1, 2), (1, 2)))
    else:
        xp = jnp.pad(x, ((0, 0), (0, 0), (1, 1), (1, 1)))
    w = jnp.flip(weight, axis=(-2, -1)).transpose(1, 0, 2, 3)
    return conv2d(xp, w, bias, stride=1, padding=0)


# ----------------------------------------------------------------------------
# GroupNorm + LeakyReLU (fused Pallas kernel, no materialized broadcasts)
# ----------------------------------------------------------------------------

def groupnorm_leakyrelu(x, gamma, beta, groups):
    N, C, H, W = x.shape
    Cg = C // groups
    HW = H * W
    xr = x.reshape(N, groups, Cg, HW)
    g3 = gamma.reshape(groups, Cg, 1).astype(jnp.float32)
    b3 = beta.reshape(groups, Cg, 1).astype(jnp.float32)
    out = pl.pallas_call(
        _gn_lrelu_kernel,
        out_shape=jax.ShapeDtypeStruct((N, groups, Cg, HW), jnp.float32),
        grid=(N, groups),
        in_specs=[
            pl.BlockSpec((None, None, Cg, HW), lambda n, gi: (n, gi, 0, 0)),
            pl.BlockSpec((None, Cg, 1), lambda n, gi: (gi, 0, 0)),
            pl.BlockSpec((None, Cg, 1), lambda n, gi: (gi, 0, 0)),
        ],
        out_specs=pl.BlockSpec((None, None, Cg, HW), lambda n, gi: (n, gi, 0, 0)),
        compiler_params=pltpu.CompilerParams(
            dimension_semantics=("parallel", "parallel")),
    )(xr, g3, b3)
    return out.reshape(N, C, H, W)


# ----------------------------------------------------------------------------
# Parameter initialization (deterministic, synthetic).  params contains ONLY
# arrays; strides / kernel sizes / groups live in the static config.
# ----------------------------------------------------------------------------

class KeyGen:
    def __init__(self, seed=0):
        self.key = jax.random.PRNGKey(seed)

    def __call__(self):
        self.key, sub = jax.random.split(self.key)
        return sub


def conv_init(kg, c_out, c_in_g, k):
    fan_in = c_in_g * k * k
    w = jax.random.normal(kg(), (c_out, c_in_g, k, k), jnp.float32) / jnp.sqrt(
        jnp.float32(fan_in))
    b = jnp.zeros((c_out,), jnp.float32)
    return w, b


def convsc_init(kg, c_in, c_out, transpose=False):
    k = 3
    if transpose:
        w = jax.random.normal(kg(), (c_in, c_out, k, k), jnp.float32) / jnp.sqrt(
            jnp.float32(c_in * k * k))
    else:
        w, _ = conv_init(kg, c_out, c_in, k)
    return {"w": w, "b": jnp.zeros((c_out,), jnp.float32),
            "gamma": jnp.ones((c_out,), jnp.float32),
            "beta": jnp.zeros((c_out,), jnp.float32)}


def inception_init(kg, c_in, c_hid, c_out, incep_ker, groups):
    w1, b1 = conv_init(kg, c_hid, c_in, 1)
    branches = []
    for k in incep_ker:
        bw, bb = conv_init(kg, c_out, c_hid // groups, k)
        branches.append({"w": bw, "b": bb,
                         "gamma": jnp.ones((c_out,), jnp.float32),
                         "beta": jnp.zeros((c_out,), jnp.float32)})
    return {"conv1_w": w1, "conv1_b": b1, "branches": branches}


def init_params(kg, shape_in, hid_S, hid_T, N_S, N_T, incep_ker, groups):
    T, C, H, W = shape_in
    params = {}
    # TODO(synk): ConvolutionalNetwork.skip_connection internals not in the
    # snippet; reconstructed as a per-frame 3x3 conv (C -> C).
    sw, sb = conv_init(kg, C, C, 3)
    params["skip"] = {"w": sw, "b": sb}
    # TODO(synk): FoTF internals not in the snippet; reconstructed as an
    # FNO-style spectral mixer (rfft2 -> complex pointwise weights -> irfft2 ->
    # residual + GELU), output shape == input shape.
    Wf = W // 2 + 1
    params["fotf"] = {
        "wr": 1.0 + 0.1 * jax.random.normal(kg(), (C, H, Wf), jnp.float32),
        "wi": 0.1 * jax.random.normal(kg(), (C, H, Wf), jnp.float32),
    }
    # Encoder (latent_projection): SimVP-style, strides [1,2,1,2,...]
    strides = ([1, 2] * ((N_S + 1) // 2))[:N_S]
    enc_layers = [convsc_init(kg, C, hid_S)]
    for _ in strides[1:]:
        enc_layers.append(convsc_init(kg, hid_S, hid_S))
    params["latent_projection"] = {"layers": enc_layers}
    # (the PyTorch module also builds an unused `self.enc`; skipped here)
    # TeDev: Inception encoder/decoder over (B, T*hid_S, H1, W1)
    channel_in = T * hid_S
    enc_blocks = [inception_init(kg, channel_in, hid_T // 2, hid_T, incep_ker, groups)]
    for _ in range(1, N_T):
        enc_blocks.append(inception_init(kg, hid_T, hid_T // 2, hid_T, incep_ker, groups))
    dec_blocks = [inception_init(kg, hid_T, hid_T // 2, hid_T, incep_ker, groups)]
    for _ in range(1, N_T - 1):
        dec_blocks.append(inception_init(kg, 2 * hid_T, hid_T // 2, hid_T, incep_ker, groups))
    dec_blocks.append(inception_init(kg, 2 * hid_T, hid_T // 2, channel_in, incep_ker, groups))
    params["tedev"] = {"enc": enc_blocks, "dec": dec_blocks}
    # Decoder: transposed ConvSC layers with reversed strides + 1x1 readout
    dstrides = strides[::-1]
    dec_layers = [convsc_init(kg, hid_S, hid_S, transpose=True) for _ in dstrides[:-1]]
    dec_layers.append(convsc_init(kg, 2 * hid_S, hid_S, transpose=True))
    ro_w, ro_b = conv_init(kg, C, hid_S, 1)
    params["dec"] = {"layers": dec_layers, "ro_w": ro_w, "ro_b": ro_b}
    static = {"enc_strides": tuple(strides), "dec_strides": tuple(dstrides),
              "groups": groups}
    return params, static


# ----------------------------------------------------------------------------
# Sub-module apply functions
# ----------------------------------------------------------------------------

def convsc_apply(p, x, stride):
    y = conv2d(x, p["w"], p["b"], stride=stride, padding=1)
    return groupnorm_leakyrelu(y, p["gamma"], p["beta"], groups=2)


def convsc_t_apply(p, x, stride):
    y = conv_transpose2d(x, p["w"], p["b"], stride=stride)
    return groupnorm_leakyrelu(y, p["gamma"], p["beta"], groups=2)


def skip_apply(p, x5):
    B, T, C, H, W = x5.shape
    x = x5.reshape(B * T, C, H, W)
    y = conv2d(x, p["w"], p["b"], stride=1, padding=1)
    return y.reshape(B, T, C, H, W)


def fotf_apply(p, x5):
    B, T, C, H, W = x5.shape
    BT = B * T
    x = x5.reshape(BT, C, H, W)
    # FFT itself stays in JAX glue (no Pallas FFT primitive on TPU).
    spec = jnp.fft.rfft2(x, axes=(-2, -1))
    Wf = spec.shape[-1]
    L = C * H * Wf
    xr = jnp.real(spec).astype(jnp.float32).reshape(BT, L)
    xi = jnp.imag(spec).astype(jnp.float32).reshape(BT, L)
    wr = p["wr"].reshape(1, L)                 # small weights, NOT broadcast in HBM
    wi = p["wi"].reshape(1, L)
    tb = _pick_tile(BT, _ROW_TILES)
    yr, yi = pl.pallas_call(
        _spectral_mix_kernel,
        out_shape=(jax.ShapeDtypeStruct((BT, L), jnp.float32),
                   jax.ShapeDtypeStruct((BT, L), jnp.float32)),
        grid=(BT // tb,),
        in_specs=[
            pl.BlockSpec((tb, L), lambda i: (i, 0)),
            pl.BlockSpec((tb, L), lambda i: (i, 0)),
            pl.BlockSpec((1, L), lambda i: (0, 0)),
            pl.BlockSpec((1, L), lambda i: (0, 0)),
        ],
        out_specs=(pl.BlockSpec((tb, L), lambda i: (i, 0)),
                   pl.BlockSpec((tb, L), lambda i: (i, 0))),
        compiler_params=pltpu.CompilerParams(dimension_semantics=("parallel",)),
    )(xr, xi, wr, wi)
    spec_out = (yr + 1j * yi).reshape(BT, C, H, Wf)
    y = jnp.fft.irfft2(spec_out, s=(H, W), axes=(-2, -1)).astype(jnp.float32)
    # residual + GELU, lane-dense tiles over (B*T*C, H*W)
    R, HW = BT * C, H * W
    tr = _pick_tile(R, _ROW_TILES)
    out = pl.pallas_call(
        _residual_gelu_kernel,
        out_shape=jax.ShapeDtypeStruct((R, HW), jnp.float32),
        grid=(R // tr,),
        in_specs=[pl.BlockSpec((tr, HW), lambda i: (i, 0)),
                  pl.BlockSpec((tr, HW), lambda i: (i, 0))],
        out_specs=pl.BlockSpec((tr, HW), lambda i: (i, 0)),
        compiler_params=pltpu.CompilerParams(dimension_semantics=("parallel",)),
    )(x.reshape(R, HW), y.reshape(R, HW))
    return out.reshape(B, T, C, H, W)


def encoder_apply(p, x, strides):
    enc1 = convsc_apply(p["layers"][0], x, strides[0])
    latent = enc1
    for layer, s in zip(p["layers"][1:], strides[1:]):
        latent = convsc_apply(layer, latent, s)
    return latent, enc1


def inception_apply(p, x, groups):
    h = conv2d(x, p["conv1_w"], p["conv1_b"], stride=1, padding=0)
    y = None
    for br in p["branches"]:
        k = int(br["w"].shape[-1])            # static (shape-derived)
        z = conv2d(h, br["w"], br["b"], stride=1, padding=k // 2, groups=groups)
        z = groupnorm_leakyrelu(z, br["gamma"], br["beta"], groups=groups)
        y = z if y is None else y + z
    return y


def tedev_apply(p, x5, groups):
    B, T, Cc, Hh, Ww = x5.shape
    z = x5.reshape(B, T * Cc, Hh, Ww)
    skips = []
    n_enc = len(p["enc"])
    for i, blk in enumerate(p["enc"]):
        z = inception_apply(blk, z, groups)
        if i < n_enc - 1:
            skips.append(z)
    for i, blk in enumerate(p["dec"]):
        if i > 0:
            z = jnp.concatenate([z, skips[-i]], axis=1)
        z = inception_apply(blk, z, groups)
    return z.reshape(B, T, Cc, Hh, Ww)


def decoder_apply(p, hid, enc1, strides):
    for layer, s in zip(p["layers"][:-1], strides[:-1]):
        hid = convsc_t_apply(layer, hid, s)
    hid = convsc_t_apply(p["layers"][-1],
                         jnp.concatenate([hid, enc1], axis=1),
                         strides[-1])
    return conv2d(hid, p["ro_w"], p["ro_b"], stride=1, padding=0)


# ----------------------------------------------------------------------------
# Top-level Earthfarseer forward
# ----------------------------------------------------------------------------

def earthfarseer_forward(params, x, static):
    groups = static["groups"]
    B, T, C, H, W = x.shape
    skip_feature = skip_apply(params["skip"], x)                     # (B,T,C,H,W)
    spatial_feature = fotf_apply(params["fotf"], x)                  # (B,T,C,H,W)
    spatial_feature = spatial_feature.reshape(-1, C, H, W)
    spatial_embed, spatial_skip = encoder_apply(
        params["latent_projection"], spatial_feature, static["enc_strides"])
    _, C_, H_, W_ = spatial_embed.shape
    spatial_embed = spatial_embed.reshape(B, T, C_, H_, W_)
    st_embed = tedev_apply(params["tedev"], spatial_embed, groups)
    st_embed = st_embed.reshape(B * T, C_, H_, W_)
    predictions = decoder_apply(params["dec"], st_embed, spatial_skip,
                                static["dec_strides"])
    # predictions = 0.05 * predictions.reshape(B,T,C,H,W) + skip_feature
    R, HW = B * T * C, H * W
    tr = _pick_tile(R, _ROW_TILES)
    out = pl.pallas_call(
        _final_combine_kernel,
        out_shape=jax.ShapeDtypeStruct((R, HW), jnp.float32),
        grid=(R // tr,),
        in_specs=[pl.BlockSpec((tr, HW), lambda i: (i, 0)),
                  pl.BlockSpec((tr, HW), lambda i: (i, 0))],
        out_specs=pl.BlockSpec((tr, HW), lambda i: (i, 0)),
        compiler_params=pltpu.CompilerParams(dimension_semantics=("parallel",)),
    )(predictions.reshape(R, HW), skip_feature.reshape(R, HW))
    return out.reshape(B, T, C, H, W)


# ----------------------------------------------------------------------------
# Main
# ----------------------------------------------------------------------------

if __name__ == "__main__":
    # Small config consistent with the module's __init__ signature
    B, T, C, H, W = 2, 4, 4, 16, 16
    hid_S, hid_T, N_S, N_T = 32, 16, 4, 2
    incep_ker, groups = [3, 5], 4
    shape_in = (T, C, H, W)
    # mirrors the PyTorch H1/W1 computation (documentation only)
    H1 = int(H / 2 ** (N_S / 2)) + 1 if H % 3 == 0 else int(H / 2 ** (N_S / 2))
    W1 = int(W / 2 ** (N_S / 2))

    kg = KeyGen(seed=0)
    params, static = init_params(kg, shape_in, hid_S, hid_T, N_S, N_T,
                                 incep_ker, groups)

    x = jax.random.normal(jax.random.PRNGKey(0), (B, T, C, H, W), jnp.float32)

    fwd = jax.jit(functools.partial(earthfarseer_forward, static=static))
    out = fwd(params, x)
    out = jax.block_until_ready(out)
    assert out.shape == (B, T, C, H, W), out.shape
    assert jnp.all(jnp.isfinite(out))
    print("KERNEL_OK")
</pallas_src>

<mosaic_0001>
module attributes {stable_mosaic.version = 11 : i64} {
  func.func @_spectral_mix_kernel(%arg0: i32, %arg1: memref<8x576xf32, #tpu.memory_space<vmem>>, %arg2: memref<8x576xf32, #tpu.memory_space<vmem>>, %arg3: memref<1x576xf32, #tpu.memory_space<vmem>>, %arg4: memref<1x576xf32, #tpu.memory_space<vmem>>, %arg5: memref<8x576xf32, #tpu.memory_space<vmem>>, %arg6: memref<8x576xf32, #tpu.memory_space<vmem>>) attributes {dimension_semantics = [#tpu.dimension_semantics<parallel>], iteration_bounds = array<i64: 1>, scalar_prefetch = 0 : i64, scratch_operands = 0 : i64, tpu.core_type = #tpu.core_type<tc>, window_params = [{transform_indices = @transform_0, window_bounds = array<i64: 8, 576>}, {transform_indices = @transform_1, window_bounds = array<i64: 8, 576>}, {pipeline_mode = #tpu.pipeline_mode<synchronous>, transform_indices = @transform_2, window_bounds = array<i64: 1, 576>}, {pipeline_mode = #tpu.pipeline_mode<synchronous>, transform_indices = @transform_3, window_bounds = array<i64: 1, 576>}, {transform_indices = @transform_4, window_bounds = array<i64: 8, 576>}, {transform_indices = @transform_5, window_bounds = array<i64: 8, 576>}]} {
    %c0 = arith.constant 0 : index
    %c0_0 = arith.constant 0 : index
    %0 = vector.load %arg1[%c0, %c0_0] : memref<8x576xf32, #tpu.memory_space<vmem>>, vector<8x576xf32>
    %c0_1 = arith.constant 0 : index
    %c0_2 = arith.constant 0 : index
    %1 = vector.load %arg2[%c0_1, %c0_2] : memref<8x576xf32, #tpu.memory_space<vmem>>, vector<8x576xf32>
    %c0_3 = arith.constant 0 : index
    %c0_4 = arith.constant 0 : index
    %2 = vector.load %arg3[%c0_3, %c0_4] : memref<1x576xf32, #tpu.memory_space<vmem>>, vector<1x576xf32>
    %c0_5 = arith.constant 0 : index
    %c0_6 = arith.constant 0 : index
    %3 = vector.load %arg4[%c0_5, %c0_6] : memref<1x576xf32, #tpu.memory_space<vmem>>, vector<1x576xf32>
    %4 = vector.broadcast %2 : vector<1x576xf32> to vector<8x576xf32>
    %5 = arith.mulf %0, %4 : vector<8x576xf32>
    %6 = vector.broadcast %3 : vector<1x576xf32> to vector<8x576xf32>
    %7 = arith.mulf %1, %6 : vector<8x576xf32>
    %8 = arith.subf %5, %7 : vector<8x576xf32>
    %c0_7 = arith.constant 0 : index
    %c0_8 = arith.constant 0 : index
    %9 = vector.load %arg5[%c0_7, %c0_8] : memref<8x576xf32, #tpu.memory_space<vmem>>, vector<8x576xf32>
    tpu.vector_store %arg5[%c0_7, %c0_8], %8 {strides = array<i32>} : memref<8x576xf32, #tpu.memory_space<vmem>>, vector<8x576xf32>,
    %10 = vector.broadcast %3 : vector<1x576xf32> to vector<8x576xf32>
    %11 = arith.mulf %0, %10 : vector<8x576xf32>
    %12 = vector.broadcast %2 : vector<1x576xf32> to vector<8x576xf32>
    %13 = arith.mulf %1, %12 : vector<8x576xf32>
    %14 = arith.addf %11, %13 : vector<8x576xf32>
    %c0_9 = arith.constant 0 : index
    %c0_10 = arith.constant 0 : index
    %15 = vector.load %arg6[%c0_9, %c0_10] : memref<8x576xf32, #tpu.memory_space<vmem>>, vector<8x576xf32>
    tpu.vector_store %arg6[%c0_9, %c0_10], %14 {strides = array<i32>} : memref<8x576xf32, #tpu.memory_space<vmem>>, vector<8x576xf32>,
    return
  }
  func.func @transform_0(%arg0: i32) -> (i32, i32) {
    %c0_i32 = arith.constant 0 : i32
    %c0_i32_0 = arith.constant 0 : i32
    return %arg0, %c0_i32 : i32, i32
  }
  func.func @transform_1(%arg0: i32) -> (i32, i32) {
    %c0_i32 = arith.constant 0 : i32
    %c0_i32_0 = arith.constant 0 : i32
    return %arg0, %c0_i32 : i32, i32
  }
  func.func @transform_2(%arg0: i32) -> (i32, i32) {
    %c0_i32 = arith.constant 0 : i32
    %c0_i32_0 = arith.constant 0 : i32
    %c0_i32_1 = arith.constant 0 : i32
    return %c0_i32, %c0_i32_0 : i32, i32
  }
  func.func @transform_3(%arg0: i32) -> (i32, i32) {
    %c0_i32 = arith.constant 0 : i32
    %c0_i32_0 = arith.constant 0 : i32
    %c0_i32_1 = arith.constant 0 : i32
    return %c0_i32, %c0_i32_0 : i32, i32
  }
  func.func @transform_4(%arg0: i32) -> (i32, i32) {
    %c0_i32 = arith.constant 0 : i32
    %c0_i32_0 = arith.constant 0 : i32
    return %arg0, %c0_i32 : i32, i32
  }
  func.func @transform_5(%arg0: i32) -> (i32, i32) {
    %c0_i32 = arith.constant 0 : i32
    %c0_i32_0 = arith.constant 0 : i32
    return %arg0, %c0_i32 : i32, i32
  }
}

module attributes {stable_mosaic.version = 11 : i64} {
  func.func @_residual_gelu_kernel(%arg0: i32, %arg1: memref<32x256xf32, #tpu.memory_space<vmem>>, %arg2: memref<32x256xf32, #tpu.memory_space<vmem>>, %arg3: memref<32x256xf32, #tpu.memory_space<vmem>>) attributes {dimension_semantics = [#tpu.dimension_semantics<parallel>], iteration_bounds = array<i64: 1>, scalar_prefetch = 0 : i64, scratch_operands = 0 : i64, tpu.core_type = #tpu.core_type<tc>, window_params = [{transform_indices = @transform_0, window_bounds = array<i64: 32, 256>}, {transform_indices = @transform_1, window_bounds = array<i64: 32, 256>}, {transform_indices = @transform_2, window_bounds = array<i64: 32, 256>}]} {
    %c0 = arith.constant 0 : index
    %c0_0 = arith.constant 0 : index
    %0 = vector.load %arg2[%c0, %c0_0] : memref<32x256xf32, #tpu.memory_space<vmem>>, vector<32x256xf32>
    %cst = arith.constant 5.000000e-01 : f32
    %1 = vector.broadcast %cst : f32 to vector<32x256xf32>
    %2 = arith.mulf %1, %0 : vector<32x256xf32>
    %cst_1 = arith.constant 4.471500e-02 : f32
    %3 = vector.broadcast %cst_1 : f32 to vector<32x256xf32>
    %4 = arith.mulf %3, %0 : vector<32x256xf32>
    %5 = arith.mulf %4, %0 : vector<32x256xf32>
    %6 = arith.mulf %5, %0 : vector<32x256xf32>
    %7 = arith.addf %0, %6 : vector<32x256xf32>
    %cst_2 = arith.constant 0.797884583 : f32
    %8 = vector.broadcast %cst_2 : f32 to vector<32x256xf32>
    %9 = arith.mulf %8, %7 : vector<32x256xf32>
    %10 = math.tanh %9 : vector<32x256xf32>
    %cst_3 = arith.constant 1.000000e+00 : f32
    %11 = vector.broadcast %cst_3 : f32 to vector<32x256xf32>
    %12 = arith.addf %11, %10 : vector<32x256xf32>
    %13 = arith.mulf %2, %12 : vector<32x256xf32>
    %c0_4 = arith.constant 0 : index
    %c0_5 = arith.constant 0 : index
    %14 = vector.load %arg1[%c0_4, %c0_5] : memref<32x256xf32, #tpu.memory_space<vmem>>, vector<32x256xf32>
    %15 = arith.addf %14, %13 : vector<32x256xf32>
    %c0_6 = arith.constant 0 : index
    %c0_7 = arith.constant 0 : index
    %16 = vector.load %arg3[%c0_6, %c0_7] : memref<32x256xf32, #tpu.memory_space<vmem>>, vector<32x256xf32>
    tpu.vector_store %arg3[%c0_6, %c0_7], %15 {strides = array<i32>} : memref<32x256xf32, #tpu.memory_space<vmem>>, vector<32x256xf32>,
    return
  }
  func.func @transform_0(%arg0: i32) -> (i32, i32) {
    %c0_i32 = arith.constant 0 : i32
    %c0_i32_0 = arith.constant 0 : i32
    return %arg0, %c0_i32 : i32, i32
  }
  func.func @transform_1(%arg0: i32) -> (i32, i32) {
    %c0_i32 = arith.constant 0 : i32
    %c0_i32_0 = arith.constant 0 : i32
    return %arg0, %c0_i32 : i32, i32
  }
  func.func @transform_2(%arg0: i32) -> (i32, i32) {
    %c0_i32 = arith.constant 0 : i32
    %c0_i32_0 = arith.constant 0 : i32
    return %arg0, %c0_i32 : i32, i32
  }
}

module attributes {stable_mosaic.version = 11 : i64} {
  func.func @_gmm_bias_kernel(%arg0: i32, %arg1: i32, %arg2: memref<1x32x36xbf16, #tpu.memory_space<vmem>>, %arg3: memref<1x36x2048xbf16, #tpu.memory_space<vmem>>, %arg4: memref<1x32x1xf32, #tpu.memory_space<vmem>>, %arg5: memref<1x32x2048xf32, #tpu.memory_space<vmem>>) attributes {dimension_semantics = [#tpu.dimension_semantics<parallel>, #tpu.dimension_semantics<parallel>], iteration_bounds = array<i64: 1, 1>, scalar_prefetch = 0 : i64, scratch_operands = 0 : i64, tpu.core_type = #tpu.core_type<tc>, window_params = [{transform_indices = @transform_0, window_bounds = array<i64: 1, 32, 36>}, {transform_indices = @transform_1, window_bounds = array<i64: 1, 36, 2048>}, {transform_indices = @transform_2, window_bounds = array<i64: 1, 32, 1>}, {transform_indices = @transform_3, window_bounds = array<i64: 1, 32, 2048>}]} {
    %c0 = arith.constant 0 : index
    %c0_0 = arith.constant 0 : index
    %c0_1 = arith.constant 0 : index
    %0 = vector.load %arg2[%c0, %c0_0, %c0_1] : memref<1x32x36xbf16, #tpu.memory_space<vmem>>, vector<1x32x36xbf16>
    %1 = vector.shape_cast %0 : vector<1x32x36xbf16> to vector<32x36xbf16>
    %c0_2 = arith.constant 0 : index
    %c0_3 = arith.constant 0 : index
    %c0_4 = arith.constant 0 : index
    %2 = vector.load %arg3[%c0_2, %c0_3, %c0_4] : memref<1x36x2048xbf16, #tpu.memory_space<vmem>>, vector<1x36x2048xbf16>
    %3 = vector.shape_cast %2 : vector<1x36x2048xbf16> to vector<36x2048xbf16>
    %cst = arith.constant dense<0.000000e+00> : vector<32x2048xf32>
    %4 = tpu.matmul %1, %3, %cst {dimension_numbers = #tpu.dot_dimension_numbers<[1], [0], [0], [1], [0, 0, 1, 1], [], []>} : vector<32x36xbf16>, vector<36x2048xbf16>, vector<32x2048xf32> -> vector<32x2048xf32>
    %c0_5 = arith.constant 0 : index
    %c0_6 = arith.constant 0 : index
    %c0_7 = arith.constant 0 : index
    %5 = vector.load %arg4[%c0_5, %c0_6, %c0_7] : memref<1x32x1xf32, #tpu.memory_space<vmem>>, vector<1x32x1xf32>
    %6 = vector.shape_cast %5 : vector<1x32x1xf32> to vector<32x1xf32>
    %7 = vector.broadcast %6 : vector<32x1xf32> to vector<32x2048xf32>
    %8 = arith.addf %4, %7 : vector<32x2048xf32>
    %c0_8 = arith.constant 0 : index
    %c0_9 = arith.constant 0 : index
    %c0_10 = arith.constant 0 : index
    %9 = vector.load %arg5[%c0_8, %c0_9, %c0_10] : memref<1x32x2048xf32, #tpu.memory_space<vmem>>, vector<1x32x2048xf32>
    %10 = vector.shape_cast %9 : vector<1x32x2048xf32> to vector<32x2048xf32>
    %11 = vector.shape_cast %8 : vector<32x2048xf32> to vector<1x32x2048xf32>
    tpu.vector_store %arg5[%c0_8, %c0_9, %c0_10], %11 {strides = array<i32>} : memref<1x32x2048xf32, #tpu.memory_space<vmem>>, vector<1x32x2048xf32>,
    return
  }
  func.func @transform_0(%arg0: i32, %arg1: i32) -> (i32, i32, i32) {
    %c0_i32 = arith.constant 0 : i32
    %c0_i32_0 = arith.constant 0 : i32
    %c0_i32_1 = arith.constant 0 : i32
    return %arg0, %c0_i32, %c0_i32_0 : i32, i32, i32
  }
  func.func @transform_1(%arg0: i32, %arg1: i32) -> (i32, i32, i32) {
    %c0_i32 = arith.constant 0 : i32
    %c0_i32_0 = arith.constant 0 : i32
    return %arg0, %c0_i32, %arg1 : i32, i32, i32
  }
  func.func @transform_2(%arg0: i32, %arg1: i32) -> (i32, i32, i32) {
    %c0_i32 = arith.constant 0 : i32
    %c0_i32_0 = arith.constant 0 : i32
    %c0_i32_1 = arith.constant 0 : i32
    return %arg0, %c0_i32, %c0_i32_0 : i32, i32, i32
  }
  func.func @transform_3(%arg0: i32, %arg1: i32) -> (i32, i32, i32) {
    %c0_i32 = arith.constant 0 : i32
    %c0_i32_0 = arith.constant 0 : i32
    return %arg0, %c0_i32, %arg1 : i32, i32, i32
  }
}

module attributes {stable_mosaic.version = 11 : i64} {
  func.func @_gn_lrelu_kernel(%arg0: i32, %arg1: i32, %arg2: memref<1x1x16x256xf32, #tpu.memory_space<vmem>>, %arg3: memref<1x16x1xf32, #tpu.memory_space<vmem>>, %arg4: memref<1x16x1xf32, #tpu.memory_space<vmem>>, %arg5: memref<1x1x16x256xf32, #tpu.memory_space<vmem>>) attributes {dimension_semantics = [#tpu.dimension_semantics<parallel>, #tpu.dimension_semantics<parallel>], iteration_bounds = array<i64: 8, 2>, scalar_prefetch = 0 : i64, scratch_operands = 0 : i64, tpu.core_type = #tpu.core_type<tc>, window_params = [{transform_indices = @transform_0, window_bounds = array<i64: 1, 1, 16, 256>}, {transform_indices = @transform_1, window_bounds = array<i64: 1, 16, 1>}, {transform_indices = @transform_2, window_bounds = array<i64: 1, 16, 1>}, {transform_indices = @transform_3, window_bounds = array<i64: 1, 1, 16, 256>}]} {
    %c0 = arith.constant 0 : index
    %c0_0 = arith.constant 0 : index
    %c0_1 = arith.constant 0 : index
    %c0_2 = arith.constant 0 : index
    %0 = vector.load %arg2[%c0, %c0_0, %c0_1, %c0_2] : memref<1x1x16x256xf32, #tpu.memory_space<vmem>>, vector<1x1x16x256xf32>
    %1 = vector.shape_cast %0 : vector<1x1x16x256xf32> to vector<16x256xf32>
    %2 = vector.shape_cast %1 : vector<16x256xf32> to vector<1x16x256xf32>
    %cst = arith.constant dense<0.000000e+00> : vector<1xf32>
    %3 = vector.multi_reduction <add>, %2, %cst [1, 2] : vector<1x16x256xf32> to vector<1xf32>
    %4 = vector.shape_cast %3 : vector<1xf32> to vector<1x1x1xf32>
    %5 = vector.extract %4[0, 0, 0] : f32 from vector<1x1x1xf32>
    %6 = vector.broadcast %5 : f32 to vector<1x1xf32>
    %cst_3 = arith.constant 4.096000e+03 : f32
    %7 = vector.broadcast %cst_3 : f32 to vector<1x1xf32>
    %8 = arith.divf %6, %7 : vector<1x1xf32>
    %9 = vector.broadcast %8 : vector<1x1xf32> to vector<16x256xf32>
    %10 = arith.subf %1, %9 : vector<16x256xf32>
    %11 = arith.mulf %10, %10 : vector<16x256xf32>
    %12 = vector.shape_cast %11 : vector<16x256xf32> to vector<1x16x256xf32>
    %cst_4 = arith.constant dense<0.000000e+00> : vector<1xf32>
    %13 = vector.multi_reduction <add>, %12, %cst_4 [1, 2] : vector<1x16x256xf32> to vector<1xf32>
    %14 = vector.shape_cast %13 : vector<1xf32> to vector<1x1x1xf32>
    %15 = vector.extract %14[0, 0, 0] : f32 from vector<1x1x1xf32>
    %16 = vector.broadcast %15 : f32 to vector<1x1xf32>
    %cst_5 = arith.constant 4.096000e+03 : f32
    %17 = vector.broadcast %cst_5 : f32 to vector<1x1xf32>
    %18 = arith.divf %16, %17 : vector<1x1xf32>
    %19 = vector.broadcast %8 : vector<1x1xf32> to vector<16x256xf32>
    %20 = arith.subf %1, %19 : vector<16x256xf32>
    %cst_6 = arith.constant 9.99999974E-6 : f32
    %21 = vector.broadcast %cst_6 : f32 to vector<1x1xf32>
    %22 = arith.addf %18, %21 : vector<1x1xf32>
    %23 = math.rsqrt %22 : vector<1x1xf32>
    %24 = vector.broadcast %23 : vector<1x1xf32> to vector<16x256xf32>
    %25 = arith.mulf %20, %24 : vector<16x256xf32>
    %c0_7 = arith.constant 0 : index
    %c0_8 = arith.constant 0 : index
    %c0_9 = arith.constant 0 : index
    %26 = vector.load %arg3[%c0_7, %c0_8, %c0_9] : memref<1x16x1xf32, #tpu.memory_space<vmem>>, vector<1x16x1xf32>
    %27 = vector.shape_cast %26 : vector<1x16x1xf32> to vector<16x1xf32>
    %28 = vector.broadcast %27 : vector<16x1xf32> to vector<16x256xf32>
    %29 = arith.mulf %25, %28 : vector<16x256xf32>
    %c0_10 = arith.constant 0 : index
    %c0_11 = arith.constant 0 : index
    %c0_12 = arith.constant 0 : index
    %30 = vector.load %arg4[%c0_10, %c0_11, %c0_12] : memref<1x16x1xf32, #tpu.memory_space<vmem>>, vector<1x16x1xf32>
    %31 = vector.shape_cast %30 : vector<1x16x1xf32> to vector<16x1xf32>
    %32 = vector.broadcast %31 : vector<16x1xf32> to vector<16x256xf32>
    %33 = arith.addf %29, %32 : vector<16x256xf32>
    %cst_13 = arith.constant 0.000000e+00 : f32
    %34 = vector.broadcast %cst_13 : f32 to vector<16x256xf32>
    %35 = arith.cmpf ogt, %33, %34 : vector<16x256xf32>
    %cst_14 = arith.constant 2.000000e-01 : f32
    %36 = vector.broadcast %cst_14 : f32 to vector<16x256xf32>
    %37 = arith.mulf %36, %33 : vector<16x256xf32>
    %38 = arith.select %35, %33, %37 : vector<16x256xi1>, vector<16x256xf32>
    %c0_15 = arith.constant 0 : index
    %c0_16 = arith.constant 0 : index
    %c0_17 = arith.constant 0 : index
    %c0_18 = arith.constant 0 : index
    %39 = vector.load %arg5[%c0_15, %c0_16, %c0_17, %c0_18] : memref<1x1x16x256xf32, #tpu.memory_space<vmem>>, vector<1x1x16x256xf32>
    %40 = vector.shape_cast %39 : vector<1x1x16x256xf32> to vector<16x256xf32>
    %41 = vector.shape_cast %38 : vector<16x256xf32> to vector<1x1x16x256xf32>
    tpu.vector_store %arg5[%c0_15, %c0_16, %c0_17, %c0_18], %41 {strides = array<i32>} : memref<1x1x16x256xf32, #tpu.memory_space<vmem>>, vector<1x1x16x256xf32>,
    return
  }
  func.func @transform_0(%arg0: i32, %arg1: i32) -> (i32, i32, i32, i32) {
    %c0_i32 = arith.constant 0 : i32
    %c0_i32_0 = arith.constant 0 : i32
    %c0_i32_1 = arith.constant 0 : i32
    return %arg0, %arg1, %c0_i32, %c0_i32_0 : i32, i32, i32, i32
  }
  func.func @transform_1(%arg0: i32, %arg1: i32) -> (i32, i32, i32) {
    %c0_i32 = arith.constant 0 : i32
    %c0_i32_0 = arith.constant 0 : i32
    %c0_i32_1 = arith.constant 0 : i32
    return %arg1, %c0_i32, %c0_i32_0 : i32, i32, i32
  }
  func.func @transform_2(%arg0: i32, %arg1: i32) -> (i32, i32, i32) {
    %c0_i32 = arith.constant 0 : i32
    %c0_i32_0 = arith.constant 0 : i32
    %c0_i32_1 = arith.constant 0 : i32
    return %arg1, %c0_i32, %c0_i32_0 : i32, i32, i32
  }
  func.func @transform_3(%arg0: i32, %arg1: i32) -> (i32, i32, i32, i32) {
    %c0_i32 = arith.constant 0 : i32
    %c0_i32_0 = arith.constant 0 : i32
    %c0_i32_1 = arith.constant 0 : i32
    return %arg0, %arg1, %c0_i32, %c0_i32_0 : i32, i32, i32, i32
  }
}

module attributes {stable_mosaic.version = 11 : i64} {
  func.func @_gmm_bias_kernel(%arg0: i32, %arg1: i32, %arg2: memref<1x32x288xbf16, #tpu.memory_space<vmem>>, %arg3: memref<1x288x512xbf16, #tpu.memory_space<vmem>>, %arg4: memref<1x32x1xf32, #tpu.memory_space<vmem>>, %arg5: memref<1x32x512xf32, #tpu.memory_space<vmem>>) attributes {dimension_semantics = [#tpu.dimension_semantics<parallel>, #tpu.dimension_semantics<parallel>], iteration_bounds = array<i64: 1, 1>, scalar_prefetch = 0 : i64, scratch_operands = 0 : i64, tpu.core_type = #tpu.core_type<tc>, window_params = [{transform_indices = @transform_0, window_bounds = array<i64: 1, 32, 288>}, {transform_indices = @transform_1, window_bounds = array<i64: 1, 288, 512>}, {transform_indices = @transform_2, window_bounds = array<i64: 1, 32, 1>}, {transform_indices = @transform_3, window_bounds = array<i64: 1, 32, 512>}]} {
    %c0 = arith.constant 0 : index
    %c0_0 = arith.constant 0 : index
    %c0_1 = arith.constant 0 : index
    %0 = vector.load %arg2[%c0, %c0_0, %c0_1] : memref<1x32x288xbf16, #tpu.memory_space<vmem>>, vector<1x32x288xbf16>
    %1 = vector.shape_cast %0 : vector<1x32x288xbf16> to vector<32x288xbf16>
    %c0_2 = arith.constant 0 : index
    %c0_3 = arith.constant 0 : index
    %c0_4 = arith.constant 0 : index
    %2 = vector.load %arg3[%c0_2, %c0_3, %c0_4] : memref<1x288x512xbf16, #tpu.memory_space<vmem>>, vector<1x288x512xbf16>
    %3 = vector.shape_cast %2 : vector<1x288x512xbf16> to vector<288x512xbf16>
    %cst = arith.constant dense<0.000000e+00> : vector<32x512xf32>
    %4 = tpu.matmul %1, %3, %cst {dimension_numbers = #tpu.dot_dimension_numbers<[1], [0], [0], [1], [0, 0, 1, 1], [], []>} : vector<32x288xbf16>, vector<288x512xbf16>, vector<32x512xf32> -> vector<32x512xf32>
    %c0_5 = arith.constant 0 : index
    %c0_6 = arith.constant 0 : index
    %c0_7 = arith.constant 0 : index
    %5 = vector.load %arg4[%c0_5, %c0_6, %c0_7] : memref<1x32x1xf32, #tpu.memory_space<vmem>>, vector<1x32x1xf32>
    %6 = vector.shape_cast %5 : vector<1x32x1xf32> to vector<32x1xf32>
    %7 = vector.broadcast %6 : vector<32x1xf32> to vector<32x512xf32>
    %8 = arith.addf %4, %7 : vector<32x512xf32>
    %c0_8 = arith.constant 0 : index
    %c0_9 = arith.constant 0 : index
    %c0_10 = arith.constant 0 : index
    %9 = vector.load %arg5[%c0_8, %c0_9, %c0_10] : memref<1x32x512xf32, #tpu.memory_space<vmem>>, vector<1x32x512xf32>
    %10 = vector.shape_cast %9 : vector<1x32x512xf32> to vector<32x512xf32>
    %11 = vector.shape_cast %8 : vector<32x512xf32> to vector<1x32x512xf32>
    tpu.vector_store %arg5[%c0_8, %c0_9, %c0_10], %11 {strides = array<i32>} : memref<1x32x512xf32, #tpu.memory_space<vmem>>, vector<1x32x512xf32>,
    return
  }
  func.func @transform_0(%arg0: i32, %arg1: i32) -> (i32, i32, i32) {
    %c0_i32 = arith.constant 0 : i32
    %c0_i32_0 = arith.constant 0 : i32
    %c0_i32_1 = arith.constant 0 : i32
    return %arg0, %c0_i32, %c0_i32_0 : i32, i32, i32
  }
  func.func @transform_1(%arg0: i32, %arg1: i32) -> (i32, i32, i32) {
    %c0_i32 = arith.constant 0 : i32
    %c0_i32_0 = arith.constant 0 : i32
    return %arg0, %c0_i32, %arg1 : i32, i32, i32
  }
  func.func @transform_2(%arg0: i32, %arg1: i32) -> (i32, i32, i32) {
    %c0_i32 = arith.constant 0 : i32
    %c0_i32_0 = arith.constant 0 : i32
    %c0_i32_1 = arith.constant 0 : i32
    return %arg0, %c0_i32, %c0_i32_0 : i32, i32, i32
  }
  func.func @transform_3(%arg0: i32, %arg1: i32) -> (i32, i32, i32) {
    %c0_i32 = arith.constant 0 : i32
    %c0_i32_0 = arith.constant 0 : i32
    return %arg0, %c0_i32, %arg1 : i32, i32, i32
  }
}

module attributes {stable_mosaic.version = 11 : i64} {
  func.func @_gn_lrelu_kernel(%arg0: i32, %arg1: i32, %arg2: memref<1x1x16x64xf32, #tpu.memory_space<vmem>>, %arg3: memref<1x16x1xf32, #tpu.memory_space<vmem>>, %arg4: memref<1x16x1xf32, #tpu.memory_space<vmem>>, %arg5: memref<1x1x16x64xf32, #tpu.memory_space<vmem>>) attributes {dimension_semantics = [#tpu.dimension_semantics<parallel>, #tpu.dimension_semantics<parallel>], iteration_bounds = array<i64: 8, 2>, scalar_prefetch = 0 : i64, scratch_operands = 0 : i64, tpu.core_type = #tpu.core_type<tc>, window_params = [{transform_indices = @transform_0, window_bounds = array<i64: 1, 1, 16, 64>}, {transform_indices = @transform_1, window_bounds = array<i64: 1, 16, 1>}, {transform_indices = @transform_2, window_bounds = array<i64: 1, 16, 1>}, {transform_indices = @transform_3, window_bounds = array<i64: 1, 1, 16, 64>}]} {
    %c0 = arith.constant 0 : index
    %c0_0 = arith.constant 0 : index
    %c0_1 = arith.constant 0 : index
    %c0_2 = arith.constant 0 : index
    %0 = vector.load %arg2[%c0, %c0_0, %c0_1, %c0_2] : memref<1x1x16x64xf32, #tpu.memory_space<vmem>>, vector<1x1x16x64xf32>
    %1 = vector.shape_cast %0 : vector<1x1x16x64xf32> to vector<16x64xf32>
    %2 = vector.shape_cast %1 : vector<16x64xf32> to vector<1x16x64xf32>
    %cst = arith.constant dense<0.000000e+00> : vector<1xf32>
    %3 = vector.multi_reduction <add>, %2, %cst [1, 2] : vector<1x16x64xf32> to vector<1xf32>
    %4 = vector.shape_cast %3 : vector<1xf32> to vector<1x1x1xf32>
    %5 = vector.extract %4[0, 0, 0] : f32 from vector<1x1x1xf32>
    %6 = vector.broadcast %5 : f32 to vector<1x1xf32>
    %cst_3 = arith.constant 1.024000e+03 : f32
    %7 = vector.broadcast %cst_3 : f32 to vector<1x1xf32>
    %8 = arith.divf %6, %7 : vector<1x1xf32>
    %9 = vector.broadcast %8 : vector<1x1xf32> to vector<16x64xf32>
    %10 = arith.subf %1, %9 : vector<16x64xf32>
    %11 = arith.mulf %10, %10 : vector<16x64xf32>
    %12 = vector.shape_cast %11 : vector<16x64xf32> to vector<1x16x64xf32>
    %cst_4 = arith.constant dense<0.000000e+00> : vector<1xf32>
    %13 = vector.multi_reduction <add>, %12, %cst_4 [1, 2] : vector<1x16x64xf32> to vector<1xf32>
    %14 = vector.shape_cast %13 : vector<1xf32> to vector<1x1x1xf32>
    %15 = vector.extract %14[0, 0, 0] : f32 from vector<1x1x1xf32>
    %16 = vector.broadcast %15 : f32 to vector<1x1xf32>
    %cst_5 = arith.constant 1.024000e+03 : f32
    %17 = vector.broadcast %cst_5 : f32 to vector<1x1xf32>
    %18 = arith.divf %16, %17 : vector<1x1xf32>
    %19 = vector.broadcast %8 : vector<1x1xf32> to vector<16x64xf32>
    %20 = arith.subf %1, %19 : vector<16x64xf32>
    %cst_6 = arith.constant 9.99999974E-6 : f32
    %21 = vector.broadcast %cst_6 : f32 to vector<1x1xf32>
    %22 = arith.addf %18, %21 : vector<1x1xf32>
    %23 = math.rsqrt %22 : vector<1x1xf32>
    %24 = vector.broadcast %23 : vector<1x1xf32> to vector<16x64xf32>
    %25 = arith.mulf %20, %24 : vector<16x64xf32>
    %c0_7 = arith.constant 0 : index
    %c0_8 = arith.constant 0 : index
    %c0_9 = arith.constant 0 : index
    %26 = vector.load %arg3[%c0_7, %c0_8, %c0_9] : memref<1x16x1xf32, #tpu.memory_space<vmem>>, vector<1x16x1xf32>
    %27 = vector.shape_cast %26 : vector<1x16x1xf32> to vector<16x1xf32>
    %28 = vector.broadcast %27 : vector<16x1xf32> to vector<16x64xf32>
    %29 = arith.mulf %25, %28 : vector<16x64xf32>
    %c0_10 = arith.constant 0 : index
    %c0_11 = arith.constant 0 : index
    %c0_12 = arith.constant 0 : index
    %30 = vector.load %arg4[%c0_10, %c0_11, %c0_12] : memref<1x16x1xf32, #tpu.memory_space<vmem>>, vector<1x16x1xf32>
    %31 = vector.shape_cast %30 : vector<1x16x1xf32> to vector<16x1xf32>
    %32 = vector.broadcast %31 : vector<16x1xf32> to vector<16x64xf32>
    %33 = arith.addf %29, %32 : vector<16x64xf32>
    %cst_13 = arith.constant 0.000000e+00 : f32
    %34 = vector.broadcast %cst_13 : f32 to vector<16x64xf32>
    %35 = arith.cmpf ogt, %33, %34 : vector<16x64xf32>
    %cst_14 = arith.constant 2.000000e-01 : f32
    %36 = vector.broadcast %cst_14 : f32 to vector<16x64xf32>
    %37 = arith.mulf %36, %33 : vector<16x64xf32>
    %38 = arith.select %35, %33, %37 : vector<16x64xi1>, vector<16x64xf32>
    %c0_15 = arith.constant 0 : index
    %c0_16 = arith.constant 0 : index
    %c0_17 = arith.constant 0 : index
    %c0_18 = arith.constant 0 : index
    %39 = vector.load %arg5[%c0_15, %c0_16, %c0_17, %c0_18] : memref<1x1x16x64xf32, #tpu.memory_space<vmem>>, vector<1x1x16x64xf32>
    %40 = vector.shape_cast %39 : vector<1x1x16x64xf32> to vector<16x64xf32>
    %41 = vector.shape_cast %38 : vector<16x64xf32> to vector<1x1x16x64xf32>
    tpu.vector_store %arg5[%c0_15, %c0_16, %c0_17, %c0_18], %41 {strides = array<i32>} : memref<1x1x16x64xf32, #tpu.memory_space<vmem>>, vector<1x1x16x64xf32>,
    return
  }
  func.func @transform_0(%arg0: i32, %arg1: i32) -> (i32, i32, i32, i32) {
    %c0_i32 = arith.constant 0 : i32
    %c0_i32_0 = arith.constant 0 : i32
    %c0_i32_1 = arith.constant 0 : i32
    return %arg0, %arg1, %c0_i32, %c0_i32_0 : i32, i32, i32, i32
  }
  func.func @transform_1(%arg0: i32, %arg1: i32) -> (i32, i32, i32) {
    %c0_i32 = arith.constant 0 : i32
    %c0_i32_0 = arith.constant 0 : i32
    %c0_i32_1 = arith.constant 0 : i32
    return %arg1, %c0_i32, %c0_i32_0 : i32, i32, i32
  }
  func.func @transform_2(%arg0: i32, %arg1: i32) -> (i32, i32, i32) {
    %c0_i32 = arith.constant 0 : i32
    %c0_i32_0 = arith.constant 0 : i32
    %c0_i32_1 = arith.constant 0 : i32
    return %arg1, %c0_i32, %c0_i32_0 : i32, i32, i32
  }
  func.func @transform_3(%arg0: i32, %arg1: i32) -> (i32, i32, i32, i32) {
    %c0_i32 = arith.constant 0 : i32
    %c0_i32_0 = arith.constant 0 : i32
    %c0_i32_1 = arith.constant 0 : i32
    return %arg0, %arg1, %c0_i32, %c0_i32_0 : i32, i32, i32, i32
  }
}

module attributes {stable_mosaic.version = 11 : i64} {
  func.func @_gmm_bias_kernel(%arg0: i32, %arg1: i32, %arg2: memref<1x32x288xbf16, #tpu.memory_space<vmem>>, %arg3: memref<1x288x128xbf16, #tpu.memory_space<vmem>>, %arg4: memref<1x32x1xf32, #tpu.memory_space<vmem>>, %arg5: memref<1x32x128xf32, #tpu.memory_space<vmem>>) attributes {dimension_semantics = [#tpu.dimension_semantics<parallel>, #tpu.dimension_semantics<parallel>], iteration_bounds = array<i64: 1, 1>, scalar_prefetch = 0 : i64, scratch_operands = 0 : i64, tpu.core_type = #tpu.core_type<tc>, window_params = [{transform_indices = @transform_0, window_bounds = array<i64: 1, 32, 288>}, {transform_indices = @transform_1, window_bounds = array<i64: 1, 288, 128>}, {transform_indices = @transform_2, window_bounds = array<i64: 1, 32, 1>}, {transform_indices = @transform_3, window_bounds = array<i64: 1, 32, 128>}]} {
    %c0 = arith.constant 0 : index
    %c0_0 = arith.constant 0 : index
    %c0_1 = arith.constant 0 : index
    %0 = vector.load %arg2[%c0, %c0_0, %c0_1] : memref<1x32x288xbf16, #tpu.memory_space<vmem>>, vector<1x32x288xbf16>
    %1 = vector.shape_cast %0 : vector<1x32x288xbf16> to vector<32x288xbf16>
    %c0_2 = arith.constant 0 : index
    %c0_3 = arith.constant 0 : index
    %c0_4 = arith.constant 0 : index
    %2 = vector.load %arg3[%c0_2, %c0_3, %c0_4] : memref<1x288x128xbf16, #tpu.memory_space<vmem>>, vector<1x288x128xbf16>
    %3 = vector.shape_cast %2 : vector<1x288x128xbf16> to vector<288x128xbf16>
    %cst = arith.constant dense<0.000000e+00> : vector<32x128xf32>
    %4 = tpu.matmul %1, %3, %cst {dimension_numbers = #tpu.dot_dimension_numbers<[1], [0], [0], [1], [0, 0, 1, 1], [], []>} : vector<32x288xbf16>, vector<288x128xbf16>, vector<32x128xf32> -> vector<32x128xf32>
    %c0_5 = arith.constant 0 : index
    %c0_6 = arith.constant 0 : index
    %c0_7 = arith.constant 0 : index
    %5 = vector.load %arg4[%c0_5, %c0_6, %c0_7] : memref<1x32x1xf32, #tpu.memory_space<vmem>>, vector<1x32x1xf32>
    %6 = vector.shape_cast %5 : vector<1x32x1xf32> to vector<32x1xf32>
    %7 = vector.broadcast %6 : vector<32x1xf32> to vector<32x128xf32>
    %8 = arith.addf %4, %7 : vector<32x128xf32>
    %c0_8 = arith.constant 0 : index
    %c0_9 = arith.constant 0 : index
    %c0_10 = arith.constant 0 : index
    %9 = vector.load %arg5[%c0_8, %c0_9, %c0_10] : memref<1x32x128xf32, #tpu.memory_space<vmem>>, vector<1x32x128xf32>
    %10 = vector.shape_cast %9 : vector<1x32x128xf32> to vector<32x128xf32>
    %11 = vector.shape_cast %8 : vector<32x128xf32> to vector<1x32x128xf32>
    tpu.vector_store %arg5[%c0_8, %c0_9, %c0_10], %11 {strides = array<i32>} : memref<1x32x128xf32, #tpu.memory_space<vmem>>, vector<1x32x128xf32>,
    return
  }
  func.func @transform_0(%arg0: i32, %arg1: i32) -> (i32, i32, i32) {
    %c0_i32 = arith.constant 0 : i32
    %c0_i32_0 = arith.constant 0 : i32
    %c0_i32_1 = arith.constant 0 : i32
    return %arg0, %c0_i32, %c0_i32_0 : i32, i32, i32
  }
  func.func @transform_1(%arg0: i32, %arg1: i32) -> (i32, i32, i32) {
    %c0_i32 = arith.constant 0 : i32
    %c0_i32_0 = arith.constant 0 : i32
    return %arg0, %c0_i32, %arg1 : i32, i32, i32
  }
  func.func @transform_2(%arg0: i32, %arg1: i32) -> (i32, i32, i32) {
    %c0_i32 = arith.constant 0 : i32
    %c0_i32_0 = arith.constant 0 : i32
    %c0_i32_1 = arith.constant 0 : i32
    return %arg0, %c0_i32, %c0_i32_0 : i32, i32, i32
  }
  func.func @transform_3(%arg0: i32, %arg1: i32) -> (i32, i32, i32) {
    %c0_i32 = arith.constant 0 : i32
    %c0_i32_0 = arith.constant 0 : i32
    return %arg0, %c0_i32, %arg1 : i32, i32, i32
  }
}

module attributes {stable_mosaic.version = 11 : i64} {
  func.func @_gn_lrelu_kernel(%arg0: i32, %arg1: i32, %arg2: memref<1x1x16x16xf32, #tpu.memory_space<vmem>>, %arg3: memref<1x16x1xf32, #tpu.memory_space<vmem>>, %arg4: memref<1x16x1xf32, #tpu.memory_space<vmem>>, %arg5: memref<1x1x16x16xf32, #tpu.memory_space<vmem>>) attributes {dimension_semantics = [#tpu.dimension_semantics<parallel>, #tpu.dimension_semantics<parallel>], iteration_bounds = array<i64: 8, 2>, scalar_prefetch = 0 : i64, scratch_operands = 0 : i64, tpu.core_type = #tpu.core_type<tc>, window_params = [{transform_indices = @transform_0, window_bounds = array<i64: 1, 1, 16, 16>}, {transform_indices = @transform_1, window_bounds = array<i64: 1, 16, 1>}, {transform_indices = @transform_2, window_bounds = array<i64: 1, 16, 1>}, {transform_indices = @transform_3, window_bounds = array<i64: 1, 1, 16, 16>}]} {
    %c0 = arith.constant 0 : index
    %c0_0 = arith.constant 0 : index
    %c0_1 = arith.constant 0 : index
    %c0_2 = arith.constant 0 : index
    %0 = vector.load %arg2[%c0, %c0_0, %c0_1, %c0_2] : memref<1x1x16x16xf32, #tpu.memory_space<vmem>>, vector<1x1x16x16xf32>
    %1 = vector.shape_cast %0 : vector<1x1x16x16xf32> to vector<16x16xf32>
    %2 = vector.shape_cast %1 : vector<16x16xf32> to vector<1x16x16xf32>
    %cst = arith.constant dense<0.000000e+00> : vector<1xf32>
    %3 = vector.multi_reduction <add>, %2, %cst [1, 2] : vector<1x16x16xf32> to vector<1xf32>
    %4 = vector.shape_cast %3 : vector<1xf32> to vector<1x1x1xf32>
    %5 = vector.extract %4[0, 0, 0] : f32 from vector<1x1x1xf32>
    %6 = vector.broadcast %5 : f32 to vector<1x1xf32>
    %cst_3 = arith.constant 2.560000e+02 : f32
    %7 = vector.broadcast %cst_3 : f32 to vector<1x1xf32>
    %8 = arith.divf %6, %7 : vector<1x1xf32>
    %9 = vector.broadcast %8 : vector<1x1xf32> to vector<16x16xf32>
    %10 = arith.subf %1, %9 : vector<16x16xf32>
    %11 = arith.mulf %10, %10 : vector<16x16xf32>
    %12 = vector.shape_cast %11 : vector<16x16xf32> to vector<1x16x16xf32>
    %cst_4 = arith.constant dense<0.000000e+00> : vector<1xf32>
    %13 = vector.multi_reduction <add>, %12, %cst_4 [1, 2] : vector<1x16x16xf32> to vector<1xf32>
    %14 = vector.shape_cast %13 : vector<1xf32> to vector<1x1x1xf32>
    %15 = vector.extract %14[0, 0, 0] : f32 from vector<1x1x1xf32>
    %16 = vector.broadcast %15 : f32 to vector<1x1xf32>
    %cst_5 = arith.constant 2.560000e+02 : f32
    %17 = vector.broadcast %cst_5 : f32 to vector<1x1xf32>
    %18 = arith.divf %16, %17 : vector<1x1xf32>
    %19 = vector.broadcast %8 : vector<1x1xf32> to vector<16x16xf32>
    %20 = arith.subf %1, %19 : vector<16x16xf32>
    %cst_6 = arith.constant 9.99999974E-6 : f32
    %21 = vector.broadcast %cst_6 : f32 to vector<1x1xf32>
    %22 = arith.addf %18, %21 : vector<1x1xf32>
    %23 = math.rsqrt %22 : vector<1x1xf32>
    %24 = vector.broadcast %23 : vector<1x1xf32> to vector<16x16xf32>
    %25 = arith.mulf %20, %24 : vector<16x16xf32>
    %c0_7 = arith.constant 0 : index
    %c0_8 = arith.constant 0 : index
    %c0_9 = arith.constant 0 : index
    %26 = vector.load %arg3[%c0_7, %c0_8, %c0_9] : memref<1x16x1xf32, #tpu.memory_space<vmem>>, vector<1x16x1xf32>
    %27 = vector.shape_cast %26 : vector<1x16x1xf32> to vector<16x1xf32>
    %28 = vector.broadcast %27 : vector<16x1xf32> to vector<16x16xf32>
    %29 = arith.mulf %25, %28 : vector<16x16xf32>
    %c0_10 = arith.constant 0 : index
    %c0_11 = arith.constant 0 : index
    %c0_12 = arith.constant 0 : index
    %30 = vector.load %arg4[%c0_10, %c0_11, %c0_12] : memref<1x16x1xf32, #tpu.memory_space<vmem>>, vector<1x16x1xf32>
    %31 = vector.shape_cast %30 : vector<1x16x1xf32> to vector<16x1xf32>
    %32 = vector.broadcast %31 : vector<16x1xf32> to vector<16x16xf32>
    %33 = arith.addf %29, %32 : vector<16x16xf32>
    %cst_13 = arith.constant 0.000000e+00 : f32
    %34 = vector.broadcast %cst_13 : f32 to vector<16x16xf32>
    %35 = arith.cmpf ogt, %33, %34 : vector<16x16xf32>
    %cst_14 = arith.constant 2.000000e-01 : f32
    %36 = vector.broadcast %cst_14 : f32 to vector<16x16xf32>
    %37 = arith.mulf %36, %33 : vector<16x16xf32>
    %38 = arith.select %35, %33, %37 : vector<16x16xi1>, vector<16x16xf32>
    %c0_15 = arith.constant 0 : index
    %c0_16 = arith.constant 0 : index
    %c0_17 = arith.constant 0 : index
    %c0_18 = arith.constant 0 : index
    %39 = vector.load %arg5[%c0_15, %c0_16, %c0_17, %c0_18] : memref<1x1x16x16xf32, #tpu.memory_space<vmem>>, vector<1x1x16x16xf32>
    %40 = vector.shape_cast %39 : vector<1x1x16x16xf32> to vector<16x16xf32>
    %41 = vector.shape_cast %38 : vector<16x16xf32> to vector<1x1x16x16xf32>
    tpu.vector_store %arg5[%c0_15, %c0_16, %c0_17, %c0_18], %41 {strides = array<i32>} : memref<1x1x16x16xf32, #tpu.memory_space<vmem>>, vector<1x1x16x16xf32>,
    return
  }
  func.func @transform_0(%arg0: i32, %arg1: i32) -> (i32, i32, i32, i32) {
    %c0_i32 = arith.constant 0 : i32
    %c0_i32_0 = arith.constant 0 : i32
    %c0_i32_1 = arith.constant 0 : i32
    return %arg0, %arg1, %c0_i32, %c0_i32_0 : i32, i32, i32, i32
  }
  func.func @transform_1(%arg0: i32, %arg1: i32) -> (i32, i32, i32) {
    %c0_i32 = arith.constant 0 : i32
    %c0_i32_0 = arith.constant 0 : i32
    %c0_i32_1 = arith.constant 0 : i32
    return %arg1, %c0_i32, %c0_i32_0 : i32, i32, i32
  }
  func.func @transform_2(%arg0: i32, %arg1: i32) -> (i32, i32, i32) {
    %c0_i32 = arith.constant 0 : i32
    %c0_i32_0 = arith.constant 0 : i32
    %c0_i32_1 = arith.constant 0 : i32
    return %arg1, %c0_i32, %c0_i32_0 : i32, i32, i32
  }
  func.func @transform_3(%arg0: i32, %arg1: i32) -> (i32, i32, i32, i32) {
    %c0_i32 = arith.constant 0 : i32
    %c0_i32_0 = arith.constant 0 : i32
    %c0_i32_1 = arith.constant 0 : i32
    return %arg0, %arg1, %c0_i32, %c0_i32_0 : i32, i32, i32, i32
  }
}

module attributes {stable_mosaic.version = 11 : i64} {
  func.func @_gmm_bias_kernel(%arg0: i32, %arg1: i32, %arg2: memref<1x8x128xbf16, #tpu.memory_space<vmem>>, %arg3: memref<1x128x32xbf16, #tpu.memory_space<vmem>>, %arg4: memref<1x8x1xf32, #tpu.memory_space<vmem>>, %arg5: memref<1x8x32xf32, #tpu.memory_space<vmem>>) attributes {dimension_semantics = [#tpu.dimension_semantics<parallel>, #tpu.dimension_semantics<parallel>], iteration_bounds = array<i64: 1, 1>, scalar_prefetch = 0 : i64, scratch_operands = 0 : i64, tpu.core_type = #tpu.core_type<tc>, window_params = [{transform_indices = @transform_0, window_bounds = array<i64: 1, 8, 128>}, {transform_indices = @transform_1, window_bounds = array<i64: 1, 128, 32>}, {transform_indices = @transform_2, window_bounds = array<i64: 1, 8, 1>}, {transform_indices = @transform_3, window_bounds = array<i64: 1, 8, 32>}]} {
    %c0 = arith.constant 0 : index
    %c0_0 = arith.constant 0 : index
    %c0_1 = arith.constant 0 : index
    %0 = vector.load %arg2[%c0, %c0_0, %c0_1] : memref<1x8x128xbf16, #tpu.memory_space<vmem>>, vector<1x8x128xbf16>
    %1 = vector.shape_cast %0 : vector<1x8x128xbf16> to vector<8x128xbf16>
    %c0_2 = arith.constant 0 : index
    %c0_3 = arith.constant 0 : index
    %c0_4 = arith.constant 0 : index
    %2 = vector.load %arg3[%c0_2, %c0_3, %c0_4] : memref<1x128x32xbf16, #tpu.memory_space<vmem>>, vector<1x128x32xbf16>
    %3 = vector.shape_cast %2 : vector<1x128x32xbf16> to vector<128x32xbf16>
    %cst = arith.constant dense<0.000000e+00> : vector<8x32xf32>
    %4 = tpu.matmul %1, %3, %cst {dimension_numbers = #tpu.dot_dimension_numbers<[1], [0], [0], [1], [0, 0, 1, 1], [], []>} : vector<8x128xbf16>, vector<128x32xbf16>, vector<8x32xf32> -> vector<8x32xf32>
    %c0_5 = arith.constant 0 : index
    %c0_6 = arith.constant 0 : index
    %c0_7 = arith.constant 0 : index
    %5 = vector.load %arg4[%c0_5, %c0_6, %c0_7] : memref<1x8x1xf32, #tpu.memory_space<vmem>>, vector<1x8x1xf32>
    %6 = vector.shape_cast %5 : vector<1x8x1xf32> to vector<8x1xf32>
    %7 = vector.broadcast %6 : vector<8x1xf32> to vector<8x32xf32>
    %8 = arith.addf %4, %7 : vector<8x32xf32>
    %c0_8 = arith.constant 0 : index
    %c0_9 = arith.constant 0 : index
    %c0_10 = arith.constant 0 : index
    %9 = vector.load %arg5[%c0_8, %c0_9, %c0_10] : memref<1x8x32xf32, #tpu.memory_space<vmem>>, vector<1x8x32xf32>
    %10 = vector.shape_cast %9 : vector<1x8x32xf32> to vector<8x32xf32>
    %11 = vector.shape_cast %8 : vector<8x32xf32> to vector<1x8x32xf32>
    tpu.vector_store %arg5[%c0_8, %c0_9, %c0_10], %11 {strides = array<i32>} : memref<1x8x32xf32, #tpu.memory_space<vmem>>, vector<1x8x32xf32>,
    return
  }
  func.func @transform_0(%arg0: i32, %arg1: i32) -> (i32, i32, i32) {
    %c0_i32 = arith.constant 0 : i32
    %c0_i32_0 = arith.constant 0 : i32
    %c0_i32_1 = arith.constant 0 : i32
    return %arg0, %c0_i32, %c0_i32_0 : i32, i32, i32
  }
  func.func @transform_1(%arg0: i32, %arg1: i32) -> (i32, i32, i32) {
    %c0_i32 = arith.constant 0 : i32
    %c0_i32_0 = arith.constant 0 : i32
    return %arg0, %c0_i32, %arg1 : i32, i32, i32
  }
  func.func @transform_2(%arg0: i32, %arg1: i32) -> (i32, i32, i32) {
    %c0_i32 = arith.constant 0 : i32
    %c0_i32_0 = arith.constant 0 : i32
    %c0_i32_1 = arith.constant 0 : i32
    return %arg0, %c0_i32, %c0_i32_0 : i32, i32, i32
  }
  func.func @transform_3(%arg0: i32, %arg1: i32) -> (i32, i32, i32) {
    %c0_i32 = arith.constant 0 : i32
    %c0_i32_0 = arith.constant 0 : i32
    return %arg0, %c0_i32, %arg1 : i32, i32, i32
  }
}

module attributes {stable_mosaic.version = 11 : i64} {
  func.func @_gmm_bias_kernel(%arg0: i32, %arg1: i32, %arg2: memref<1x4x50xbf16, #tpu.memory_space<vmem>>, %arg3: memref<1x50x32xbf16, #tpu.memory_space<vmem>>, %arg4: memref<1x4x1xf32, #tpu.memory_space<vmem>>, %arg5: memref<1x4x32xf32, #tpu.memory_space<vmem>>) attributes {dimension_semantics = [#tpu.dimension_semantics<parallel>, #tpu.dimension_semantics<parallel>], iteration_bounds = array<i64: 4, 1>, scalar_prefetch = 0 : i64, scratch_operands = 0 : i64, tpu.core_type = #tpu.core_type<tc>, window_params = [{transform_indices = @transform_0, window_bounds = array<i64: 1, 4, 50>}, {transform_indices = @transform_1, window_bounds = array<i64: 1, 50, 32>}, {transform_indices = @transform_2, window_bounds = array<i64: 1, 4, 1>}, {transform_indices = @transform_3, window_bounds = array<i64: 1, 4, 32>}]} {
    %c0 = arith.constant 0 : index
    %c0_0 = arith.constant 0 : index
    %c0_1 = arith.constant 0 : index
    %0 = vector.load %arg2[%c0, %c0_0, %c0_1] : memref<1x4x50xbf16, #tpu.memory_space<vmem>>, vector<1x4x50xbf16>
    %1 = vector.shape_cast %0 : vector<1x4x50xbf16> to vector<4x50xbf16>
    %c0_2 = arith.constant 0 : index
    %c0_3 = arith.constant 0 : index
    %c0_4 = arith.constant 0 : index
    %2 = vector.load %arg3[%c0_2, %c0_3, %c0_4] : memref<1x50x32xbf16, #tpu.memory_space<vmem>>, vector<1x50x32xbf16>
    %3 = vector.shape_cast %2 : vector<1x50x32xbf16> to vector<50x32xbf16>
    %cst = arith.constant dense<0.000000e+00> : vector<4x32xf32>
    %4 = tpu.matmul %1, %3, %cst {dimension_numbers = #tpu.dot_dimension_numbers<[1], [0], [0], [1], [0, 0, 1, 1], [], []>} : vector<4x50xbf16>, vector<50x32xbf16>, vector<4x32xf32> -> vector<4x32xf32>
    %c0_5 = arith.constant 0 : index
    %c0_6 = arith.constant 0 : index
    %c0_7 = arith.constant 0 : index
    %5 = vector.load %arg4[%c0_5, %c0_6, %c0_7] : memref<1x4x1xf32, #tpu.memory_space<vmem>>, vector<1x4x1xf32>
    %6 = vector.shape_cast %5 : vector<1x4x1xf32> to vector<4x1xf32>
    %7 = vector.broadcast %6 : vector<4x1xf32> to vector<4x32xf32>
    %8 = arith.addf %4, %7 : vector<4x32xf32>
    %c0_8 = arith.constant 0 : index
    %c0_9 = arith.constant 0 : index
    %c0_10 = arith.constant 0 : index
    %9 = vector.load %arg5[%c0_8, %c0_9, %c0_10] : memref<1x4x32xf32, #tpu.memory_space<vmem>>, vector<1x4x32xf32>
    %10 = vector.shape_cast %9 : vector<1x4x32xf32> to vector<4x32xf32>
    %11 = vector.shape_cast %8 : vector<4x32xf32> to vector<1x4x32xf32>
    tpu.vector_store %arg5[%c0_8, %c0_9, %c0_10], %11 {strides = array<i32>} : memref<1x4x32xf32, #tpu.memory_space<vmem>>, vector<1x4x32xf32>,
    return
  }
  func.func @transform_0(%arg0: i32, %arg1: i32) -> (i32, i32, i32) {
    %c0_i32 = arith.constant 0 : i32
    %c0_i32_0 = arith.constant 0 : i32
    %c0_i32_1 = arith.constant 0 : i32
    return %arg0, %c0_i32, %c0_i32_0 : i32, i32, i32
  }
  func.func @transform_1(%arg0: i32, %arg1: i32) -> (i32, i32, i32) {
    %c0_i32 = arith.constant 0 : i32
    %c0_i32_0 = arith.constant 0 : i32
    return %arg0, %c0_i32, %arg1 : i32, i32, i32
  }
  func.func @transform_2(%arg0: i32, %arg1: i32) -> (i32, i32, i32) {
    %c0_i32 = arith.constant 0 : i32
    %c0_i32_0 = arith.constant 0 : i32
    %c0_i32_1 = arith.constant 0 : i32
    return %arg0, %c0_i32, %c0_i32_0 : i32, i32, i32
  }
  func.func @transform_3(%arg0: i32, %arg1: i32) -> (i32, i32, i32) {
    %c0_i32 = arith.constant 0 : i32
    %c0_i32_0 = arith.constant 0 : i32
    return %arg0, %c0_i32, %arg1 : i32, i32, i32
  }
}

module attributes {stable_mosaic.version = 11 : i64} {
  func.func @_gn_lrelu_kernel(%arg0: i32, %arg1: i32, %arg2: memref<1x1x4x16xf32, #tpu.memory_space<vmem>>, %arg3: memref<1x4x1xf32, #tpu.memory_space<vmem>>, %arg4: memref<1x4x1xf32, #tpu.memory_space<vmem>>, %arg5: memref<1x1x4x16xf32, #tpu.memory_space<vmem>>) attributes {dimension_semantics = [#tpu.dimension_semantics<parallel>, #tpu.dimension_semantics<parallel>], iteration_bounds = array<i64: 2, 4>, scalar_prefetch = 0 : i64, scratch_operands = 0 : i64, tpu.core_type = #tpu.core_type<tc>, window_params = [{transform_indices = @transform_0, window_bounds = array<i64: 1, 1, 4, 16>}, {transform_indices = @transform_1, window_bounds = array<i64: 1, 4, 1>}, {transform_indices = @transform_2, window_bounds = array<i64: 1, 4, 1>}, {transform_indices = @transform_3, window_bounds = array<i64: 1, 1, 4, 16>}]} {
    %c0 = arith.constant 0 : index
    %c0_0 = arith.constant 0 : index
    %c0_1 = arith.constant 0 : index
    %c0_2 = arith.constant 0 : index
    %0 = vector.load %arg2[%c0, %c0_0, %c0_1, %c0_2] : memref<1x1x4x16xf32, #tpu.memory_space<vmem>>, vector<1x1x4x16xf32>
    %1 = vector.shape_cast %0 : vector<1x1x4x16xf32> to vector<4x16xf32>
    %2 = vector.shape_cast %1 : vector<4x16xf32> to vector<1x4x16xf32>
    %cst = arith.constant dense<0.000000e+00> : vector<1xf32>
    %3 = vector.multi_reduction <add>, %2, %cst [1, 2] : vector<1x4x16xf32> to vector<1xf32>
    %4 = vector.shape_cast %3 : vector<1xf32> to vector<1x1x1xf32>
    %5 = vector.extract %4[0, 0, 0] : f32 from vector<1x1x1xf32>
    %6 = vector.broadcast %5 : f32 to vector<1x1xf32>
    %cst_3 = arith.constant 6.400000e+01 : f32
    %7 = vector.broadcast %cst_3 : f32 to vector<1x1xf32>
    %8 = arith.divf %6, %7 : vector<1x1xf32>
    %9 = vector.broadcast %8 : vector<1x1xf32> to vector<4x16xf32>
    %10 = arith.subf %1, %9 : vector<4x16xf32>
    %11 = arith.mulf %10, %10 : vector<4x16xf32>
    %12 = vector.shape_cast %11 : vector<4x16xf32> to vector<1x4x16xf32>
    %cst_4 = arith.constant dense<0.000000e+00> : vector<1xf32>
    %13 = vector.multi_reduction <add>, %12, %cst_4 [1, 2] : vector<1x4x16xf32> to vector<1xf32>
    %14 = vector.shape_cast %13 : vector<1xf32> to vector<1x1x1xf32>
    %15 = vector.extract %14[0, 0, 0] : f32 from vector<1x1x1xf32>
    %16 = vector.broadcast %15 : f32 to vector<1x1xf32>
    %cst_5 = arith.constant 6.400000e+01 : f32
    %17 = vector.broadcast %cst_5 : f32 to vector<1x1xf32>
    %18 = arith.divf %16, %17 : vector<1x1xf32>
    %19 = vector.broadcast %8 : vector<1x1xf32> to vector<4x16xf32>
    %20 = arith.subf %1, %19 : vector<4x16xf32>
    %cst_6 = arith.constant 9.99999974E-6 : f32
    %21 = vector.broadcast %cst_6 : f32 to vector<1x1xf32>
    %22 = arith.addf %18, %21 : vector<1x1xf32>
    %23 = math.rsqrt %22 : vector<1x1xf32>
    %24 = vector.broadcast %23 : vector<1x1xf32> to vector<4x16xf32>
    %25 = arith.mulf %20, %24 : vector<4x16xf32>
    %c0_7 = arith.constant 0 : index
    %c0_8 = arith.constant 0 : index
    %c0_9 = arith.constant 0 : index
    %26 = vector.load %arg3[%c0_7, %c0_8, %c0_9] : memref<1x4x1xf32, #tpu.memory_space<vmem>>, vector<1x4x1xf32>
    %27 = vector.shape_cast %26 : vector<1x4x1xf32> to vector<4x1xf32>
    %28 = vector.broadcast %27 : vector<4x1xf32> to vector<4x16xf32>
    %29 = arith.mulf %25, %28 : vector<4x16xf32>
    %c0_10 = arith.constant 0 : index
    %c0_11 = arith.constant 0 : index
    %c0_12 = arith.constant 0 : index
    %30 = vector.load %arg4[%c0_10, %c0_11, %c0_12] : memref<1x4x1xf32, #tpu.memory_space<vmem>>, vector<1x4x1xf32>
    %31 = vector.shape_cast %30 : vector<1x4x1xf32> to vector<4x1xf32>
    %32 = vector.broadcast %31 : vector<4x1xf32> to vector<4x16xf32>
    %33 = arith.addf %29, %32 : vector<4x16xf32>
    %cst_13 = arith.constant 0.000000e+00 : f32
    %34 = vector.broadcast %cst_13 : f32 to vector<4x16xf32>
    %35 = arith.cmpf ogt, %33, %34 : vector<4x16xf32>
    %cst_14 = arith.constant 2.000000e-01 : f32
    %36 = vector.broadcast %cst_14 : f32 to vector<4x16xf32>
    %37 = arith.mulf %36, %33 : vector<4x16xf32>
    %38 = arith.select %35, %33, %37 : vector<4x16xi1>, vector<4x16xf32>
    %c0_15 = arith.constant 0 : index
    %c0_16 = arith.constant 0 : index
    %c0_17 = arith.constant 0 : index
    %c0_18 = arith.constant 0 : index
    %39 = vector.load %arg5[%c0_15, %c0_16, %c0_17, %c0_18] : memref<1x1x4x16xf32, #tpu.memory_space<vmem>>, vector<1x1x4x16xf32>
    %40 = vector.shape_cast %39 : vector<1x1x4x16xf32> to vector<4x16xf32>
    %41 = vector.shape_cast %38 : vector<4x16xf32> to vector<1x1x4x16xf32>
    tpu.vector_store %arg5[%c0_15, %c0_16, %c0_17, %c0_18], %41 {strides = array<i32>} : memref<1x1x4x16xf32, #tpu.memory_space<vmem>>, vector<1x1x4x16xf32>,
    return
  }
  func.func @transform_0(%arg0: i32, %arg1: i32) -> (i32, i32, i32, i32) {
    %c0_i32 = arith.constant 0 : i32
    %c0_i32_0 = arith.constant 0 : i32
    %c0_i32_1 = arith.constant 0 : i32
    return %arg0, %arg1, %c0_i32, %c0_i32_0 : i32, i32, i32, i32
  }
  func.func @transform_1(%arg0: i32, %arg1: i32) -> (i32, i32, i32) {
    %c0_i32 = arith.constant 0 : i32
    %c0_i32_0 = arith.constant 0 : i32
    %c0_i32_1 = arith.constant 0 : i32
    return %arg1, %c0_i32, %c0_i32_0 : i32, i32, i32
  }
  func.func @transform_2(%arg0: i32, %arg1: i32) -> (i32, i32, i32) {
    %c0_i32 = arith.constant 0 : i32
    %c0_i32_0 = arith.constant 0 : i32
    %c0_i32_1 = arith.constant 0 : i32
    return %arg1, %c0_i32, %c0_i32_0 : i32, i32, i32
  }
  func.func @transform_3(%arg0: i32, %arg1: i32) -> (i32, i32, i32, i32) {
    %c0_i32 = arith.constant 0 : i32
    %c0_i32_0 = arith.constant 0 : i32
    %c0_i32_1 = arith.constant 0 : i32
    return %arg0, %arg1, %c0_i32, %c0_i32_0 : i32, i32, i32, i32
  }
}

module attributes {stable_mosaic.version = 11 : i64} {
  func.func @_gmm_bias_kernel(%arg0: i32, %arg1: i32, %arg2: memref<1x4x18xbf16, #tpu.memory_space<vmem>>, %arg3: memref<1x18x32xbf16, #tpu.memory_space<vmem>>, %arg4: memref<1x4x1xf32, #tpu.memory_space<vmem>>, %arg5: memref<1x4x32xf32, #tpu.memory_space<vmem>>) attributes {dimension_semantics = [#tpu.dimension_semantics<parallel>, #tpu.dimension_semantics<parallel>], iteration_bounds = array<i64: 4, 1>, scalar_prefetch = 0 : i64, scratch_operands = 0 : i64, tpu.core_type = #tpu.core_type<tc>, window_params = [{transform_indices = @transform_0, window_bounds = array<i64: 1, 4, 18>}, {transform_indices = @transform_1, window_bounds = array<i64: 1, 18, 32>}, {transform_indices = @transform_2, window_bounds = array<i64: 1, 4, 1>}, {transform_indices = @transform_3, window_bounds = array<i64: 1, 4, 32>}]} {
    %c0 = arith.constant 0 : index
    %c0_0 = arith.constant 0 : index
    %c0_1 = arith.constant 0 : index
    %0 = vector.load %arg2[%c0, %c0_0, %c0_1] : memref<1x4x18xbf16, #tpu.memory_space<vmem>>, vector<1x4x18xbf16>
    %1 = vector.shape_cast %0 : vector<1x4x18xbf16> to vector<4x18xbf16>
    %c0_2 = arith.constant 0 : index
    %c0_3 = arith.constant 0 : index
    %c0_4 = arith.constant 0 : index
    %2 = vector.load %arg3[%c0_2, %c0_3, %c0_4] : memref<1x18x32xbf16, #tpu.memory_space<vmem>>, vector<1x18x32xbf16>
    %3 = vector.shape_cast %2 : vector<1x18x32xbf16> to vector<18x32xbf16>
    %cst = arith.constant dense<0.000000e+00> : vector<4x32xf32>
    %4 = tpu.matmul %1, %3, %cst {dimension_numbers = #tpu.dot_dimension_numbers<[1], [0], [0], [1], [0, 0, 1, 1], [], []>} : vector<4x18xbf16>, vector<18x32xbf16>, vector<4x32xf32> -> vector<4x32xf32>
    %c0_5 = arith.constant 0 : index
    %c0_6 = arith.constant 0 : index
    %c0_7 = arith.constant 0 : index
    %5 = vector.load %arg4[%c0_5, %c0_6, %c0_7] : memref<1x4x1xf32, #tpu.memory_space<vmem>>, vector<1x4x1xf32>
    %6 = vector.shape_cast %5 : vector<1x4x1xf32> to vector<4x1xf32>
    %7 = vector.broadcast %6 : vector<4x1xf32> to vector<4x32xf32>
    %8 = arith.addf %4, %7 : vector<4x32xf32>
    %c0_8 = arith.constant 0 : index
    %c0_9 = arith.constant 0 : index
    %c0_10 = arith.constant 0 : index
    %9 = vector.load %arg5[%c0_8, %c0_9, %c0_10] : memref<1x4x32xf32, #tpu.memory_space<vmem>>, vector<1x4x32xf32>
    %10 = vector.shape_cast %9 : vector<1x4x32xf32> to vector<4x32xf32>
    %11 = vector.shape_cast %8 : vector<4x32xf32> to vector<1x4x32xf32>
    tpu.vector_store %arg5[%c0_8, %c0_9, %c0_10], %11 {strides = array<i32>} : memref<1x4x32xf32, #tpu.memory_space<vmem>>, vector<1x4x32xf32>,
    return
  }
  func.func @transform_0(%arg0: i32, %arg1: i32) -> (i32, i32, i32) {
    %c0_i32 = arith.constant 0 : i32
    %c0_i32_0 = arith.constant 0 : i32
    %c0_i32_1 = arith.constant 0 : i32
    return %arg0, %c0_i32, %c0_i32_0 : i32, i32, i32
  }
  func.func @transform_1(%arg0: i32, %arg1: i32) -> (i32, i32, i32) {
    %c0_i32 = arith.constant 0 : i32
    %c0_i32_0 = arith.constant 0 : i32
    return %arg0, %c0_i32, %arg1 : i32, i32, i32
  }
  func.func @transform_2(%arg0: i32, %arg1: i32) -> (i32, i32, i32) {
    %c0_i32 = arith.constant 0 : i32
    %c0_i32_0 = arith.constant 0 : i32
    %c0_i32_1 = arith.constant 0 : i32
    return %arg0, %c0_i32, %c0_i32_0 : i32, i32, i32
  }
  func.func @transform_3(%arg0: i32, %arg1: i32) -> (i32, i32, i32) {
    %c0_i32 = arith.constant 0 : i32
    %c0_i32_0 = arith.constant 0 : i32
    return %arg0, %c0_i32, %arg1 : i32, i32, i32
  }
}

module attributes {stable_mosaic.version = 11 : i64} {
  func.func @_gmm_bias_kernel(%arg0: i32, %arg1: i32, %arg2: memref<1x8x16xbf16, #tpu.memory_space<vmem>>, %arg3: memref<1x16x32xbf16, #tpu.memory_space<vmem>>, %arg4: memref<1x8x1xf32, #tpu.memory_space<vmem>>, %arg5: memref<1x8x32xf32, #tpu.memory_space<vmem>>) attributes {dimension_semantics = [#tpu.dimension_semantics<parallel>, #tpu.dimension_semantics<parallel>], iteration_bounds = array<i64: 1, 1>, scalar_prefetch = 0 : i64, scratch_operands = 0 : i64, tpu.core_type = #tpu.core_type<tc>, window_params = [{transform_indices = @transform_0, window_bounds = array<i64: 1, 8, 16>}, {transform_indices = @transform_1, window_bounds = array<i64: 1, 16, 32>}, {transform_indices = @transform_2, window_bounds = array<i64: 1, 8, 1>}, {transform_indices = @transform_3, window_bounds = array<i64: 1, 8, 32>}]} {
    %c0 = arith.constant 0 : index
    %c0_0 = arith.constant 0 : index
    %c0_1 = arith.constant 0 : index
    %0 = vector.load %arg2[%c0, %c0_0, %c0_1] : memref<1x8x16xbf16, #tpu.memory_space<vmem>>, vector<1x8x16xbf16>
    %1 = vector.shape_cast %0 : vector<1x8x16xbf16> to vector<8x16xbf16>
    %c0_2 = arith.constant 0 : index
    %c0_3 = arith.constant 0 : index
    %c0_4 = arith.constant 0 : index
    %2 = vector.load %arg3[%c0_2, %c0_3, %c0_4] : memref<1x16x32xbf16, #tpu.memory_space<vmem>>, vector<1x16x32xbf16>
    %3 = vector.shape_cast %2 : vector<1x16x32xbf16> to vector<16x32xbf16>
    %cst = arith.constant dense<0.000000e+00> : vector<8x32xf32>
    %4 = tpu.matmul %1, %3, %cst {dimension_numbers = #tpu.dot_dimension_numbers<[1], [0], [0], [1], [0, 0, 1, 1], [], []>} : vector<8x16xbf16>, vector<16x32xbf16>, vector<8x32xf32> -> vector<8x32xf32>
    %c0_5 = arith.constant 0 : index
    %c0_6 = arith.constant 0 : index
    %c0_7 = arith.constant 0 : index
    %5 = vector.load %arg4[%c0_5, %c0_6, %c0_7] : memref<1x8x1xf32, #tpu.memory_space<vmem>>, vector<1x8x1xf32>
    %6 = vector.shape_cast %5 : vector<1x8x1xf32> to vector<8x1xf32>
    %7 = vector.broadcast %6 : vector<8x1xf32> to vector<8x32xf32>
    %8 = arith.addf %4, %7 : vector<8x32xf32>
    %c0_8 = arith.constant 0 : index
    %c0_9 = arith.constant 0 : index
    %c0_10 = arith.constant 0 : index
    %9 = vector.load %arg5[%c0_8, %c0_9, %c0_10] : memref<1x8x32xf32, #tpu.memory_space<vmem>>, vector<1x8x32xf32>
    %10 = vector.shape_cast %9 : vector<1x8x32xf32> to vector<8x32xf32>
    %11 = vector.shape_cast %8 : vector<8x32xf32> to vector<1x8x32xf32>
    tpu.vector_store %arg5[%c0_8, %c0_9, %c0_10], %11 {strides = array<i32>} : memref<1x8x32xf32, #tpu.memory_space<vmem>>, vector<1x8x32xf32>,
    return
  }
  func.func @transform_0(%arg0: i32, %arg1: i32) -> (i32, i32, i32) {
    %c0_i32 = arith.constant 0 : i32
    %c0_i32_0 = arith.constant 0 : i32
    %c0_i32_1 = arith.constant 0 : i32
    return %arg0, %c0_i32, %c0_i32_0 : i32, i32, i32
  }
  func.func @transform_1(%arg0: i32, %arg1: i32) -> (i32, i32, i32) {
    %c0_i32 = arith.constant 0 : i32
    %c0_i32_0 = arith.constant 0 : i32
    return %arg0, %c0_i32, %arg1 : i32, i32, i32
  }
  func.func @transform_2(%arg0: i32, %arg1: i32) -> (i32, i32, i32) {
    %c0_i32 = arith.constant 0 : i32
    %c0_i32_0 = arith.constant 0 : i32
    %c0_i32_1 = arith.constant 0 : i32
    return %arg0, %c0_i32, %c0_i32_0 : i32, i32, i32
  }
  func.func @transform_3(%arg0: i32, %arg1: i32) -> (i32, i32, i32) {
    %c0_i32 = arith.constant 0 : i32
    %c0_i32_0 = arith.constant 0 : i32
    return %arg0, %c0_i32, %arg1 : i32, i32, i32
  }
}

module attributes {stable_mosaic.version = 11 : i64} {
  func.func @_gmm_bias_kernel(%arg0: i32, %arg1: i32, %arg2: memref<1x8x32xbf16, #tpu.memory_space<vmem>>, %arg3: memref<1x32x32xbf16, #tpu.memory_space<vmem>>, %arg4: memref<1x8x1xf32, #tpu.memory_space<vmem>>, %arg5: memref<1x8x32xf32, #tpu.memory_space<vmem>>) attributes {dimension_semantics = [#tpu.dimension_semantics<parallel>, #tpu.dimension_semantics<parallel>], iteration_bounds = array<i64: 1, 1>, scalar_prefetch = 0 : i64, scratch_operands = 0 : i64, tpu.core_type = #tpu.core_type<tc>, window_params = [{transform_indices = @transform_0, window_bounds = array<i64: 1, 8, 32>}, {transform_indices = @transform_1, window_bounds = array<i64: 1, 32, 32>}, {transform_indices = @transform_2, window_bounds = array<i64: 1, 8, 1>}, {transform_indices = @transform_3, window_bounds = array<i64: 1, 8, 32>}]} {
    %c0 = arith.constant 0 : index
    %c0_0 = arith.constant 0 : index
    %c0_1 = arith.constant 0 : index
    %0 = vector.load %arg2[%c0, %c0_0, %c0_1] : memref<1x8x32xbf16, #tpu.memory_space<vmem>>, vector<1x8x32xbf16>
    %1 = vector.shape_cast %0 : vector<1x8x32xbf16> to vector<8x32xbf16>
    %c0_2 = arith.constant 0 : index
    %c0_3 = arith.constant 0 : index
    %c0_4 = arith.constant 0 : index
    %2 = vector.load %arg3[%c0_2, %c0_3, %c0_4] : memref<1x32x32xbf16, #tpu.memory_space<vmem>>, vector<1x32x32xbf16>
    %3 = vector.shape_cast %2 : vector<1x32x32xbf16> to vector<32x32xbf16>
    %cst = arith.constant dense<0.000000e+00> : vector<8x32xf32>
    %4 = tpu.matmul %1, %3, %cst {dimension_numbers = #tpu.dot_dimension_numbers<[1], [0], [0], [1], [0, 0, 1, 1], [], []>} : vector<8x32xbf16>, vector<32x32xbf16>, vector<8x32xf32> -> vector<8x32xf32>
    %c0_5 = arith.constant 0 : index
    %c0_6 = arith.constant 0 : index
    %c0_7 = arith.constant 0 : index
    %5 = vector.load %arg4[%c0_5, %c0_6, %c0_7] : memref<1x8x1xf32, #tpu.memory_space<vmem>>, vector<1x8x1xf32>
    %6 = vector.shape_cast %5 : vector<1x8x1xf32> to vector<8x1xf32>
    %7 = vector.broadcast %6 : vector<8x1xf32> to vector<8x32xf32>
    %8 = arith.addf %4, %7 : vector<8x32xf32>
    %c0_8 = arith.constant 0 : index
    %c0_9 = arith.constant 0 : index
    %c0_10 = arith.constant 0 : index
    %9 = vector.load %arg5[%c0_8, %c0_9, %c0_10] : memref<1x8x32xf32, #tpu.memory_space<vmem>>, vector<1x8x32xf32>
    %10 = vector.shape_cast %9 : vector<1x8x32xf32> to vector<8x32xf32>
    %11 = vector.shape_cast %8 : vector<8x32xf32> to vector<1x8x32xf32>
    tpu.vector_store %arg5[%c0_8, %c0_9, %c0_10], %11 {strides = array<i32>} : memref<1x8x32xf32, #tpu.memory_space<vmem>>, vector<1x8x32xf32>,
    return
  }
  func.func @transform_0(%arg0: i32, %arg1: i32) -> (i32, i32, i32) {
    %c0_i32 = arith.constant 0 : i32
    %c0_i32_0 = arith.constant 0 : i32
    %c0_i32_1 = arith.constant 0 : i32
    return %arg0, %c0_i32, %c0_i32_0 : i32, i32, i32
  }
  func.func @transform_1(%arg0: i32, %arg1: i32) -> (i32, i32, i32) {
    %c0_i32 = arith.constant 0 : i32
    %c0_i32_0 = arith.constant 0 : i32
    return %arg0, %c0_i32, %arg1 : i32, i32, i32
  }
  func.func @transform_2(%arg0: i32, %arg1: i32) -> (i32, i32, i32) {
    %c0_i32 = arith.constant 0 : i32
    %c0_i32_0 = arith.constant 0 : i32
    %c0_i32_1 = arith.constant 0 : i32
    return %arg0, %c0_i32, %c0_i32_0 : i32, i32, i32
  }
  func.func @transform_3(%arg0: i32, %arg1: i32) -> (i32, i32, i32) {
    %c0_i32 = arith.constant 0 : i32
    %c0_i32_0 = arith.constant 0 : i32
    return %arg0, %c0_i32, %arg1 : i32, i32, i32
  }
}

module attributes {stable_mosaic.version = 11 : i64} {
  func.func @_gmm_bias_kernel(%arg0: i32, %arg1: i32, %arg2: memref<1x32x50xbf16, #tpu.memory_space<vmem>>, %arg3: memref<1x50x32xbf16, #tpu.memory_space<vmem>>, %arg4: memref<1x32x1xf32, #tpu.memory_space<vmem>>, %arg5: memref<1x32x32xf32, #tpu.memory_space<vmem>>) attributes {dimension_semantics = [#tpu.dimension_semantics<parallel>, #tpu.dimension_semantics<parallel>], iteration_bounds = array<i64: 4, 1>, scalar_prefetch = 0 : i64, scratch_operands = 0 : i64, tpu.core_type = #tpu.core_type<tc>, window_params = [{transform_indices = @transform_0, window_bounds = array<i64: 1, 32, 50>}, {transform_indices = @transform_1, window_bounds = array<i64: 1, 50, 32>}, {transform_indices = @transform_2, window_bounds = array<i64: 1, 32, 1>}, {transform_indices = @transform_3, window_bounds = array<i64: 1, 32, 32>}]} {
    %c0 = arith.constant 0 : index
    %c0_0 = arith.constant 0 : index
    %c0_1 = arith.constant 0 : index
    %0 = vector.load %arg2[%c0, %c0_0, %c0_1] : memref<1x32x50xbf16, #tpu.memory_space<vmem>>, vector<1x32x50xbf16>
    %1 = vector.shape_cast %0 : vector<1x32x50xbf16> to vector<32x50xbf16>
    %c0_2 = arith.constant 0 : index
    %c0_3 = arith.constant 0 : index
    %c0_4 = arith.constant 0 : index
    %2 = vector.load %arg3[%c0_2, %c0_3, %c0_4] : memref<1x50x32xbf16, #tpu.memory_space<vmem>>, vector<1x50x32xbf16>
    %3 = vector.shape_cast %2 : vector<1x50x32xbf16> to vector<50x32xbf16>
    %cst = arith.constant dense<0.000000e+00> : vector<32x32xf32>
    %4 = tpu.matmul %1, %3, %cst {dimension_numbers = #tpu.dot_dimension_numbers<[1], [0], [0], [1], [0, 0, 1, 1], [], []>} : vector<32x50xbf16>, vector<50x32xbf16>, vector<32x32xf32> -> vector<32x32xf32>
    %c0_5 = arith.constant 0 : index
    %c0_6 = arith.constant 0 : index
    %c0_7 = arith.constant 0 : index
    %5 = vector.load %arg4[%c0_5, %c0_6, %c0_7] : memref<1x32x1xf32, #tpu.memory_space<vmem>>, vector<1x32x1xf32>
    %6 = vector.shape_cast %5 : vector<1x32x1xf32> to vector<32x1xf32>
    %7 = vector.broadcast %6 : vector<32x1xf32> to vector<32x32xf32>
    %8 = arith.addf %4, %7 : vector<32x32xf32>
    %c0_8 = arith.constant 0 : index
    %c0_9 = arith.constant 0 : index
    %c0_10 = arith.constant 0 : index
    %9 = vector.load %arg5[%c0_8, %c0_9, %c0_10] : memref<1x32x32xf32, #tpu.memory_space<vmem>>, vector<1x32x32xf32>
    %10 = vector.shape_cast %9 : vector<1x32x32xf32> to vector<32x32xf32>
    %11 = vector.shape_cast %8 : vector<32x32xf32> to vector<1x32x32xf32>
    tpu.vector_store %arg5[%c0_8, %c0_9, %c0_10], %11 {strides = array<i32>} : memref<1x32x32xf32, #tpu.memory_space<vmem>>, vector<1x32x32xf32>,
    return
  }
  func.func @transform_0(%arg0: i32, %arg1: i32) -> (i32, i32, i32) {
    %c0_i32 = arith.constant 0 : i32
    %c0_i32_0 = arith.constant 0 : i32
    %c0_i32_1 = arith.constant 0 : i32
    return %arg0, %c0_i32, %c0_i32_0 : i32, i32, i32
  }
  func.func @transform_1(%arg0: i32, %arg1: i32) -> (i32, i32, i32) {
    %c0_i32 = arith.constant 0 : i32
    %c0_i32_0 = arith.constant 0 : i32
    return %arg0, %c0_i32, %arg1 : i32, i32, i32
  }
  func.func @transform_2(%arg0: i32, %arg1: i32) -> (i32, i32, i32) {
    %c0_i32 = arith.constant 0 : i32
    %c0_i32_0 = arith.constant 0 : i32
    %c0_i32_1 = arith.constant 0 : i32
    return %arg0, %c0_i32, %c0_i32_0 : i32, i32, i32
  }
  func.func @transform_3(%arg0: i32, %arg1: i32) -> (i32, i32, i32) {
    %c0_i32 = arith.constant 0 : i32
    %c0_i32_0 = arith.constant 0 : i32
    return %arg0, %c0_i32, %arg1 : i32, i32, i32
  }
}

module attributes {stable_mosaic.version = 11 : i64} {
  func.func @_gn_lrelu_kernel(%arg0: i32, %arg1: i32, %arg2: memref<1x1x32x16xf32, #tpu.memory_space<vmem>>, %arg3: memref<1x32x1xf32, #tpu.memory_space<vmem>>, %arg4: memref<1x32x1xf32, #tpu.memory_space<vmem>>, %arg5: memref<1x1x32x16xf32, #tpu.memory_space<vmem>>) attributes {dimension_semantics = [#tpu.dimension_semantics<parallel>, #tpu.dimension_semantics<parallel>], iteration_bounds = array<i64: 2, 4>, scalar_prefetch = 0 : i64, scratch_operands = 0 : i64, tpu.core_type = #tpu.core_type<tc>, window_params = [{transform_indices = @transform_0, window_bounds = array<i64: 1, 1, 32, 16>}, {transform_indices = @transform_1, window_bounds = array<i64: 1, 32, 1>}, {transform_indices = @transform_2, window_bounds = array<i64: 1, 32, 1>}, {transform_indices = @transform_3, window_bounds = array<i64: 1, 1, 32, 16>}]} {
    %c0 = arith.constant 0 : index
    %c0_0 = arith.constant 0 : index
    %c0_1 = arith.constant 0 : index
    %c0_2 = arith.constant 0 : index
    %0 = vector.load %arg2[%c0, %c0_0, %c0_1, %c0_2] : memref<1x1x32x16xf32, #tpu.memory_space<vmem>>, vector<1x1x32x16xf32>
    %1 = vector.shape_cast %0 : vector<1x1x32x16xf32> to vector<32x16xf32>
    %2 = vector.shape_cast %1 : vector<32x16xf32> to vector<1x32x16xf32>
    %cst = arith.constant dense<0.000000e+00> : vector<1xf32>
    %3 = vector.multi_reduction <add>, %2, %cst [1, 2] : vector<1x32x16xf32> to vector<1xf32>
    %4 = vector.shape_cast %3 : vector<1xf32> to vector<1x1x1xf32>
    %5 = vector.extract %4[0, 0, 0] : f32 from vector<1x1x1xf32>
    %6 = vector.broadcast %5 : f32 to vector<1x1xf32>
    %cst_3 = arith.constant 5.120000e+02 : f32
    %7 = vector.broadcast %cst_3 : f32 to vector<1x1xf32>
    %8 = arith.divf %6, %7 : vector<1x1xf32>
    %9 = vector.broadcast %8 : vector<1x1xf32> to vector<32x16xf32>
    %10 = arith.subf %1, %9 : vector<32x16xf32>
    %11 = arith.mulf %10, %10 : vector<32x16xf32>
    %12 = vector.shape_cast %11 : vector<32x16xf32> to vector<1x32x16xf32>
    %cst_4 = arith.constant dense<0.000000e+00> : vector<1xf32>
    %13 = vector.multi_reduction <add>, %12, %cst_4 [1, 2] : vector<1x32x16xf32> to vector<1xf32>
    %14 = vector.shape_cast %13 : vector<1xf32> to vector<1x1x1xf32>
    %15 = vector.extract %14[0, 0, 0] : f32 from vector<1x1x1xf32>
    %16 = vector.broadcast %15 : f32 to vector<1x1xf32>
    %cst_5 = arith.constant 5.120000e+02 : f32
    %17 = vector.broadcast %cst_5 : f32 to vector<1x1xf32>
    %18 = arith.divf %16, %17 : vector<1x1xf32>
    %19 = vector.broadcast %8 : vector<1x1xf32> to vector<32x16xf32>
    %20 = arith.subf %1, %19 : vector<32x16xf32>
    %cst_6 = arith.constant 9.99999974E-6 : f32
    %21 = vector.broadcast %cst_6 : f32 to vector<1x1xf32>
    %22 = arith.addf %18, %21 : vector<1x1xf32>
    %23 = math.rsqrt %22 : vector<1x1xf32>
    %24 = vector.broadcast %23 : vector<1x1xf32> to vector<32x16xf32>
    %25 = arith.mulf %20, %24 : vector<32x16xf32>
    %c0_7 = arith.constant 0 : index
    %c0_8 = arith.constant 0 : index
    %c0_9 = arith.constant 0 : index
    %26 = vector.load %arg3[%c0_7, %c0_8, %c0_9] : memref<1x32x1xf32, #tpu.memory_space<vmem>>, vector<1x32x1xf32>
    %27 = vector.shape_cast %26 : vector<1x32x1xf32> to vector<32x1xf32>
    %28 = vector.broadcast %27 : vector<32x1xf32> to vector<32x16xf32>
    %29 = arith.mulf %25, %28 : vector<32x16xf32>
    %c0_10 = arith.constant 0 : index
    %c0_11 = arith.constant 0 : index
    %c0_12 = arith.constant 0 : index
    %30 = vector.load %arg4[%c0_10, %c0_11, %c0_12] : memref<1x32x1xf32, #tpu.memory_space<vmem>>, vector<1x32x1xf32>
    %31 = vector.shape_cast %30 : vector<1x32x1xf32> to vector<32x1xf32>
    %32 = vector.broadcast %31 : vector<32x1xf32> to vector<32x16xf32>
    %33 = arith.addf %29, %32 : vector<32x16xf32>
    %cst_13 = arith.constant 0.000000e+00 : f32
    %34 = vector.broadcast %cst_13 : f32 to vector<32x16xf32>
    %35 = arith.cmpf ogt, %33, %34 : vector<32x16xf32>
    %cst_14 = arith.constant 2.000000e-01 : f32
    %36 = vector.broadcast %cst_14 : f32 to vector<32x16xf32>
    %37 = arith.mulf %36, %33 : vector<32x16xf32>
    %38 = arith.select %35, %33, %37 : vector<32x16xi1>, vector<32x16xf32>
    %c0_15 = arith.constant 0 : index
    %c0_16 = arith.constant 0 : index
    %c0_17 = arith.constant 0 : index
    %c0_18 = arith.constant 0 : index
    %39 = vector.load %arg5[%c0_15, %c0_16, %c0_17, %c0_18] : memref<1x1x32x16xf32, #tpu.memory_space<vmem>>, vector<1x1x32x16xf32>
    %40 = vector.shape_cast %39 : vector<1x1x32x16xf32> to vector<32x16xf32>
    %41 = vector.shape_cast %38 : vector<32x16xf32> to vector<1x1x32x16xf32>
    tpu.vector_store %arg5[%c0_15, %c0_16, %c0_17, %c0_18], %41 {strides = array<i32>} : memref<1x1x32x16xf32, #tpu.memory_space<vmem>>, vector<1x1x32x16xf32>,
    return
  }
  func.func @transform_0(%arg0: i32, %arg1: i32) -> (i32, i32, i32, i32) {
    %c0_i32 = arith.constant 0 : i32
    %c0_i32_0 = arith.constant 0 : i32
    %c0_i32_1 = arith.constant 0 : i32
    return %arg0, %arg1, %c0_i32, %c0_i32_0 : i32, i32, i32, i32
  }
  func.func @transform_1(%arg0: i32, %arg1: i32) -> (i32, i32, i32) {
    %c0_i32 = arith.constant 0 : i32
    %c0_i32_0 = arith.constant 0 : i32
    %c0_i32_1 = arith.constant 0 : i32
    return %arg1, %c0_i32, %c0_i32_0 : i32, i32, i32
  }
  func.func @transform_2(%arg0: i32, %arg1: i32) -> (i32, i32, i32) {
    %c0_i32 = arith.constant 0 : i32
    %c0_i32_0 = arith.constant 0 : i32
    %c0_i32_1 = arith.constant 0 : i32
    return %arg1, %c0_i32, %c0_i32_0 : i32, i32, i32
  }
  func.func @transform_3(%arg0: i32, %arg1: i32) -> (i32, i32, i32, i32) {
    %c0_i32 = arith.constant 0 : i32
    %c0_i32_0 = arith.constant 0 : i32
    %c0_i32_1 = arith.constant 0 : i32
    return %arg0, %arg1, %c0_i32, %c0_i32_0 : i32, i32, i32, i32
  }
}

module attributes {stable_mosaic.version = 11 : i64} {
  func.func @_gmm_bias_kernel(%arg0: i32, %arg1: i32, %arg2: memref<1x32x18xbf16, #tpu.memory_space<vmem>>, %arg3: memref<1x18x32xbf16, #tpu.memory_space<vmem>>, %arg4: memref<1x32x1xf32, #tpu.memory_space<vmem>>, %arg5: memref<1x32x32xf32, #tpu.memory_space<vmem>>) attributes {dimension_semantics = [#tpu.dimension_semantics<parallel>, #tpu.dimension_semantics<parallel>], iteration_bounds = array<i64: 4, 1>, scalar_prefetch = 0 : i64, scratch_operands = 0 : i64, tpu.core_type = #tpu.core_type<tc>, window_params = [{transform_indices = @transform_0, window_bounds = array<i64: 1, 32, 18>}, {transform_indices = @transform_1, window_bounds = array<i64: 1, 18, 32>}, {transform_indices = @transform_2, window_bounds = array<i64: 1, 32, 1>}, {transform_indices = @transform_3, window_bounds = array<i64: 1, 32, 32>}]} {
    %c0 = arith.constant 0 : index
    %c0_0 = arith.constant 0 : index
    %c0_1 = arith.constant 0 : index
    %0 = vector.load %arg2[%c0, %c0_0, %c0_1] : memref<1x32x18xbf16, #tpu.memory_space<vmem>>, vector<1x32x18xbf16>
    %1 = vector.shape_cast %0 : vector<1x32x18xbf16> to vector<32x18xbf16>
    %c0_2 = arith.constant 0 : index
    %c0_3 = arith.constant 0 : index
    %c0_4 = arith.constant 0 : index
    %2 = vector.load %arg3[%c0_2, %c0_3, %c0_4] : memref<1x18x32xbf16, #tpu.memory_space<vmem>>, vector<1x18x32xbf16>
    %3 = vector.shape_cast %2 : vector<1x18x32xbf16> to vector<18x32xbf16>
    %cst = arith.constant dense<0.000000e+00> : vector<32x32xf32>
    %4 = tpu.matmul %1, %3, %cst {dimension_numbers = #tpu.dot_dimension_numbers<[1], [0], [0], [1], [0, 0, 1, 1], [], []>} : vector<32x18xbf16>, vector<18x32xbf16>, vector<32x32xf32> -> vector<32x32xf32>
    %c0_5 = arith.constant 0 : index
    %c0_6 = arith.constant 0 : index
    %c0_7 = arith.constant 0 : index
    %5 = vector.load %arg4[%c0_5, %c0_6, %c0_7] : memref<1x32x1xf32, #tpu.memory_space<vmem>>, vector<1x32x1xf32>
    %6 = vector.shape_cast %5 : vector<1x32x1xf32> to vector<32x1xf32>
    %7 = vector.broadcast %6 : vector<32x1xf32> to vector<32x32xf32>
    %8 = arith.addf %4, %7 : vector<32x32xf32>
    %c0_8 = arith.constant 0 : index
    %c0_9 = arith.constant 0 : index
    %c0_10 = arith.constant 0 : index
    %9 = vector.load %arg5[%c0_8, %c0_9, %c0_10] : memref<1x32x32xf32, #tpu.memory_space<vmem>>, vector<1x32x32xf32>
    %10 = vector.shape_cast %9 : vector<1x32x32xf32> to vector<32x32xf32>
    %11 = vector.shape_cast %8 : vector<32x32xf32> to vector<1x32x32xf32>
    tpu.vector_store %arg5[%c0_8, %c0_9, %c0_10], %11 {strides = array<i32>} : memref<1x32x32xf32, #tpu.memory_space<vmem>>, vector<1x32x32xf32>,
    return
  }
  func.func @transform_0(%arg0: i32, %arg1: i32) -> (i32, i32, i32) {
    %c0_i32 = arith.constant 0 : i32
    %c0_i32_0 = arith.constant 0 : i32
    %c0_i32_1 = arith.constant 0 : i32
    return %arg0, %c0_i32, %c0_i32_0 : i32, i32, i32
  }
  func.func @transform_1(%arg0: i32, %arg1: i32) -> (i32, i32, i32) {
    %c0_i32 = arith.constant 0 : i32
    %c0_i32_0 = arith.constant 0 : i32
    return %arg0, %c0_i32, %arg1 : i32, i32, i32
  }
  func.func @transform_2(%arg0: i32, %arg1: i32) -> (i32, i32, i32) {
    %c0_i32 = arith.constant 0 : i32
    %c0_i32_0 = arith.constant 0 : i32
    %c0_i32_1 = arith.constant 0 : i32
    return %arg0, %c0_i32, %c0_i32_0 : i32, i32, i32
  }
  func.func @transform_3(%arg0: i32, %arg1: i32) -> (i32, i32, i32) {
    %c0_i32 = arith.constant 0 : i32
    %c0_i32_0 = arith.constant 0 : i32
    return %arg0, %c0_i32, %arg1 : i32, i32, i32
  }
}

module attributes {stable_mosaic.version = 11 : i64} {
  func.func @_gmm_bias_kernel(%arg0: i32, %arg1: i32, %arg2: memref<1x32x288xbf16, #tpu.memory_space<vmem>>, %arg3: memref<1x288x2048xbf16, #tpu.memory_space<vmem>>, %arg4: memref<1x32x1xf32, #tpu.memory_space<vmem>>, %arg5: memref<1x32x2048xf32, #tpu.memory_space<vmem>>) attributes {dimension_semantics = [#tpu.dimension_semantics<parallel>, #tpu.dimension_semantics<parallel>], iteration_bounds = array<i64: 1, 1>, scalar_prefetch = 0 : i64, scratch_operands = 0 : i64, tpu.core_type = #tpu.core_type<tc>, window_params = [{transform_indices = @transform_0, window_bounds = array<i64: 1, 32, 288>}, {transform_indices = @transform_1, window_bounds = array<i64: 1, 288, 2048>}, {transform_indices = @transform_2, window_bounds = array<i64: 1, 32, 1>}, {transform_indices = @transform_3, window_bounds = array<i64: 1, 32, 2048>}]} {
    %c0 = arith.constant 0 : index
    %c0_0 = arith.constant 0 : index
    %c0_1 = arith.constant 0 : index
    %0 = vector.load %arg2[%c0, %c0_0, %c0_1] : memref<1x32x288xbf16, #tpu.memory_space<vmem>>, vector<1x32x288xbf16>
    %1 = vector.shape_cast %0 : vector<1x32x288xbf16> to vector<32x288xbf16>
    %c0_2 = arith.constant 0 : index
    %c0_3 = arith.constant 0 : index
    %c0_4 = arith.constant 0 : index
    %2 = vector.load %arg3[%c0_2, %c0_3, %c0_4] : memref<1x288x2048xbf16, #tpu.memory_space<vmem>>, vector<1x288x2048xbf16>
    %3 = vector.shape_cast %2 : vector<1x288x2048xbf16> to vector<288x2048xbf16>
    %cst = arith.constant dense<0.000000e+00> : vector<32x2048xf32>
    %4 = tpu.matmul %1, %3, %cst {dimension_numbers = #tpu.dot_dimension_numbers<[1], [0], [0], [1], [0, 0, 1, 1], [], []>} : vector<32x288xbf16>, vector<288x2048xbf16>, vector<32x2048xf32> -> vector<32x2048xf32>
    %c0_5 = arith.constant 0 : index
    %c0_6 = arith.constant 0 : index
    %c0_7 = arith.constant 0 : index
    %5 = vector.load %arg4[%c0_5, %c0_6, %c0_7] : memref<1x32x1xf32, #tpu.memory_space<vmem>>, vector<1x32x1xf32>
    %6 = vector.shape_cast %5 : vector<1x32x1xf32> to vector<32x1xf32>
    %7 = vector.broadcast %6 : vector<32x1xf32> to vector<32x2048xf32>
    %8 = arith.addf %4, %7 : vector<32x2048xf32>
    %c0_8 = arith.constant 0 : index
    %c0_9 = arith.constant 0 : index
    %c0_10 = arith.constant 0 : index
    %9 = vector.load %arg5[%c0_8, %c0_9, %c0_10] : memref<1x32x2048xf32, #tpu.memory_space<vmem>>, vector<1x32x2048xf32>
    %10 = vector.shape_cast %9 : vector<1x32x2048xf32> to vector<32x2048xf32>
    %11 = vector.shape_cast %8 : vector<32x2048xf32> to vector<1x32x2048xf32>
    tpu.vector_store %arg5[%c0_8, %c0_9, %c0_10], %11 {strides = array<i32>} : memref<1x32x2048xf32, #tpu.memory_space<vmem>>, vector<1x32x2048xf32>,
    return
  }
  func.func @transform_0(%arg0: i32, %arg1: i32) -> (i32, i32, i32) {
    %c0_i32 = arith.constant 0 : i32
    %c0_i32_0 = arith.constant 0 : i32
    %c0_i32_1 = arith.constant 0 : i32
    return %arg0, %c0_i32, %c0_i32_0 : i32, i32, i32
  }
  func.func @transform_1(%arg0: i32, %arg1: i32) -> (i32, i32, i32) {
    %c0_i32 = arith.constant 0 : i32
    %c0_i32_0 = arith.constant 0 : i32
    return %arg0, %c0_i32, %arg1 : i32, i32, i32
  }
  func.func @transform_2(%arg0: i32, %arg1: i32) -> (i32, i32, i32) {
    %c0_i32 = arith.constant 0 : i32
    %c0_i32_0 = arith.constant 0 : i32
    %c0_i32_1 = arith.constant 0 : i32
    return %arg0, %c0_i32, %c0_i32_0 : i32, i32, i32
  }
  func.func @transform_3(%arg0: i32, %arg1: i32) -> (i32, i32, i32) {
    %c0_i32 = arith.constant 0 : i32
    %c0_i32_0 = arith.constant 0 : i32
    return %arg0, %c0_i32, %arg1 : i32, i32, i32
  }
}

module attributes {stable_mosaic.version = 11 : i64} {
  func.func @_gmm_bias_kernel(%arg0: i32, %arg1: i32, %arg2: memref<1x32x576xbf16, #tpu.memory_space<vmem>>, %arg3: memref<1x576x2048xbf16, #tpu.memory_space<vmem>>, %arg4: memref<1x32x1xf32, #tpu.memory_space<vmem>>, %arg5: memref<1x32x2048xf32, #tpu.memory_space<vmem>>) attributes {dimension_semantics = [#tpu.dimension_semantics<parallel>, #tpu.dimension_semantics<parallel>], iteration_bounds = array<i64: 1, 1>, scalar_prefetch = 0 : i64, scratch_operands = 0 : i64, tpu.core_type = #tpu.core_type<tc>, window_params = [{transform_indices = @transform_0, window_bounds = array<i64: 1, 32, 576>}, {transform_indices = @transform_1, window_bounds = array<i64: 1, 576, 2048>}, {transform_indices = @transform_2, window_bounds = array<i64: 1, 32, 1>}, {transform_indices = @transform_3, window_bounds = array<i64: 1, 32, 2048>}]} {
    %c0 = arith.constant 0 : index
    %c0_0 = arith.constant 0 : index
    %c0_1 = arith.constant 0 : index
    %0 = vector.load %arg2[%c0, %c0_0, %c0_1] : memref<1x32x576xbf16, #tpu.memory_space<vmem>>, vector<1x32x576xbf16>
    %1 = vector.shape_cast %0 : vector<1x32x576xbf16> to vector<32x576xbf16>
    %c0_2 = arith.constant 0 : index
    %c0_3 = arith.constant 0 : index
    %c0_4 = arith.constant 0 : index
    %2 = vector.load %arg3[%c0_2, %c0_3, %c0_4] : memref<1x576x2048xbf16, #tpu.memory_space<vmem>>, vector<1x576x2048xbf16>
    %3 = vector.shape_cast %2 : vector<1x576x2048xbf16> to vector<576x2048xbf16>
    %cst = arith.constant dense<0.000000e+00> : vector<32x2048xf32>
    %4 = tpu.matmul %1, %3, %cst {dimension_numbers = #tpu.dot_dimension_numbers<[1], [0], [0], [1], [0, 0, 1, 1], [], []>} : vector<32x576xbf16>, vector<576x2048xbf16>, vector<32x2048xf32> -> vector<32x2048xf32>
    %c0_5 = arith.constant 0 : index
    %c0_6 = arith.constant 0 : index
    %c0_7 = arith.constant 0 : index
    %5 = vector.load %arg4[%c0_5, %c0_6, %c0_7] : memref<1x32x1xf32, #tpu.memory_space<vmem>>, vector<1x32x1xf32>
    %6 = vector.shape_cast %5 : vector<1x32x1xf32> to vector<32x1xf32>
    %7 = vector.broadcast %6 : vector<32x1xf32> to vector<32x2048xf32>
    %8 = arith.addf %4, %7 : vector<32x2048xf32>
    %c0_8 = arith.constant 0 : index
    %c0_9 = arith.constant 0 : index
    %c0_10 = arith.constant 0 : index
    %9 = vector.load %arg5[%c0_8, %c0_9, %c0_10] : memref<1x32x2048xf32, #tpu.memory_space<vmem>>, vector<1x32x2048xf32>
    %10 = vector.shape_cast %9 : vector<1x32x2048xf32> to vector<32x2048xf32>
    %11 = vector.shape_cast %8 : vector<32x2048xf32> to vector<1x32x2048xf32>
    tpu.vector_store %arg5[%c0_8, %c0_9, %c0_10], %11 {strides = array<i32>} : memref<1x32x2048xf32, #tpu.memory_space<vmem>>, vector<1x32x2048xf32>,
    return
  }
  func.func @transform_0(%arg0: i32, %arg1: i32) -> (i32, i32, i32) {
    %c0_i32 = arith.constant 0 : i32
    %c0_i32_0 = arith.constant 0 : i32
    %c0_i32_1 = arith.constant 0 : i32
    return %arg0, %c0_i32, %c0_i32_0 : i32, i32, i32
  }
  func.func @transform_1(%arg0: i32, %arg1: i32) -> (i32, i32, i32) {
    %c0_i32 = arith.constant 0 : i32
    %c0_i32_0 = arith.constant 0 : i32
    return %arg0, %c0_i32, %arg1 : i32, i32, i32
  }
  func.func @transform_2(%arg0: i32, %arg1: i32) -> (i32, i32, i32) {
    %c0_i32 = arith.constant 0 : i32
    %c0_i32_0 = arith.constant 0 : i32
    %c0_i32_1 = arith.constant 0 : i32
    return %arg0, %c0_i32, %c0_i32_0 : i32, i32, i32
  }
  func.func @transform_3(%arg0: i32, %arg1: i32) -> (i32, i32, i32) {
    %c0_i32 = arith.constant 0 : i32
    %c0_i32_0 = arith.constant 0 : i32
    return %arg0, %c0_i32, %arg1 : i32, i32, i32
  }
}

module attributes {stable_mosaic.version = 11 : i64} {
  func.func @_gmm_bias_kernel(%arg0: i32, %arg1: i32, %arg2: memref<1x4x32xbf16, #tpu.memory_space<vmem>>, %arg3: memref<1x32x2048xbf16, #tpu.memory_space<vmem>>, %arg4: memref<1x4x1xf32, #tpu.memory_space<vmem>>, %arg5: memref<1x4x2048xf32, #tpu.memory_space<vmem>>) attributes {dimension_semantics = [#tpu.dimension_semantics<parallel>, #tpu.dimension_semantics<parallel>], iteration_bounds = array<i64: 1, 1>, scalar_prefetch = 0 : i64, scratch_operands = 0 : i64, tpu.core_type = #tpu.core_type<tc>, window_params = [{transform_indices = @transform_0, window_bounds = array<i64: 1, 4, 32>}, {transform_indices = @transform_1, window_bounds = array<i64: 1, 32, 2048>}, {transform_indices = @transform_2, window_bounds = array<i64: 1, 4, 1>}, {transform_indices = @transform_3, window_bounds = array<i64: 1, 4, 2048>}]} {
    %c0 = arith.constant 0 : index
    %c0_0 = arith.constant 0 : index
    %c0_1 = arith.constant 0 : index
    %0 = vector.load %arg2[%c0, %c0_0, %c0_1] : memref<1x4x32xbf16, #tpu.memory_space<vmem>>, vector<1x4x32xbf16>
    %1 = vector.shape_cast %0 : vector<1x4x32xbf16> to vector<4x32xbf16>
    %c0_2 = arith.constant 0 : index
    %c0_3 = arith.constant 0 : index
    %c0_4 = arith.constant 0 : index
    %2 = vector.load %arg3[%c0_2, %c0_3, %c0_4] : memref<1x32x2048xbf16, #tpu.memory_space<vmem>>, vector<1x32x2048xbf16>
    %3 = vector.shape_cast %2 : vector<1x32x2048xbf16> to vector<32x2048xbf16>
    %cst = arith.constant dense<0.000000e+00> : vector<4x2048xf32>
    %4 = tpu.matmul %1, %3, %cst {dimension_numbers = #tpu.dot_dimension_numbers<[1], [0], [0], [1], [0, 0, 1, 1], [], []>} : vector<4x32xbf16>, vector<32x2048xbf16>, vector<4x2048xf32> -> vector<4x2048xf32>
    %c0_5 = arith.constant 0 : index
    %c0_6 = arith.constant 0 : index
    %c0_7 = arith.constant 0 : index
    %5 = vector.load %arg4[%c0_5, %c0_6, %c0_7] : memref<1x4x1xf32, #tpu.memory_space<vmem>>, vector<1x4x1xf32>
    %6 = vector.shape_cast %5 : vector<1x4x1xf32> to vector<4x1xf32>
    %7 = vector.broadcast %6 : vector<4x1xf32> to vector<4x2048xf32>
    %8 = arith.addf %4, %7 : vector<4x2048xf32>
    %c0_8 = arith.constant 0 : index
    %c0_9 = arith.constant 0 : index
    %c0_10 = arith.constant 0 : index
    %9 = vector.load %arg5[%c0_8, %c0_9, %c0_10] : memref<1x4x2048xf32, #tpu.memory_space<vmem>>, vector<1x4x2048xf32>
    %10 = vector.shape_cast %9 : vector<1x4x2048xf32> to vector<4x2048xf32>
    %11 = vector.shape_cast %8 : vector<4x2048xf32> to vector<1x4x2048xf32>
    tpu.vector_store %arg5[%c0_8, %c0_9, %c0_10], %11 {strides = array<i32>} : memref<1x4x2048xf32, #tpu.memory_space<vmem>>, vector<1x4x2048xf32>,
    return
  }
  func.func @transform_0(%arg0: i32, %arg1: i32) -> (i32, i32, i32) {
    %c0_i32 = arith.constant 0 : i32
    %c0_i32_0 = arith.constant 0 : i32
    %c0_i32_1 = arith.constant 0 : i32
    return %arg0, %c0_i32, %c0_i32_0 : i32, i32, i32
  }
  func.func @transform_1(%arg0: i32, %arg1: i32) -> (i32, i32, i32) {
    %c0_i32 = arith.constant 0 : i32
    %c0_i32_0 = arith.constant 0 : i32
    return %arg0, %c0_i32, %arg1 : i32, i32, i32
  }
  func.func @transform_2(%arg0: i32, %arg1: i32) -> (i32, i32, i32) {
    %c0_i32 = arith.constant 0 : i32
    %c0_i32_0 = arith.constant 0 : i32
    %c0_i32_1 = arith.constant 0 : i32
    return %arg0, %c0_i32, %c0_i32_0 : i32, i32, i32
  }
  func.func @transform_3(%arg0: i32, %arg1: i32) -> (i32, i32, i32) {
    %c0_i32 = arith.constant 0 : i32
    %c0_i32_0 = arith.constant 0 : i32
    return %arg0, %c0_i32, %arg1 : i32, i32, i32
  }
}

module attributes {stable_mosaic.version = 11 : i64} {
  func.func @_gmm_bias_kernel(%arg0: i32, %arg1: i32, %arg2: memref<1x4x36xbf16, #tpu.memory_space<vmem>>, %arg3: memref<1x36x2048xbf16, #tpu.memory_space<vmem>>, %arg4: memref<1x4x1xf32, #tpu.memory_space<vmem>>, %arg5: memref<1x4x2048xf32, #tpu.memory_space<vmem>>) attributes {dimension_semantics = [#tpu.dimension_semantics<parallel>, #tpu.dimension_semantics<parallel>], iteration_bounds = array<i64: 1, 1>, scalar_prefetch = 0 : i64, scratch_operands = 0 : i64, tpu.core_type = #tpu.core_type<tc>, window_params = [{transform_indices = @transform_0, window_bounds = array<i64: 1, 4, 36>}, {transform_indices = @transform_1, window_bounds = array<i64: 1, 36, 2048>}, {transform_indices = @transform_2, window_bounds = array<i64: 1, 4, 1>}, {transform_indices = @transform_3, window_bounds = array<i64: 1, 4, 2048>}]} {
    %c0 = arith.constant 0 : index
    %c0_0 = arith.constant 0 : index
    %c0_1 = arith.constant 0 : index
    %0 = vector.load %arg2[%c0, %c0_0, %c0_1] : memref<1x4x36xbf16, #tpu.memory_space<vmem>>, vector<1x4x36xbf16>
    %1 = vector.shape_cast %0 : vector<1x4x36xbf16> to vector<4x36xbf16>
    %c0_2 = arith.constant 0 : index
    %c0_3 = arith.constant 0 : index
    %c0_4 = arith.constant 0 : index
    %2 = vector.load %arg3[%c0_2, %c0_3, %c0_4] : memref<1x36x2048xbf16, #tpu.memory_space<vmem>>, vector<1x36x2048xbf16>
    %3 = vector.shape_cast %2 : vector<1x36x2048xbf16> to vector<36x2048xbf16>
    %cst = arith.constant dense<0.000000e+00> : vector<4x2048xf32>
    %4 = tpu.matmul %1, %3, %cst {dimension_numbers = #tpu.dot_dimension_numbers<[1], [0], [0], [1], [0, 0, 1, 1], [], []>} : vector<4x36xbf16>, vector<36x2048xbf16>, vector<4x2048xf32> -> vector<4x2048xf32>
    %c0_5 = arith.constant 0 : index
    %c0_6 = arith.constant 0 : index
    %c0_7 = arith.constant 0 : index
    %5 = vector.load %arg4[%c0_5, %c0_6, %c0_7] : memref<1x4x1xf32, #tpu.memory_space<vmem>>, vector<1x4x1xf32>
    %6 = vector.shape_cast %5 : vector<1x4x1xf32> to vector<4x1xf32>
    %7 = vector.broadcast %6 : vector<4x1xf32> to vector<4x2048xf32>
    %8 = arith.addf %4, %7 : vector<4x2048xf32>
    %c0_8 = arith.constant 0 : index
    %c0_9 = arith.constant 0 : index
    %c0_10 = arith.constant 0 : index
    %9 = vector.load %arg5[%c0_8, %c0_9, %c0_10] : memref<1x4x2048xf32, #tpu.memory_space<vmem>>, vector<1x4x2048xf32>
    %10 = vector.shape_cast %9 : vector<1x4x2048xf32> to vector<4x2048xf32>
    %11 = vector.shape_cast %8 : vector<4x2048xf32> to vector<1x4x2048xf32>
    tpu.vector_store %arg5[%c0_8, %c0_9, %c0_10], %11 {strides = array<i32>} : memref<1x4x2048xf32, #tpu.memory_space<vmem>>, vector<1x4x2048xf32>,
    return
  }
  func.func @transform_0(%arg0: i32, %arg1: i32) -> (i32, i32, i32) {
    %c0_i32 = arith.constant 0 : i32
    %c0_i32_0 = arith.constant 0 : i32
    %c0_i32_1 = arith.constant 0 : i32
    return %arg0, %c0_i32, %c0_i32_0 : i32, i32, i32
  }
  func.func @transform_1(%arg0: i32, %arg1: i32) -> (i32, i32, i32) {
    %c0_i32 = arith.constant 0 : i32
    %c0_i32_0 = arith.constant 0 : i32
    return %arg0, %c0_i32, %arg1 : i32, i32, i32
  }
  func.func @transform_2(%arg0: i32, %arg1: i32) -> (i32, i32, i32) {
    %c0_i32 = arith.constant 0 : i32
    %c0_i32_0 = arith.constant 0 : i32
    %c0_i32_1 = arith.constant 0 : i32
    return %arg0, %c0_i32, %c0_i32_0 : i32, i32, i32
  }
  func.func @transform_3(%arg0: i32, %arg1: i32) -> (i32, i32, i32) {
    %c0_i32 = arith.constant 0 : i32
    %c0_i32_0 = arith.constant 0 : i32
    return %arg0, %c0_i32, %arg1 : i32, i32, i32
  }
}

module attributes {stable_mosaic.version = 11 : i64} {
  func.func @_final_combine_kernel(%arg0: i32, %arg1: memref<32x256xf32, #tpu.memory_space<vmem>>, %arg2: memref<32x256xf32, #tpu.memory_space<vmem>>, %arg3: memref<32x256xf32, #tpu.memory_space<vmem>>) attributes {dimension_semantics = [#tpu.dimension_semantics<parallel>], iteration_bounds = array<i64: 1>, scalar_prefetch = 0 : i64, scratch_operands = 0 : i64, tpu.core_type = #tpu.core_type<tc>, window_params = [{transform_indices = @transform_0, window_bounds = array<i64: 32, 256>}, {transform_indices = @transform_1, window_bounds = array<i64: 32, 256>}, {transform_indices = @transform_2, window_bounds = array<i64: 32, 256>}]} {
    %c0 = arith.constant 0 : index
    %c0_0 = arith.constant 0 : index
    %0 = vector.load %arg1[%c0, %c0_0] : memref<32x256xf32, #tpu.memory_space<vmem>>, vector<32x256xf32>
    %cst = arith.constant 5.000000e-02 : f32
    %1 = vector.broadcast %cst : f32 to vector<32x256xf32>
    %2 = arith.mulf %1, %0 : vector<32x256xf32>
    %c0_1 = arith.constant 0 : index
    %c0_2 = arith.constant 0 : index
    %3 = vector.load %arg2[%c0_1, %c0_2] : memref<32x256xf32, #tpu.memory_space<vmem>>, vector<32x256xf32>
    %4 = arith.addf %2, %3 : vector<32x256xf32>
    %c0_3 = arith.constant 0 : index
    %c0_4 = arith.constant 0 : index
    %5 = vector.load %arg3[%c0_3, %c0_4] : memref<32x256xf32, #tpu.memory_space<vmem>>, vector<32x256xf32>
    tpu.vector_store %arg3[%c0_3, %c0_4], %4 {strides = array<i32>} : memref<32x256xf32, #tpu.memory_space<vmem>>, vector<32x256xf32>,
    return
  }
  func.func @transform_0(%arg0: i32) -> (i32, i32) {
    %c0_i32 = arith.constant 0 : i32
    %c0_i32_0 = arith.constant 0 : i32
    return %arg0, %c0_i32 : i32, i32
  }
  func.func @transform_1(%arg0: i32) -> (i32, i32) {
    %c0_i32 = arith.constant 0 : i32
    %c0_i32_0 = arith.constant 0 : i32
    return %arg0, %c0_i32 : i32, i32
  }
  func.func @transform_2(%arg0: i32) -> (i32, i32) {
    %c0_i32 = arith.constant 0 : i32
    %c0_i32_0 = arith.constant 0 : i32
    return %arg0, %c0_i32 : i32, i32
  }
}

</mosaic_0001>

<bundles_post_ra>
// kernel: earthfarseer_forward.41
= control target key start
LH: loop header
LB: loop body
LE: loop exit
PB: predicated region body
PF: predicated region fallthrough
CT: control target
= control target key end

     0   :  { %v32_v0 = vlaneseq  ;;  %vm102_vm0 = vcmask 523264   ;;  %s230_s2 = inlined_call_operand.vmem [shape: f32[1,576], index: 2, kind: input, shape index: {}]   ;;  %s231_s3 = inlined_call_operand.vmem [shape: f32[1,576], index: 3, kind: input, shape index: {}]   ;;  %s232_s0 = inlined_call_operand.vmem [shape: f32[8,576], index: 0, kind: input, shape index: {}]   ;;  %s233_s1 = inlined_call_operand.vmem [shape: f32[8,576], index: 1, kind: input, shape index: {}]   ;;  %s234_s4 = inlined_call_operand.vmem [shape: f32[8,576], index: 4, kind: output, shape index: {0}]   ;;  %s235_s5 = inlined_call_operand.vmem [shape: f32[8,576], index: 5, kind: output, shape index: {1}]  }
   0x1   :  { %v29_v2 = vld [vmem:[%s230_s2] sm:$0x1f]  ;;  %v20_v10 = vld [vmem:[%s232_s0 + $0x8] sm:$0xff]  ;;  %v21_v12 = vld [vmem:[%s232_s0 + $0x10] sm:$0xff] }
   0x2   :  { %v33_v1 = vshrl.u32 %v32_v0, 7  ;;  %v30_v3 = vld [vmem:[%s231_s3] sm:$0x1f]  ;;  %v25_v11 = vld [vmem:[%s233_s1 + $0x8] sm:$0xff]  ;;  %v26_v18 = vld [vmem:[%s233_s1 + $0x10] sm:$0xff] }
   0x3   :  { %v19_v4 = vld [vmem:[%s232_s0] sm:$0xff]  ;;  %v22_v19 = vld [vmem:[%s232_s0 + $0x18] sm:$0xff] }
   0x4   :  { %v24_v5 = vld [vmem:[%s233_s1] sm:$0xff]  ;;  %v34_v6 = vsub.s32 0, %v33_v1  ;;  %v38_v7 = vsub.s32 1, %v33_v1  ;;  %v42_v8 = vsub.s32 2, %v33_v1  ;;  %v46_v9 = vsub.s32 3, %v33_v1  ;;  %v27_v20 = vld [vmem:[%s233_s1 + $0x18] sm:$0xff] }
   0x5   :  { %v50_v13 = vsub.s32 4, %v33_v1  ;;  %v23_v33 = vld [vmem:[%s232_s0 + $0x20] sm:$0xff] }
   0x6   :  { %v35_v14 = vrot.slane %v29_v2, %v34_v6  ;;  %v66_v15 = vrot.slane %v30_v3, %v34_v6  ;;  %v39_v16 = vrot.slane %v29_v2, %v38_v7  ;;  %v70_v17 = vrot.slane %v30_v3, %v38_v7  ;;  %v28_v34 = vld [vmem:[%s233_s1 + $0x20] sm:$0xff] }
   0x7   :  { %v43_v21 = vrot.slane %v29_v2, %v42_v8  ;;  %v74_v22 = vrot.slane %v30_v3, %v42_v8  ;;  %v47_v23 = vrot.slane %v29_v2, %v46_v9  ;;  %v78_v24 = vrot.slane %v30_v3, %v46_v9 }
   0x8   :  { %v57_v25 = vmul.f32 %v35_v14, %v19_v4  ;;  %v88_v26 = vmul.f32 %v66_v15, %v24_v5  ;;  %v58_v27 = vmul.f32 %v39_v16, %v20_v10  ;;  %v89_v28 = vmul.f32 %v70_v17, %v25_v11 }
   0x9   :  { %v59_v29 = vmul.f32 %v43_v21, %v21_v12  ;;  %v90_v30 = vmul.f32 %v74_v22, %v26_v18  ;;  %v60_v31 = vmul.f32 %v47_v23, %v22_v19  ;;  %v91_v32 = vmul.f32 %v78_v24, %v27_v20 }
   0xa   :  { %v93_v35 = vsub.f32 %v57_v25, %v88_v26  ;;  %v94_v36 = vsub.f32 %v58_v27, %v89_v28  ;;  %v51_v37 = vrot.slane %v29_v2, %v50_v13  ;;  %v82_v38 = vrot.slane %v30_v3, %v50_v13 }
   0xb   :  { %v95_v39 = vsub.f32 %v59_v29, %v90_v30  ;;  %v96_v40 = vsub.f32 %v60_v31, %v91_v32  ;;  %v104_v41 = vmul.f32 %v66_v15, %v19_v4  ;;  %v109_v42 = vmul.f32 %v35_v14, %v24_v5 }
   0xc   :  { %98 = vst [vmem:[%s234_s4] sm:$0xff] %v93_v35  ;;  %99 = vst [vmem:[%s234_s4 + $0x8] sm:$0xff] %v94_v36  ;;  %v61_v43 = vmul.f32 %v51_v37, %v23_v33  ;;  %v92_v44 = vmul.f32 %v82_v38, %v28_v34  ;;  %v105_v45 = vmul.f32 %v70_v17, %v20_v10 }
   0xd   :  { %v110_v46 = vmul.f32 %v39_v16, %v25_v11  ;;  %100 = vst [vmem:[%s234_s4 + $0x10] sm:$0xff] %v95_v39  ;;  %101 = vst [vmem:[%s234_s4 + $0x18] sm:$0xff] %v96_v40  ;;  %v114_v47 = vadd.f32 %v109_v42, %v104_v41  ;;  %v106_v48 = vmul.f32 %v74_v22, %v21_v12 }
   0xe   :  { %v111_v49 = vmul.f32 %v43_v21, %v26_v18  ;;  %v107_v50 = vmul.f32 %v78_v24, %v22_v19  ;;  %v97_v51 = vsub.f32 %v61_v43, %v92_v44  ;;  %v112_v53 = vmul.f32 %v47_v23, %v27_v20 }
   0xf   :  { %v115_v52 = vadd.f32 %v110_v46, %v105_v45  ;;  %v108_v54 = vmul.f32 %v82_v38, %v23_v33  ;;  %119 = vst [vmem:[%s235_s5] sm:$0xff] %v114_v47  ;;  %v113_v56 = vmul.f32 %v51_v37, %v28_v34 }
  0x10   :  { %v116_v55 = vadd.f32 %v111_v49, %v106_v48  ;;  %103 = vst.msk [vmem:[%s234_s4 + $0x20] sm:$0xff] %vm102_vm0, %v97_v51  ;;  %v117_v57 = vadd.f32 %v112_v53, %v107_v50 }
  0x11   :  { %120 = vst [vmem:[%s235_s5 + $0x8] sm:$0xff] %v115_v52  ;;  %v118_v58 = vadd.f32 %v113_v56, %v108_v54 }
  0x12   :  { %121 = vst [vmem:[%s235_s5 + $0x10] sm:$0xff] %v116_v55  ;;  %122 = vst [vmem:[%s235_s5 + $0x18] sm:$0xff] %v117_v57 }
  0x13   :  { %123 = vst.msk [vmem:[%s235_s5 + $0x20] sm:$0xff] %vm102_vm0, %v118_v58 }

// kernel: reverse.0
= control target key start
LH: loop header
LB: loop body
LE: loop exit
PB: predicated region body
PF: predicated region fallthrough
CT: control target
= control target key end

     0   :  { %v167_v12 = vlaneseq  ;;  %v160_v34 = vld [vmem:[#allocation0 + $0x7] ss:$-1 sm:$0xff]  ;;  %v174_v37 = vld [vmem:[#allocation0 + $0x17] ss:$-1 sm:$0xff]  ;;  %s1132_s0 = inlined_call_operand.vmem [shape: f32[8,4,16,7], index: 0, kind: input, shape index: {}]   ;;  %s1133_s1 = inlined_call_operand.vmem [shape: f32[8,4,16,7], index: 1, kind: output, shape index: {}]  }
   0x1   :  { %v92_v0 = vld [vmem:[%s1132_s0] sm:$0xff]  ;;  %v94_v1 = vld [vmem:[%s1132_s0 + $0x8] sm:$0xff]  ;;  %v96_v2 = vld [vmem:[%s1132_s0 + $0x10] sm:$0xff]  ;;  %v161_v35 = vrot.slane %v160_v34, 1  ;;  %v175_v39 = vrot.slane %v174_v37, 1 }
   0x2   :  { %93 = vst [vmem:[#allocation0 + $0x8] sm:$0xff] %v92_v0  ;;  %95 = vst [vmem:[#allocation0 + $0x18] sm:$0xff] %v94_v1  ;;  %v98_v3 = vld [vmem:[%s1132_s0 + $0x18] sm:$0xff]  ;;  %v100_v4 = vld [vmem:[%s1132_s0 + $0x20] sm:$0xff]  ;;  %v945_v25 = vshrl.u32 %v167_v12, 7 }
   0x3   :  { %97 = vst [vmem:[#allocation0 + $0x28] sm:$0xff] %v96_v2  ;;  %v102_v5 = vld [vmem:[%s1132_s0 + $0x28] sm:$0xff]  ;;  %99 = vst [vmem:[#allocation0 + $0x38] sm:$0xff] %v98_v3  ;;  %v104_v6 = vld [vmem:[%s1132_s0 + $0x30] sm:$0xff] }
   0x4   :  { %101 = vst [vmem:[#allocation0 + $0x48] sm:$0xff] %v100_v4  ;;  %103 = vst [vmem:[#allocation0 + $0x58] sm:$0xff] %v102_v5  ;;  %v106_v7 = vld [vmem:[%s1132_s0 + $0x38] sm:$0xff]  ;;  %v108_v8 = vld [vmem:[%s1132_s0 + $0x40] sm:$0xff]  ;;  %vm169_vm0 = vcmp.lt.s32.totalorder %v945_v25, 7 }
   0x5   :  { %105 = vst [vmem:[#allocation0 + $0x68] sm:$0xff] %v104_v6  ;;  %107 = vst [vmem:[#allocation0 + $0x78] sm:$0xff] %v106_v7  ;;  %v110_v9 = vld [vmem:[%s1132_s0 + $0x48] sm:$0xff]  ;;  %v112_v10 = vld [vmem:[%s1132_s0 + $0x50] sm:$0xff] }
   0x6   :  { %109 = vst [vmem:[#allocation0 + $0x88] sm:$0xff] %v108_v8  ;;  %v114_v11 = vld [vmem:[%s1132_s0 + $0x58] sm:$0xff]  ;;  %111 = vst [vmem:[#allocation0 + $0x98] sm:$0xff] %v110_v9  ;;  %v116_v13 = vld [vmem:[%s1132_s0 + $0x60] sm:$0xff] }
   0x7   :  { %113 = vst [vmem:[#allocation0 + $0xa8] sm:$0xff] %v112_v10  ;;  %115 = vst [vmem:[#allocation0 + $0xb8] sm:$0xff] %v114_v11  ;;  %v118_v14 = vld [vmem:[%s1132_s0 + $0x68] sm:$0xff]  ;;  %v120_v15 = vld [vmem:[%s1132_s0 + $0x70] sm:$0xff] }
   0x8   :  { %117 = vst [vmem:[#allocation0 + $0xc8] sm:$0xff] %v116_v13  ;;  %119 = vst [vmem:[#allocation0 + $0xd8] sm:$0xff] %v118_v14  ;;  %v122_v16 = vld [vmem:[%s1132_s0 + $0x78] sm:$0xff]  ;;  %v124_v17 = vld [vmem:[%s1132_s0 + $0x80] sm:$0xff] }
   0x9   :  { %121 = vst [vmem:[#allocation0 + $0xe8] sm:$0xff] %v120_v15  ;;  %v126_v18 = vld [vmem:[%s1132_s0 + $0x88] sm:$0xff]  ;;  %123 = vst [vmem:[#allocation0 + $0xf8] sm:$0xff] %v122_v16  ;;  %v128_v19 = vld [vmem:[%s1132_s0 + $0x90] sm:$0xff] }
   0xa   :  { %125 = vst [vmem:[#allocation0 + $0x108] sm:$0xff] %v124_v17  ;;  %127 = vst [vmem:[#allocation0 + $0x118] sm:$0xff] %v126_v18  ;;  %v130_v20 = vld [vmem:[%s1132_s0 + $0x98] sm:$0xff]  ;;  %v132_v21 = vld [vmem:[%s1132_s0 + $0xa0] sm:$0xff] }
   0xb   :  { %129 = vst [vmem:[#allocation0 + $0x128] sm:$0xff] %v128_v19  ;;  %131 = vst [vmem:[#allocation0 + $0x138] sm:$0xff] %v130_v20  ;;  %v134_v22 = vld [vmem:[%s1132_s0 + $0xa8] sm:$0xff]  ;;  %v136_v23 = vld [vmem:[%s1132_s0 + $0xb0] sm:$0xff] }
   0xc   :  { %133 = vst [vmem:[#allocation0 + $0x148] sm:$0xff] %v132_v21  ;;  %v138_v24 = vld [vmem:[%s1132_s0 + $0xb8] sm:$0xff]  ;;  %135 = vst [vmem:[#allocation0 + $0x158] sm:$0xff] %v134_v22  ;;  %v140_v26 = vld [vmem:[%s1132_s0 + $0xc0] sm:$0xff] }
   0xd   :  { %137 = vst [vmem:[#allocation0 + $0x168] sm:$0xff] %v136_v23  ;;  %139 = vst [vmem:[#allocation0 + $0x178] sm:$0xff] %v138_v24  ;;  %v142_v27 = vld [vmem:[%s1132_s0 + $0xc8] sm:$0xff]  ;;  %v144_v28 = vld [vmem:[%s1132_s0 + $0xd0] sm:$0xff] }
   0xe   :  { %141 = vst [vmem:[#allocation0 + $0x188] sm:$0xff] %v140_v26  ;;  %143 = vst [vmem:[#allocation0 + $0x198] sm:$0xff] %v142_v27  ;;  %v146_v29 = vld [vmem:[%s1132_s0 + $0xd8] sm:$0xff]  ;;  %v148_v30 = vld [vmem:[%s1132_s0 + $0xe0] sm:$0xff] }
   0xf   :  { %145 = vst [vmem:[#allocation0 + $0x1a8] sm:$0xff] %v144_v28  ;;  %v150_v31 = vld [vmem:[%s1132_s0 + $0xe8] sm:$0xff]  ;;  %147 = vst [vmem:[#allocation0 + $0x1b8] sm:$0xff] %v146_v29  ;;  %v152_v32 = vld [vmem:[%s1132_s0 + $0xf0] sm:$0xff] }
  0x10   :  { %149 = vst [vmem:[#allocation0 + $0x1c8] sm:$0xff] %v148_v30  ;;  %151 = vst [vmem:[#allocation0 + $0x1d8] sm:$0xff] %v150_v31  ;;  %v154_v33 = vld [vmem:[%s1132_s0 + $0xf8] sm:$0xff]  ;;  %v165_v36 = vld [vmem:[#allocation0 + $0xf] ss:$-1 sm:$0xff] }
  0x11   :  { %153 = vst [vmem:[#allocation0 + $0x1e8] sm:$0xff] %v152_v32  ;;  %155 = vst [vmem:[#allocation0 + $0x1f8] sm:$0xff] %v154_v33  ;;  %v166_v38 = vrot.slane %v165_v36, 1  ;;  %v179_v40 = vld [vmem:[#allocation0 + $0x1f] ss:$-1 sm:$0xff] }
  0x12   :  { %v188_v41 = vld [vmem:[#allocation0 + $0x27] ss:$-1 sm:$0xff]  ;;  %162 = vst [vmem:[#allocation1] sm:$0xff] %v161_v35  ;;  %v180_v42 = vrot.slane %v179_v40, 1  ;;  %v193_v44 = vld [vmem:[#allocation0 + $0x2f] ss:$-1 sm:$0xff] }
  0x13   :  { %v189_v43 = vrot.slane %v188_v41, 1  ;;  %v202_v45 = vld [vmem:[#allocation0 + $0x37] ss:$-1 sm:$0xff]  ;;  %170 = vst.msk [vmem:[#allocation1] sm:$0xff] %vm169_vm0, %v166_v38  ;;  %176 = vst [vmem:[#allocation1 + $0x8] sm:$0xff] %v175_v39  ;;  %v194_v46 = vrot.slane %v193_v44, 1 }
  0x14   :  { %v203_v47 = vrot.slane %v202_v45, 1  ;;  %v207_v48 = vld [vmem:[#allocation0 + $0x3f] ss:$-1 sm:$0xff]  ;;  %v216_v49 = vld [vmem:[#allocation0 + $0x47] ss:$-1 sm:$0xff]  ;;  %184 = vst.msk [vmem:[#allocation1 + $0x8] sm:$0xff] %vm169_vm0, %v180_v42 }
  0x15   :  { %190 = vst [vmem:[#allocation1 + $0x10] sm:$0xff] %v189_v43  ;;  %v208_v50 = vrot.slane %v207_v48, 1  ;;  %v217_v51 = vrot.slane %v216_v49, 1  ;;  %v221_v52 = vld [vmem:[#allocation0 + $0x4f] ss:$-1 sm:$0xff] }
  0x16   :  { %v230_v53 = vld [vmem:[#allocation0 + $0x57] ss:$-1 sm:$0xff]  ;;  %198 = vst.msk [vmem:[#allocation1 + $0x10] sm:$0xff] %vm169_vm0, %v194_v46  ;;  %204 = vst [vmem:[#allocation1 + $0x18] sm:$0xff] %v203_v47  ;;  %v222_v54 = vrot.slane %v221_v52, 1 }
  0x17   :  { %v231_v55 = vrot.slane %v230_v53, 1  ;;  %v235_v56 = vld [vmem:[#allocation0 + $0x5f] ss:$-1 sm:$0xff]  ;;  %v244_v57 = vld [vmem:[#allocation0 + $0x67] ss:$-1 sm:$0xff]  ;;  %212 = vst.msk [vmem:[#allocation1 + $0x18] sm:$0xff] %vm169_vm0, %v208_v50 }
  0x18   :  { %218 = vst [vmem:[#allocation1 + $0x20] sm:$0xff] %v217_v51  ;;  %v236_v58 = vrot.slane %v235_v56, 1  ;;  %v245_v59 = vrot.slane %v244_v57, 1  ;;  %v249_v60 = vld [vmem:[#allocation0 + $0x6f] ss:$-1 sm:$0xff] }
  0x19   :  { %v258_v61 = vld [vmem:[#allocation0 + $0x77] ss:$-1 sm:$0xff]  ;;  %226 = vst.msk [vmem:[#allocation1 + $0x20] sm:$0xff] %vm169_vm0, %v222_v54  ;;  %232 = vst [vmem:[#allocation1 + $0x28] sm:$0xff] %v231_v55  ;;  %v250_v62 = vrot.slane %v249_v60, 1 }
  0x1a   :  { %v259_v63 = vrot.slane %v258_v61, 1  ;;  %v263_v0 = vld [vmem:[#allocation0 + $0x7f] ss:$-1 sm:$0xff]  ;;  %v272_v1 = vld [vmem:[#allocation0 + $0x87] ss:$-1 sm:$0xff]  ;;  %240 = vst.msk [vmem:[#allocation1 + $0x28] sm:$0xff] %vm169_vm0, %v236_v58 }
  0x1b   :  { %246 = vst [vmem:[#allocation1 + $0x30] sm:$0xff] %v245_v59  ;;  %v264_v2 = vrot.slane %v263_v0, 1  ;;  %v273_v3 = vrot.slane %v272_v1, 1  ;;  %v277_v4 = vld [vmem:[#allocation0 + $0x8f] ss:$-1 sm:$0xff] }
  0x1c   :  { %v286_v5 = vld [vmem:[#allocation0 + $0x97] ss:$-1 sm:$0xff]  ;;  %254 = vst.msk [vmem:[#allocation1 + $0x30] sm:$0xff] %vm169_vm0, %v250_v62  ;;  %260 = vst [vmem:[#allocation1 + $0x38] sm:$0xff] %v259_v63  ;;  %v278_v6 = vrot.slane %v277_v4, 1 }
  0x1d   :  { %v287_v7 = vrot.slane %v286_v5, 1  ;;  %v291_v8 = vld [vmem:[#allocation0 + $0x9f] ss:$-1 sm:$0xff]  ;;  %v300_v9 = vld [vmem:[#allocation0 + $0xa7] ss:$-1 sm:$0xff]  ;;  %268 = vst.msk [vmem:[#allocation1 + $0x38] sm:$0xff] %vm169_vm0, %v264_v2 }
  0x1e   :  { %274 = vst [vmem:[#allocation1 + $0x40] sm:$0xff] %v273_v3  ;;  %v292_v10 = vrot.slane %v291_v8, 1  ;;  %v301_v11 = vrot.slane %v300_v9, 1  ;;  %v305_v12 = vld [vmem:[#allocation0 + $0xaf] ss:$-1 sm:$0xff] }
  0x1f   :  { %v314_v13 = vld [vmem:[#allocation0 + $0xb7] ss:$-1 sm:$0xff]  ;;  %282 = vst.msk [vmem:[#allocation1 + $0x40] sm:$0xff] %vm169_vm0, %v278_v6  ;;  %288 = vst [vmem:[#allocation1 + $0x48] sm:$0xff] %v287_v7  ;;  %v306_v14 = vrot.slane %v305_v12, 1 }
  0x20   :  { %v315_v15 = vrot.slane %v314_v13, 1  ;;  %v319_v16 = vld [vmem:[#allocation0 + $0xbf] ss:$-1 sm:$0xff]  ;;  %v328_v17 = vld [vmem:[#allocation0 + $0xc7] ss:$-1 sm:$0xff]  ;;  %296 = vst.msk [vmem:[#allocation1 + $0x48] sm:$0xff] %vm169_vm0, %v292_v10 }
  0x21   :  { %302 = vst [vmem:[#allocation1 + $0x50] sm:$0xff] %v301_v11  ;;  %v320_v18 = vrot.slane %v319_v16, 1  ;;  %v329_v19 = vrot.slane %v328_v17, 1  ;;  %v333_v20 = vld [vmem:[#allocation0 + $0xcf] ss:$-1 sm:$0xff] }
  0x22   :  { %v342_v21 = vld [vmem:[#allocation0 + $0xd7] ss:$-1 sm:$0xff]  ;;  %310 = vst.msk [vmem:[#allocation1 + $0x50] sm:$0xff] %vm169_vm0, %v306_v14  ;;  %316 = vst [vmem:[#allocation1 + $0x58] sm:$0xff] %v315_v15  ;;  %v334_v22 = vrot.slane %v333_v20, 1 }
  0x23   :  { %v343_v23 = vrot.slane %v342_v21, 1  ;;  %v347_v24 = vld [vmem:[#allocation0 + $0xdf] ss:$-1 sm:$0xff]  ;;  %v356_v26 = vld [vmem:[#allocation0 + $0xe7] ss:$-1 sm:$0xff]  ;;  %324 = vst.msk [vmem:[#allocation1 + $0x58] sm:$0xff] %vm169_vm0, %v320_v18 }
  0x24   :  { %330 = vst [vmem:[#allocation1 + $0x60] sm:$0xff] %v329_v19  ;;  %v348_v27 = vrot.slane %v347_v24, 1  ;;  %v357_v28 = vrot.slane %v356_v26, 1  ;;  %v361_v29 = vld [vmem:[#allocation0 + $0xef] ss:$-1 sm:$0xff] }
  0x25   :  { %v370_v30 = vld [vmem:[#allocation0 + $0xf7] ss:$-1 sm:$0xff]  ;;  %338 = vst.msk [vmem:[#allocation1 + $0x60] sm:$0xff] %vm169_vm0, %v334_v22  ;;  %344 = vst [vmem:[#allocation1 + $0x68] sm:$0xff] %v343_v23  ;;  %v362_v31 = vrot.slane %v361_v29, 1 }
  0x26   :  { %v371_v32 = vrot.slane %v370_v30, 1  ;;  %v375_v33 = vld [vmem:[#allocation0 + $0xff] ss:$-1 sm:$0xff]  ;;  %v384_v34 = vld [vmem:[#allocation0 + $0x107] ss:$-1 sm:$0xff]  ;;  %352 = vst.msk [vmem:[#allocation1 + $0x68] sm:$0xff] %vm169_vm0, %v348_v27 }
  0x27   :  { %358 = vst [vmem:[#allocation1 + $0x70] sm:$0xff] %v357_v28  ;;  %v376_v35 = vrot.slane %v375_v33, 1  ;;  %v385_v36 = vrot.slane %v384_v34, 1  ;;  %v389_v37 = vld [vmem:[#allocation0 + $0x10f] ss:$-1 sm:$0xff]  ;;  %v710_v25 = vld [vmem:[#allocation1 + $0x40] sm:$0xff] }
  0x28   :  { %v398_v38 = vld [vmem:[#allocation0 + $0x117] ss:$-1 sm:$0xff]  ;;  %366 = vst.msk [vmem:[#allocation1 + $0x70] sm:$0xff] %vm169_vm0, %v362_v31  ;;  %372 = vst [vmem:[#allocation1 + $0x78] sm:$0xff] %v371_v32  ;;  %v390_v39 = vrot.slane %v389_v37, 1 }
  0x29   :  { %v399_v40 = vrot.slane %v398_v38, 1  ;;  %v403_v41 = vld [vmem:[#allocation0 + $0x11f] ss:$-1 sm:$0xff]  ;;  %v412_v42 = vld [vmem:[#allocation0 + $0x127] ss:$-1 sm:$0xff]  ;;  %380 = vst.msk [vmem:[#allocation1 + $0x78] sm:$0xff] %vm169_vm0, %v376_v35 }
  0x2a   :  { %386 = vst [vmem:[#allocation1 + $0x80] sm:$0xff] %v385_v36  ;;  %v404_v43 = vrot.slane %v403_v41, 1  ;;  %v413_v44 = vrot.slane %v412_v42, 1  ;;  %v417_v45 = vld [vmem:[#allocation0 + $0x12f] ss:$-1 sm:$0xff]  ;;  %v694_v35 = vld [vmem:[#allocation1] sm:$0xff] }
  0x2b   :  { %v426_v46 = vld [vmem:[#allocation0 + $0x137] ss:$-1 sm:$0xff]  ;;  %394 = vst.msk [vmem:[#allocation1 + $0x80] sm:$0xff] %vm169_vm0, %v390_v39  ;;  %400 = vst [vmem:[#allocation1 + $0x88] sm:$0xff] %v399_v40  ;;  %v418_v47 = vrot.slane %v417_v45, 1  ;;  %v696_v36 = vld [vmem:[#allocation1 + $0x8] sm:$0xff] }
  0x2c   :  { %v427_v48 = vrot.slane %v426_v46, 1  ;;  %v431_v49 = vld [vmem:[#allocation0 + $0x13f] ss:$-1 sm:$0xff]  ;;  %v440_v50 = vld [vmem:[#allocation0 + $0x147] ss:$-1 sm:$0xff]  ;;  %408 = vst.msk [vmem:[#allocation1 + $0x88] sm:$0xff] %vm169_vm0, %v404_v43  ;;  %695 = vst [vmem:[%s1133_s1] sm:$0xff] %v694_v35 }
  0x2d   :  { %414 = vst [vmem:[#allocation1 + $0x90] sm:$0xff] %v413_v44  ;;  %v432_v51 = vrot.slane %v431_v49, 1  ;;  %v441_v52 = vrot.slane %v440_v50, 1  ;;  %v445_v53 = vld [vmem:[#allocation0 + $0x14f] ss:$-1 sm:$0xff]  ;;  %697 = vst [vmem:[%s1133_s1 + $0x8] sm:$0xff] %v696_v36 }
  0x2e   :  { %v454_v54 = vld [vmem:[#allocation0 + $0x157] ss:$-1 sm:$0xff]  ;;  %422 = vst.msk [vmem:[#allocation1 + $0x90] sm:$0xff] %vm169_vm0, %v418_v47  ;;  %428 = vst [vmem:[#allocation1 + $0x98] sm:$0xff] %v427_v48  ;;  %v446_v55 = vrot.slane %v445_v53, 1  ;;  %v700_v39 = vld [vmem:[#allocation1 + $0x18] sm:$0xff] }
  0x2f   :  { %v455_v56 = vrot.slane %v454_v54, 1  ;;  %v459_v57 = vld [vmem:[#allocation0 + $0x15f] ss:$-1 sm:$0xff]  ;;  %v468_v58 = vld [vmem:[#allocation0 + $0x167] ss:$-1 sm:$0xff]  ;;  %436 = vst.msk [vmem:[#allocation1 + $0x98] sm:$0xff] %vm169_vm0, %v432_v51 }
  0x30   :  { %442 = vst [vmem:[#allocation1 + $0xa0] sm:$0xff] %v441_v52  ;;  %v460_v59 = vrot.slane %v459_v57, 1  ;;  %v469_v60 = vrot.slane %v468_v58, 1  ;;  %v473_v61 = vld [vmem:[#allocation0 + $0x16f] ss:$-1 sm:$0xff]  ;;  %v698_v38 = vld [vmem:[#allocation1 + $0x10] sm:$0xff] }
  0x31   :  { %v482_v62 = vld [vmem:[#allocation0 + $0x177] ss:$-1 sm:$0xff]  ;;  %450 = vst.msk [vmem:[#allocation1 + $0xa0] sm:$0xff] %vm169_vm0, %v446_v55  ;;  %456 = vst [vmem:[#allocation1 + $0xa8] sm:$0xff] %v455_v56  ;;  %v474_v63 = vrot.slane %v473_v61, 1  ;;  %v702_v40 = vld [vmem:[#allocation1 + $0x20] sm:$0xff] }
  0x32   :  { %v483_v0 = vrot.slane %v482_v62, 1  ;;  %v487_v1 = vld [vmem:[#allocation0 + $0x17f] ss:$-1 sm:$0xff]  ;;  %v496_v2 = vld [vmem:[#allocation0 + $0x187] ss:$-1 sm:$0xff]  ;;  %464 = vst.msk [vmem:[#allocation1 + $0xa8] sm:$0xff] %vm169_vm0, %v460_v59 }
  0x33   :  { %470 = vst [vmem:[#allocation1 + $0xb0] sm:$0xff] %v469_v60  ;;  %v488_v3 = vrot.slane %v487_v1, 1  ;;  %v497_v4 = vrot.slane %v496_v2, 1  ;;  %v501_v5 = vld [vmem:[#allocation0 + $0x18f] ss:$-1 sm:$0xff]  ;;  %699 = vst [vmem:[%s1133_s1 + $0x10] sm:$0xff] %v698_v38 }
  0x34   :  { %v510_v6 = vld [vmem:[#allocation0 + $0x197] ss:$-1 sm:$0xff]  ;;  %478 = vst.msk [vmem:[#allocation1 + $0xb0] sm:$0xff] %vm169_vm0, %v474_v63  ;;  %484 = vst [vmem:[#allocation1 + $0xb8] sm:$0xff] %v483_v0  ;;  %v502_v7 = vrot.slane %v501_v5, 1  ;;  %v704_v41 = vld [vmem:[#allocation1 + $0x28] sm:$0xff] }
  0x35   :  { %v511_v8 = vrot.slane %v510_v6, 1  ;;  %v515_v9 = vld [vmem:[#allocation0 + $0x19f] ss:$-1 sm:$0xff]  ;;  %v524_v10 = vld [vmem:[#allocation0 + $0x1a7] ss:$-1 sm:$0xff]  ;;  %492 = vst.msk [vmem:[#allocation1 + $0xb8] sm:$0xff] %vm169_vm0, %v488_v3 }
  0x36   :  { %498 = vst [vmem:[#allocation1 + $0xc0] sm:$0xff] %v497_v4  ;;  %v516_v11 = vrot.slane %v515_v9, 1  ;;  %v525_v12 = vrot.slane %v524_v10, 1  ;;  %v529_v13 = vld [vmem:[#allocation0 + $0x1af] ss:$-1 sm:$0xff]  ;;  %701 = vst [vmem:[%s1133_s1 + $0x18] sm:$0xff] %v700_v39 }
  0x37   :  { %v538_v14 = vld [vmem:[#allocation0 + $0x1b7] ss:$-1 sm:$0xff]  ;;  %506 = vst.msk [vmem:[#allocation1 + $0xc0] sm:$0xff] %vm169_vm0, %v502_v7  ;;  %512 = vst [vmem:[#allocation1 + $0xc8] sm:$0xff] %v511_v8  ;;  %v530_v15 = vrot.slane %v529_v13, 1  ;;  %v708_v43 = vld [vmem:[#allocation1 + $0x38] sm:$0xff] }
  0x38   :  { %v539_v16 = vrot.slane %v538_v14, 1  ;;  %v543_v17 = vld [vmem:[#allocation0 + $0x1bf] ss:$-1 sm:$0xff]  ;;  %v552_v18 = vld [vmem:[#allocation0 + $0x1c7] ss:$-1 sm:$0xff]  ;;  %520 = vst.msk [vmem:[#allocation1 + $0xc8] sm:$0xff] %vm169_vm0, %v516_v11 }
  0x39   :  { %526 = vst [vmem:[#allocation1 + $0xd0] sm:$0xff] %v525_v12  ;;  %v544_v19 = vrot.slane %v543_v17, 1  ;;  %v553_v20 = vrot.slane %v552_v18, 1  ;;  %v557_v21 = vld [vmem:[#allocation0 + $0x1cf] ss:$-1 sm:$0xff]  ;;  %703 = vst [vmem:[%s1133_s1 + $0x20] sm:$0xff] %v702_v40 }
  0x3a   :  { %v566_v22 = vld [vmem:[#allocation0 + $0x1d7] ss:$-1 sm:$0xff]  ;;  %534 = vst.msk [vmem:[#allocation1 + $0xd0] sm:$0xff] %vm169_vm0, %v530_v15  ;;  %540 = vst [vmem:[#allocation1 + $0xd8] sm:$0xff] %v539_v16  ;;  %v558_v23 = vrot.slane %v557_v21, 1  ;;  %v712_v44 = vld [vmem:[#allocation1 + $0x48] sm:$0xff] }
  0x3b   :  { %v567_v24 = vrot.slane %v566_v22, 1  ;;  %v571_v26 = vld [vmem:[#allocation0 + $0x1df] ss:$-1 sm:$0xff]  ;;  %v580_v27 = vld [vmem:[#allocation0 + $0x1e7] ss:$-1 sm:$0xff]  ;;  %548 = vst.msk [vmem:[#allocation1 + $0xd8] sm:$0xff] %vm169_vm0, %v544_v19 }
  0x3c   :  { %554 = vst [vmem:[#allocation1 + $0xe0] sm:$0xff] %v553_v20  ;;  %v572_v28 = vrot.slane %v571_v26, 1  ;;  %v581_v29 = vrot.slane %v580_v27, 1  ;;  %v585_v30 = vld [vmem:[#allocation0 + $0x1ef] ss:$-1 sm:$0xff]  ;;  %v706_v42 = vld [vmem:[#allocation1 + $0x30] sm:$0xff] }
  0x3d   :  { %v594_v31 = vld [vmem:[#allocation0 + $0x1f7] ss:$-1 sm:$0xff]  ;;  %562 = vst.msk [vmem:[#allocation1 + $0xe0] sm:$0xff] %vm169_vm0, %v558_v23  ;;  %568 = vst [vmem:[#allocation1 + $0xe8] sm:$0xff] %v567_v24  ;;  %v586_v32 = vrot.slane %v585_v30, 1  ;;  %v716_v46 = vld [vmem:[#allocation1 + $0x58] sm:$0xff] }
  0x3e   :  { %v595_v33 = vrot.slane %v594_v31, 1  ;;  %v599_v34 = vld [vmem:[#allocation0 + $0x1ff] ss:$-1 sm:$0xff]  ;;  %576 = vst.msk [vmem:[#allocation1 + $0xe8] sm:$0xff] %vm169_vm0, %v572_v28  ;;  %582 = vst [vmem:[#allocation1 + $0xf0] sm:$0xff] %v581_v29  ;;  %v714_v45 = vld [vmem:[#allocation1 + $0x50] sm:$0xff] }
  0x3f   :  { %v600_v37 = vrot.slane %v599_v34, 1  ;;  %590 = vst.msk [vmem:[#allocation1 + $0xf0] sm:$0xff] %vm169_vm0, %v586_v32  ;;  %705 = vst [vmem:[%s1133_s1 + $0x28] sm:$0xff] %v704_v41  ;;  %v718_v47 = vld [vmem:[#allocation1 + $0x60] sm:$0xff]  ;;  %v720_v48 = vld [vmem:[#allocation1 + $0x68] sm:$0xff] }
  0x40   :  { %596 = vst [vmem:[#allocation1 + $0xf8] sm:$0xff] %v595_v33  ;;  %707 = vst [vmem:[%s1133_s1 + $0x30] sm:$0xff] %v706_v42  ;;  %v722_v49 = vld [vmem:[#allocation1 + $0x70] sm:$0xff]  ;;  %v724_v50 = vld [vmem:[#allocation1 + $0x78] sm:$0xff] }
  0x41   :  { %604 = vst.msk [vmem:[#allocation1 + $0xf8] sm:$0xff] %vm169_vm0, %v600_v37  ;;  %709 = vst [vmem:[%s1133_s1 + $0x38] sm:$0xff] %v708_v43  ;;  %v726_v51 = vld [vmem:[#allocation1 + $0x80] sm:$0xff]  ;;  %v728_v52 = vld [vmem:[#allocation1 + $0x88] sm:$0xff] }
  0x42   :  { %711 = vst [vmem:[%s1133_s1 + $0x40] sm:$0xff] %v710_v25  ;;  %713 = vst [vmem:[%s1133_s1 + $0x48] sm:$0xff] %v712_v44  ;;  %v730_v53 = vld [vmem:[#allocation1 + $0x90] sm:$0xff]  ;;  %v732_v54 = vld [vmem:[#allocation1 + $0x98] sm:$0xff] }
  0x43   :  { %715 = vst [vmem:[%s1133_s1 + $0x50] sm:$0xff] %v714_v45  ;;  %717 = vst [vmem:[%s1133_s1 + $0x58] sm:$0xff] %v716_v46  ;;  %v734_v55 = vld [vmem:[#allocation1 + $0xa0] sm:$0xff]  ;;  %v736_v56 = vld [vmem:[#allocation1 + $0xa8] sm:$0xff] }
  0x44   :  { %719 = vst [vmem:[%s1133_s1 + $0x60] sm:$0xff] %v718_v47  ;;  %721 = vst [vmem:[%s1133_s1 + $0x68] sm:$0xff] %v720_v48  ;;  %v738_v57 = vld [vmem:[#allocation1 + $0xb0] sm:$0xff]  ;;  %v740_v58 = vld [vmem:[#allocation1 + $0xb8] sm:$0xff] }
  0x45   :  { %723 = vst [vmem:[%s1133_s1 + $0x70] sm:$0xff] %v722_v49  ;;  %725 = vst [vmem:[%s1133_s1 + $0x78] sm:$0xff] %v724_v50  ;;  %v742_v59 = vld [vmem:[#allocation1 + $0xc0] sm:$0xff]  ;;  %v744_v60 = vld [vmem:[#allocation1 + $0xc8] sm:$0xff] }
  0x46   :  { %727 = vst [vmem:[%s1133_s1 + $0x80] sm:$0xff] %v726_v51  ;;  %729 = vst [vmem:[%s1133_s1 + $0x88] sm:$0xff] %v728_v52  ;;  %v746_v61 = vld [vmem:[#allocation1 + $0xd0] sm:$0xff]  ;;  %v748_v62 = vld [vmem:[#allocation1 + $0xd8] sm:$0xff] }
  0x47   :  { %731 = vst [vmem:[%s1133_s1 + $0x90] sm:$0xff] %v730_v53  ;;  %733 = vst [vmem:[%s1133_s1 + $0x98] sm:$0xff] %v732_v54  ;;  %v750_v63 = vld [vmem:[#allocation1 + $0xe0] sm:$0xff]  ;;  %v752_v0 = vld [vmem:[#allocation1 + $0xe8] sm:$0xff] }
  0x48   :  { %735 = vst [vmem:[%s1133_s1 + $0xa0] sm:$0xff] %v734_v55  ;;  %737 = vst [vmem:[%s1133_s1 + $0xa8] sm:$0xff] %v736_v56  ;;  %v754_v1 = vld [vmem:[#allocation1 + $0xf0] sm:$0xff]  ;;  %v756_v2 = vld [vmem:[#allocation1 + $0xf8] sm:$0xff] }
  0x49   :  { %739 = vst [vmem:[%s1133_s1 + $0xb0] sm:$0xff] %v738_v57  ;;  %741 = vst [vmem:[%s1133_s1 + $0xb8] sm:$0xff] %v740_v58 }
  0x4a   :  { %743 = vst [vmem:[%s1133_s1 + $0xc0] sm:$0xff] %v742_v59  ;;  %745 = vst [vmem:[%s1133_s1 + $0xc8] sm:$0xff] %v744_v60 }
  0x4b   :  { %747 = vst [vmem:[%s1133_s1 + $0xd0] sm:$0xff] %v746_v61  ;;  %749 = vst [vmem:[%s1133_s1 + $0xd8] sm:$0xff] %v748_v62 }
  0x4c   :  { %751 = vst [vmem:[%s1133_s1 + $0xe0] sm:$0xff] %v750_v63  ;;  %753 = vst [vmem:[%s1133_s1 + $0xe8] sm:$0xff] %v752_v0 }
  0x4d   :  { %755 = vst [vmem:[%s1133_s1 + $0xf0] sm:$0xff] %v754_v1  ;;  %757 = vst [vmem:[%s1133_s1 + $0xf8] sm:$0xff] %v756_v2 }

// kernel: earthfarseer_forward.42
= control target key start
LH: loop header
LB: loop body
LE: loop exit
PB: predicated region body
PF: predicated region fallthrough
CT: control target
= control target key end

     0   :  { %s236_s1 = inlined_call_operand.vmem [shape: f32[32,256], index: 1, kind: input, shape index: {}]   ;;  %s237_s0 = inlined_call_operand.vmem [shape: f32[32,256], index: 0, kind: input, shape index: {}]   ;;  %s238_s2 = inlined_call_operand.vmem [shape: f32[32,256], index: 2, kind: output, shape index: {}]  }
   0x1   :  { %v11_v0 = vld [vmem:[%s236_s1] sm:$0xff]  ;;  %v12_v1 = vld [vmem:[%s236_s1 + $0x8] sm:$0xff]  ;;  %v13_v4 = vld [vmem:[%s236_s1 + $0x10] sm:$0xff] }
   0x2   :  { %v27_v2 = vmul.f32 0.044715, %v11_v0  ;;  %v28_v3 = vmul.f32 0.044715, %v12_v1  ;;  %v29_v7 = vmul.f32 0.044715, %v13_v4 }
   0x3   :  { %v14_v8 = vld [vmem:[%s236_s1 + $0x18] sm:$0xff]  ;;  %v15_v9 = vld [vmem:[%s236_s1 + $0x20] sm:$0xff]  ;;  %v16_v15 = vld [vmem:[%s236_s1 + $0x28] sm:$0xff]  ;;  %v19_v48 = vmul.f32 0.5, %v11_v0  ;;  %v20_v50 = vmul.f32 0.5, %v12_v1  ;;  %v21_v53 = vmul.f32 0.5, %v13_v4 }
   0x4   :  { %v35_v5 = vmul.f32 %v27_v2, %v11_v0  ;;  %v36_v6 = vmul.f32 %v28_v3, %v12_v1  ;;  %v30_v10 = vmul.f32 0.044715, %v14_v8  ;;  %v31_v11 = vmul.f32 0.044715, %v15_v9  ;;  %v171_v19 = vld [vmem:[%s236_s1 + $0x30] sm:$0xff]  ;;  %v177_v27 = vld [vmem:[%s236_s1 + $0x38] sm:$0xff] }
   0x5   :  { %v37_v14 = vmul.f32 %v29_v7, %v13_v4  ;;  %v32_v18 = vmul.f32 0.044715, %v16_v15  ;;  %v33_v26 = vmul.f32 0.044715, %v171_v19  ;;  %v34_v36 = vmul.f32 0.044715, %v177_v27 }
   0x6   :  { %v43_v12 = vmul.f32 %v35_v5, %v11_v0  ;;  %v44_v13 = vmul.f32 %v36_v6, %v12_v1  ;;  %v38_v16 = vmul.f32 %v30_v10, %v14_v8  ;;  %v39_v17 = vmul.f32 %v31_v11, %v15_v9  ;;  %v91_v55 = vld [vmem:[%s237_s0] sm:$0xff]  ;;  %v92_v60 = vld [vmem:[%s237_s0 + $0x8] sm:$0xff]  ;;  %v94_v7 = vld [vmem:[%s237_s0 + $0x18] sm:$0xff] }
   0x7   :  { %v45_v22 = vmul.f32 %v37_v14, %v13_v4  ;;  %v40_v25 = vmul.f32 %v32_v18, %v16_v15  ;;  %v41_v34 = vmul.f32 %v33_v26, %v171_v19  ;;  %v42_v41 = vmul.f32 %v34_v36, %v177_v27 }
   0x8   :  { %v51_v20 = vadd.f32 %v43_v12, %v11_v0  ;;  %v52_v21 = vadd.f32 %v44_v13, %v12_v1  ;;  %v46_v23 = vmul.f32 %v38_v16, %v14_v8  ;;  %v47_v24 = vmul.f32 %v39_v17, %v15_v9  ;;  %v93_v1 = vld [vmem:[%s237_s0 + $0x10] sm:$0xff] }
   0x9   :  { %v53_v30 = vadd.f32 %v45_v22, %v13_v4  ;;  %v48_v33 = vmul.f32 %v40_v25, %v16_v15  ;;  %v49_v40 = vmul.f32 %v41_v34, %v171_v19  ;;  %v50_v44 = vmul.f32 %v42_v41, %v177_v27  ;;  %v97_v25 = vld [vmem:[%s237_s0 + $0x30] sm:$0xff] }
   0xa   :  { %v59_v28 = vmul.f32 0.7978846, %v51_v20  ;;  %v60_v29 = vmul.f32 0.7978846, %v52_v21  ;;  %v54_v31 = vadd.f32 %v46_v23, %v14_v8  ;;  %v55_v32 = vadd.f32 %v47_v24, %v15_v9 }
   0xb   :  { %v61_v35 = vmul.f32 0.7978846, %v53_v30  ;;  %v56_v39 = vadd.f32 %v48_v33, %v16_v15  ;;  %v57_v43 = vadd.f32 %v49_v40, %v171_v19  ;;  %v58_v46 = vadd.f32 %v50_v44, %v177_v27 }
   0xc   :  { %119 = vtanh.f32 %v59_v28  ;;  %v62_v37 = vmul.f32 0.7978846, %v54_v31  ;;  %v63_v38 = vmul.f32 0.7978846, %v55_v32  ;;  %v22_v57 = vmul.f32 0.5, %v14_v8 }
   0xd   :  { %121 = vtanh.f32 %v60_v29  ;;  %v64_v42 = vmul.f32 0.7978846, %v56_v39  ;;  %v65_v45 = vmul.f32 0.7978846, %v57_v43  ;;  %v66_v47 = vmul.f32 0.7978846, %v58_v46 }
   0xe   :  { %123 = vtanh.f32 %v61_v35  ;;  %v23_v62 = vmul.f32 0.5, %v15_v9  ;;  %v24_v3 = vmul.f32 0.5, %v16_v15  ;;  %v95_v9 = vld [vmem:[%s237_s0 + $0x20] sm:$0xff]  ;;  %v96_v15 = vld [vmem:[%s237_s0 + $0x28] sm:$0xff]  ;;  %v25_v16 = vmul.f32 0.5, %v171_v19 }
   0xf   :  { %125 = vtanh.f32 %v62_v37  ;;  %v26_v23 = vmul.f32 0.5, %v177_v27  ;;  %v98_v27 = vld [vmem:[%s237_s0 + $0x38] sm:$0xff] }
  0x10   :  { %127 = vtanh.f32 %v63_v38 }
  0x11   :  { %129 = vtanh.f32 %v64_v42 }
  0x12   :  { %131 = vtanh.f32 %v65_v45 }
  0x13   :  { %133 = vtanh.f32 %v66_v47 }
  0x16   :  { %v120_v49 = vpop.eup %119 }
  0x17   :  { %v122_v51 = vpop.eup %121  ;;  %v75_v52 = vadd.f32 1.0, %v120_v49 }
  0x18   :  { %v124_v54 = vpop.eup %123  ;;  %v76_v56 = vadd.f32 1.0, %v122_v51 }
  0x19   :  { %v126_v58 = vpop.eup %125  ;;  %v83_v59 = vmul.f32 %v75_v52, %v19_v48  ;;  %v77_v61 = vadd.f32 1.0, %v124_v54 }
  0x1a   :  { %v128_v63 = vpop.eup %127  ;;  %v84_v0 = vmul.f32 %v76_v56, %v20_v50  ;;  %v78_v2 = vadd.f32 1.0, %v126_v58 }
  0x1b   :  { %v130_v4 = vpop.eup %129  ;;  %v99_v5 = vadd.f32 %v91_v55, %v83_v59  ;;  %v85_v6 = vmul.f32 %v77_v61, %v21_v53  ;;  %v79_v8 = vadd.f32 1.0, %v128_v63 }
  0x1c   :  { %v100_v10 = vadd.f32 %v92_v60, %v84_v0  ;;  %v86_v11 = vmul.f32 %v78_v2, %v22_v57  ;;  %v80_v12 = vadd.f32 1.0, %v130_v4  ;;  %v132_v17 = vpop.eup %131 }
  0x1d   :  { %107 = vst [vmem:[%s238_s2] sm:$0xff] %v99_v5  ;;  %v101_v13 = vadd.f32 %v93_v1, %v85_v6  ;;  %v87_v14 = vmul.f32 %v79_v8, %v23_v62  ;;  %v81_v22 = vadd.f32 1.0, %v132_v17  ;;  %v134_v24 = vpop.eup %133 }
  0x1e   :  { %108 = vst [vmem:[%s238_s2 + $0x8] sm:$0xff] %v100_v10  ;;  %v102_v18 = vadd.f32 %v94_v7, %v86_v11  ;;  %v88_v20 = vmul.f32 %v80_v12, %v24_v3  ;;  %v82_v28 = vadd.f32 1.0, %v134_v24 }
  0x1f   :  { %109 = vst [vmem:[%s238_s2 + $0x10] sm:$0xff] %v101_v13  ;;  %v103_v21 = vadd.f32 %v95_v9, %v87_v14  ;;  %v89_v26 = vmul.f32 %v81_v22, %v25_v16 }
  0x20   :  { %110 = vst [vmem:[%s238_s2 + $0x18] sm:$0xff] %v102_v18  ;;  %v104_v19 = vadd.f32 %v96_v15, %v88_v20  ;;  %v90_v30 = vmul.f32 %v82_v28, %v26_v23 }
  0x21   :  { %111 = vst [vmem:[%s238_s2 + $0x20] sm:$0xff] %v103_v21  ;;  %v105_v29 = vadd.f32 %v97_v25, %v89_v26 }
  0x22   :  { %112 = vst [vmem:[%s238_s2 + $0x28] sm:$0xff] %v104_v19  ;;  %v106_v31 = vadd.f32 %v98_v27, %v90_v30 }
  0x23   :  { %113 = vst [vmem:[%s238_s2 + $0x30] sm:$0xff] %v105_v29 }
  0x24   :  { %114 = vst [vmem:[%s238_s2 + $0x38] sm:$0xff] %v106_v31 }

// kernel: earthfarseer_forward.43
= control target key start
LH: loop header
LB: loop body
LE: loop exit
PB: predicated region body
PF: predicated region fallthrough
CT: control target
= control target key end

     0   :  { %v936_v3 = vmov 0   ;;  %vm300_vm0 = vcmask 1041408   ;;  %vm293_vm1 = vcmask 293888   ;;  %s1429_s1 = inlined_call_operand.vmem [shape: bf16[1,36,2048], index: 1, kind: input, shape index: {}]   ;;  %s1430_s0 = inlined_call_operand.vmem [shape: bf16[1,32,36], index: 0, kind: input, shape index: {}]   ;;  %s1431_s2 = inlined_call_operand.vmem [shape: f32[1,32,1], index: 2, kind: input, shape index: {}]   ;;  %s1432_s3 = inlined_call_operand.vmem [shape: f32[1,32,2048], index: 3, kind: output, shape index: {}]  }
   0x1   :  { %v19_v0 = vld [vmem:[%s1429_s1] sm:$0xff]  ;;  %v20_v2 = vld [vmem:[%s1429_s1 + $0x8] sm:$0xff]  ;;  %381 = vmatprep.mubr.bf16.mxu0 %v936_v3  ;;  %434 = vmatprep.mubr.bf16.mxu1 %v936_v3  ;;  %v21_v23 = vld [vmem:[%s1429_s1 + $0x10] sm:$0xff] }
   0x2   :  { %v27_v1 = vld [vmem:[%s1429_s1 + $0x40] sm:$0xff]  ;;  %v28_v5 = vld [vmem:[%s1429_s1 + $0x48] sm:$0xff]  ;;  %916 = vset.pattern.permute.xlu0 %v936_v3  ;;  %917 = vset.pattern.permute.xlu1 %v936_v3  ;;  %v29_v24 = vld [vmem:[%s1429_s1 + $0x50] sm:$0xff] }
   0x3   :  { %v844_v4 = vcombine.high %v19_v0, %v27_v1  ;;  %v843_v6 = vcombine.low %v19_v0, %v27_v1  ;;  %v35_v7 = vld [vmem:[%s1429_s1 + $0x80] sm:$0xff]  ;;  %v846_v9 = vcombine.high %v20_v2, %v28_v5  ;;  %v845_v10 = vcombine.low %v20_v2, %v28_v5  ;;  %v36_v12 = vld [vmem:[%s1429_s1 + $0x88] sm:$0xff]  ;;  %v22_v25 = vld [vmem:[%s1429_s1 + $0x18] sm:$0xff] }
   0x4   :  { %v43_v8 = vld [vmem:[%s1429_s1 + $0xc0] sm:$0xff]  ;;  %v44_v13 = vld [vmem:[%s1429_s1 + $0xc8] sm:$0xff]  ;;  %v30_v26 = vld [vmem:[%s1429_s1 + $0x58] sm:$0xff]  ;;  %v848_v28 = vcombine.high %v21_v23, %v29_v24  ;;  %v847_v36 = vcombine.low %v21_v23, %v29_v24 }
   0x5   :  { %v860_v11 = vcombine.high %v35_v7, %v43_v8  ;;  %v51_v14 = vld [vmem:[%s1429_s1 + $0x100] sm:$0x33]  ;;  %349 = vmatprep.subr.bf16.mxu0 %v844_v4  ;;  %v862_v15 = vcombine.high %v36_v12, %v44_v13  ;;  %v52_v16 = vld [vmem:[%s1429_s1 + $0x108] sm:$0x33]  ;;  %402 = vmatprep.subr.bf16.mxu1 %v846_v9  ;;  %v859_v17 = vcombine.low %v35_v7, %v43_v8  ;;  %v37_v31 = vld [vmem:[%s1429_s1 + $0x90] sm:$0xff] }
   0x6   :  { %350 = vmatpush1.bf16.msra.mxu0 %v843_v6  ;;  %403 = vmatpush1.bf16.msra.mxu1 %v845_v10  ;;  %v861_v18 = vcombine.low %v36_v12, %v44_v13  ;;  %v876_v19 = vcombine.high %v51_v14, %v51_v14  ;;  %v875_v20 = vcombine.low %v51_v14, %v51_v14  ;;  %v45_v32 = vld [vmem:[%s1429_s1 + $0xd0] sm:$0xff]  ;;  %v1016_v33 = vld [vmem:[%s1430_s0] sm:$0xff]   ;;  %v38_v34 = vld [vmem:[%s1429_s1 + $0x98] sm:$0xff] }
   0x7   :  { %351 = vmatprep.subr.bf16.mxu0 %v860_v11  ;;  %404 = vmatprep.subr.bf16.mxu1 %v862_v15  ;;  %v878_v21 = vcombine.high %v52_v16, %v52_v16  ;;  %v877_v22 = vcombine.low %v52_v16, %v52_v16  ;;  %v850_v30 = vcombine.high %v22_v25, %v30_v26  ;;  %v46_v35 = vld [vmem:[%s1429_s1 + $0xd8] sm:$0xff]  ;;  %v53_v40 = vld [vmem:[%s1429_s1 + $0x110] sm:$0x33]  ;;  %v59_v43 = vld [vmem:[%s1431_s2] sm:$0xff] }
   0x8   :  { %v302_v27 = vsel %vm300_vm0, %v875_v20, 0  ;;  %v849_v37 = vcombine.low %v22_v25, %v30_v26  ;;  %v864_v38 = vcombine.high %v37_v31, %v45_v32  ;;  %v866_v39 = vcombine.high %v38_v34, %v46_v35  ;;  %v54_v41 = vld [vmem:[%s1429_s1 + $0x118] sm:$0x33]  ;;  %v61_v47 = vld [vmem:[%s1431_s2 + $0x10] sm:$0xff]  ;;  %v1045_v50 = vld [vmem:[%s1430_s0 + $0x8] sm:$0xff]   ;;  %65 = vperm.xlu0 %916, %v59_v43  }
   0x9   :  { %v308_v29 = vsel %vm300_vm0, %v877_v22, 0  ;;  %v863_v42 = vcombine.low %v37_v31, %v45_v32  ;;  %v865_v44 = vcombine.low %v38_v34, %v46_v35  ;;  %v880_v45 = vcombine.high %v53_v40, %v53_v40  ;;  %v23_v51 = vld [vmem:[%s1429_s1 + $0x20] sm:$0xff]  ;;  %v24_v53 = vld [vmem:[%s1429_s1 + $0x28] sm:$0xff]  ;;  %75 = vperm.xlu1 %917, %v61_v47   ;;  %v62_v60 = vld [vmem:[%s1431_s2 + $0x18] sm:$0xff] }
   0xa   :  { %352 = vmatpush1.bf16.msra.mxu0 %v859_v17  ;;  %405 = vmatpush1.bf16.msra.mxu1 %v861_v18  ;;  %v879_v46 = vcombine.low %v53_v40, %v53_v40  ;;  %v882_v48 = vcombine.high %v54_v41, %v54_v41  ;;  %v881_v49 = vcombine.low %v54_v41, %v54_v41  ;;  %v31_v52 = vld [vmem:[%s1429_s1 + $0x60] sm:$0xff]  ;;  %v32_v54 = vld [vmem:[%s1429_s1 + $0x68] sm:$0xff]  ;;  %v25_v14 = vld [vmem:[%s1429_s1 + $0x30] sm:$0xff] }
   0xb   :  { %891 = vmatprep.subr.msk.bf16.mxu0 %vm300_vm0, %v876_v19  ;;  %894 = vmatprep.subr.msk.bf16.mxu1 %vm300_vm0, %v878_v21  ;;  %v60_v55 = vld [vmem:[%s1431_s2 + $0x8] sm:$0xff]  ;;  %v852_v58 = vcombine.high %v23_v51, %v31_v52  ;;  %v854_v59 = vcombine.high %v24_v53, %v32_v54  ;;  %v39_v61 = vld [vmem:[%s1429_s1 + $0xa0] sm:$0xff]  ;;  %v851_v1 = vcombine.low %v23_v51, %v31_v52  ;;  %v33_v15 = vld [vmem:[%s1429_s1 + $0x70] sm:$0xff] }
   0xc   :  { %v314_v56 = vsel %vm300_vm0, %v879_v46, 0  ;;  %v320_v57 = vsel %vm300_vm0, %v881_v49, 0  ;;  %70 = vperm.xlu0 %916, %v60_v55   ;;  %v47_v62 = vld [vmem:[%s1429_s1 + $0xe0] sm:$0xff]  ;;  %v40_v63 = vld [vmem:[%s1429_s1 + $0xa8] sm:$0xff]  ;;  %v853_v2 = vcombine.low %v24_v53, %v32_v54  ;;  %v26_v16 = vld [vmem:[%s1429_s1 + $0x38] sm:$0xff]  ;;  %v856_v20 = vcombine.high %v25_v14, %v33_v15 }
   0xd   :  { %v48_v0 = vld [vmem:[%s1429_s1 + $0xe8] sm:$0xff]  ;;  %80 = vperm.xlu1 %917, %v62_v60   ;;  %v868_v4 = vcombine.high %v39_v61, %v47_v62  ;;  %v55_v6 = vld [vmem:[%s1429_s1 + $0x120] sm:$0x33]  ;;  %v867_v8 = vcombine.low %v39_v61, %v47_v62  ;;  %v34_v17 = vld [vmem:[%s1429_s1 + $0x78] sm:$0xff]  ;;  %v855_v26 = vcombine.low %v25_v14, %v33_v15 }
   0xe   :  { %354 = vmatpush1.bf16.msra.mxu0 %v302_v27  ;;  %407 = vmatpush1.bf16.msra.mxu1 %v308_v29  ;;  %v870_v5 = vcombine.high %v40_v63, %v48_v0  ;;  %v56_v7 = vld [vmem:[%s1429_s1 + $0x128] sm:$0x33]  ;;  %v869_v9 = vcombine.low %v40_v63, %v48_v0  ;;  %v884_v10 = vcombine.high %v55_v6, %v55_v6  ;;  %v41_v22 = vld [vmem:[%s1429_s1 + $0xb0] sm:$0xff]  ;;  %v42_v24 = vld [vmem:[%s1429_s1 + $0xb8] sm:$0xff] }
   0xf   :  { %455 = vmatprep.subr.bf16.mxu0 %v848_v28  ;;  %508 = vmatprep.subr.bf16.mxu1 %v850_v30  ;;  %v883_v11 = vcombine.low %v55_v6, %v55_v6  ;;  %v886_v12 = vcombine.high %v56_v7, %v56_v7  ;;  %v885_v13 = vcombine.low %v56_v7, %v56_v7  ;;  %v49_v23 = vld [vmem:[%s1429_s1 + $0xf0] sm:$0xff]  ;;  %v50_v25 = vld [vmem:[%s1429_s1 + $0xf8] sm:$0xff] }
  0x10   :  { %v858_v21 = vcombine.high %v26_v16, %v34_v17  ;;  %v857_v27 = vcombine.low %v26_v16, %v34_v17  ;;  %v872_v28 = vcombine.high %v41_v22, %v49_v23  ;;  %v874_v29 = vcombine.high %v42_v24, %v50_v25  ;;  %v57_v30 = vld [vmem:[%s1429_s1 + $0x130] sm:$0x33]  ;;  %v58_v31 = vld [vmem:[%s1429_s1 + $0x138] sm:$0x33] }
  0x11   :  { %892 = vmatmul.mubr.msk.bf16.vlgmr.msra.gmra.mrb[0].mxu0 %vm293_vm1, %v1016_v33  ;;  %895 = vmatmul.mubr.msk.bf16.vlgmr.msra.gmra.mrb[0].mxu1 %vm293_vm1, %v1016_v33  ;;  %v326_v18 = vsel %vm300_vm0, %v883_v11, 0  ;;  %v332_v19 = vsel %vm300_vm0, %v885_v13, 0  ;;  %v871_v32 = vcombine.low %v41_v22, %v49_v23  ;;  %v873_v34 = vcombine.low %v42_v24, %v50_v25 }
  0x12   :  { %456 = vmatpush1.bf16.msra.mxu0 %v847_v36  ;;  %509 = vmatpush1.bf16.msra.mxu1 %v849_v37  ;;  %v888_v35 = vcombine.high %v57_v30, %v57_v30  ;;  %v887_v36 = vcombine.low %v57_v30, %v57_v30  ;;  %v890_v37 = vcombine.high %v58_v31, %v58_v31 }
  0x13   :  { %457 = vmatprep.subr.bf16.mxu0 %v864_v38  ;;  %510 = vmatprep.subr.bf16.mxu1 %v866_v39  ;;  %v889_v38 = vcombine.low %v58_v31, %v58_v31 }
  0x14   :  { %391 = vmatprep.mubr.bf16.mxu0 %v936_v3  ;;  %444 = vmatprep.mubr.bf16.mxu1 %v936_v3  ;;  %v338_v39 = vsel %vm300_vm0, %v887_v36, 0 }
  0x15   :  { %v344_v40 = vsel %vm300_vm0, %v889_v38, 0 }
  0x16   :  { %458 = vmatpush1.bf16.msra.mxu0 %v863_v42  ;;  %511 = vmatpush1.bf16.msra.mxu1 %v865_v44 }
  0x17   :  { %897 = vmatprep.subr.msk.bf16.mxu0 %vm300_vm0, %v880_v45  ;;  %900 = vmatprep.subr.msk.bf16.mxu1 %vm300_vm0, %v882_v48 }
  0x19   :  { %893 = vmatmul.mubr.msk.bf16.gmra.mrb[4].mxu0 %vm293_vm1, %v1045_v50  ;;  %896 = vmatmul.mubr.msk.bf16.gmra.mrb[4].mxu1 %vm293_vm1, %v1045_v50 }
  0x1a   :  { %460 = vmatpush1.bf16.msra.mxu0 %v314_v56  ;;  %513 = vmatpush1.bf16.msra.mxu1 %v320_v57 }
  0x1b   :  { %487 = vmatprep.mubr.bf16.mxu0 %v936_v3  ;;  %540 = vmatprep.mubr.bf16.mxu1 %v936_v3 }
  0x1c   :  { %561 = vmatprep.subr.bf16.mxu0 %v852_v58  ;;  %614 = vmatprep.subr.bf16.mxu1 %v854_v59 }
  0x21   :  { %898 = vmatmul.mubr.msk.bf16.vlgmr.msra.gmra.mrb[8].mxu0 %vm293_vm1, %v1016_v33  ;;  %901 = vmatmul.mubr.msk.bf16.vlgmr.msra.gmra.mrb[8].mxu1 %vm293_vm1, %v1016_v33 }
  0x22   :  { %562 = vmatpush1.bf16.msra.mxu0 %v851_v1  ;;  %615 = vmatpush1.bf16.msra.mxu1 %v853_v2 }
  0x23   :  { %563 = vmatprep.subr.bf16.mxu0 %v868_v4  ;;  %616 = vmatprep.subr.bf16.mxu1 %v870_v5 }
  0x24   :  { %497 = vmatprep.mubr.bf16.mxu0 %v936_v3  ;;  %550 = vmatprep.mubr.bf16.mxu1 %v936_v3 }
  0x26   :  { %564 = vmatpush1.bf16.msra.mxu0 %v867_v8  ;;  %617 = vmatpush1.bf16.msra.mxu1 %v869_v9 }
  0x27   :  { %903 = vmatprep.subr.msk.bf16.mxu0 %vm300_vm0, %v884_v10  ;;  %906 = vmatprep.subr.msk.bf16.mxu1 %vm300_vm0, %v886_v12 }
  0x29   :  { %899 = vmatmul.mubr.msk.bf16.gmra.mrb[12].mxu0 %vm293_vm1, %v1045_v50  ;;  %902 = vmatmul.mubr.msk.bf16.gmra.mrb[12].mxu1 %vm293_vm1, %v1045_v50 }
  0x2a   :  { %566 = vmatpush1.bf16.msra.mxu0 %v326_v18  ;;  %619 = vmatpush1.bf16.msra.mxu1 %v332_v19 }
  0x2b   :  { %593 = vmatprep.mubr.bf16.mxu0 %v936_v3  ;;  %646 = vmatprep.mubr.bf16.mxu1 %v936_v3 }
  0x2c   :  { %667 = vmatprep.subr.bf16.mxu0 %v856_v20  ;;  %720 = vmatprep.subr.bf16.mxu1 %v858_v21 }
  0x31   :  { %904 = vmatmul.mubr.msk.bf16.vlgmr.msra.gmra.mrb[16].mxu0 %vm293_vm1, %v1016_v33  ;;  %907 = vmatmul.mubr.msk.bf16.vlgmr.msra.gmra.mrb[16].mxu1 %vm293_vm1, %v1016_v33 }
  0x32   :  { %668 = vmatpush1.bf16.msra.mxu0 %v855_v26  ;;  %721 = vmatpush1.bf16.msra.mxu1 %v857_v27 }
  0x33   :  { %669 = vmatprep.subr.bf16.mxu0 %v872_v28  ;;  %722 = vmatprep.subr.bf16.mxu1 %v874_v29 }
  0x34   :  { %603 = vmatprep.mubr.bf16.mxu0 %v936_v3  ;;  %656 = vmatprep.mubr.bf16.mxu1 %v936_v3 }
  0x36   :  { %670 = vmatpush1.bf16.msra.mxu0 %v871_v32  ;;  %723 = vmatpush1.bf16.msra.mxu1 %v873_v34 }
  0x37   :  { %909 = vmatprep.subr.msk.bf16.mxu0 %vm300_vm0, %v888_v35  ;;  %912 = vmatprep.subr.msk.bf16.mxu1 %vm300_vm0, %v890_v37 }
  0x39   :  { %905 = vmatmul.mubr.msk.bf16.gmra.mrb[20].mxu0 %vm293_vm1, %v1045_v50  ;;  %908 = vmatmul.mubr.msk.bf16.gmra.mrb[20].mxu1 %vm293_vm1, %v1045_v50 }
  0x3a   :  { %672 = vmatpush1.bf16.msra.mxu0 %v338_v39  ;;  %725 = vmatpush1.bf16.msra.mxu1 %v344_v40 }
  0x3b   :  { %699 = vmatprep.mubr.bf16.mxu0 %v936_v3  ;;  %752 = vmatprep.mubr.bf16.mxu1 %v936_v3 }
  0x41   :  { %910 = vmatmul.mubr.msk.bf16.vlgmr.msra.gmra.mrb[24].mxu0 %vm293_vm1, %v1016_v33  ;;  %913 = vmatmul.mubr.msk.bf16.vlgmr.msra.gmra.mrb[24].mxu1 %vm293_vm1, %v1016_v33 }
  0x42   :  { %709 = vmatprep.mubr.bf16.mxu0 %v936_v3  ;;  %762 = vmatprep.mubr.bf16.mxu1 %v936_v3 }
  0x49   :  { %911 = vmatmul.mubr.msk.bf16.gmra.mrb[28].mxu0 %vm293_vm1, %v1045_v50  ;;  %914 = vmatmul.mubr.msk.bf16.gmra.mrb[28].mxu1 %vm293_vm1, %v1045_v50 }
  0x87   :  { %v1165_v41 = vpop.permute.xlu0 %65 }
  0x88   :  { %v1167_v42 = vpop.permute.xlu1 %75 }
  0x8b   :  { %v1169_v44 = vpop.permute.xlu0 %70 }
  0x8c   :  { %v1203_v59 = vpop.permute.xlu1 %80 }
  0xe4   :  { %v383_v43 = vpop.f32.mrb[0].mxu0  ;;  %v436_v33 = vpop.f32.mrb[0].mxu1 }
  0xe5   :  { %v384_v45 = vadd.f32 %v383_v43, %v1165_v41  ;;  %v385_v46 = vpop.f32.mrb[1].mxu0  ;;  %v437_v47 = vadd.f32 %v436_v33, %v1165_v41  ;;  %v438_v48 = vpop.f32.mrb[1].mxu1 }
  0xe6   :  { %v386_v3 = vadd.f32 %v385_v46, %v1165_v41  ;;  %v387_v49 = vpop.f32.mrb[2].mxu0  ;;  %v439_v50 = vadd.f32 %v438_v48, %v1165_v41  ;;  %v440_v52 = vpop.f32.mrb[2].mxu1 }
  0xe7   :  { %773 = vst [vmem:[%s1432_s3] sm:$0xff] %v384_v45  ;;  %v388_v51 = vadd.f32 %v387_v49, %v1169_v44  ;;  %v389_v53 = vpop.f32.mrb[3].mxu0  ;;  %775 = vst [vmem:[%s1432_s3 + $0x10] sm:$0xff] %v437_v47  ;;  %v441_v54 = vadd.f32 %v440_v52, %v1169_v44  ;;  %v442_v56 = vpop.f32.mrb[3].mxu1 }
  0xe8   :  { %774 = vst [vmem:[%s1432_s3 + $0x8] sm:$0xff] %v386_v3  ;;  %v390_v55 = vadd.f32 %v389_v53, %v1169_v44  ;;  %776 = vst [vmem:[%s1432_s3 + $0x18] sm:$0xff] %v439_v50  ;;  %v443_v57 = vadd.f32 %v442_v56, %v1169_v44 }
  0xe9   :  { %789 = vst [vmem:[%s1432_s3 + $0x80] sm:$0xff] %v388_v51  ;;  %791 = vst [vmem:[%s1432_s3 + $0x90] sm:$0xff] %v441_v54 }
  0xea   :  { %790 = vst [vmem:[%s1432_s3 + $0x88] sm:$0xff] %v390_v55  ;;  %792 = vst [vmem:[%s1432_s3 + $0x98] sm:$0xff] %v443_v57 }
  0xec   :  { %v393_v58 = vpop.f32.mrb[4].mxu0  ;;  %v446_v61 = vpop.f32.mrb[4].mxu1 }
  0xed   :  { %v394_v60 = vadd.f32 %v393_v58, %v1167_v42  ;;  %v395_v62 = vpop.f32.mrb[5].mxu0  ;;  %v447_v63 = vadd.f32 %v446_v61, %v1167_v42  ;;  %v448_v1 = vpop.f32.mrb[5].mxu1 }
  0xee   :  { %v396_v0 = vadd.f32 %v395_v62, %v1167_v42  ;;  %v397_v2 = vpop.f32.mrb[6].mxu0  ;;  %v449_v4 = vadd.f32 %v448_v1, %v1167_v42  ;;  %v450_v6 = vpop.f32.mrb[6].mxu1 }
  0xef   :  { %805 = vst [vmem:[%s1432_s3 + $0x100] sm:$0xff] %v394_v60  ;;  %v398_v5 = vadd.f32 %v397_v2, %v1203_v59  ;;  %v399_v7 = vpop.f32.mrb[7].mxu0  ;;  %807 = vst [vmem:[%s1432_s3 + $0x110] sm:$0xff] %v447_v63  ;;  %v451_v8 = vadd.f32 %v450_v6, %v1203_v59  ;;  %v452_v10 = vpop.f32.mrb[7].mxu1 }
  0xf0   :  { %806 = vst [vmem:[%s1432_s3 + $0x108] sm:$0xff] %v396_v0  ;;  %v400_v9 = vadd.f32 %v399_v7, %v1203_v59  ;;  %808 = vst [vmem:[%s1432_s3 + $0x118] sm:$0xff] %v449_v4  ;;  %v453_v11 = vadd.f32 %v452_v10, %v1203_v59 }
  0xf1   :  { %821 = vst [vmem:[%s1432_s3 + $0x180] sm:$0xff] %v398_v5  ;;  %823 = vst [vmem:[%s1432_s3 + $0x190] sm:$0xff] %v451_v8 }
  0xf2   :  { %822 = vst [vmem:[%s1432_s3 + $0x188] sm:$0xff] %v400_v9  ;;  %824 = vst [vmem:[%s1432_s3 + $0x198] sm:$0xff] %v453_v11 }
  0xf4   :  { %v489_v12 = vpop.f32.mrb[8].mxu0  ;;  %v542_v14 = vpop.f32.mrb[8].mxu1 }
  0xf5   :  { %v490_v13 = vadd.f32 %v489_v12, %v1165_v41  ;;  %v491_v15 = vpop.f32.mrb[9].mxu0  ;;  %v543_v16 = vadd.f32 %v542_v14, %v1165_v41  ;;  %v544_v18 = vpop.f32.mrb[9].mxu1 }
  0xf6   :  { %v492_v17 = vadd.f32 %v491_v15, %v1165_v41  ;;  %v493_v19 = vpop.f32.mrb[10].mxu0  ;;  %v545_v20 = vadd.f32 %v544_v18, %v1165_v41  ;;  %v546_v22 = vpop.f32.mrb[10].mxu1 }
  0xf7   :  { %777 = vst [vmem:[%s1432_s3 + $0x20] sm:$0xff] %v490_v13  ;;  %v494_v21 = vadd.f32 %v493_v19, %v1169_v44  ;;  %v495_v23 = vpop.f32.mrb[11].mxu0  ;;  %779 = vst [vmem:[%s1432_s3 + $0x30] sm:$0xff] %v543_v16  ;;  %v547_v24 = vadd.f32 %v546_v22, %v1169_v44  ;;  %v548_v26 = vpop.f32.mrb[11].mxu1 }
  0xf8   :  { %778 = vst [vmem:[%s1432_s3 + $0x28] sm:$0xff] %v492_v17  ;;  %v496_v25 = vadd.f32 %v495_v23, %v1169_v44  ;;  %780 = vst [vmem:[%s1432_s3 + $0x38] sm:$0xff] %v545_v20  ;;  %v549_v27 = vadd.f32 %v548_v26, %v1169_v44 }
  0xf9   :  { %793 = vst [vmem:[%s1432_s3 + $0xa0] sm:$0xff] %v494_v21  ;;  %795 = vst [vmem:[%s1432_s3 + $0xb0] sm:$0xff] %v547_v24 }
  0xfa   :  { %794 = vst [vmem:[%s1432_s3 + $0xa8] sm:$0xff] %v496_v25  ;;  %796 = vst [vmem:[%s1432_s3 + $0xb8] sm:$0xff] %v549_v27 }
  0xfc   :  { %v499_v28 = vpop.f32.mrb[12].mxu0  ;;  %v552_v30 = vpop.f32.mrb[12].mxu1 }
  0xfd   :  { %v500_v29 = vadd.f32 %v499_v28, %v1167_v42  ;;  %v501_v31 = vpop.f32.mrb[13].mxu0  ;;  %v553_v32 = vadd.f32 %v552_v30, %v1167_v42  ;;  %v554_v35 = vpop.f32.mrb[13].mxu1 }
  0xfe   :  { %v502_v34 = vadd.f32 %v501_v31, %v1167_v42  ;;  %v503_v36 = vpop.f32.mrb[14].mxu0  ;;  %v555_v37 = vadd.f32 %v554_v35, %v1167_v42  ;;  %v556_v39 = vpop.f32.mrb[14].mxu1 }
  0xff   :  { %809 = vst [vmem:[%s1432_s3 + $0x120] sm:$0xff] %v500_v29  ;;  %v504_v38 = vadd.f32 %v503_v36, %v1203_v59  ;;  %v505_v40 = vpop.f32.mrb[15].mxu0  ;;  %811 = vst [vmem:[%s1432_s3 + $0x130] sm:$0xff] %v553_v32  ;;  %v557_v43 = vadd.f32 %v556_v39, %v1203_v59  ;;  %v558_v33 = vpop.f32.mrb[15].mxu1 }
 0x100   :  { %810 = vst [vmem:[%s1432_s3 + $0x128] sm:$0xff] %v502_v34  ;;  %v506_v45 = vadd.f32 %v505_v40, %v1203_v59  ;;  %812 = vst [vmem:[%s1432_s3 + $0x138] sm:$0xff] %v555_v37  ;;  %v559_v46 = vadd.f32 %v558_v33, %v1203_v59 }
 0x101   :  { %825 = vst [vmem:[%s1432_s3 + $0x1a0] sm:$0xff] %v504_v38  ;;  %827 = vst [vmem:[%s1432_s3 + $0x1b0] sm:$0xff] %v557_v43 }
 0x102   :  { %826 = vst [vmem:[%s1432_s3 + $0x1a8] sm:$0xff] %v506_v45  ;;  %828 = vst [vmem:[%s1432_s3 + $0x1b8] sm:$0xff] %v559_v46 }
 0x104   :  { %v595_v47 = vpop.f32.mrb[16].mxu0  ;;  %v648_v48 = vpop.f32.mrb[16].mxu1 }
 0x105   :  { %v596_v3 = vadd.f32 %v595_v47, %v1165_v41  ;;  %v597_v49 = vpop.f32.mrb[17].mxu0  ;;  %v649_v50 = vadd.f32 %v648_v48, %v1165_v41  ;;  %v650_v52 = vpop.f32.mrb[17].mxu1 }
 0x106   :  { %v598_v51 = vadd.f32 %v597_v49, %v1165_v41  ;;  %v599_v53 = vpop.f32.mrb[18].mxu0  ;;  %v651_v54 = vadd.f32 %v650_v52, %v1165_v41  ;;  %v652_v56 = vpop.f32.mrb[18].mxu1 }
 0x107   :  { %781 = vst [vmem:[%s1432_s3 + $0x40] sm:$0xff] %v596_v3  ;;  %v600_v55 = vadd.f32 %v599_v53, %v1169_v44  ;;  %v601_v57 = vpop.f32.mrb[19].mxu0  ;;  %783 = vst [vmem:[%s1432_s3 + $0x50] sm:$0xff] %v649_v50  ;;  %v653_v58 = vadd.f32 %v652_v56, %v1169_v44  ;;  %v654_v61 = vpop.f32.mrb[19].mxu1 }
 0x108   :  { %782 = vst [vmem:[%s1432_s3 + $0x48] sm:$0xff] %v598_v51  ;;  %v602_v60 = vadd.f32 %v601_v57, %v1169_v44  ;;  %784 = vst [vmem:[%s1432_s3 + $0x58] sm:$0xff] %v651_v54  ;;  %v655_v62 = vadd.f32 %v654_v61, %v1169_v44 }
 0x109   :  { %797 = vst [vmem:[%s1432_s3 + $0xc0] sm:$0xff] %v600_v55  ;;  %799 = vst [vmem:[%s1432_s3 + $0xd0] sm:$0xff] %v653_v58 }
 0x10a   :  { %798 = vst [vmem:[%s1432_s3 + $0xc8] sm:$0xff] %v602_v60  ;;  %800 = vst [vmem:[%s1432_s3 + $0xd8] sm:$0xff] %v655_v62 }
 0x10c   :  { %v605_v63 = vpop.f32.mrb[20].mxu0  ;;  %v658_v1 = vpop.f32.mrb[20].mxu1 }
 0x10d   :  { %v606_v0 = vadd.f32 %v605_v63, %v1167_v42  ;;  %v607_v2 = vpop.f32.mrb[21].mxu0  ;;  %v659_v4 = vadd.f32 %v658_v1, %v1167_v42  ;;  %v660_v6 = vpop.f32.mrb[21].mxu1 }
 0x10e   :  { %v608_v5 = vadd.f32 %v607_v2, %v1167_v42  ;;  %v609_v7 = vpop.f32.mrb[22].mxu0  ;;  %v661_v8 = vadd.f32 %v660_v6, %v1167_v42  ;;  %v662_v10 = vpop.f32.mrb[22].mxu1 }
 0x10f   :  { %813 = vst [vmem:[%s1432_s3 + $0x140] sm:$0xff] %v606_v0  ;;  %v610_v9 = vadd.f32 %v609_v7, %v1203_v59  ;;  %v611_v11 = vpop.f32.mrb[23].mxu0  ;;  %815 = vst [vmem:[%s1432_s3 + $0x150] sm:$0xff] %v659_v4  ;;  %v663_v12 = vadd.f32 %v662_v10, %v1203_v59  ;;  %v664_v14 = vpop.f32.mrb[23].mxu1 }
 0x110   :  { %814 = vst [vmem:[%s1432_s3 + $0x148] sm:$0xff] %v608_v5  ;;  %v612_v13 = vadd.f32 %v611_v11, %v1203_v59  ;;  %816 = vst [vmem:[%s1432_s3 + $0x158] sm:$0xff] %v661_v8  ;;  %v665_v15 = vadd.f32 %v664_v14, %v1203_v59 }
 0x111   :  { %829 = vst [vmem:[%s1432_s3 + $0x1c0] sm:$0xff] %v610_v9  ;;  %831 = vst [vmem:[%s1432_s3 + $0x1d0] sm:$0xff] %v663_v12 }
 0x112   :  { %830 = vst [vmem:[%s1432_s3 + $0x1c8] sm:$0xff] %v612_v13  ;;  %832 = vst [vmem:[%s1432_s3 + $0x1d8] sm:$0xff] %v665_v15 }
 0x114   :  { %v701_v16 = vpop.f32.mrb[24].mxu0  ;;  %v754_v18 = vpop.f32.mrb[24].mxu1 }
 0x115   :  { %v702_v17 = vadd.f32 %v701_v16, %v1165_v41  ;;  %v703_v19 = vpop.f32.mrb[25].mxu0  ;;  %v755_v20 = vadd.f32 %v754_v18, %v1165_v41  ;;  %v756_v22 = vpop.f32.mrb[25].mxu1 }
 0x116   :  { %v704_v21 = vadd.f32 %v703_v19, %v1165_v41  ;;  %v705_v23 = vpop.f32.mrb[26].mxu0  ;;  %v757_v24 = vadd.f32 %v756_v22, %v1165_v41  ;;  %v758_v26 = vpop.f32.mrb[26].mxu1 }
 0x117   :  { %785 = vst [vmem:[%s1432_s3 + $0x60] sm:$0xff] %v702_v17  ;;  %v706_v25 = vadd.f32 %v705_v23, %v1169_v44  ;;  %v707_v27 = vpop.f32.mrb[27].mxu0  ;;  %787 = vst [vmem:[%s1432_s3 + $0x70] sm:$0xff] %v755_v20  ;;  %v759_v28 = vadd.f32 %v758_v26, %v1169_v44  ;;  %v760_v30 = vpop.f32.mrb[27].mxu1 }
 0x118   :  { %786 = vst [vmem:[%s1432_s3 + $0x68] sm:$0xff] %v704_v21  ;;  %v708_v29 = vadd.f32 %v707_v27, %v1169_v44  ;;  %788 = vst [vmem:[%s1432_s3 + $0x78] sm:$0xff] %v757_v24  ;;  %v761_v41 = vadd.f32 %v760_v30, %v1169_v44 }
 0x119   :  { %801 = vst [vmem:[%s1432_s3 + $0xe0] sm:$0xff] %v706_v25  ;;  %803 = vst [vmem:[%s1432_s3 + $0xf0] sm:$0xff] %v759_v28 }
 0x11a   :  { %802 = vst [vmem:[%s1432_s3 + $0xe8] sm:$0xff] %v708_v29  ;;  %804 = vst [vmem:[%s1432_s3 + $0xf8] sm:$0xff] %v761_v41 }
 0x11c   :  { %v711_v31 = vpop.f32.mrb[28].mxu0  ;;  %v764_v34 = vpop.f32.mrb[28].mxu1 }
 0x11d   :  { %v712_v32 = vadd.f32 %v711_v31, %v1167_v42  ;;  %v713_v35 = vpop.f32.mrb[29].mxu0  ;;  %v765_v36 = vadd.f32 %v764_v34, %v1167_v42  ;;  %v766_v37 = vpop.f32.mrb[29].mxu1 }
 0x11e   :  { %v714_v44 = vadd.f32 %v713_v35, %v1167_v42  ;;  %v715_v38 = vpop.f32.mrb[30].mxu0  ;;  %v767_v39 = vadd.f32 %v766_v37, %v1167_v42  ;;  %v768_v43 = vpop.f32.mrb[30].mxu1 }
 0x11f   :  { %817 = vst [vmem:[%s1432_s3 + $0x160] sm:$0xff] %v712_v32  ;;  %v716_v40 = vadd.f32 %v715_v38, %v1203_v59  ;;  %v717_v45 = vpop.f32.mrb[31].mxu0  ;;  %819 = vst [vmem:[%s1432_s3 + $0x170] sm:$0xff] %v765_v36  ;;  %v769_v33 = vadd.f32 %v768_v43, %v1203_v59  ;;  %v770_v47 = vpop.f32.mrb[31].mxu1 }
 0x120   :  { %818 = vst [vmem:[%s1432_s3 + $0x168] sm:$0xff] %v714_v44  ;;  %v718_v46 = vadd.f32 %v717_v45, %v1203_v59  ;;  %820 = vst [vmem:[%s1432_s3 + $0x178] sm:$0xff] %v767_v39  ;;  %v771_v42 = vadd.f32 %v770_v47, %v1203_v59 }
 0x121   :  { %833 = vst [vmem:[%s1432_s3 + $0x1e0] sm:$0xff] %v716_v40  ;;  %835 = vst [vmem:[%s1432_s3 + $0x1f0] sm:$0xff] %v769_v33 }
 0x122   :  { %834 = vst [vmem:[%s1432_s3 + $0x1e8] sm:$0xff] %v718_v46  ;;  %836 = vst [vmem:[%s1432_s3 + $0x1f8] sm:$0xff] %v771_v42 }

// kernel: earthfarseer_forward.44
= control target key start
LH: loop header
LB: loop body
LE: loop exit
PB: predicated region body
PF: predicated region fallthrough
CT: control target
= control target key end

     0   :  { %s590_s12 = smov 0   ;;  %s592_s13 = smov 0   ;;  %s654_s0 = inlined_call_operand.vmem [shape: f32[8,2,16,256], index: 0, kind: input, shape index: {}]   ;;  %s655_s1 = inlined_call_operand.vmem [shape: f32[2,16,1], index: 1, kind: input, shape index: {}]   ;;  %s656_s2 = inlined_call_operand.vmem [shape: f32[2,16,1], index: 2, kind: input, shape index: {}]   ;;  %s657_s3 = inlined_call_operand.vmem [shape: f32[8,2,16,256], index: 3, kind: output, shape index: {}]  }
   0x1   :  { %s594_s14 = smov 0   ;;  %s596_s15 = smov 0  }
   0x2   :  { %s598_s16 = smov 0  }
   0x3 LB: > { %s22_s17 = sadd.s32 1, %s559_s14  ;;  %s25_s18 = sadd.s32 1, %s563_s15  ;;  %s567_s16 = sphi %s598_s16, %s13_s16   ;;  %s563_s15 = sphi %s596_s15, %s661_s15   ;;  %s559_s14 = sphi %s594_s14, %s660_s14   ;;  %s555_s13 = sphi %s592_s13, %s659_s13   ;;  %s551_s12 = sphi %s590_s12, %s658_s12  }
   0x4   : > { %p23_p0 = scmp.ge.s32.totalorder %s22_s17, 2  ;;  %p465_p1 = scmp.ge.s32.totalorder %s567_s16, 1 }
   0x5   : > { %p177_p2 = scmp.lt.s32.totalorder %s567_s16, 17 }
   0x6   : > { %s663_s17 = smov (%p23_p0, %s22_s17), 0  ;;  %s665_s18 = smov (!%p23_p0, %s25_s18), %s563_s15 }
   0x7   : > { %p178_p3 = pnand %p465_p1, %p177_p2  ;;  %p27_p4 = scmp.ge.s32.totalorder %s665_s18, 8 }
   0x8   : > { %p219_p5 = scmp.lt.s32.totalorder (!%p178_p3), %s555_s13, 7  ;;  %p221_p6 = scmp.lt.s32.totalorder (!%p178_p3), %s551_s12, 1  ;;  %v569_v7 = vmov (!%p178_p3), 0  }
   0x9   : > { %s667_s18 = smov (%p27_p4, %s665_s18), 0  ;;  %181 = sbr.rel (%p178_p3) target bundleno = 476 (0x1dc), region = 32 }
   0xa   : > { %525 = vset.pattern.permute.xlu1 (!%p178_p3), %v569_v7  ;;  %526 = vset.pattern.permute.xlu0 (!%p178_p3), %v569_v7 }
  0x10   : > { %s669_s13 = smov (!%p219_p5, %s555_s13), 7  ;;  %s671_s12 = smov (!%p221_p6, %s551_s12), 1 }
  0x11   : > { %s467_s19 = sshll.u32 %s669_s13, 3  ;;  %s466_s20 = sshll.u32 %s671_s12, 2 }
  0x12   : > { %s620_s21 = sadd.s32 %s467_s19, %s466_s20  ;;  %s478_s26 = sshll.u32 %s671_s12, 4 }
  0x13   : > { %s468_s22 = sshll.u32 %s620_s21, 3  ;;  %s232_s29 = scalar_lea.vmem %s655_s1, %s478_s26 }
  0x14   : > { %s227_s25 = scalar_lea.vmem %s654_s0, %s468_s22  ;;  %v294_v8 = vld [vmem:[%s232_s29] sm:$0xff]  ;;  %v295_v9 = vld [vmem:[%s232_s29 + $0x8] sm:$0xff]  ;;  %s237_s5 = scalar_lea.vmem %s656_s2, %s478_s26 }
  0x15   : > { %v247_v0 = vld [vmem:[%s227_s25] sm:$0xff]  ;;  %v248_v1 = vld [vmem:[%s227_s25 + $0x8] sm:$0xff]  ;;  %v249_v2 = vld [vmem:[%s227_s25 + $0x10] sm:$0xff]  ;;  %298 = vperm.xlu1 %525, %v294_v8   ;;  %s246_s10 = scalar_lea.vmem %s657_s3, %s468_s22 }
  0x16   : > { %v251_v3 = vadd.f32 %v248_v1, %v247_v0  ;;  %v250_v4 = vld [vmem:[%s227_s25 + $0x18] sm:$0xff]  ;;  %v311_v10 = vld [vmem:[%s237_s5 + $0x8] sm:$0xff]  ;;  %v310_v31 = vld [vmem:[%s237_s5] sm:$0xff] }
  0x18   : > { %v252_v5 = vadd.f32 %v251_v3, %v249_v2 }
  0x19   : > { %303 = vperm.xlu1 %525, %v295_v9  }
  0x1a   : > { %v253_v6 = vadd.f32 %v252_v5, %v250_v4 }
  0x1c   : > { %254 = vadd.xlane.f32.xlu0 %v253_v6 }
  0x1d   : > { %319 = vperm.xlu1 %525, %v311_v10  }
  0x94   : > { %v299_v42 = vpop.permute.xlu1 %298 }
  0x98   : > { %v304_v43 = vpop.permute.xlu1 %303 }
  0x9c   : > { %v320_v54 = vpop.permute.xlu1 %319 }
  0xa9   : > { %v255_v11 = vpop.xlane.xlu0 %254 }
  0xaa   : > { %v256_v12 = vrot.slane %v255_v11, 4 }
  0xac   : > { %v257_v13 = vadd.f32 %v256_v12, %v255_v11 }
  0xae   : > { %v258_v14 = vrot.slane %v257_v13, 2 }
  0xb0   : > { %v259_v15 = vadd.f32 %v258_v14, %v257_v13 }
  0xb2   : > { %v260_v16 = vrot.slane %v259_v15, 1 }
  0xb4   : > { %v261_v17 = vadd.f32 %v260_v16, %v259_v15 }
  0xb6   : > { %480 = vpush %v261_v17 }
  0xe7   : > { %s481_s6 = spop %480 }
  0xe8   : > { %v263_v18 = vstv %s481_s6 }
  0xe9   : > { %v265_v19 = vmul.f32 0.00024414063, %v263_v18 }
  0xeb   : > { %v266_v20 = vsub.f32 %v247_v0, %v265_v19  ;;  %v267_v21 = vsub.f32 %v248_v1, %v265_v19  ;;  %v268_v22 = vsub.f32 %v249_v2, %v265_v19  ;;  %v269_v23 = vsub.f32 %v250_v4, %v265_v19 }
  0xed   : > { %v270_v24 = vmul.f32 %v266_v20, %v266_v20  ;;  %v271_v25 = vmul.f32 %v267_v21, %v267_v21  ;;  %v272_v26 = vmul.f32 %v268_v22, %v268_v22  ;;  %v273_v28 = vmul.f32 %v269_v23, %v269_v23 }
  0xef   : > { %v274_v27 = vadd.f32 %v271_v25, %v270_v24 }
  0xf1   : > { %v275_v29 = vadd.f32 %v274_v27, %v272_v26 }
  0xf3   : > { %v276_v30 = vadd.f32 %v275_v29, %v273_v28 }
  0xf5   : > { %277 = vadd.xlane.f32.xlu0 %v276_v30 }
 0x10b   : > { %314 = vperm.xlu0 %526, %v310_v31  }
 0x182   : > { %v278_v32 = vpop.xlane.xlu0 %277 }
 0x183   : > { %v279_v33 = vrot.slane %v278_v32, 4 }
 0x185   : > { %v280_v34 = vadd.f32 %v279_v33, %v278_v32 }
 0x187   : > { %v281_v35 = vrot.slane %v280_v34, 2 }
 0x189   : > { %v282_v36 = vadd.f32 %v281_v35, %v280_v34 }
 0x18a   : > { %v315_v49 = vpop.permute.xlu0 %314 }
 0x18b   : > { %v283_v37 = vrot.slane %v282_v36, 1 }
 0x18d   : > { %v284_v38 = vadd.f32 %v283_v37, %v282_v36 }
 0x18f   : > { %482 = vpush %v284_v38 }
 0x1c0   : > { %s483_s7 = spop %482 }
 0x1c1   : > { %v286_v39 = vstv %s483_s7 }
 0x1c2   : > { %v287_v40 = vmul.f32 0.00024414063, %v286_v39 }
 0x1c4   : > { %v288_v41 = vadd.f32 1e-05, %v287_v40 }
 0x1c6   : > { %527 = vrsqrt.f32 %v288_v41 }
 0x1d0   : > { %v528_v44 = vpop.eup %527 }
 0x1d1   : > { %v290_v45 = vmul.f32 %v528_v44, %v266_v20  ;;  %v291_v46 = vmul.f32 %v528_v44, %v267_v21  ;;  %v292_v47 = vmul.f32 %v528_v44, %v268_v22  ;;  %v293_v48 = vmul.f32 %v528_v44, %v269_v23 }
 0x1d3   : > { %v306_v50 = vmul.f32 %v299_v42, %v290_v45  ;;  %v307_v51 = vmul.f32 %v299_v42, %v291_v46  ;;  %v308_v52 = vmul.f32 %v304_v43, %v292_v47  ;;  %v309_v53 = vmul.f32 %v304_v43, %v293_v48 }
 0x1d5   : > { %v324_v55 = vadd.f32 %v320_v54, %v308_v52  ;;  %v325_v56 = vadd.f32 %v320_v54, %v309_v53  ;;  %v322_v57 = vadd.f32 %v315_v49, %v306_v50  ;;  %v323_v58 = vadd.f32 %v315_v49, %v307_v51 }
 0x1d7   : > { %vm328_vm0 = vcmp.gt.f32.partialorder %v324_v55, 0.0  ;;  %vm329_vm1 = vcmp.gt.f32.partialorder %v325_v56, 0.0  ;;  %v332_v59 = vmul.f32 0.2, %v324_v55  ;;  %v333_v60 = vmul.f32 0.2, %v325_v56 }
 0x1d8   : > { %vm326_vm2 = vcmp.gt.f32.partialorder %v322_v57, 0.0  ;;  %vm327_vm3 = vcmp.gt.f32.partialorder %v323_v58, 0.0  ;;  %v330_v61 = vmul.f32 0.2, %v322_v57  ;;  %v331_v62 = vmul.f32 0.2, %v323_v58 }
 0x1d9   : > { %v336_v63 = vsel %vm328_vm0, %v324_v55, %v332_v59  ;;  %v337_v0 = vsel %vm329_vm1, %v325_v56, %v333_v60 }
 0x1da   : > { %340 = vst [vmem:[%s246_s10 + $0x10] sm:$0xff] %v336_v63  ;;  %341 = vst [vmem:[%s246_s10 + $0x18] sm:$0xff] %v337_v0  ;;  %v334_v1 = vsel %vm326_vm2, %v322_v57, %v330_v61  ;;  %v335_v2 = vsel %vm327_vm3, %v323_v58, %v331_v62 }
 0x1db   : > { %338 = vst [vmem:[%s246_s10] sm:$0xff] %v334_v1  ;;  %339 = vst [vmem:[%s246_s10 + $0x8] sm:$0xff] %v335_v2 }
 0x1dc PF: > { %s13_s16 = sadd.s32 1, %s567_s16   ;;  %s658_s12 = smov %s559_s14 }
 0x1dd   : > { %p10_p7 = scmp.ge.s32.totalorder %s13_s16, 18   ;;  %s659_s13 = smov %s563_s15 }
 0x1de   : > { %s660_s14 = smov %s663_s17  ;;  %s661_s15 = smov %s667_s18 }
 0x1df   :  { %12 = sbr.rel (!%p10_p7) target bundleno = 3 (0x3), region = 68 }

// kernel: earthfarseer_forward.45
= control target key start
LH: loop header
LB: loop body
LE: loop exit
PB: predicated region body
PF: predicated region fallthrough
CT: control target
= control target key end

     0   :  { %v981_v1 = vmov 0   ;;  %vm509_vm0 = vcmask 261120   ;;  %s1302_s1 = inlined_call_operand.vmem [shape: bf16[1,288,512], index: 1, kind: input, shape index: {}]   ;;  %s1303_s0 = inlined_call_operand.vmem [shape: bf16[1,32,288], index: 0, kind: input, shape index: {}]   ;;  %s1304_s2 = inlined_call_operand.vmem [shape: f32[1,32,1], index: 2, kind: input, shape index: {}]   ;;  %s1305_s3 = inlined_call_operand.vmem [shape: f32[1,32,512], index: 3, kind: output, shape index: {}]  }
   0x1   :  { %v865_v0 = vld [vmem:[%s1302_s1 + $0x4] ss:$16 sps:$4 sm:$0xff]   ;;  %863 = vset.pattern.permute.xlu0 %v981_v1  ;;  %864 = vset.pattern.permute.xlu1 %v981_v1  ;;  %v867_v2 = vld [vmem:[%s1302_s1 + $0xc] ss:$16 sps:$4 sm:$0xff]   ;;  %v869_v3 = vld [vmem:[%s1302_s1] ss:$16 sps:$4 sm:$0xff]  }
   0x2   :  { %516 = vmatprep.subr.bf16.mxu0 %v865_v0  ;;  %v870_v4 = vld [vmem:[%s1302_s1 + $0x8] ss:$16 sps:$4 sm:$0xff]   ;;  %622 = vmatprep.subr.bf16.mxu1 %v867_v2  ;;  %v871_v5 = vld [vmem:[%s1302_s1 + $0x24] ss:$16 sps:$4 sm:$0xff]   ;;  %v873_v6 = vld [vmem:[%s1302_s1 + $0x2c] ss:$16 sps:$4 sm:$0xff]  }
   0x3   :  { %517 = vmatpush1.bf16.msra.mxu0 %v869_v3  ;;  %623 = vmatpush1.bf16.msra.mxu1 %v870_v4  ;;  %v875_v7 = vld [vmem:[%s1302_s1 + $0x20] ss:$16 sps:$4 sm:$0xff]   ;;  %v876_v8 = vld [vmem:[%s1302_s1 + $0x28] ss:$16 sps:$4 sm:$0xff]   ;;  %v877_v9 = vld [vmem:[%s1302_s1 + $0x44] ss:$16 sps:$4 sm:$0xff]  }
   0x4   :  { %518 = vmatprep.subr.bf16.mxu0 %v871_v5  ;;  %624 = vmatprep.subr.bf16.mxu1 %v873_v6  ;;  %v879_v10 = vld [vmem:[%s1302_s1 + $0x4c] ss:$16 sps:$4 sm:$0xff]   ;;  %v881_v11 = vld [vmem:[%s1302_s1 + $0x40] ss:$16 sps:$4 sm:$0xff]   ;;  %v882_v12 = vld [vmem:[%s1302_s1 + $0x48] ss:$16 sps:$4 sm:$0xff]  }
   0x5   :  { %v883_v13 = vld [vmem:[%s1302_s1 + $0x64] ss:$16 sps:$4 sm:$0xff]   ;;  %v885_v14 = vld [vmem:[%s1302_s1 + $0x6c] ss:$16 sps:$4 sm:$0xff]   ;;  %v887_v15 = vld [vmem:[%s1302_s1 + $0x60] ss:$16 sps:$4 sm:$0xff]  }
   0x6   :  { %v888_v16 = vld [vmem:[%s1302_s1 + $0x68] ss:$16 sps:$4 sm:$0xff]   ;;  %v889_v17 = vld [vmem:[%s1302_s1 + $0x84] ss:$16 sps:$4 sm:$0xff]   ;;  %v891_v18 = vld [vmem:[%s1302_s1 + $0x8c] ss:$16 sps:$4 sm:$0xff]  }
   0x7   :  { %519 = vmatpush1.bf16.msra.mxu0 %v875_v7  ;;  %625 = vmatpush1.bf16.msra.mxu1 %v876_v8  ;;  %v893_v19 = vld [vmem:[%s1302_s1 + $0x80] ss:$16 sps:$4 sm:$0xff]   ;;  %v894_v20 = vld [vmem:[%s1302_s1 + $0x88] ss:$16 sps:$4 sm:$0xff]   ;;  %v895_v21 = vld [vmem:[%s1302_s1 + $0xa4] ss:$16 sps:$4 sm:$0xff]  }
   0x8   :  { %520 = vmatprep.subr.bf16.mxu0 %v877_v9  ;;  %626 = vmatprep.subr.bf16.mxu1 %v879_v10  ;;  %v897_v22 = vld [vmem:[%s1302_s1 + $0xac] ss:$16 sps:$4 sm:$0xff]   ;;  %v899_v23 = vld [vmem:[%s1302_s1 + $0xa0] ss:$16 sps:$4 sm:$0xff]   ;;  %v900_v24 = vld [vmem:[%s1302_s1 + $0xa8] ss:$16 sps:$4 sm:$0xff]  }
   0x9   :  { %v901_v25 = vld [vmem:[%s1302_s1 + $0xc4] ss:$16 sps:$4 sm:$0xff]   ;;  %v903_v26 = vld [vmem:[%s1302_s1 + $0xcc] ss:$16 sps:$4 sm:$0xff]   ;;  %v905_v27 = vld [vmem:[%s1302_s1 + $0xc0] ss:$16 sps:$4 sm:$0xff]  }
   0xa   :  { %v906_v28 = vld [vmem:[%s1302_s1 + $0xc8] ss:$16 sps:$4 sm:$0xff]   ;;  %v907_v29 = vld [vmem:[%s1302_s1 + $0xe4] ss:$16 sps:$4 sm:$0xff]   ;;  %v909_v30 = vld [vmem:[%s1302_s1 + $0xec] ss:$16 sps:$4 sm:$0xff]  }
   0xb   :  { %521 = vmatpush1.bf16.msra.mxu0 %v881_v11  ;;  %627 = vmatpush1.bf16.msra.mxu1 %v882_v12  ;;  %v911_v31 = vld [vmem:[%s1302_s1 + $0xe0] ss:$16 sps:$4 sm:$0xff]   ;;  %v912_v32 = vld [vmem:[%s1302_s1 + $0xe8] ss:$16 sps:$4 sm:$0xff]   ;;  %v913_v33 = vld [vmem:[%s1302_s1 + $0x104] ss:$16 sps:$4 sm:$0xff]  }
   0xc   :  { %522 = vmatprep.subr.bf16.mxu0 %v883_v13  ;;  %628 = vmatprep.subr.bf16.mxu1 %v885_v14  ;;  %v915_v34 = vld [vmem:[%s1302_s1 + $0x10c] ss:$16 sps:$4 sm:$0xff]   ;;  %v917_v35 = vld [vmem:[%s1302_s1 + $0x100] ss:$16 sps:$4 sm:$0xff]   ;;  %v918_v36 = vld [vmem:[%s1302_s1 + $0x108] ss:$16 sps:$4 sm:$0xff]  }
   0xd   :  { %v919_v37 = vld [vmem:[%s1302_s1 + $0x124] ss:$16 sps:$4 sm:$0xff]   ;;  %v921_v38 = vld [vmem:[%s1302_s1 + $0x12c] ss:$16 sps:$4 sm:$0xff]   ;;  %v923_v39 = vld [vmem:[%s1302_s1 + $0x120] ss:$16 sps:$4 sm:$0xff]  }
   0xe   :  { %v924_v40 = vld [vmem:[%s1302_s1 + $0x128] ss:$16 sps:$4 sm:$0xff]   ;;  %v925_v41 = vld [vmem:[%s1302_s1 + $0x144] ss:$16 sps:$4 sm:$0xff]   ;;  %v927_v42 = vld [vmem:[%s1302_s1 + $0x14c] ss:$16 sps:$4 sm:$0xff]  }
   0xf   :  { %523 = vmatpush1.bf16.msra.mxu0 %v887_v15  ;;  %629 = vmatpush1.bf16.msra.mxu1 %v888_v16  ;;  %v929_v43 = vld [vmem:[%s1302_s1 + $0x140] ss:$16 sps:$4 sm:$0xff]   ;;  %v930_v44 = vld [vmem:[%s1302_s1 + $0x148] ss:$16 sps:$4 sm:$0xff]   ;;  %v931_v45 = vld [vmem:[%s1302_s1 + $0x164] ss:$16 sps:$4 sm:$0xff]  }
  0x10   :  { %524 = vmatprep.subr.bf16.mxu0 %v889_v17  ;;  %630 = vmatprep.subr.bf16.mxu1 %v891_v18  ;;  %v933_v46 = vld [vmem:[%s1302_s1 + $0x16c] ss:$16 sps:$4 sm:$0xff]   ;;  %v935_v47 = vld [vmem:[%s1302_s1 + $0x160] ss:$16 sps:$4 sm:$0xff]   ;;  %v936_v48 = vld [vmem:[%s1302_s1 + $0x168] ss:$16 sps:$4 sm:$0xff]  }
  0x11   :  { %v963_v49 = vld [vmem:[%s1303_s0 + $0x4] ss:$12 sps:$4 sm:$0xff]   ;;  %v939_v51 = vld [vmem:[%s1302_s1 + $0x18c] ss:$16 sps:$4 sm:$0xff]   ;;  %v942_v53 = vld [vmem:[%s1302_s1 + $0x188] ss:$16 sps:$4 sm:$0xff]  }
  0x12   :  { %v937_v50 = vld [vmem:[%s1302_s1 + $0x184] ss:$16 sps:$4 sm:$0xff]   ;;  %548 = vmatprep.mubr.bf16.mxu0 %v963_v49  ;;  %654 = vmatprep.mubr.bf16.mxu1 %v963_v49  ;;  %v941_v52 = vld [vmem:[%s1302_s1 + $0x180] ss:$16 sps:$4 sm:$0xff]   ;;  %v945_v55 = vld [vmem:[%s1302_s1 + $0x1ac] ss:$16 sps:$4 sm:$0xff]  }
  0x13   :  { %525 = vmatpush1.bf16.msra.mxu0 %v893_v19  ;;  %631 = vmatpush1.bf16.msra.mxu1 %v894_v20  ;;  %v943_v54 = vld [vmem:[%s1302_s1 + $0x1a4] ss:$16 sps:$4 sm:$0xff]   ;;  %v947_v56 = vld [vmem:[%s1302_s1 + $0x1a0] ss:$16 sps:$4 sm:$0xff]   ;;  %v948_v57 = vld [vmem:[%s1302_s1 + $0x1a8] ss:$16 sps:$4 sm:$0xff]  }
  0x14   :  { %526 = vmatprep.subr.bf16.mxu0 %v895_v21  ;;  %632 = vmatprep.subr.bf16.mxu1 %v897_v22  ;;  %v95_v58 = vld [vmem:[%s1304_s2] sm:$0xff]  ;;  %v951_v60 = vld [vmem:[%s1302_s1 + $0x1cc] ss:$16 sps:$4 sm:$0xff]   ;;  %v97_v61 = vld [vmem:[%s1304_s2 + $0x10] sm:$0xff] }
  0x15   :  { %v949_v59 = vld [vmem:[%s1302_s1 + $0x1c4] ss:$16 sps:$4 sm:$0xff]   ;;  %101 = vperm.xlu0 %863, %v95_v58   ;;  %111 = vperm.xlu1 %864, %v97_v61   ;;  %v96_v62 = vld [vmem:[%s1304_s2 + $0x8] sm:$0xff]  ;;  %v98_v63 = vld [vmem:[%s1304_s2 + $0x18] sm:$0xff] }
  0x16   :  { %v953_v0 = vld [vmem:[%s1302_s1 + $0x1c0] ss:$16 sps:$4 sm:$0xff]   ;;  %v954_v2 = vld [vmem:[%s1302_s1 + $0x1c8] ss:$16 sps:$4 sm:$0xff]   ;;  %v955_v3 = vld [vmem:[%s1302_s1 + $0x1e4] ss:$16 sps:$4 sm:$0xff]  }
  0x17   :  { %527 = vmatpush1.bf16.msra.mxu0 %v899_v23  ;;  %633 = vmatpush1.bf16.msra.mxu1 %v900_v24  ;;  %v957_v4 = vld [vmem:[%s1302_s1 + $0x1ec] ss:$16 sps:$4 sm:$0xff]   ;;  %v959_v5 = vld [vmem:[%s1302_s1 + $0x1e0] ss:$16 sps:$4 sm:$0xff]   ;;  %v960_v6 = vld [vmem:[%s1302_s1 + $0x1e8] ss:$16 sps:$4 sm:$0xff]  }
  0x18   :  { %528 = vmatprep.subr.bf16.mxu0 %v901_v25  ;;  %634 = vmatprep.subr.bf16.mxu1 %v903_v26  ;;  %v966_v7 = vld [vmem:[%s1302_s1 + $0x204] ss:$16 sps:$4 sm:$0xff]   ;;  %v969_v8 = vld [vmem:[%s1302_s1 + $0x20c] ss:$16 sps:$4 sm:$0xff]   ;;  %v964_v10 = vld [vmem:[%s1302_s1 + $0x200] ss:$16 sps:$4 sm:$0xff]  }
  0x19   :  { %106 = vperm.xlu0 %863, %v96_v62   ;;  %116 = vperm.xlu1 %864, %v98_v63   ;;  %v961_v9 = vld [vmem:[%s1303_s0] ss:$12 sps:$4 sm:$0xff]   ;;  %v967_v11 = vld [vmem:[%s1302_s1 + $0x208] ss:$16 sps:$4 sm:$0xff]   ;;  %v975_v13 = vld [vmem:[%s1302_s1 + $0x224] ss:$16 sps:$4 sm:$0xff]  }
  0x1a   :  { %v970_v12 = vld [vmem:[%s1303_s0 + $0x1c] ss:$12 sps:$4 sm:$0xff]   ;;  %v973_v15 = vld [vmem:[%s1302_s1 + $0x220] ss:$16 sps:$4 sm:$0xff]   ;;  %v972_v17 = vld [vmem:[%s1303_s0 + $0x18] ss:$12 sps:$4 sm:$0xff]  }
  0x1b   :  { %529 = vmatpush1.bf16.msra.mxu0 %v905_v27  ;;  %635 = vmatpush1.bf16.msra.mxu1 %v906_v28  ;;  %v978_v14 = vld [vmem:[%s1302_s1 + $0x22c] ss:$16 sps:$4 sm:$0xff]   ;;  %v976_v16 = vld [vmem:[%s1302_s1 + $0x228] ss:$16 sps:$4 sm:$0xff]  }
  0x1c   :  { %530 = vmatprep.subr.bf16.mxu0 %v907_v29  ;;  %636 = vmatprep.subr.bf16.mxu1 %v909_v30  ;;  %v979_v18 = vld [vmem:[%s1303_s0 + $0x8] ss:$12 sps:$4 sm:$0xff]   ;;  %v980_v19 = vld [vmem:[%s1303_s0 + $0x20] ss:$12 sps:$4 sm:$0xff]  }
  0x1f   :  { %531 = vmatpush1.bf16.msra.mxu0 %v911_v31  ;;  %637 = vmatpush1.bf16.msra.mxu1 %v912_v32 }
  0x20   :  { %532 = vmatprep.subr.bf16.mxu0 %v913_v33  ;;  %638 = vmatprep.subr.bf16.mxu1 %v915_v34 }
  0x23   :  { %533 = vmatpush1.bf16.msra.mxu0 %v917_v35  ;;  %639 = vmatpush1.bf16.msra.mxu1 %v918_v36 }
  0x24   :  { %534 = vmatprep.subr.bf16.mxu0 %v919_v37  ;;  %640 = vmatprep.subr.bf16.mxu1 %v921_v38 }
  0x27   :  { %535 = vmatpush1.bf16.msra.mxu0 %v923_v39  ;;  %641 = vmatpush1.bf16.msra.mxu1 %v924_v40 }
  0x28   :  { %536 = vmatprep.subr.bf16.mxu0 %v925_v41  ;;  %642 = vmatprep.subr.bf16.mxu1 %v927_v42 }
  0x2b   :  { %537 = vmatpush1.bf16.msra.mxu0 %v929_v43  ;;  %643 = vmatpush1.bf16.msra.mxu1 %v930_v44 }
  0x2c   :  { %538 = vmatprep.subr.bf16.mxu0 %v931_v45  ;;  %644 = vmatprep.subr.bf16.mxu1 %v933_v46 }
  0x2f   :  { %539 = vmatpush1.bf16.msra.mxu0 %v935_v47  ;;  %645 = vmatpush1.bf16.msra.mxu1 %v936_v48 }
  0x30   :  { %540 = vmatprep.subr.bf16.mxu0 %v937_v50  ;;  %646 = vmatprep.subr.bf16.mxu1 %v939_v51 }
  0x33   :  { %541 = vmatpush1.bf16.msra.mxu0 %v941_v52  ;;  %647 = vmatpush1.bf16.msra.mxu1 %v942_v53 }
  0x34   :  { %542 = vmatprep.subr.bf16.mxu0 %v943_v54  ;;  %648 = vmatprep.subr.bf16.mxu1 %v945_v55 }
  0x37   :  { %543 = vmatpush1.bf16.msra.mxu0 %v947_v56  ;;  %649 = vmatpush1.bf16.msra.mxu1 %v948_v57 }
  0x38   :  { %544 = vmatprep.subr.bf16.mxu0 %v949_v59  ;;  %650 = vmatprep.subr.bf16.mxu1 %v951_v60 }
  0x3b   :  { %545 = vmatpush1.bf16.msra.mxu0 %v953_v0  ;;  %651 = vmatpush1.bf16.msra.mxu1 %v954_v2 }
  0x3c   :  { %546 = vmatprep.subr.bf16.mxu0 %v955_v3  ;;  %652 = vmatprep.subr.bf16.mxu1 %v957_v4 }
  0x3f   :  { %547 = vmatpush1.bf16.msra.mxu0 %v959_v5  ;;  %653 = vmatpush1.bf16.msra.mxu1 %v960_v6 }
  0x40   :  { %569 = vmatprep.subr.bf16.mxu0 %v966_v7  ;;  %675 = vmatprep.subr.bf16.mxu1 %v969_v8 }
  0x42   :  { %549 = vmatmul.mubr.bf16.vlgmr.msra.gmra.mrb[0].mxu0 %v961_v9  ;;  %655 = vmatmul.mubr.bf16.vlgmr.msra.gmra.mrb[0].mxu1 %v961_v9 }
  0x43   :  { %570 = vmatpush1.bf16.msra.mxu0 %v964_v10  ;;  %676 = vmatpush1.bf16.msra.mxu1 %v967_v11 }
  0x44   :  { %558 = vmatprep.mubr.bf16.mxu0 %v970_v12  ;;  %664 = vmatprep.mubr.bf16.mxu1 %v970_v12 }
  0x45   :  { %571 = vmatprep.subr.bf16.mxu0 %v975_v13  ;;  %677 = vmatprep.subr.bf16.mxu1 %v978_v14 }
  0x47   :  { %572 = vmatpush1.bf16.msra.mxu0 %v973_v15  ;;  %678 = vmatpush1.bf16.msra.mxu1 %v976_v16 }
  0x4a   :  { %559 = vmatmul.mubr.bf16.gmra.mrb[4].mxu0 %v972_v17  ;;  %665 = vmatmul.mubr.bf16.gmra.mrb[4].mxu1 %v972_v17 }
  0x4b   :  { %601 = vmatprep.mubr.bf16.mxu0 %v981_v1  ;;  %707 = vmatprep.mubr.bf16.mxu1 %v981_v1 }
  0x52   :  { %826 = vmatmul.mubr.msk.bf16.vlgmr.msra.gmra.mrb[0].mxu0 %vm509_vm0, %v979_v18  ;;  %828 = vmatmul.mubr.msk.bf16.vlgmr.msra.gmra.mrb[0].mxu1 %vm509_vm0, %v979_v18 }
  0x53   :  { %611 = vmatprep.mubr.bf16.mxu0 %v981_v1  ;;  %717 = vmatprep.mubr.bf16.mxu1 %v981_v1 }
  0x5a   :  { %827 = vmatmul.mubr.msk.bf16.gmra.mrb[4].mxu0 %vm509_vm0, %v980_v19  ;;  %829 = vmatmul.mubr.msk.bf16.gmra.mrb[4].mxu1 %vm509_vm0, %v980_v19 }
  0x94   :  { %v102_v20 = vpop.permute.xlu0 %101  ;;  %v112_v22 = vpop.permute.xlu1 %111 }
  0x98   :  { %v107_v21 = vpop.permute.xlu0 %106  ;;  %v117_v38 = vpop.permute.xlu1 %116 }
 0x125   :  { %v603_v23 = vpop.f32.mrb[0].mxu0  ;;  %v709_v24 = vpop.f32.mrb[0].mxu1 }
 0x126   :  { %v830_v25 = vadd.f32 %v603_v23, %v102_v20  ;;  %v838_v26 = vadd.f32 %v709_v24, %v102_v20  ;;  %v605_v27 = vpop.f32.mrb[1].mxu0  ;;  %v711_v28 = vpop.f32.mrb[1].mxu1 }
 0x127   :  { %v831_v29 = vadd.f32 %v605_v27, %v102_v20  ;;  %v839_v30 = vadd.f32 %v711_v28, %v102_v20  ;;  %v607_v31 = vpop.f32.mrb[2].mxu0  ;;  %v713_v32 = vpop.f32.mrb[2].mxu1 }
 0x128   :  { %728 = vst [vmem:[%s1305_s3] sm:$0xff] %v830_v25  ;;  %730 = vst [vmem:[%s1305_s3 + $0x10] sm:$0xff] %v838_v26  ;;  %v832_v1 = vadd.f32 %v607_v31, %v107_v21  ;;  %v840_v33 = vadd.f32 %v713_v32, %v107_v21  ;;  %v609_v34 = vpop.f32.mrb[3].mxu0  ;;  %v715_v35 = vpop.f32.mrb[3].mxu1 }
 0x129   :  { %729 = vst [vmem:[%s1305_s3 + $0x8] sm:$0xff] %v831_v29  ;;  %731 = vst [vmem:[%s1305_s3 + $0x18] sm:$0xff] %v839_v30  ;;  %v833_v36 = vadd.f32 %v609_v34, %v107_v21  ;;  %v841_v37 = vadd.f32 %v715_v35, %v107_v21 }
 0x12a   :  { %732 = vst [vmem:[%s1305_s3 + $0x20] sm:$0xff] %v832_v1  ;;  %734 = vst [vmem:[%s1305_s3 + $0x30] sm:$0xff] %v840_v33 }
 0x12b   :  { %733 = vst [vmem:[%s1305_s3 + $0x28] sm:$0xff] %v833_v36  ;;  %735 = vst [vmem:[%s1305_s3 + $0x38] sm:$0xff] %v841_v37 }
 0x12d   :  { %v613_v39 = vpop.f32.mrb[4].mxu0  ;;  %v719_v40 = vpop.f32.mrb[4].mxu1 }
 0x12e   :  { %v834_v41 = vadd.f32 %v613_v39, %v112_v22  ;;  %v842_v42 = vadd.f32 %v719_v40, %v112_v22  ;;  %v615_v43 = vpop.f32.mrb[5].mxu0  ;;  %v721_v44 = vpop.f32.mrb[5].mxu1 }
 0x12f   :  { %v835_v45 = vadd.f32 %v615_v43, %v112_v22  ;;  %v843_v46 = vadd.f32 %v721_v44, %v112_v22  ;;  %v617_v47 = vpop.f32.mrb[6].mxu0  ;;  %v723_v48 = vpop.f32.mrb[6].mxu1 }
 0x130   :  { %736 = vst [vmem:[%s1305_s3 + $0x40] sm:$0xff] %v834_v41  ;;  %738 = vst [vmem:[%s1305_s3 + $0x50] sm:$0xff] %v842_v42  ;;  %v836_v49 = vadd.f32 %v617_v47, %v117_v38  ;;  %v844_v50 = vadd.f32 %v723_v48, %v117_v38  ;;  %v619_v51 = vpop.f32.mrb[7].mxu0  ;;  %v725_v52 = vpop.f32.mrb[7].mxu1 }
 0x131   :  { %737 = vst [vmem:[%s1305_s3 + $0x48] sm:$0xff] %v835_v45  ;;  %739 = vst [vmem:[%s1305_s3 + $0x58] sm:$0xff] %v843_v46  ;;  %v837_v53 = vadd.f32 %v619_v51, %v117_v38  ;;  %v845_v54 = vadd.f32 %v725_v52, %v117_v38 }
 0x132   :  { %740 = vst [vmem:[%s1305_s3 + $0x60] sm:$0xff] %v836_v49  ;;  %742 = vst [vmem:[%s1305_s3 + $0x70] sm:$0xff] %v844_v50 }
 0x133   :  { %741 = vst [vmem:[%s1305_s3 + $0x68] sm:$0xff] %v837_v53  ;;  %743 = vst [vmem:[%s1305_s3 + $0x78] sm:$0xff] %v845_v54 }

// kernel: earthfarseer_forward.46
= control target key start
LH: loop header
LB: loop body
LE: loop exit
PB: predicated region body
PF: predicated region fallthrough
CT: control target
= control target key end

     0   :  { %s571_s12 = smov 0   ;;  %s573_s13 = smov 0   ;;  %s641_s0 = inlined_call_operand.vmem [shape: f32[8,2,16,64], index: 0, kind: input, shape index: {}]   ;;  %s642_s1 = inlined_call_operand.vmem [shape: f32[2,16,1], index: 1, kind: input, shape index: {}]   ;;  %s643_s2 = inlined_call_operand.vmem [shape: f32[2,16,1], index: 2, kind: input, shape index: {}]   ;;  %s644_s3 = inlined_call_operand.vmem [shape: f32[8,2,16,64], index: 3, kind: output, shape index: {}]  }
   0x1   :  { %s575_s14 = smov 0   ;;  %s577_s15 = smov 0  }
   0x2   :  { %s579_s16 = smov 0  }
   0x3 LB: > { %s22_s17 = sadd.s32 1, %s540_s14  ;;  %s25_s18 = sadd.s32 1, %s544_s15  ;;  %s548_s16 = sphi %s579_s16, %s13_s16   ;;  %s544_s15 = sphi %s577_s15, %s648_s15   ;;  %s540_s14 = sphi %s575_s14, %s647_s14   ;;  %s536_s13 = sphi %s573_s13, %s646_s13   ;;  %s532_s12 = sphi %s571_s12, %s645_s12  }
   0x4   : > { %p23_p0 = scmp.ge.s32.totalorder %s22_s17, 2  ;;  %p446_p1 = scmp.ge.s32.totalorder %s548_s16, 1 }
   0x5   : > { %p177_p2 = scmp.lt.s32.totalorder %s548_s16, 17 }
   0x6   : > { %s650_s17 = smov (%p23_p0, %s22_s17), 0  ;;  %s652_s18 = smov (!%p23_p0, %s25_s18), %s544_s15 }
   0x7   : > { %p178_p3 = pnand %p446_p1, %p177_p2  ;;  %p27_p4 = scmp.ge.s32.totalorder %s652_s18, 8 }
   0x8   : > { %p219_p5 = scmp.lt.s32.totalorder (!%p178_p3), %s536_s13, 7  ;;  %p221_p6 = scmp.lt.s32.totalorder (!%p178_p3), %s532_s12, 1  ;;  %vm249_vm0 = vcmask (!%p178_p3), 523264   ;;  %v550_v5 = vmov (!%p178_p3), 0  }
   0x9   : > { %s654_s18 = smov (%p27_p4, %s652_s18), 0  ;;  %181 = sbr.rel (%p178_p3) target bundleno = 469 (0x1d5), region = 32 }
   0xa   : > { %506 = vset.pattern.permute.xlu1 (!%p178_p3), %v550_v5  ;;  %507 = vset.pattern.permute.xlu0 (!%p178_p3), %v550_v5 }
  0x10   : > { %s656_s13 = smov (!%p219_p5, %s536_s13), 7  ;;  %s658_s12 = smov (!%p221_p6, %s532_s12), 1 }
  0x11   : > { %s448_s19 = sshll.u32 %s656_s13, 2  ;;  %s447_s20 = sshll.u32 %s658_s12, 1 }
  0x12   : > { %s601_s21 = sadd.s32 %s448_s19, %s447_s20  ;;  %s459_s26 = sshll.u32 %s658_s12, 4 }
  0x13   : > { %s449_s22 = sshll.u32 %s601_s21, 3  ;;  %s232_s29 = scalar_lea.vmem %s642_s1, %s459_s26 }
  0x14   : > { %s227_s25 = scalar_lea.vmem %s641_s0, %s449_s22  ;;  %v287_v6 = vld [vmem:[%s232_s29] sm:$0xff]  ;;  %v288_v7 = vld [vmem:[%s232_s29 + $0x8] sm:$0xff]  ;;  %s237_s5 = scalar_lea.vmem %s643_s2, %s459_s26 }
  0x15   : > { %v247_v0 = vld [vmem:[%s227_s25] sm:$0xff]  ;;  %v248_v1 = vld [vmem:[%s227_s25 + $0x8] sm:$0xff]  ;;  %291 = vperm.xlu1 %506, %v287_v6   ;;  %s246_s10 = scalar_lea.vmem %s644_s3, %s449_s22 }
  0x16   : > { %v250_v2 = vsel %vm249_vm0, %v247_v0, 0.0  ;;  %v251_v3 = vsel %vm249_vm0, %v248_v1, 0.0  ;;  %v302_v8 = vld [vmem:[%s237_s5 + $0x8] sm:$0xff]  ;;  %v301_v25 = vld [vmem:[%s237_s5] sm:$0xff] }
  0x17   : > { %v252_v4 = vadd.f32 %v251_v3, %v250_v2 }
  0x19   : > { %253 = vadd.xlane.f32.xlu0 %v252_v4  ;;  %296 = vperm.xlu1 %506, %v288_v7  }
  0x1d   : > { %310 = vperm.xlu1 %506, %v302_v8  }
  0x94   : > { %v292_v36 = vpop.permute.xlu1 %291 }
  0x98   : > { %v297_v37 = vpop.permute.xlu1 %296 }
  0x9c   : > { %v311_v44 = vpop.permute.xlu1 %310 }
  0xa6   : > { %v254_v9 = vpop.xlane.xlu0 %253 }
  0xa7   : > { %v255_v10 = vrot.slane %v254_v9, 4 }
  0xa9   : > { %v256_v11 = vadd.f32 %v255_v10, %v254_v9 }
  0xab   : > { %v257_v12 = vrot.slane %v256_v11, 2 }
  0xad   : > { %v258_v13 = vadd.f32 %v257_v12, %v256_v11 }
  0xaf   : > { %v259_v14 = vrot.slane %v258_v13, 1 }
  0xb1   : > { %v260_v15 = vadd.f32 %v259_v14, %v258_v13 }
  0xb3   : > { %461 = vpush %v260_v15 }
  0xe4   : > { %s462_s6 = spop %461 }
  0xe5   : > { %v262_v16 = vstv %s462_s6 }
  0xe6   : > { %v264_v17 = vmul.f32 0.0009765625, %v262_v16 }
  0xe8   : > { %v265_v18 = vsub.f32 %v247_v0, %v264_v17  ;;  %v266_v19 = vsub.f32 %v248_v1, %v264_v17 }
  0xea   : > { %v267_v20 = vmul.f32 %v265_v18, %v265_v18  ;;  %v268_v21 = vmul.f32 %v266_v19, %v266_v19 }
  0xec   : > { %v269_v22 = vsel %vm249_vm0, %v267_v20, 0.0  ;;  %v270_v23 = vsel %vm249_vm0, %v268_v21, 0.0 }
  0xed   : > { %v271_v24 = vadd.f32 %v270_v23, %v269_v22 }
  0xef   : > { %272 = vadd.xlane.f32.xlu0 %v271_v24 }
 0x105   : > { %305 = vperm.xlu0 %507, %v301_v25  }
 0x17c   : > { %v273_v26 = vpop.xlane.xlu0 %272 }
 0x17d   : > { %v274_v27 = vrot.slane %v273_v26, 4 }
 0x17f   : > { %v275_v28 = vadd.f32 %v274_v27, %v273_v26 }
 0x181   : > { %v276_v29 = vrot.slane %v275_v28, 2 }
 0x183   : > { %v277_v30 = vadd.f32 %v276_v29, %v275_v28 }
 0x184   : > { %v306_v41 = vpop.permute.xlu0 %305 }
 0x185   : > { %v278_v31 = vrot.slane %v277_v30, 1 }
 0x187   : > { %v279_v32 = vadd.f32 %v278_v31, %v277_v30 }
 0x189   : > { %463 = vpush %v279_v32 }
 0x1ba   : > { %s464_s7 = spop %463 }
 0x1bb   : > { %v281_v33 = vstv %s464_s7 }
 0x1bc   : > { %v282_v34 = vmul.f32 0.0009765625, %v281_v33 }
 0x1be   : > { %v283_v35 = vadd.f32 1e-05, %v282_v34 }
 0x1c0   : > { %508 = vrsqrt.f32 %v283_v35 }
 0x1ca   : > { %v509_v38 = vpop.eup %508 }
 0x1cb   : > { %v285_v39 = vmul.f32 %v509_v38, %v265_v18  ;;  %v286_v40 = vmul.f32 %v509_v38, %v266_v19 }
 0x1cd   : > { %v299_v42 = vmul.f32 %v292_v36, %v285_v39  ;;  %v300_v43 = vmul.f32 %v297_v37, %v286_v40 }
 0x1cf   : > { %v314_v45 = vadd.f32 %v311_v44, %v300_v43  ;;  %v313_v46 = vadd.f32 %v306_v41, %v299_v42 }
 0x1d1   : > { %vm316_vm1 = vcmp.gt.f32.partialorder %v314_v45, 0.0  ;;  %v318_v47 = vmul.f32 0.2, %v314_v45  ;;  %vm315_vm2 = vcmp.gt.f32.partialorder %v313_v46, 0.0  ;;  %v317_v48 = vmul.f32 0.2, %v313_v46 }
 0x1d3   : > { %v320_v49 = vsel %vm316_vm1, %v314_v45, %v318_v47  ;;  %v319_v50 = vsel %vm315_vm2, %v313_v46, %v317_v48 }
 0x1d4   : > { %322 = vst.msk [vmem:[%s246_s10 + $0x8] sm:$0xff] %vm249_vm0, %v320_v49  ;;  %321 = vst.msk [vmem:[%s246_s10] sm:$0xff] %vm249_vm0, %v319_v50 }
 0x1d5 PF: > { %s13_s16 = sadd.s32 1, %s548_s16   ;;  %s645_s12 = smov %s540_s14 }
 0x1d6   : > { %p10_p7 = scmp.ge.s32.totalorder %s13_s16, 18   ;;  %s646_s13 = smov %s544_s15 }
 0x1d7   : > { %s647_s14 = smov %s650_s17  ;;  %s648_s15 = smov %s654_s18 }
 0x1d8   :  { %12 = sbr.rel (!%p10_p7) target bundleno = 3 (0x3), region = 68 }

// kernel: earthfarseer_forward.49
= control target key start
LH: loop header
LB: loop body
LE: loop exit
PB: predicated region body
PF: predicated region fallthrough
CT: control target
= control target key end

     0   :  { %v429_v1 = vmov 0   ;;  %vm221_vm0 = vcmask 261120   ;;  %s548_s1 = inlined_call_operand.vmem [shape: bf16[1,288,128], index: 1, kind: input, shape index: {}]   ;;  %s549_s0 = inlined_call_operand.vmem [shape: bf16[1,32,288], index: 0, kind: input, shape index: {}]   ;;  %s550_s2 = inlined_call_operand.vmem [shape: f32[1,32,1], index: 2, kind: input, shape index: {}]   ;;  %s551_s3 = inlined_call_operand.vmem [shape: f32[1,32,128], index: 3, kind: output, shape index: {}]  }
   0x1   :  { %v403_v0 = vld [vmem:[%s548_s1 + $0x40] sm:$0xff]   ;;  %401 = vset.pattern.permute.xlu0 %v429_v1  ;;  %402 = vset.pattern.permute.xlu1 %v429_v1  ;;  %v405_v3 = vld [vmem:[%s548_s1 + $0x48] sm:$0xff]   ;;  %v407_v5 = vld [vmem:[%s548_s1 + $0x50] sm:$0xff]  }
   0x2   :  { %v404_v2 = vld [vmem:[%s548_s1] sm:$0xff]   ;;  %360 = vmatprep.subr.bf16.mxu0 %v403_v0  ;;  %v406_v4 = vld [vmem:[%s548_s1 + $0x8] sm:$0xff]   ;;  %v408_v6 = vld [vmem:[%s548_s1 + $0x10] sm:$0xff]  }
   0x3   :  { %361 = vmatpush3.bf16.msra.mxu0 %v404_v2  ;;  %v409_v7 = vld [vmem:[%s548_s1 + $0x58] sm:$0xff]   ;;  %v411_v9 = vld [vmem:[%s548_s1 + $0x60] sm:$0xff]   ;;  %v413_v12 = vld [vmem:[%s548_s1 + $0x68] sm:$0xff]  }
   0x4   :  { %362 = vmatprep.subr.bf16.mxu0 %v405_v3  ;;  %v410_v8 = vld [vmem:[%s548_s1 + $0x18] sm:$0xff]   ;;  %v412_v10 = vld [vmem:[%s548_s1 + $0x20] sm:$0xff]   ;;  %v414_v13 = vld [vmem:[%s548_s1 + $0x28] sm:$0xff]  }
   0x5   :  { %v418_v11 = vld [vmem:[%s548_s1 + $0x80] sm:$0xff]   ;;  %v415_v14 = vld [vmem:[%s548_s1 + $0x70] sm:$0xff]   ;;  %v423_v16 = vld [vmem:[%s548_s1 + $0x88] sm:$0xff]  }
   0x6   :  { %392 = vmatprep.subr.bf16.mxu1 %v418_v11  ;;  %v422_v15 = vld [vmem:[%s549_s0 + $0x4] ss:$12 sps:$4 sm:$0xff]   ;;  %v424_v17 = vld [vmem:[%s549_s0 + $0x8] ss:$12 sps:$4 sm:$0xff]   ;;  %v425_v18 = vld [vmem:[%s549_s0 + $0x20] ss:$12 sps:$4 sm:$0xff]  }
   0x7   :  { %363 = vmatpush3.bf16.msra.mxu0 %v406_v4  ;;  %393 = vmatpush3.bf16.msra.mxu1 %v418_v11  ;;  %v59_v19 = vld [vmem:[%s550_s2] sm:$0xff]  ;;  %v416_v20 = vld [vmem:[%s548_s1 + $0x30] sm:$0xff]   ;;  %v417_v22 = vld [vmem:[%s548_s1 + $0x78] sm:$0xff]  }
   0x8   :  { %364 = vmatprep.subr.bf16.mxu0 %v407_v5  ;;  %260 = vmatprep.mubr.bf16.mxu0 %v422_v15  ;;  %v61_v21 = vld [vmem:[%s550_s2 + $0x10] sm:$0xff]  ;;  %v60_v23 = vld [vmem:[%s550_s2 + $0x8] sm:$0xff]  ;;  %v62_v24 = vld [vmem:[%s550_s2 + $0x18] sm:$0xff] }
   0x9   :  { %394 = vmatprep.subr.bf16.mxu1 %v423_v16  ;;  %396 = vmatprep.mubr.msk.bf16.mxu1 %vm221_vm0, %v424_v17  ;;  %v419_v25 = vld [vmem:[%s548_s1 + $0x38] sm:$0xff]   ;;  %v420_v26 = vld [vmem:[%s549_s0] ss:$12 sps:$4 sm:$0xff]  }
   0xa   :  { %65 = vperm.xlu0 %401, %v59_v19   ;;  %75 = vperm.xlu1 %402, %v61_v21   ;;  %v426_v27 = vld [vmem:[%s549_s0 + $0x1c] ss:$12 sps:$4 sm:$0xff]   ;;  %v428_v28 = vld [vmem:[%s549_s0 + $0x18] ss:$12 sps:$4 sm:$0xff]  }
   0xb   :  { %365 = vmatpush3.bf16.msra.mxu0 %v408_v6  ;;  %395 = vmatpush3.bf16.msra.mxu1 %v423_v16 }
   0xc   :  { %366 = vmatprep.subr.bf16.mxu0 %v409_v7 }
   0xe   :  { %397 = vmatmul.mubr.msk.bf16.vlgmr.msra.gmra.mrb[0].mxu1 %vm221_vm0, %v425_v18  ;;  %70 = vperm.xlu0 %401, %v60_v23  }
   0xf   :  { %367 = vmatpush3.bf16.msra.mxu0 %v410_v8  ;;  %80 = vperm.xlu1 %402, %v62_v24  }
  0x10   :  { %368 = vmatprep.subr.bf16.mxu0 %v411_v9 }
  0x13   :  { %369 = vmatpush3.bf16.msra.mxu0 %v412_v10 }
  0x14   :  { %370 = vmatprep.subr.bf16.mxu0 %v413_v12 }
  0x17   :  { %371 = vmatpush3.bf16.msra.mxu0 %v414_v13 }
  0x18   :  { %372 = vmatprep.subr.bf16.mxu0 %v415_v14 }
  0x1b   :  { %373 = vmatpush3.bf16.msra.mxu0 %v416_v20 }
  0x1c   :  { %374 = vmatprep.subr.bf16.mxu0 %v417_v22 }
  0x1f   :  { %375 = vmatpush3.bf16.msra.mxu0 %v419_v25 }
  0x22   :  { %261 = vmatmul.mubr.bf16.vlgmr.msra.gmra.mrb[0].mxu0 %v420_v26 }
  0x23   :  { %268 = vmatprep.mubr.bf16.mxu0 %v426_v27 }
  0x2a   :  { %269 = vmatmul.mubr.bf16.gmra.mrb[4].mxu0 %v428_v28 }
  0x89   :  { %v66_v33 = vpop.permute.xlu0 %65  ;;  %v76_v44 = vpop.permute.xlu1 %75 }
  0x8d   :  { %v71_v39 = vpop.permute.xlu0 %70 }
  0x8e   :  { %v81_v53 = vpop.permute.xlu1 %80 }
  0xe1   :  { %v398_v29 = vpop.f32.mrb[0].mxu1 }
  0xe2   :  { %v311_v30 = vpop.f32.mrb[1].mxu1 }
  0xe3   :  { %v399_v31 = vpop.f32.mrb[2].mxu1 }
  0xe4   :  { %v314_v32 = vpop.f32.mrb[3].mxu1 }
  0xf5   :  { %v376_v34 = vpop.f32.mrb[0].mxu0 }
  0xf6   :  { %v377_v35 = vpop.f32.mrb[1].mxu0 }
  0xf7   :  { %v378_v36 = vadd.f32 %v377_v35, %v376_v34  ;;  %v379_v37 = vpop.f32.mrb[2].mxu0 }
  0xf8   :  { %v380_v38 = vpop.f32.mrb[3].mxu0 }
  0xf9   :  { %v381_v40 = vadd.f32 %v380_v38, %v379_v37  ;;  %v263_v41 = vadd.f32 %v378_v36, %v66_v33 }
  0xfb   :  { %v266_v42 = vadd.f32 %v381_v40, %v71_v39  ;;  %v312_v43 = vadd.f32 %v311_v30, %v263_v41 }
  0xfd   :  { %326 = vst [vmem:[%s551_s3] sm:$0xff] %v312_v43  ;;  %v315_v45 = vadd.f32 %v314_v32, %v266_v42  ;;  %v382_v46 = vpop.f32.mrb[4].mxu0 }
  0xfe   :  { %v383_v47 = vpop.f32.mrb[5].mxu0 }
  0xff   :  { %327 = vst [vmem:[%s551_s3 + $0x8] sm:$0xff] %v315_v45  ;;  %v384_v48 = vadd.f32 %v383_v47, %v382_v46  ;;  %v385_v49 = vpop.f32.mrb[6].mxu0 }
 0x100   :  { %v386_v50 = vpop.f32.mrb[7].mxu0 }
 0x101   :  { %v271_v51 = vadd.f32 %v384_v48, %v76_v44  ;;  %v387_v52 = vadd.f32 %v386_v50, %v385_v49 }
 0x103   :  { %v320_v54 = vadd.f32 %v398_v29, %v271_v51  ;;  %v274_v55 = vadd.f32 %v387_v52, %v81_v53 }
 0x105   :  { %328 = vst [vmem:[%s551_s3 + $0x10] sm:$0xff] %v320_v54  ;;  %v323_v56 = vadd.f32 %v399_v31, %v274_v55 }
 0x107   :  { %329 = vst [vmem:[%s551_s3 + $0x18] sm:$0xff] %v323_v56 }

// kernel: earthfarseer_forward.50
= control target key start
LH: loop header
LB: loop body
LE: loop exit
PB: predicated region body
PF: predicated region fallthrough
CT: control target
= control target key end

     0   :  { %s571_s12 = smov 0   ;;  %s573_s13 = smov 0   ;;  %s641_s0 = inlined_call_operand.vmem [shape: f32[8,2,16,16], index: 0, kind: input, shape index: {}]   ;;  %s642_s1 = inlined_call_operand.vmem [shape: f32[2,16,1], index: 1, kind: input, shape index: {}]   ;;  %s643_s2 = inlined_call_operand.vmem [shape: f32[2,16,1], index: 2, kind: input, shape index: {}]   ;;  %s644_s3 = inlined_call_operand.vmem [shape: f32[8,2,16,16], index: 3, kind: output, shape index: {}]  }
   0x1   :  { %s575_s14 = smov 0   ;;  %s577_s15 = smov 0  }
   0x2   :  { %s579_s16 = smov 0  }
   0x3 LB: > { %s22_s17 = sadd.s32 1, %s540_s14  ;;  %s25_s18 = sadd.s32 1, %s544_s15  ;;  %s548_s16 = sphi %s579_s16, %s13_s16   ;;  %s544_s15 = sphi %s577_s15, %s648_s15   ;;  %s540_s14 = sphi %s575_s14, %s647_s14   ;;  %s536_s13 = sphi %s573_s13, %s646_s13   ;;  %s532_s12 = sphi %s571_s12, %s645_s12  }
   0x4   : > { %p23_p0 = scmp.ge.s32.totalorder %s22_s17, 2  ;;  %p446_p1 = scmp.ge.s32.totalorder %s548_s16, 1 }
   0x5   : > { %p177_p2 = scmp.lt.s32.totalorder %s548_s16, 17 }
   0x6   : > { %s650_s17 = smov (%p23_p0, %s22_s17), 0  ;;  %s652_s18 = smov (!%p23_p0, %s25_s18), %s544_s15 }
   0x7   : > { %p178_p3 = pnand %p446_p1, %p177_p2  ;;  %p27_p4 = scmp.ge.s32.totalorder %s652_s18, 8 }
   0x8   : > { %p219_p5 = scmp.lt.s32.totalorder (!%p178_p3), %s536_s13, 7  ;;  %p221_p6 = scmp.lt.s32.totalorder (!%p178_p3), %s532_s12, 1  ;;  %vm249_vm0 = vcmask (!%p178_p3), 130048   ;;  %v550_v5 = vmov (!%p178_p3), 0  }
   0x9   : > { %s654_s18 = smov (%p27_p4, %s652_s18), 0  ;;  %181 = sbr.rel (%p178_p3) target bundleno = 469 (0x1d5), region = 32 }
   0xa   : > { %506 = vset.pattern.permute.xlu1 (!%p178_p3), %v550_v5  ;;  %507 = vset.pattern.permute.xlu0 (!%p178_p3), %v550_v5 }
  0x10   : > { %s656_s13 = smov (!%p219_p5, %s536_s13), 7  ;;  %s658_s12 = smov (!%p221_p6, %s532_s12), 1 }
  0x11   : > { %s448_s19 = sshll.u32 %s656_s13, 2  ;;  %s447_s20 = sshll.u32 %s658_s12, 1 }
  0x12   : > { %s601_s21 = sadd.s32 %s448_s19, %s447_s20  ;;  %s459_s26 = sshll.u32 %s658_s12, 4 }
  0x13   : > { %s449_s22 = sshll.u32 %s601_s21, 3  ;;  %s232_s29 = scalar_lea.vmem %s642_s1, %s459_s26 }
  0x14   : > { %s227_s25 = scalar_lea.vmem %s641_s0, %s449_s22  ;;  %v287_v6 = vld [vmem:[%s232_s29] sm:$0xff]  ;;  %v288_v7 = vld [vmem:[%s232_s29 + $0x8] sm:$0xff]  ;;  %s237_s5 = scalar_lea.vmem %s643_s2, %s459_s26 }
  0x15   : > { %v247_v0 = vld [vmem:[%s227_s25] sm:$0xff]  ;;  %v248_v1 = vld [vmem:[%s227_s25 + $0x8] sm:$0xff]  ;;  %291 = vperm.xlu1 %506, %v287_v6   ;;  %s246_s10 = scalar_lea.vmem %s644_s3, %s449_s22 }
  0x16   : > { %v250_v2 = vsel %vm249_vm0, %v247_v0, 0.0  ;;  %v251_v3 = vsel %vm249_vm0, %v248_v1, 0.0  ;;  %v302_v8 = vld [vmem:[%s237_s5 + $0x8] sm:$0xff]  ;;  %v301_v25 = vld [vmem:[%s237_s5] sm:$0xff] }
  0x17   : > { %v252_v4 = vadd.f32 %v251_v3, %v250_v2 }
  0x19   : > { %253 = vadd.xlane.f32.xlu0 %v252_v4  ;;  %296 = vperm.xlu1 %506, %v288_v7  }
  0x1d   : > { %310 = vperm.xlu1 %506, %v302_v8  }
  0x94   : > { %v292_v36 = vpop.permute.xlu1 %291 }
  0x98   : > { %v297_v37 = vpop.permute.xlu1 %296 }
  0x9c   : > { %v311_v44 = vpop.permute.xlu1 %310 }
  0xa6   : > { %v254_v9 = vpop.xlane.xlu0 %253 }
  0xa7   : > { %v255_v10 = vrot.slane %v254_v9, 4 }
  0xa9   : > { %v256_v11 = vadd.f32 %v255_v10, %v254_v9 }
  0xab   : > { %v257_v12 = vrot.slane %v256_v11, 2 }
  0xad   : > { %v258_v13 = vadd.f32 %v257_v12, %v256_v11 }
  0xaf   : > { %v259_v14 = vrot.slane %v258_v13, 1 }
  0xb1   : > { %v260_v15 = vadd.f32 %v259_v14, %v258_v13 }
  0xb3   : > { %461 = vpush %v260_v15 }
  0xe4   : > { %s462_s6 = spop %461 }
  0xe5   : > { %v262_v16 = vstv %s462_s6 }
  0xe6   : > { %v264_v17 = vmul.f32 0.00390625, %v262_v16 }
  0xe8   : > { %v265_v18 = vsub.f32 %v247_v0, %v264_v17  ;;  %v266_v19 = vsub.f32 %v248_v1, %v264_v17 }
  0xea   : > { %v267_v20 = vmul.f32 %v265_v18, %v265_v18  ;;  %v268_v21 = vmul.f32 %v266_v19, %v266_v19 }
  0xec   : > { %v269_v22 = vsel %vm249_vm0, %v267_v20, 0.0  ;;  %v270_v23 = vsel %vm249_vm0, %v268_v21, 0.0 }
  0xed   : > { %v271_v24 = vadd.f32 %v270_v23, %v269_v22 }
  0xef   : > { %272 = vadd.xlane.f32.xlu0 %v271_v24 }
 0x105   : > { %305 = vperm.xlu0 %507, %v301_v25  }
 0x17c   : > { %v273_v26 = vpop.xlane.xlu0 %272 }
 0x17d   : > { %v274_v27 = vrot.slane %v273_v26, 4 }
 0x17f   : > { %v275_v28 = vadd.f32 %v274_v27, %v273_v26 }
 0x181   : > { %v276_v29 = vrot.slane %v275_v28, 2 }
 0x183   : > { %v277_v30 = vadd.f32 %v276_v29, %v275_v28 }
 0x184   : > { %v306_v41 = vpop.permute.xlu0 %305 }
 0x185   : > { %v278_v31 = vrot.slane %v277_v30, 1 }
 0x187   : > { %v279_v32 = vadd.f32 %v278_v31, %v277_v30 }
 0x189   : > { %463 = vpush %v279_v32 }
 0x1ba   : > { %s464_s7 = spop %463 }
 0x1bb   : > { %v281_v33 = vstv %s464_s7 }
 0x1bc   : > { %v282_v34 = vmul.f32 0.00390625, %v281_v33 }
 0x1be   : > { %v283_v35 = vadd.f32 1e-05, %v282_v34 }
 0x1c0   : > { %508 = vrsqrt.f32 %v283_v35 }
 0x1ca   : > { %v509_v38 = vpop.eup %508 }
 0x1cb   : > { %v285_v39 = vmul.f32 %v509_v38, %v265_v18  ;;  %v286_v40 = vmul.f32 %v509_v38, %v266_v19 }
 0x1cd   : > { %v299_v42 = vmul.f32 %v292_v36, %v285_v39  ;;  %v300_v43 = vmul.f32 %v297_v37, %v286_v40 }
 0x1cf   : > { %v314_v45 = vadd.f32 %v311_v44, %v300_v43  ;;  %v313_v46 = vadd.f32 %v306_v41, %v299_v42 }
 0x1d1   : > { %vm316_vm1 = vcmp.gt.f32.partialorder %v314_v45, 0.0  ;;  %v318_v47 = vmul.f32 0.2, %v314_v45  ;;  %vm315_vm2 = vcmp.gt.f32.partialorder %v313_v46, 0.0  ;;  %v317_v48 = vmul.f32 0.2, %v313_v46 }
 0x1d3   : > { %v320_v49 = vsel %vm316_vm1, %v314_v45, %v318_v47  ;;  %v319_v50 = vsel %vm315_vm2, %v313_v46, %v317_v48 }
 0x1d4   : > { %322 = vst.msk [vmem:[%s246_s10 + $0x8] sm:$0xff] %vm249_vm0, %v320_v49  ;;  %321 = vst.msk [vmem:[%s246_s10] sm:$0xff] %vm249_vm0, %v319_v50 }
 0x1d5 PF: > { %s13_s16 = sadd.s32 1, %s548_s16   ;;  %s645_s12 = smov %s540_s14 }
 0x1d6   : > { %p10_p7 = scmp.ge.s32.totalorder %s13_s16, 18   ;;  %s646_s13 = smov %s544_s15 }
 0x1d7   : > { %s647_s14 = smov %s650_s17  ;;  %s648_s15 = smov %s654_s18 }
 0x1d8   :  { %12 = sbr.rel (!%p10_p7) target bundleno = 3 (0x3), region = 68 }

// kernel: earthfarseer_forward.51
= control target key start
LH: loop header
LB: loop body
LE: loop exit
PB: predicated region body
PF: predicated region fallthrough
CT: control target
= control target key end

     0   :  { %v181_v0 = vmov 0.0   ;;  %vm182_vm0 = vmmov 0   ;;  %v183_v2 = vmov 0   ;;  %vm126_vm1 = vcmask 261120   ;;  %s237_s1 = inlined_call_operand.vmem [shape: bf16[1,128,32], index: 1, kind: input, shape index: {}]   ;;  %s238_s2 = inlined_call_operand.vmem [shape: f32[1,8,1], index: 2, kind: input, shape index: {}]   ;;  %s239_s0 = inlined_call_operand.vmem [shape: bf16[1,8,128], index: 0, kind: input, shape index: {}]   ;;  %s240_s3 = inlined_call_operand.vmem [shape: f32[1,8,32], index: 3, kind: output, shape index: {}]  }
   0x1   :  { %149 = vmatprep.subr.bf16.mxu0 %v181_v0  ;;  %v173_v1 = vld [vmem:[%s237_s1] sm:$0xff]   ;;  %165 = vmatprep.mubr.msk.bf16.mxu0 %vm182_vm0, %v181_v0  ;;  %v174_v3 = vld [vmem:[%s237_s1 + $0x8] sm:$0xff]   ;;  %v175_v4 = vld [vmem:[%s237_s1 + $0x10] sm:$0xff]  }
   0x2   :  { %172 = vset.pattern.permute.xlu0 %v183_v2  ;;  %150 = vmatpush3.bf16.msra.mxu0 %v173_v1  ;;  %v32_v5 = vld [vmem:[%s238_s2] sm:$0xff]  ;;  %v176_v6 = vld [vmem:[%s237_s1 + $0x18] sm:$0xff]   ;;  %v178_v8 = vld [vmem:[%s237_s1 + $0x28] sm:$0xff]  }
   0x3   :  { %151 = vmatprep.subr.bf16.mxu0 %v181_v0  ;;  %35 = vperm.xlu0 %172, %v32_v5   ;;  %v177_v7 = vld [vmem:[%s237_s1 + $0x20] sm:$0xff]   ;;  %v179_v9 = vld [vmem:[%s237_s1 + $0x30] sm:$0xff]   ;;  %v180_v10 = vld [vmem:[%s237_s1 + $0x38] sm:$0xff]  }
   0x4   :  { %v15_v11 = vld [vmem:[%s239_s0] sm:$0xf] }
   0x6   :  { %152 = vmatpush3.bf16.msra.mxu0 %v174_v3 }
   0x7   :  { %153 = vmatprep.subr.bf16.mxu0 %v181_v0 }
   0xa   :  { %154 = vmatpush3.bf16.msra.mxu0 %v175_v4 }
   0xb   :  { %155 = vmatprep.subr.bf16.mxu0 %v181_v0 }
   0xe   :  { %156 = vmatpush3.bf16.msra.mxu0 %v176_v6 }
   0xf   :  { %157 = vmatprep.subr.bf16.mxu0 %v181_v0 }
  0x12   :  { %158 = vmatpush3.bf16.msra.mxu0 %v177_v7 }
  0x13   :  { %159 = vmatprep.subr.bf16.mxu0 %v181_v0 }
  0x16   :  { %160 = vmatpush3.bf16.msra.mxu0 %v178_v8 }
  0x17   :  { %161 = vmatprep.subr.bf16.mxu0 %v181_v0 }
  0x1a   :  { %162 = vmatpush3.bf16.msra.mxu0 %v179_v9 }
  0x1b   :  { %163 = vmatprep.subr.bf16.mxu0 %v181_v0 }
  0x1e   :  { %164 = vmatpush3.bf16.msra.mxu0 %v180_v10 }
  0x21   :  { %166 = vmatmul.mubr.bf16.vlgmr.msra.gmra.mrb[0].mxu0 %v15_v11 }
  0x82   :  { %v36_v12 = vpop.permute.xlu0 %35 }
  0xf4   :  { %v120_v13 = vpop.f32.mrb[0].mxu0 }
  0xf5   :  { %v121_v14 = vadd.f32 %v120_v13, %v36_v12  ;;  %v167_v15 = vpop.f32.mrb[1].mxu0 }
  0xf6   :  { %v123_v16 = vpop.f32.mrb[2].mxu0 }
  0xf7   :  { %127 = vst.msk [vmem:[%s240_s3] sm:$0xff] %vm126_vm1, %v121_v14  ;;  %v168_v17 = vpop.f32.mrb[3].mxu0 }

// kernel: earthfarseer_forward.54
= control target key start
LH: loop header
LB: loop body
LE: loop exit
PB: predicated region body
PF: predicated region fallthrough
CT: control target
= control target key end

     0   :  { %s534_s12 = smov 0   ;;  %s536_s13 = smov 0   ;;  %s578_s0 = inlined_call_operand.vmem [shape: bf16[4,4,50], index: 0, kind: input, shape index: {}]   ;;  %s579_s1 = inlined_call_operand.vmem [shape: bf16[4,50,32], index: 1, kind: input, shape index: {}]   ;;  %s580_s2 = inlined_call_operand.vmem [shape: f32[4,4,1], index: 2, kind: input, shape index: {}]   ;;  %s581_s3 = inlined_call_operand.vmem [shape: f32[4,4,32], index: 3, kind: output, shape index: {}]  }
   0x1   :  { %s538_s14 = smov 0  }
   0x2 LB: > { %s25_s15 = sadd.s32 1, %s505_s13  ;;  %p425_p0 = scmp.ge.s32.totalorder %s509_s14, 1  ;;  %s509_s14 = sphi %s538_s14, %s13_s14   ;;  %s505_s13 = sphi %s536_s13, %s583_s13   ;;  %s501_s12 = sphi %s534_s12, %s582_s12  }
   0x3   : > { %p27_p1 = scmp.ge.s32.totalorder %s25_s15, 4  ;;  %p174_p2 = scmp.lt.s32.totalorder %s509_s14, 5 }
   0x5   : > { %s585_s15 = smov (%p27_p1, %s25_s15), 0  ;;  %p175_p3 = pnand %p425_p0, %p174_p2 }
   0x6   : > { %p211_p4 = scmp.lt.s32.totalorder (!%p175_p3), %s501_s12, 3  ;;  %v511_v0 = vmov (!%p175_p3), 0.0   ;;  %vm512_vm0 = vmmov (!%p175_p3), 0   ;;  %v513_v1 = vmov (!%p175_p3), 0   ;;  %vm274_vm1 = vcmask (!%p175_p3), 1040384  }
   0x7   : > { %178 = sbr.rel (%p175_p3) target bundleno = 249 (0xf9), region = 32  ;;  %442 = vmatprep.subr.bf16.mxu0 (!%p175_p3), %v511_v0  ;;  %450 = vmatprep.mubr.msk.bf16.mxu0 (!%p175_p3), %vm512_vm0, %v511_v0  ;;  %vm270_vm2 = vcmask (!%p175_p3), 408576   ;;  %vm318_vm3 = vcmask (!%p175_p3), 257024  }
   0x8   : > { %482 = vset.pattern.permute.xlu0 (!%p175_p3), %v513_v1 }
   0xe   : > { %s587_s12 = smov (!%p211_p4, %s501_s12), 3 }
   0xf   : > { %s454_s16 = smul.u32 28, %s587_s12  ;;  %s428_s17 = sshll.u32 %s587_s12, 2 }
  0x10   : > { %s226_s23 = scalar_lea.vmem %s580_s2, %s428_s17  ;;  %s426_s24 = sshll.u32 %s587_s12, 1 }
  0x11   : > { %s222_s20 = scalar_lea.vmem %s579_s1, %s454_s16  ;;  %v243_v4 = vld [vmem:[%s226_s23] sm:$0xf]  ;;  %s214_s27 = scalar_lea.vmem %s578_s0, %s426_s24 }
  0x12   : > { %v483_v2 = vld [vmem:[%s222_s20] sm:$0xff]   ;;  %v484_v3 = vld [vmem:[%s222_s20 + $0x8] sm:$0xff]   ;;  %246 = vperm.xlu0 %482, %v243_v4   ;;  %v485_v5 = vld [vmem:[%s222_s20 + $0x10] sm:$0xff]   ;;  %s233_s30 = scalar_lea.vmem %s581_s3, %s428_s17 }
  0x13   : > { %443 = vmatpush3.bf16.msra.mxu0 %v483_v2  ;;  %v486_v6 = vld [vmem:[%s222_s20 + $0x18] ss:$0 sps:$4 sm:$0x11]   ;;  %v235_v8 = vld [vmem:[%s214_s27] sm:$0x3] }
  0x14   : > { %444 = vmatprep.subr.bf16.mxu0 %v511_v0  ;;  %v276_v7 = vsel %vm274_vm1, %v486_v6, 0 }
  0x17   : > { %445 = vmatpush3.bf16.msra.mxu0 %v484_v3 }
  0x18   : > { %446 = vmatprep.subr.bf16.mxu0 %v511_v0 }
  0x1b   : > { %447 = vmatpush3.bf16.msra.mxu0 %v485_v5 }
  0x1c   : > { %448 = vmatprep.subr.bf16.mxu0 %v511_v0 }
  0x1f   : > { %449 = vmatpush3.bf16.msra.mxu0 %v276_v7 }
  0x22   : > { %451 = vmatmul.mubr.msk.bf16.vlgmr.msra.gmra.mrb[0].mxu0 %vm270_vm2, %v235_v8 }
  0x91   : > { %v247_v9 = vpop.permute.xlu0 %246 }
  0xf5   : > { %v312_v10 = vpop.f32.mrb[0].mxu0 }
  0xf6   : > { %v313_v11 = vadd.f32 %v312_v10, %v247_v9  ;;  %v452_v12 = vpop.f32.mrb[1].mxu0 }
  0xf7   : > { %v315_v13 = vpop.f32.mrb[2].mxu0 }
  0xf8   : > { %319 = vst.msk [vmem:[%s233_s30] sm:$0xf] %vm318_vm3, %v313_v11  ;;  %v453_v14 = vpop.f32.mrb[3].mxu0 }
  0xf9 PF: > { %s13_s14 = sadd.s32 1, %s509_s14   ;;  %s582_s12 = smov %s505_s13 }
  0xfa   : > { %p10_p5 = scmp.ge.s32.totalorder %s13_s14, 6   ;;  %s583_s13 = smov %s585_s15 }
  0xfc   :  { %12 = sbr.rel (!%p10_p5) target bundleno = 2 (0x2), region = 68 }

// kernel: earthfarseer_forward.55
= control target key start
LH: loop header
LB: loop body
LE: loop exit
PB: predicated region body
PF: predicated region fallthrough
CT: control target
= control target key end

     0   :  { %s519_s12 = smov 0   ;;  %s521_s13 = smov 0   ;;  %s586_s0 = inlined_call_operand.vmem [shape: f32[2,4,4,16], index: 0, kind: input, shape index: {}]   ;;  %s587_s1 = inlined_call_operand.vmem [shape: f32[4,4,1], index: 1, kind: input, shape index: {}]   ;;  %s588_s2 = inlined_call_operand.vmem [shape: f32[4,4,1], index: 2, kind: input, shape index: {}]   ;;  %s589_s3 = inlined_call_operand.vmem [shape: f32[2,4,4,16], index: 3, kind: output, shape index: {}]  }
   0x1   :  { %s523_s14 = smov 0   ;;  %s525_s15 = smov 0  }
   0x2   :  { %s527_s16 = smov 0  }
   0x3 LB: > { %s22_s17 = sadd.s32 1, %s488_s14  ;;  %s25_s18 = sadd.s32 1, %s492_s15  ;;  %s496_s16 = sphi %s527_s16, %s13_s16   ;;  %s492_s15 = sphi %s525_s15, %s593_s15   ;;  %s488_s14 = sphi %s523_s14, %s592_s14   ;;  %s484_s13 = sphi %s521_s13, %s591_s13   ;;  %s480_s12 = sphi %s519_s12, %s590_s12  }
   0x4   : > { %p23_p0 = scmp.ge.s32.totalorder %s22_s17, 4  ;;  %p400_p1 = scmp.ge.s32.totalorder %s496_s16, 1 }
   0x5   : > { %p174_p2 = scmp.lt.s32.totalorder %s496_s16, 9 }
   0x6   : > { %s595_s17 = smov (%p23_p0, %s22_s17), 0  ;;  %s597_s18 = smov (!%p23_p0, %s25_s18), %s492_s15 }
   0x7   : > { %p175_p3 = pnand %p400_p1, %p174_p2  ;;  %p27_p4 = scmp.ge.s32.totalorder %s597_s18, 2 }
   0x8   : > { %p212_p5 = scmp.lt.s32.totalorder (!%p175_p3), %s484_s13, 1  ;;  %p214_p6 = scmp.lt.s32.totalorder (!%p175_p3), %s480_s12, 3  ;;  %vm237_vm0 = vcmask (!%p175_p3), 125952   ;;  %v498_v2 = vmov (!%p175_p3), 0  }
   0x9   : > { %s599_s18 = smov (%p27_p4, %s597_s18), 0  ;;  %178 = sbr.rel (%p175_p3) target bundleno = 465 (0x1d1), region = 32 }
   0xa   : > { %454 = vset.pattern.permute.xlu1 (!%p175_p3), %v498_v2  ;;  %455 = vset.pattern.permute.xlu0 (!%p175_p3), %v498_v2 }
  0x10   : > { %s601_s13 = smov (!%p212_p5, %s484_s13), 1  ;;  %s603_s12 = smov (!%p214_p6, %s480_s12), 3 }
  0x11   : > { %s401_s19 = sshll.u32 %s601_s13, 2  ;;  %s403_s25 = sshll.u32 %s603_s12, 2 }
  0x12   : > { %s549_s20 = sadd.s32 %s401_s19, %s603_s12  ;;  %s223_s28 = scalar_lea.vmem %s587_s1, %s403_s25 }
  0x13   : > { %s402_s21 = sshll.u32 %s549_s20, 2  ;;  %s227_s4 = scalar_lea.vmem %s588_s2, %s403_s25  ;;  %v268_v3 = vld [vmem:[%s223_s28] sm:$0xf] }
  0x14   : > { %s219_s24 = scalar_lea.vmem %s586_s0, %s402_s21  ;;  %271 = vperm.xlu1 %454, %v268_v3   ;;  %v275_v4 = vld [vmem:[%s227_s4] sm:$0xf]  ;;  %s235_s9 = scalar_lea.vmem %s589_s3, %s402_s21 }
  0x15   : > { %v236_v0 = vld [vmem:[%s219_s24] sm:$0xf] }
  0x16   : > { %v238_v1 = vsel %vm237_vm0, %v236_v0, 0.0 }
  0x17   : > { %239 = vadd.xlane.f32.xlu0 %v238_v1 }
  0x18   : > { %278 = vperm.xlu1 %454, %v275_v4  }
  0x93   : > { %v272_v27 = vpop.permute.xlu1 %271 }
  0x97   : > { %v279_v31 = vpop.permute.xlu1 %278 }
  0xa4   : > { %v240_v5 = vpop.xlane.xlu0 %239 }
  0xa5   : > { %v241_v6 = vrot.slane %v240_v5, 4 }
  0xa7   : > { %v242_v7 = vadd.f32 %v241_v6, %v240_v5 }
  0xa9   : > { %v243_v8 = vrot.slane %v242_v7, 2 }
  0xab   : > { %v244_v9 = vadd.f32 %v243_v8, %v242_v7 }
  0xad   : > { %v245_v10 = vrot.slane %v244_v9, 1 }
  0xaf   : > { %v246_v11 = vadd.f32 %v245_v10, %v244_v9 }
  0xb1   : > { %409 = vpush %v246_v11 }
  0xe2   : > { %s410_s5 = spop %409 }
  0xe3   : > { %v248_v12 = vstv %s410_s5 }
  0xe4   : > { %v250_v13 = vmul.f32 0.015625, %v248_v12 }
  0xe6   : > { %v251_v14 = vsub.f32 %v236_v0, %v250_v13 }
  0xe8   : > { %v252_v15 = vmul.f32 %v251_v14, %v251_v14 }
  0xea   : > { %v253_v16 = vsel %vm237_vm0, %v252_v15, 0.0 }
  0xeb   : > { %254 = vadd.xlane.f32.xlu0 %v253_v16 }
 0x178   : > { %v255_v17 = vpop.xlane.xlu0 %254 }
 0x179   : > { %v256_v18 = vrot.slane %v255_v17, 4 }
 0x17b   : > { %v257_v19 = vadd.f32 %v256_v18, %v255_v17 }
 0x17d   : > { %v258_v20 = vrot.slane %v257_v19, 2 }
 0x17f   : > { %v259_v21 = vadd.f32 %v258_v20, %v257_v19 }
 0x181   : > { %v260_v22 = vrot.slane %v259_v21, 1 }
 0x183   : > { %v261_v23 = vadd.f32 %v260_v22, %v259_v21 }
 0x185   : > { %411 = vpush %v261_v23 }
 0x1b6   : > { %s412_s6 = spop %411 }
 0x1b7   : > { %v263_v24 = vstv %s412_s6 }
 0x1b8   : > { %v264_v25 = vmul.f32 0.015625, %v263_v24 }
 0x1ba   : > { %v265_v26 = vadd.f32 1e-05, %v264_v25 }
 0x1bc   : > { %456 = vrsqrt.f32 %v265_v26 }
 0x1c6   : > { %v457_v28 = vpop.eup %456 }
 0x1c7   : > { %v267_v29 = vmul.f32 %v457_v28, %v251_v14 }
 0x1c9   : > { %v274_v30 = vmul.f32 %v272_v27, %v267_v29 }
 0x1cb   : > { %v281_v32 = vadd.f32 %v279_v31, %v274_v30 }
 0x1cd   : > { %vm282_vm1 = vcmp.gt.f32.partialorder %v281_v32, 0.0  ;;  %v283_v33 = vmul.f32 0.2, %v281_v32 }
 0x1cf   : > { %v284_v34 = vsel %vm282_vm1, %v281_v32, %v283_v33 }
 0x1d0   : > { %285 = vst.msk [vmem:[%s235_s9] sm:$0xf] %vm237_vm0, %v284_v34 }
 0x1d1 PF: > { %s13_s16 = sadd.s32 1, %s496_s16   ;;  %s590_s12 = smov %s488_s14 }
 0x1d2   : > { %p10_p7 = scmp.ge.s32.totalorder %s13_s16, 10   ;;  %s591_s13 = smov %s492_s15 }
 0x1d3   : > { %s592_s14 = smov %s595_s17  ;;  %s593_s15 = smov %s599_s18 }
 0x1d4   :  { %12 = sbr.rel (!%p10_p7) target bundleno = 3 (0x3), region = 68 }

// kernel: earthfarseer_forward.52
= control target key start
LH: loop header
LB: loop body
LE: loop exit
PB: predicated region body
PF: predicated region fallthrough
CT: control target
= control target key end

     0   :  { %s508_s12 = smov 0   ;;  %s510_s13 = smov 0   ;;  %s547_s0 = inlined_call_operand.vmem [shape: bf16[4,4,18], index: 0, kind: input, shape index: {}]   ;;  %s548_s1 = inlined_call_operand.vmem [shape: bf16[4,18,32], index: 1, kind: input, shape index: {}]   ;;  %s549_s2 = inlined_call_operand.vmem [shape: f32[4,4,1], index: 2, kind: input, shape index: {}]   ;;  %s550_s3 = inlined_call_operand.vmem [shape: f32[4,4,32], index: 3, kind: output, shape index: {}]  }
   0x1   :  { %s512_s14 = smov 0  }
   0x2 LB: > { %s25_s15 = sadd.s32 1, %s479_s13  ;;  %p409_p0 = scmp.ge.s32.totalorder %s483_s14, 1  ;;  %s483_s14 = sphi %s512_s14, %s13_s14   ;;  %s479_s13 = sphi %s510_s13, %s552_s13   ;;  %s475_s12 = sphi %s508_s12, %s551_s12  }
   0x3   : > { %p27_p1 = scmp.ge.s32.totalorder %s25_s15, 4  ;;  %p174_p2 = scmp.lt.s32.totalorder %s483_s14, 5 }
   0x5   : > { %s554_s15 = smov (%p27_p1, %s25_s15), 0  ;;  %p175_p3 = pnand %p409_p0, %p174_p2 }
   0x6   : > { %p211_p4 = scmp.lt.s32.totalorder (!%p175_p3), %s475_s12, 3  ;;  %v485_v0 = vmov (!%p175_p3), 0.0   ;;  %vm486_vm0 = vmmov (!%p175_p3), 0   ;;  %v487_v1 = vmov (!%p175_p3), 0   ;;  %vm258_vm1 = vcmask (!%p175_p3), 1040384  }
   0x7   : > { %178 = sbr.rel (%p175_p3) target bundleno = 241 (0xf1), region = 32  ;;  %422 = vmatprep.subr.bf16.mxu0 (!%p175_p3), %v485_v0  ;;  %426 = vmatprep.mubr.msk.bf16.mxu0 (!%p175_p3), %vm486_vm0, %v485_v0  ;;  %vm254_vm2 = vcmask (!%p175_p3), 146432   ;;  %vm302_vm3 = vcmask (!%p175_p3), 257024  }
   0x8   : > { %458 = vset.pattern.permute.xlu0 (!%p175_p3), %v487_v1 }
   0xe   : > { %s556_s12 = smov (!%p211_p4, %s475_s12), 3 }
   0xf   : > { %s430_s16 = smul.u32 12, %s556_s12  ;;  %s412_s17 = sshll.u32 %s556_s12, 2 }
  0x10   : > { %s226_s23 = scalar_lea.vmem %s549_s2, %s412_s17  ;;  %s410_s24 = sshll.u32 %s556_s12, 1 }
  0x11   : > { %s222_s20 = scalar_lea.vmem %s548_s1, %s430_s16  ;;  %v239_v4 = vld [vmem:[%s226_s23] sm:$0xf]  ;;  %s214_s27 = scalar_lea.vmem %s547_s0, %s410_s24 }
  0x12   : > { %v459_v2 = vld [vmem:[%s222_s20] sm:$0xff]   ;;  %v460_v3 = vld [vmem:[%s222_s20 + $0x8] ss:$0 sps:$4 sm:$0x11]   ;;  %242 = vperm.xlu0 %458, %v239_v4   ;;  %s233_s30 = scalar_lea.vmem %s550_s3, %s412_s17 }
  0x13   : > { %423 = vmatpush3.bf16.msra.mxu0 %v459_v2  ;;  %v260_v5 = vsel %vm258_vm1, %v460_v3, 0  ;;  %v235_v6 = vld [vmem:[%s214_s27] sm:$0x3] }
  0x14   : > { %424 = vmatprep.subr.bf16.mxu0 %v485_v0 }
  0x17   : > { %425 = vmatpush3.bf16.msra.mxu0 %v260_v5 }
  0x1a   : > { %427 = vmatmul.mubr.msk.bf16.vlgmr.msra.gmra.mrb[0].mxu0 %vm254_vm2, %v235_v6 }
  0x91   : > { %v243_v7 = vpop.permute.xlu0 %242 }
  0xed   : > { %v296_v8 = vpop.f32.mrb[0].mxu0 }
  0xee   : > { %v297_v9 = vadd.f32 %v296_v8, %v243_v7  ;;  %v428_v10 = vpop.f32.mrb[1].mxu0 }
  0xef   : > { %v299_v11 = vpop.f32.mrb[2].mxu0 }
  0xf0   : > { %303 = vst.msk [vmem:[%s233_s30] sm:$0xf] %vm302_vm3, %v297_v9  ;;  %v429_v12 = vpop.f32.mrb[3].mxu0 }
  0xf1 PF: > { %s13_s14 = sadd.s32 1, %s483_s14   ;;  %s551_s12 = smov %s479_s13 }
  0xf2   : > { %p10_p5 = scmp.ge.s32.totalorder %s13_s14, 6   ;;  %s552_s13 = smov %s554_s15 }
  0xf4   :  { %12 = sbr.rel (!%p10_p5) target bundleno = 2 (0x2), region = 68 }

// kernel: earthfarseer_forward.56
= control target key start
LH: loop header
LB: loop body
LE: loop exit
PB: predicated region body
PF: predicated region fallthrough
CT: control target
= control target key end

     0   :  { %v95_v0 = vmov 0.0   ;;  %vm96_vm0 = vmmov 0   ;;  %v97_v2 = vmov 0   ;;  %vm30_vm1 = vcmask 130048   ;;  %s130_s1 = inlined_call_operand.vmem [shape: bf16[1,16,32], index: 1, kind: input, shape index: {}]   ;;  %s131_s0 = inlined_call_operand.vmem [shape: bf16[1,8,16], index: 0, kind: input, shape index: {}]   ;;  %s132_s2 = inlined_call_operand.vmem [shape: f32[1,8,1], index: 2, kind: input, shape index: {}]   ;;  %s133_s3 = inlined_call_operand.vmem [shape: f32[1,8,32], index: 3, kind: output, shape index: {}]  }
   0x1   :  { %84 = vmatprep.subr.bf16.mxu0 %v95_v0  ;;  %v94_v1 = vld [vmem:[%s130_s1] sm:$0xff]   ;;  %86 = vmatprep.mubr.msk.bf16.mxu0 %vm96_vm0, %v95_v0  ;;  %vm74_vm2 = vcmask 261120  }
   0x2   :  { %93 = vset.pattern.permute.xlu0 %v97_v2  ;;  %v18_v3 = vld [vmem:[%s132_s2] sm:$0xff]  ;;  %85 = vmatpush3.bf16.msra.mxu0 %v94_v1 }
   0x3   :  { %v15_v4 = vld [vmem:[%s131_s0] sm:$0xf]  ;;  %21 = vperm.xlu0 %93, %v18_v3  }
   0x5   :  { %87 = vmatmul.mubr.msk.bf16.vlgmr.msra.gmra.mrb[0].mxu0 %vm30_vm1, %v15_v4 }
  0x82   :  { %v22_v5 = vpop.permute.xlu0 %21 }
  0xd8   :  { %v68_v6 = vpop.f32.mrb[0].mxu0 }
  0xd9   :  { %v69_v7 = vadd.f32 %v68_v6, %v22_v5  ;;  %v88_v8 = vpop.f32.mrb[1].mxu0 }
  0xda   :  { %v71_v9 = vpop.f32.mrb[2].mxu0 }
  0xdb   :  { %75 = vst.msk [vmem:[%s133_s3] sm:$0xff] %vm74_vm2, %v69_v7  ;;  %v89_v10 = vpop.f32.mrb[3].mxu0 }

// kernel: earthfarseer_forward.66
= control target key start
LH: loop header
LB: loop body
LE: loop exit
PB: predicated region body
PF: predicated region fallthrough
CT: control target
= control target key end

     0   :  { %v107_v0 = vmov 0.0   ;;  %vm108_vm0 = vmmov 0   ;;  %v109_v2 = vmov 0   ;;  %vm38_vm1 = vcmask 261120   ;;  %s145_s1 = inlined_call_operand.vmem [shape: bf16[1,32,32], index: 1, kind: input, shape index: {}]   ;;  %s146_s2 = inlined_call_operand.vmem [shape: f32[1,8,1], index: 2, kind: input, shape index: {}]   ;;  %s147_s0 = inlined_call_operand.vmem [shape: bf16[1,8,32], index: 0, kind: input, shape index: {}]   ;;  %s148_s3 = inlined_call_operand.vmem [shape: f32[1,8,32], index: 3, kind: output, shape index: {}]  }
   0x1   :  { %93 = vmatprep.subr.bf16.mxu0 %v107_v0  ;;  %v105_v1 = vld [vmem:[%s145_s1] sm:$0xff]   ;;  %97 = vmatprep.mubr.msk.bf16.mxu0 %vm108_vm0, %v107_v0  ;;  %v106_v3 = vld [vmem:[%s145_s1 + $0x8] sm:$0xff]  }
   0x2   :  { %104 = vset.pattern.permute.xlu0 %v109_v2  ;;  %94 = vmatpush3.bf16.msra.mxu0 %v105_v1  ;;  %v20_v4 = vld [vmem:[%s146_s2] sm:$0xff] }
   0x3   :  { %95 = vmatprep.subr.bf16.mxu0 %v107_v0  ;;  %23 = vperm.xlu0 %104, %v20_v4   ;;  %v15_v5 = vld [vmem:[%s147_s0] sm:$0xf] }
   0x6   :  { %96 = vmatpush3.bf16.msra.mxu0 %v106_v3 }
   0x9   :  { %98 = vmatmul.mubr.msk.bf16.vlgmr.msra.gmra.mrb[0].mxu0 %vm38_vm1, %v15_v5 }
  0x82   :  { %v24_v6 = vpop.permute.xlu0 %23 }
  0xdc   :  { %v76_v7 = vpop.f32.mrb[0].mxu0 }
  0xdd   :  { %v77_v8 = vadd.f32 %v76_v7, %v24_v6  ;;  %v99_v9 = vpop.f32.mrb[1].mxu0 }
  0xde   :  { %v79_v10 = vpop.f32.mrb[2].mxu0 }
  0xdf   :  { %82 = vst.msk [vmem:[%s148_s3] sm:$0xff] %vm38_vm1, %v77_v8  ;;  %v100_v11 = vpop.f32.mrb[3].mxu0 }

// kernel: earthfarseer_forward.69
= control target key start
LH: loop header
LB: loop body
LE: loop exit
PB: predicated region body
PF: predicated region fallthrough
CT: control target
= control target key end

     0   :  { %s604_s12 = smov 0   ;;  %s606_s13 = smov 0   ;;  %s654_s0 = inlined_call_operand.vmem [shape: bf16[4,32,50], index: 0, kind: input, shape index: {}]   ;;  %s655_s1 = inlined_call_operand.vmem [shape: bf16[4,50,32], index: 1, kind: input, shape index: {}]   ;;  %s656_s2 = inlined_call_operand.vmem [shape: f32[4,32,1], index: 2, kind: input, shape index: {}]   ;;  %s657_s3 = inlined_call_operand.vmem [shape: f32[4,32,32], index: 3, kind: output, shape index: {}]  }
   0x1   :  { %s608_s14 = smov 0  }
   0x2 LB: > { %s25_s15 = sadd.s32 1, %s577_s13  ;;  %p485_p0 = scmp.ge.s32.totalorder %s581_s14, 1  ;;  %s581_s14 = sphi %s608_s14, %s13_s14   ;;  %s577_s13 = sphi %s606_s13, %s659_s13   ;;  %s573_s12 = sphi %s604_s12, %s658_s12  }
   0x3   : > { %p27_p1 = scmp.ge.s32.totalorder %s25_s15, 4  ;;  %p176_p2 = scmp.lt.s32.totalorder %s581_s14, 5 }
   0x5   : > { %s661_s15 = smov (%p27_p1, %s25_s15), 0  ;;  %p177_p3 = pnand %p485_p0, %p176_p2 }
   0x6   : > { %p216_p4 = scmp.lt.s32.totalorder (!%p177_p3), %s573_s12, 3  ;;  %v583_v0 = vmov (!%p177_p3), 0   ;;  %vm309_vm0 = vcmask (!%p177_p3), 408576   ;;  %vm316_vm1 = vcmask (!%p177_p3), 1040384   ;;  %vm369_vm2 = vcmask (!%p177_p3), 261120  }
   0x7   : > { %180 = sbr.rel (%p177_p3) target bundleno = 253 (0xfd), region = 32  ;;  %552 = vset.pattern.permute.xlu1 (!%p177_p3), %v583_v0  ;;  %551 = vset.pattern.permute.xlu0 (!%p177_p3), %v583_v0 }
   0xe   : > { %s663_s12 = smov (!%p216_p4, %s573_s12), 3 }
   0xf   : > { %s525_s16 = smul.u32 28, %s663_s12  ;;  %s503_s17 = sshll.u32 %s663_s12, 4 }
  0x10   : > { %s220_s20 = scalar_lea.vmem %s654_s0, %s503_s17  ;;  %s504_s21 = sshll.u32 %s663_s12, 5 }
  0x11   : > { %s228_s24 = scalar_lea.vmem %s655_s1, %s525_s16  ;;  %v557_v1 = vld [vmem:[%s220_s20] sm:$0xff]   ;;  %s233_s27 = scalar_lea.vmem %s656_s2, %s504_s21  ;;  %v558_v11 = vld [vmem:[%s220_s20 + $0x8] sm:$0xff]  }
  0x12   : > { %v553_v2 = vld [vmem:[%s228_s24] sm:$0xff]   ;;  %v554_v3 = vld [vmem:[%s228_s24 + $0x8] sm:$0xff]   ;;  %520 = vmatprep.mubr.msk.bf16.mxu0 %vm309_vm0, %v557_v1  ;;  %v555_v4 = vld [vmem:[%s228_s24 + $0x10] sm:$0xff]   ;;  %s241_s30 = scalar_lea.vmem %s657_s3, %s504_s21 }
  0x13   : > { %512 = vmatprep.subr.bf16.mxu0 %v553_v2  ;;  %v256_v5 = vld [vmem:[%s233_s27 + $0x10] sm:$0xff]  ;;  %v254_v6 = vld [vmem:[%s233_s27] sm:$0xff]  ;;  %v257_v7 = vld [vmem:[%s233_s27 + $0x18] sm:$0xff] }
  0x14   : > { %513 = vmatpush3.bf16.msra.mxu0 %v553_v2  ;;  %270 = vperm.xlu1 %552, %v256_v5   ;;  %v255_v8 = vld [vmem:[%s233_s27 + $0x8] sm:$0xff]  ;;  %v556_v9 = vld [vmem:[%s228_s24 + $0x18] ss:$0 sps:$4 sm:$0x11]  }
  0x15   : > { %514 = vmatprep.subr.bf16.mxu0 %v554_v3  ;;  %260 = vperm.xlu0 %551, %v254_v6   ;;  %v318_v10 = vsel %vm316_vm1, %v556_v9, 0 }
  0x18   : > { %515 = vmatpush3.bf16.msra.mxu0 %v554_v3  ;;  %275 = vperm.xlu1 %552, %v257_v7  }
  0x19   : > { %516 = vmatprep.subr.bf16.mxu0 %v555_v4  ;;  %265 = vperm.xlu0 %551, %v255_v8  }
  0x1c   : > { %517 = vmatpush3.bf16.msra.mxu0 %v555_v4 }
  0x1d   : > { %524 = vmatprep.subr.msk.bf16.mxu0 %vm316_vm1, %v556_v9 }
  0x20   : > { %519 = vmatpush3.bf16.msra.mxu0 %v318_v10 }
  0x23   : > { %521 = vmatmul.mubr.msk.bf16.vlgmr.msra.gmra.mrb[0].mxu0 %vm309_vm0, %v558_v11 }
  0x93   : > { %v271_v12 = vpop.permute.xlu1 %270 }
  0x94   : > { %v261_v13 = vpop.permute.xlu0 %260 }
  0x97   : > { %v276_v17 = vpop.permute.xlu1 %275 }
  0x98   : > { %v266_v20 = vpop.permute.xlu0 %265 }
  0xf6   : > { %v522_v14 = vpop.f32.mrb[0].mxu0 }
  0xf7   : > { %v363_v15 = vadd.f32 %v522_v14, %v271_v12  ;;  %v354_v16 = vpop.f32.mrb[1].mxu0 }
  0xf8   : > { %v355_v18 = vadd.f32 %v354_v16, %v261_v13  ;;  %v523_v19 = vpop.f32.mrb[2].mxu0 }
  0xf9   : > { %372 = vst.msk [vmem:[%s241_s30 + $0x10] sm:$0xff] %vm369_vm2, %v363_v15  ;;  %v366_v21 = vadd.f32 %v523_v19, %v276_v17  ;;  %v357_v22 = vpop.f32.mrb[3].mxu0 }
  0xfa   : > { %370 = vst.msk [vmem:[%s241_s30] sm:$0xff] %vm369_vm2, %v355_v18  ;;  %v358_v23 = vadd.f32 %v357_v22, %v266_v20 }
  0xfb   : > { %373 = vst.msk [vmem:[%s241_s30 + $0x18] sm:$0xff] %vm369_vm2, %v366_v21 }
  0xfc   : > { %371 = vst.msk [vmem:[%s241_s30 + $0x8] sm:$0xff] %vm369_vm2, %v358_v23 }
  0xfd PF: > { %s13_s14 = sadd.s32 1, %s581_s14   ;;  %s658_s12 = smov %s577_s13 }
  0xfe   : > { %p10_p5 = scmp.ge.s32.totalorder %s13_s14, 6   ;;  %s659_s13 = smov %s661_s15 }
 0x100   :  { %12 = sbr.rel (!%p10_p5) target bundleno = 2 (0x2), region = 68 }

// kernel: earthfarseer_forward.70
= control target key start
LH: loop header
LB: loop body
LE: loop exit
PB: predicated region body
PF: predicated region fallthrough
CT: control target
= control target key end

     0   :  { %s623_s12 = smov 0   ;;  %s625_s13 = smov 0   ;;  %s709_s0 = inlined_call_operand.vmem [shape: f32[2,4,32,16], index: 0, kind: input, shape index: {}]   ;;  %s710_s1 = inlined_call_operand.vmem [shape: f32[4,32,1], index: 1, kind: input, shape index: {}]   ;;  %s711_s2 = inlined_call_operand.vmem [shape: f32[4,32,1], index: 2, kind: input, shape index: {}]   ;;  %s712_s3 = inlined_call_operand.vmem [shape: f32[2,4,32,16], index: 3, kind: output, shape index: {}]  }
   0x1   :  { %s627_s14 = smov 0   ;;  %s629_s15 = smov 0  }
   0x2   :  { %s631_s16 = smov 0  }
   0x3 LB: > { %s22_s17 = sadd.s32 1, %s592_s14  ;;  %s25_s18 = sadd.s32 1, %s596_s15  ;;  %s600_s16 = sphi %s631_s16, %s13_s16   ;;  %s596_s15 = sphi %s629_s15, %s716_s15   ;;  %s592_s14 = sphi %s627_s14, %s715_s14   ;;  %s588_s13 = sphi %s625_s13, %s714_s13   ;;  %s584_s12 = sphi %s623_s12, %s713_s12  }
   0x4   : > { %p23_p0 = scmp.ge.s32.totalorder %s22_s17, 4  ;;  %p498_p1 = scmp.ge.s32.totalorder %s600_s16, 1 }
   0x5   : > { %p177_p2 = scmp.lt.s32.totalorder %s600_s16, 9 }
   0x6   : > { %s718_s17 = smov (%p23_p0, %s22_s17), 0  ;;  %s720_s18 = smov (!%p23_p0, %s25_s18), %s596_s15 }
   0x7   : > { %p178_p3 = pnand %p498_p1, %p177_p2  ;;  %p27_p4 = scmp.ge.s32.totalorder %s720_s18, 2 }
   0x8   : > { %p219_p5 = scmp.lt.s32.totalorder (!%p178_p3), %s588_s13, 1  ;;  %p221_p6 = scmp.lt.s32.totalorder (!%p178_p3), %s584_s12, 3  ;;  %vm251_vm0 = vcmask (!%p178_p3), 130048   ;;  %v602_v11 = vmov (!%p178_p3), 0  }
   0x9   : > { %s722_s18 = smov (%p27_p4, %s720_s18), 0  ;;  %181 = sbr.rel (%p178_p3) target bundleno = 479 (0x1df), region = 32 }
   0xa   : > { %558 = vset.pattern.permute.xlu1 (!%p178_p3), %v602_v11  ;;  %559 = vset.pattern.permute.xlu0 (!%p178_p3), %v602_v11 }
  0x10   : > { %s724_s13 = smov (!%p219_p5, %s588_s13), 1  ;;  %s726_s12 = smov (!%p221_p6, %s584_s12), 3 }
  0x11   : > { %s500_s19 = sshll.u32 %s724_s13, 4  ;;  %s499_s20 = sshll.u32 %s726_s12, 2 }
  0x12   : > { %s656_s21 = sadd.s32 %s500_s19, %s499_s20  ;;  %s511_s26 = sshll.u32 %s726_s12, 5 }
  0x13   : > { %s501_s22 = sshll.u32 %s656_s21, 3  ;;  %s672_s29 = scalar_lea.vmem %s710_s1, %s511_s26 }
  0x14   : > { %s227_s25 = scalar_lea.vmem %s709_s0, %s501_s22  ;;  %v303_v12 = vld [vmem:[%s672_s29] sm:$0xff]  ;;  %v304_v13 = vld [vmem:[%s672_s29 + $0x8] sm:$0xff]  ;;  %v306_v14 = vld [vmem:[%s672_s29 + $0x18] sm:$0xff]  ;;  %s237_s5 = scalar_lea.vmem %s711_s2, %s511_s26 }
  0x15   : > { %v247_v0 = vld [vmem:[%s227_s25] sm:$0xff]  ;;  %v248_v1 = vld [vmem:[%s227_s25 + $0x8] sm:$0xff]  ;;  %v249_v2 = vld [vmem:[%s227_s25 + $0x10] sm:$0xff]  ;;  %309 = vperm.xlu1 %558, %v303_v12   ;;  %s246_s10 = scalar_lea.vmem %s712_s3, %s501_s22 }
  0x16   : > { %v250_v3 = vld [vmem:[%s227_s25 + $0x18] sm:$0xff]  ;;  %v252_v4 = vsel %vm251_vm0, %v247_v0, 0.0  ;;  %v253_v5 = vsel %vm251_vm0, %v248_v1, 0.0  ;;  %v255_v6 = vsel %vm251_vm0, %v249_v2, 0.0  ;;  %v331_v15 = vld [vmem:[%s237_s5] sm:$0xff]  ;;  %v332_v16 = vld [vmem:[%s237_s5 + $0x8] sm:$0xff] }
  0x17   : > { %v254_v7 = vadd.f32 %v253_v5, %v252_v4  ;;  %v257_v8 = vsel %vm251_vm0, %v250_v3, 0.0  ;;  %v333_v17 = vld [vmem:[%s237_s5 + $0x10] sm:$0xff]  ;;  %v334_v18 = vld [vmem:[%s237_s5 + $0x18] sm:$0xff] }
  0x18   : > { %v305_v43 = vld [vmem:[%s672_s29 + $0x10] sm:$0xff] }
  0x19   : > { %v256_v9 = vadd.f32 %v255_v6, %v254_v7  ;;  %314 = vperm.xlu1 %558, %v304_v13  }
  0x1b   : > { %v258_v10 = vadd.f32 %v257_v8, %v256_v9 }
  0x1d   : > { %259 = vadd.xlane.f32.xlu0 %v258_v10  ;;  %324 = vperm.xlu1 %558, %v306_v14  }
  0x21   : > { %337 = vperm.xlu1 %558, %v331_v15  }
  0x25   : > { %342 = vperm.xlu1 %558, %v332_v16  }
  0x29   : > { %347 = vperm.xlu1 %558, %v333_v17  }
  0x2d   : > { %352 = vperm.xlu1 %558, %v334_v18  }
  0x94   : > { %v310_v51 = vpop.permute.xlu1 %309 }
  0x98   : > { %v315_v52 = vpop.permute.xlu1 %314 }
  0x9c   : > { %v325_v53 = vpop.permute.xlu1 %324 }
  0xa0   : > { %v338_v55 = vpop.permute.xlu1 %337 }
  0xa4   : > { %v343_v58 = vpop.permute.xlu1 %342 }
  0xa8   : > { %v348_v59 = vpop.permute.xlu1 %347 }
  0xaa   : > { %v260_v19 = vpop.xlane.xlu0 %259 }
  0xab   : > { %v261_v20 = vrot.slane %v260_v19, 4 }
  0xac   : > { %v353_v6 = vpop.permute.xlu1 %352 }
  0xad   : > { %v262_v21 = vadd.f32 %v261_v20, %v260_v19 }
  0xaf   : > { %v263_v22 = vrot.slane %v262_v21, 2 }
  0xb1   : > { %v264_v23 = vadd.f32 %v263_v22, %v262_v21 }
  0xb3   : > { %v265_v24 = vrot.slane %v264_v23, 1 }
  0xb5   : > { %v266_v25 = vadd.f32 %v265_v24, %v264_v23 }
  0xb7   : > { %513 = vpush %v266_v25 }
  0xe8   : > { %s514_s6 = spop %513 }
  0xe9   : > { %v268_v26 = vstv %s514_s6 }
  0xea   : > { %v270_v27 = vmul.f32 0.001953125, %v268_v26 }
  0xec   : > { %v271_v28 = vsub.f32 %v247_v0, %v270_v27  ;;  %v272_v29 = vsub.f32 %v248_v1, %v270_v27  ;;  %v273_v30 = vsub.f32 %v249_v2, %v270_v27  ;;  %v274_v31 = vsub.f32 %v250_v3, %v270_v27 }
  0xee   : > { %v275_v32 = vmul.f32 %v271_v28, %v271_v28  ;;  %v276_v33 = vmul.f32 %v272_v29, %v272_v29  ;;  %v277_v34 = vmul.f32 %v273_v30, %v273_v30  ;;  %v278_v35 = vmul.f32 %v274_v31, %v274_v31 }
  0xf0   : > { %v279_v36 = vsel %vm251_vm0, %v275_v32, 0.0  ;;  %v280_v37 = vsel %vm251_vm0, %v276_v33, 0.0  ;;  %v282_v39 = vsel %vm251_vm0, %v277_v34, 0.0  ;;  %v284_v41 = vsel %vm251_vm0, %v278_v35, 0.0 }
  0xf1   : > { %v281_v38 = vadd.f32 %v280_v37, %v279_v36 }
  0xf3   : > { %v283_v40 = vadd.f32 %v282_v39, %v281_v38 }
  0xf5   : > { %v285_v42 = vadd.f32 %v284_v41, %v283_v40 }
  0xf7   : > { %286 = vadd.xlane.f32.xlu0 %v285_v42 }
 0x10d   : > { %319 = vperm.xlu0 %559, %v305_v43  }
 0x184   : > { %v287_v44 = vpop.xlane.xlu0 %286 }
 0x185   : > { %v288_v45 = vrot.slane %v287_v44, 4 }
 0x187   : > { %v289_v46 = vadd.f32 %v288_v45, %v287_v44 }
 0x189   : > { %v290_v47 = vrot.slane %v289_v46, 2 }
 0x18b   : > { %v291_v48 = vadd.f32 %v290_v47, %v289_v46 }
 0x18c   : > { %v320_v61 = vpop.permute.xlu0 %319 }
 0x18d   : > { %v292_v49 = vrot.slane %v291_v48, 1 }
 0x18f   : > { %v293_v50 = vadd.f32 %v292_v49, %v291_v48 }
 0x191   : > { %515 = vpush %v293_v50 }
 0x1c2   : > { %s516_s7 = spop %515 }
 0x1c3   : > { %v295_v54 = vstv %s516_s7 }
 0x1c4   : > { %v296_v56 = vmul.f32 0.001953125, %v295_v54 }
 0x1c6   : > { %v297_v57 = vadd.f32 1e-05, %v296_v56 }
 0x1c8   : > { %560 = vrsqrt.f32 %v297_v57 }
 0x1d2   : > { %v561_v60 = vpop.eup %560 }
 0x1d3   : > { %v299_v62 = vmul.f32 %v561_v60, %v271_v28  ;;  %v300_v63 = vmul.f32 %v561_v60, %v272_v29  ;;  %v302_v0 = vmul.f32 %v561_v60, %v274_v31  ;;  %v301_v1 = vmul.f32 %v561_v60, %v273_v30 }
 0x1d5   : > { %v327_v2 = vmul.f32 %v310_v51, %v299_v62  ;;  %v328_v3 = vmul.f32 %v315_v52, %v300_v63  ;;  %v330_v4 = vmul.f32 %v325_v53, %v302_v0  ;;  %v329_v5 = vmul.f32 %v320_v61, %v301_v1 }
 0x1d7   : > { %v355_v7 = vadd.f32 %v338_v55, %v327_v2  ;;  %v356_v8 = vadd.f32 %v343_v58, %v328_v3  ;;  %v358_v9 = vadd.f32 %v353_v6, %v330_v4  ;;  %v357_v10 = vadd.f32 %v348_v59, %v329_v5 }
 0x1d9   : > { %vm359_vm1 = vcmp.gt.f32.partialorder %v355_v7, 0.0  ;;  %vm360_vm2 = vcmp.gt.f32.partialorder %v356_v8, 0.0  ;;  %vm362_vm3 = vcmp.gt.f32.partialorder %v358_v9, 0.0  ;;  %v363_v11 = vmul.f32 0.2, %v355_v7 }
 0x1da   : > { %v364_v12 = vmul.f32 0.2, %v356_v8  ;;  %v366_v13 = vmul.f32 0.2, %v358_v9  ;;  %vm361_vm4 = vcmp.gt.f32.partialorder %v357_v10, 0.0 }
 0x1db   : > { %v367_v14 = vsel %vm359_vm1, %v355_v7, %v363_v11  ;;  %v365_v15 = vmul.f32 0.2, %v357_v10 }
 0x1dc   : > { %v368_v16 = vsel %vm360_vm2, %v356_v8, %v364_v12  ;;  %v370_v17 = vsel %vm362_vm3, %v358_v9, %v366_v13  ;;  %371 = vst.msk [vmem:[%s246_s10] sm:$0xff] %vm251_vm0, %v367_v14 }
 0x1dd   : > { %372 = vst.msk [vmem:[%s246_s10 + $0x8] sm:$0xff] %vm251_vm0, %v368_v16  ;;  %374 = vst.msk [vmem:[%s246_s10 + $0x18] sm:$0xff] %vm251_vm0, %v370_v17  ;;  %v369_v18 = vsel %vm361_vm4, %v357_v10, %v365_v15 }
 0x1de   : > { %373 = vst.msk [vmem:[%s246_s10 + $0x10] sm:$0xff] %vm251_vm0, %v369_v18 }
 0x1df PF: > { %s13_s16 = sadd.s32 1, %s600_s16   ;;  %s713_s12 = smov %s592_s14 }
 0x1e0   : > { %p10_p7 = scmp.ge.s32.totalorder %s13_s16, 10   ;;  %s714_s13 = smov %s596_s15 }
 0x1e1   : > { %s715_s14 = smov %s718_s17  ;;  %s716_s15 = smov %s722_s18 }
 0x1e2   :  { %12 = sbr.rel (!%p10_p7) target bundleno = 3 (0x3), region = 68 }

// kernel: earthfarseer_forward.67
= control target key start
LH: loop header
LB: loop body
LE: loop exit
PB: predicated region body
PF: predicated region fallthrough
CT: control target
= control target key end

     0   :  { %s578_s12 = smov 0   ;;  %s580_s13 = smov 0   ;;  %s624_s0 = inlined_call_operand.vmem [shape: bf16[4,32,18], index: 0, kind: input, shape index: {}]   ;;  %s625_s1 = inlined_call_operand.vmem [shape: bf16[4,18,32], index: 1, kind: input, shape index: {}]   ;;  %s626_s2 = inlined_call_operand.vmem [shape: f32[4,32,1], index: 2, kind: input, shape index: {}]   ;;  %s627_s3 = inlined_call_operand.vmem [shape: f32[4,32,32], index: 3, kind: output, shape index: {}]  }
   0x1   :  { %s582_s14 = smov 0  }
   0x2 LB: > { %s25_s15 = sadd.s32 1, %s551_s13  ;;  %p469_p0 = scmp.ge.s32.totalorder %s555_s14, 1  ;;  %s555_s14 = sphi %s582_s14, %s13_s14   ;;  %s551_s13 = sphi %s580_s13, %s629_s13   ;;  %s547_s12 = sphi %s578_s12, %s628_s12  }
   0x3   : > { %p27_p1 = scmp.ge.s32.totalorder %s25_s15, 4  ;;  %p176_p2 = scmp.lt.s32.totalorder %s555_s14, 5 }
   0x5   : > { %s631_s15 = smov (%p27_p1, %s25_s15), 0  ;;  %p177_p3 = pnand %p469_p0, %p176_p2 }
   0x6   : > { %p216_p4 = scmp.lt.s32.totalorder (!%p177_p3), %s547_s12, 3  ;;  %v557_v0 = vmov (!%p177_p3), 0   ;;  %vm293_vm0 = vcmask (!%p177_p3), 146432   ;;  %vm300_vm1 = vcmask (!%p177_p3), 1040384   ;;  %vm353_vm2 = vcmask (!%p177_p3), 261120  }
   0x7   : > { %180 = sbr.rel (%p177_p3) target bundleno = 245 (0xf5), region = 32  ;;  %528 = vset.pattern.permute.xlu1 (!%p177_p3), %v557_v0  ;;  %527 = vset.pattern.permute.xlu0 (!%p177_p3), %v557_v0 }
   0xe   : > { %s633_s12 = smov (!%p216_p4, %s547_s12), 3 }
   0xf   : > { %s501_s16 = smul.u32 12, %s633_s12  ;;  %s485_s17 = sshll.u32 %s633_s12, 4 }
  0x10   : > { %s220_s20 = scalar_lea.vmem %s624_s0, %s485_s17  ;;  %s486_s21 = sshll.u32 %s633_s12, 5 }
  0x11   : > { %s228_s24 = scalar_lea.vmem %s625_s1, %s501_s16  ;;  %v531_v1 = vld [vmem:[%s220_s20] sm:$0xff]   ;;  %s233_s27 = scalar_lea.vmem %s626_s2, %s486_s21  ;;  %v532_v9 = vld [vmem:[%s220_s20 + $0x8] sm:$0xff]  }
  0x12   : > { %v529_v2 = vld [vmem:[%s228_s24] sm:$0xff]   ;;  %v530_v3 = vld [vmem:[%s228_s24 + $0x8] ss:$0 sps:$4 sm:$0x11]   ;;  %496 = vmatprep.mubr.msk.bf16.mxu0 %vm293_vm0, %v531_v1  ;;  %v252_v4 = vld [vmem:[%s233_s27 + $0x10] sm:$0xff]  ;;  %s241_s30 = scalar_lea.vmem %s627_s3, %s486_s21 }
  0x13   : > { %492 = vmatprep.subr.bf16.mxu0 %v529_v2  ;;  %266 = vperm.xlu1 %528, %v252_v4   ;;  %v250_v5 = vld [vmem:[%s233_s27] sm:$0xff]  ;;  %v253_v6 = vld [vmem:[%s233_s27 + $0x18] sm:$0xff]  ;;  %v302_v7 = vsel %vm300_vm1, %v530_v3, 0  ;;  %v251_v8 = vld [vmem:[%s233_s27 + $0x8] sm:$0xff] }
  0x14   : > { %493 = vmatpush3.bf16.msra.mxu0 %v529_v2  ;;  %256 = vperm.xlu0 %527, %v250_v5  }
  0x15   : > { %500 = vmatprep.subr.msk.bf16.mxu0 %vm300_vm1, %v530_v3 }
  0x17   : > { %271 = vperm.xlu1 %528, %v253_v6  }
  0x18   : > { %495 = vmatpush3.bf16.msra.mxu0 %v302_v7  ;;  %261 = vperm.xlu0 %527, %v251_v8  }
  0x1b   : > { %497 = vmatmul.mubr.msk.bf16.vlgmr.msra.gmra.mrb[0].mxu0 %vm293_vm0, %v532_v9 }
  0x92   : > { %v267_v10 = vpop.permute.xlu1 %266 }
  0x93   : > { %v257_v11 = vpop.permute.xlu0 %256 }
  0x96   : > { %v272_v15 = vpop.permute.xlu1 %271 }
  0x97   : > { %v262_v18 = vpop.permute.xlu0 %261 }
  0xee   : > { %v498_v12 = vpop.f32.mrb[0].mxu0 }
  0xef   : > { %v347_v13 = vadd.f32 %v498_v12, %v267_v10  ;;  %v338_v14 = vpop.f32.mrb[1].mxu0 }
  0xf0   : > { %v339_v16 = vadd.f32 %v338_v14, %v257_v11  ;;  %v499_v17 = vpop.f32.mrb[2].mxu0 }
  0xf1   : > { %356 = vst.msk [vmem:[%s241_s30 + $0x10] sm:$0xff] %vm353_vm2, %v347_v13  ;;  %v350_v19 = vadd.f32 %v499_v17, %v272_v15  ;;  %v341_v20 = vpop.f32.mrb[3].mxu0 }
  0xf2   : > { %354 = vst.msk [vmem:[%s241_s30] sm:$0xff] %vm353_vm2, %v339_v16  ;;  %v342_v21 = vadd.f32 %v341_v20, %v262_v18 }
  0xf3   : > { %357 = vst.msk [vmem:[%s241_s30 + $0x18] sm:$0xff] %vm353_vm2, %v350_v19 }
  0xf4   : > { %355 = vst.msk [vmem:[%s241_s30 + $0x8] sm:$0xff] %vm353_vm2, %v342_v21 }
  0xf5 PF: > { %s13_s14 = sadd.s32 1, %s555_s14   ;;  %s628_s12 = smov %s551_s13 }
  0xf6   : > { %p10_p5 = scmp.ge.s32.totalorder %s13_s14, 6   ;;  %s629_s13 = smov %s631_s15 }
  0xf8   :  { %12 = sbr.rel (!%p10_p5) target bundleno = 2 (0x2), region = 68 }

// kernel: earthfarseer_forward.75
= control target key start
LH: loop header
LB: loop body
LE: loop exit
PB: predicated region body
PF: predicated region fallthrough
CT: control target
= control target key end

     0   :  { %v3183_v3 = vmov 0   ;;  %vm1805_vm0 = vcmask 261120   ;;  %s4462_s1 = inlined_call_operand.vmem [shape: bf16[1,288,2048], index: 1, kind: input, shape index: {}]   ;;  %s4463_s0 = inlined_call_operand.vmem [shape: bf16[1,32,288], index: 0, kind: input, shape index: {}]   ;;  %s4464_s2 = inlined_call_operand.vmem [shape: f32[1,32,1], index: 2, kind: input, shape index: {}]   ;;  %s4465_s3 = inlined_call_operand.vmem [shape: f32[1,32,2048], index: 3, kind: output, shape index: {}]  }
   0x1   :  { %v23_v0 = vld [vmem:[%s4462_s1] sm:$0xff]  ;;  %v24_v2 = vld [vmem:[%s4462_s1 + $0x8] sm:$0xff]  ;;  %3167 = vset.pattern.permute.xlu0 %v3183_v3  ;;  %3168 = vset.pattern.permute.xlu1 %v3183_v3 }
   0x2   :  { %v31_v1 = vld [vmem:[%s4462_s1 + $0x40] sm:$0xff]  ;;  %v32_v5 = vld [vmem:[%s4462_s1 + $0x48] sm:$0xff] }
   0x3   :  { %v2735_v4 = vcombine.high %v23_v0, %v31_v1  ;;  %v2734_v6 = vcombine.low %v23_v0, %v31_v1  ;;  %v39_v7 = vld [vmem:[%s4462_s1 + $0x80] sm:$0xff]  ;;  %v2737_v9 = vcombine.high %v24_v2, %v32_v5  ;;  %v2736_v10 = vcombine.low %v24_v2, %v32_v5  ;;  %v40_v12 = vld [vmem:[%s4462_s1 + $0x88] sm:$0xff] }
   0x4   :  { %v47_v8 = vld [vmem:[%s4462_s1 + $0xc0] sm:$0xff]  ;;  %v48_v13 = vld [vmem:[%s4462_s1 + $0xc8] sm:$0xff] }
   0x5   :  { %v2751_v11 = vcombine.high %v39_v7, %v47_v8  ;;  %v55_v14 = vld [vmem:[%s4462_s1 + $0x100] sm:$0xff]  ;;  %1812 = vmatprep.subr.bf16.mxu0 %v2735_v4  ;;  %v2753_v15 = vcombine.high %v40_v12, %v48_v13  ;;  %v56_v17 = vld [vmem:[%s4462_s1 + $0x108] sm:$0xff]  ;;  %1918 = vmatprep.subr.bf16.mxu1 %v2737_v9  ;;  %v2750_v19 = vcombine.low %v39_v7, %v47_v8 }
   0x6   :  { %v63_v16 = vld [vmem:[%s4462_s1 + $0x140] sm:$0xff]  ;;  %v64_v18 = vld [vmem:[%s4462_s1 + $0x148] sm:$0xff]  ;;  %1813 = vmatpush1.bf16.msra.mxu0 %v2734_v6  ;;  %1919 = vmatpush1.bf16.msra.mxu1 %v2736_v10  ;;  %v2752_v20 = vcombine.low %v40_v12, %v48_v13 }
   0x7   :  { %1814 = vmatprep.subr.bf16.mxu0 %v2751_v11  ;;  %v2767_v21 = vcombine.high %v55_v14, %v63_v16  ;;  %1920 = vmatprep.subr.bf16.mxu1 %v2753_v15  ;;  %v2769_v22 = vcombine.high %v56_v17, %v64_v18  ;;  %v71_v23 = vld [vmem:[%s4462_s1 + $0x180] sm:$0xff]  ;;  %v72_v25 = vld [vmem:[%s4462_s1 + $0x188] sm:$0xff]  ;;  %v2766_v27 = vcombine.low %v55_v14, %v63_v16 }
   0x8   :  { %v79_v24 = vld [vmem:[%s4462_s1 + $0x1c0] sm:$0xff]  ;;  %v80_v26 = vld [vmem:[%s4462_s1 + $0x1c8] sm:$0xff]  ;;  %v2768_v28 = vcombine.low %v56_v17, %v64_v18 }
   0x9   :  { %v2783_v29 = vcombine.high %v71_v23, %v79_v24  ;;  %v2785_v30 = vcombine.high %v72_v25, %v80_v26  ;;  %v87_v31 = vld [vmem:[%s4462_s1 + $0x200] sm:$0xff]  ;;  %v88_v33 = vld [vmem:[%s4462_s1 + $0x208] sm:$0xff]  ;;  %v2782_v35 = vcombine.low %v71_v23, %v79_v24  ;;  %v2784_v36 = vcombine.low %v72_v25, %v80_v26 }
   0xa   :  { %1815 = vmatpush1.bf16.msra.mxu0 %v2750_v19  ;;  %1921 = vmatpush1.bf16.msra.mxu1 %v2752_v20  ;;  %v95_v32 = vld [vmem:[%s4462_s1 + $0x240] sm:$0xff]  ;;  %v96_v34 = vld [vmem:[%s4462_s1 + $0x248] sm:$0xff] }
   0xb   :  { %1816 = vmatprep.subr.bf16.mxu0 %v2767_v21  ;;  %1922 = vmatprep.subr.bf16.mxu1 %v2769_v22  ;;  %v2799_v37 = vcombine.high %v87_v31, %v95_v32  ;;  %v2801_v38 = vcombine.high %v88_v33, %v96_v34  ;;  %v103_v39 = vld [vmem:[%s4462_s1 + $0x280] sm:$0xff]  ;;  %v104_v41 = vld [vmem:[%s4462_s1 + $0x288] sm:$0xff]  ;;  %v2798_v43 = vcombine.low %v87_v31, %v95_v32 }
   0xc   :  { %v111_v40 = vld [vmem:[%s4462_s1 + $0x2c0] sm:$0xff]  ;;  %v112_v42 = vld [vmem:[%s4462_s1 + $0x2c8] sm:$0xff]  ;;  %v2800_v44 = vcombine.low %v88_v33, %v96_v34 }
   0xd   :  { %v2815_v45 = vcombine.high %v103_v39, %v111_v40  ;;  %v2817_v46 = vcombine.high %v104_v41, %v112_v42  ;;  %v119_v47 = vld [vmem:[%s4462_s1 + $0x300] sm:$0xff]  ;;  %v120_v49 = vld [vmem:[%s4462_s1 + $0x308] sm:$0xff]  ;;  %v2814_v51 = vcombine.low %v103_v39, %v111_v40  ;;  %v2816_v52 = vcombine.low %v104_v41, %v112_v42 }
   0xe   :  { %1817 = vmatpush1.bf16.msra.mxu0 %v2766_v27  ;;  %1923 = vmatpush1.bf16.msra.mxu1 %v2768_v28  ;;  %v127_v48 = vld [vmem:[%s4462_s1 + $0x340] sm:$0xff]  ;;  %v128_v50 = vld [vmem:[%s4462_s1 + $0x348] sm:$0xff] }
   0xf   :  { %1818 = vmatprep.subr.bf16.mxu0 %v2783_v29  ;;  %1924 = vmatprep.subr.bf16.mxu1 %v2785_v30  ;;  %v2831_v53 = vcombine.high %v119_v47, %v127_v48  ;;  %v2833_v54 = vcombine.high %v120_v49, %v128_v50  ;;  %v135_v55 = vld [vmem:[%s4462_s1 + $0x380] sm:$0xff]  ;;  %v136_v58 = vld [vmem:[%s4462_s1 + $0x388] sm:$0xff]  ;;  %v2830_v60 = vcombine.low %v119_v47, %v127_v48 }
  0x10   :  { %v143_v56 = vld [vmem:[%s4462_s1 + $0x3c0] sm:$0xff]  ;;  %v144_v59 = vld [vmem:[%s4462_s1 + $0x3c8] sm:$0xff]  ;;  %v2832_v61 = vcombine.low %v120_v49, %v128_v50 }
  0x11   :  { %v3299_v57 = vld [vmem:[%s4463_s0 + $0x4] ss:$12 sps:$4 sm:$0xff]   ;;  %v2847_v62 = vcombine.high %v135_v55, %v143_v56  ;;  %v2849_v63 = vcombine.high %v136_v58, %v144_v59  ;;  %v152_v2 = vld [vmem:[%s4462_s1 + $0x408] sm:$0xff]  ;;  %v2846_v5 = vcombine.low %v135_v55, %v143_v56  ;;  %v2848_v6 = vcombine.low %v136_v58, %v144_v59 }
  0x12   :  { %1819 = vmatpush1.bf16.msra.mxu0 %v2782_v35  ;;  %1925 = vmatpush1.bf16.msra.mxu1 %v2784_v36  ;;  %v151_v0 = vld [vmem:[%s4462_s1 + $0x400] sm:$0xff]  ;;  %v160_v4 = vld [vmem:[%s4462_s1 + $0x448] sm:$0xff] }
  0x13   :  { %1820 = vmatprep.subr.bf16.mxu0 %v2799_v37  ;;  %1926 = vmatprep.subr.bf16.mxu1 %v2801_v38  ;;  %v159_v1 = vld [vmem:[%s4462_s1 + $0x440] sm:$0xff]  ;;  %v2865_v8 = vcombine.high %v152_v2, %v160_v4  ;;  %v168_v11 = vld [vmem:[%s4462_s1 + $0x488] sm:$0xff]  ;;  %v2864_v14 = vcombine.low %v152_v2, %v160_v4  ;;  %v313_v4 = vld [vmem:[%s4464_s2 + $0x10] sm:$0xff] }
  0x14   :  { %1844 = vmatprep.mubr.bf16.mxu0 %v3299_v57  ;;  %1950 = vmatprep.mubr.bf16.mxu1 %v3299_v57  ;;  %v2863_v7 = vcombine.high %v151_v0, %v159_v1  ;;  %v167_v9 = vld [vmem:[%s4462_s1 + $0x480] sm:$0xff]  ;;  %v176_v12 = vld [vmem:[%s4462_s1 + $0x4c8] sm:$0xff]  ;;  %v2862_v13 = vcombine.low %v151_v0, %v159_v1 }
  0x15   :  { %v175_v10 = vld [vmem:[%s4462_s1 + $0x4c0] sm:$0xff]  ;;  %v2881_v16 = vcombine.high %v168_v11, %v176_v12  ;;  %v184_v19 = vld [vmem:[%s4462_s1 + $0x508] sm:$0xff]  ;;  %v2880_v22 = vcombine.low %v168_v11, %v176_v12  ;;  %327 = vperm.xlu1 %3168, %v313_v4  }
  0x16   :  { %1821 = vmatpush1.bf16.msra.mxu0 %v2798_v43  ;;  %1927 = vmatpush1.bf16.msra.mxu1 %v2800_v44  ;;  %v2879_v15 = vcombine.high %v167_v9, %v175_v10  ;;  %v183_v17 = vld [vmem:[%s4462_s1 + $0x500] sm:$0xff]  ;;  %v192_v20 = vld [vmem:[%s4462_s1 + $0x548] sm:$0xff]  ;;  %v2878_v21 = vcombine.low %v167_v9, %v175_v10  ;;  %v314_v10 = vld [vmem:[%s4464_s2 + $0x18] sm:$0xff] }
  0x17   :  { %1822 = vmatprep.subr.bf16.mxu0 %v2815_v45  ;;  %1928 = vmatprep.subr.bf16.mxu1 %v2817_v46  ;;  %v191_v18 = vld [vmem:[%s4462_s1 + $0x540] sm:$0xff]  ;;  %v2897_v24 = vcombine.high %v184_v19, %v192_v20  ;;  %v200_v27 = vld [vmem:[%s4462_s1 + $0x588] sm:$0xff]  ;;  %v2896_v30 = vcombine.low %v184_v19, %v192_v20 }
  0x18   :  { %v2895_v23 = vcombine.high %v183_v17, %v191_v18  ;;  %v199_v25 = vld [vmem:[%s4462_s1 + $0x580] sm:$0xff]  ;;  %v208_v28 = vld [vmem:[%s4462_s1 + $0x5c8] sm:$0xff]  ;;  %v2894_v29 = vcombine.low %v183_v17, %v191_v18 }
  0x19   :  { %v207_v26 = vld [vmem:[%s4462_s1 + $0x5c0] sm:$0xff]  ;;  %v2913_v32 = vcombine.high %v200_v27, %v208_v28  ;;  %v216_v35 = vld [vmem:[%s4462_s1 + $0x608] sm:$0xff]  ;;  %v2912_v38 = vcombine.low %v200_v27, %v208_v28  ;;  %332 = vperm.xlu1 %3168, %v314_v10   ;;  %v26_v27 = vld [vmem:[%s4462_s1 + $0x18] sm:$0xff] }
  0x1a   :  { %1823 = vmatpush1.bf16.msra.mxu0 %v2814_v51  ;;  %1929 = vmatpush1.bf16.msra.mxu1 %v2816_v52  ;;  %v2911_v31 = vcombine.high %v199_v25, %v207_v26  ;;  %v215_v33 = vld [vmem:[%s4462_s1 + $0x600] sm:$0xff]  ;;  %v224_v36 = vld [vmem:[%s4462_s1 + $0x648] sm:$0xff]  ;;  %v2910_v37 = vcombine.low %v199_v25, %v207_v26  ;;  %v33_v25 = vld [vmem:[%s4462_s1 + $0x50] sm:$0xff] }
  0x1b   :  { %1824 = vmatprep.subr.bf16.mxu0 %v2831_v53  ;;  %1930 = vmatprep.subr.bf16.mxu1 %v2833_v54  ;;  %v223_v34 = vld [vmem:[%s4462_s1 + $0x640] sm:$0xff]  ;;  %v2929_v40 = vcombine.high %v216_v35, %v224_v36  ;;  %v232_v43 = vld [vmem:[%s4462_s1 + $0x688] sm:$0xff]  ;;  %v2928_v46 = vcombine.low %v216_v35, %v224_v36  ;;  %v34_v28 = vld [vmem:[%s4462_s1 + $0x58] sm:$0xff] }
  0x1c   :  { %v2927_v39 = vcombine.high %v215_v33, %v223_v34  ;;  %v231_v41 = vld [vmem:[%s4462_s1 + $0x680] sm:$0xff]  ;;  %v240_v44 = vld [vmem:[%s4462_s1 + $0x6c8] sm:$0xff]  ;;  %v2926_v45 = vcombine.low %v215_v33, %v223_v34  ;;  %v41_v34 = vld [vmem:[%s4462_s1 + $0x90] sm:$0xff] }
  0x1d   :  { %v239_v42 = vld [vmem:[%s4462_s1 + $0x6c0] sm:$0xff]  ;;  %v2945_v48 = vcombine.high %v232_v43, %v240_v44  ;;  %v248_v51 = vld [vmem:[%s4462_s1 + $0x708] sm:$0xff]  ;;  %v2944_v54 = vcombine.low %v232_v43, %v240_v44  ;;  %v49_v35 = vld [vmem:[%s4462_s1 + $0xd0] sm:$0xff] }
  0x1e   :  { %1825 = vmatpush1.bf16.msra.mxu0 %v2830_v60  ;;  %1931 = vmatpush1.bf16.msra.mxu1 %v2832_v61  ;;  %v2943_v47 = vcombine.high %v231_v41, %v239_v42  ;;  %v247_v49 = vld [vmem:[%s4462_s1 + $0x700] sm:$0xff]  ;;  %v256_v52 = vld [vmem:[%s4462_s1 + $0x748] sm:$0xff]  ;;  %v2942_v53 = vcombine.low %v231_v41, %v239_v42  ;;  %v2755_v41 = vcombine.high %v41_v34, %v49_v35  ;;  %v57_v43 = vld [vmem:[%s4462_s1 + $0x110] sm:$0xff] }
  0x1f   :  { %1826 = vmatprep.subr.bf16.mxu0 %v2847_v62  ;;  %1932 = vmatprep.subr.bf16.mxu1 %v2849_v63  ;;  %v255_v50 = vld [vmem:[%s4462_s1 + $0x740] sm:$0xff]  ;;  %v2961_v56 = vcombine.high %v248_v51, %v256_v52  ;;  %v264_v61 = vld [vmem:[%s4462_s1 + $0x788] sm:$0xff]  ;;  %v2960_v1 = vcombine.low %v248_v51, %v256_v52  ;;  %v65_v44 = vld [vmem:[%s4462_s1 + $0x150] sm:$0xff] }
  0x20   :  { %v2959_v55 = vcombine.high %v247_v49, %v255_v50  ;;  %v263_v58 = vld [vmem:[%s4462_s1 + $0x780] sm:$0xff]  ;;  %v272_v62 = vld [vmem:[%s4462_s1 + $0x7c8] sm:$0xff]  ;;  %v2958_v63 = vcombine.low %v247_v49, %v255_v50  ;;  %v2771_v49 = vcombine.high %v57_v43, %v65_v44  ;;  %v73_v51 = vld [vmem:[%s4462_s1 + $0x190] sm:$0xff] }
  0x21   :  { %v271_v59 = vld [vmem:[%s4462_s1 + $0x7c0] sm:$0xff]  ;;  %v312_v0 = vld [vmem:[%s4464_s2 + $0x8] sm:$0xff]  ;;  %v2976_v12 = vcombine.low %v264_v61, %v272_v62  ;;  %v81_v52 = vld [vmem:[%s4462_s1 + $0x1d0] sm:$0xff] }
  0x22   :  { %1827 = vmatpush1.bf16.msra.mxu0 %v2846_v5  ;;  %1933 = vmatpush1.bf16.msra.mxu1 %v2848_v6  ;;  %v311_v60 = vld [vmem:[%s4464_s2] sm:$0xff]  ;;  %v2975_v2 = vcombine.high %v263_v58, %v271_v59  ;;  %v2977_v5 = vcombine.high %v264_v61, %v272_v62  ;;  %v288_v9 = vld [vmem:[%s4462_s1 + $0x848] sm:$0xff]  ;;  %v2974_v11 = vcombine.low %v263_v58, %v271_v59  ;;  %v89_v61 = vld [vmem:[%s4462_s1 + $0x210] sm:$0xff] }
  0x23   :  { %1828 = vmatprep.subr.bf16.mxu0 %v2863_v7  ;;  %1934 = vmatprep.subr.bf16.mxu1 %v2865_v8  ;;  %v279_v6 = vld [vmem:[%s4462_s1 + $0x800] sm:$0xff]  ;;  %v280_v8 = vld [vmem:[%s4462_s1 + $0x808] sm:$0xff]  ;;  %v2787_v59 = vcombine.high %v73_v51, %v81_v52  ;;  %v97_v62 = vld [vmem:[%s4462_s1 + $0x250] sm:$0xff] }
  0x24   :  { %317 = vperm.xlu0 %3167, %v311_v60   ;;  %v287_v7 = vld [vmem:[%s4462_s1 + $0x840] sm:$0xff]  ;;  %v296_v19 = vld [vmem:[%s4462_s1 + $0x888] sm:$0xff]  ;;  %v2803_v4 = vcombine.high %v89_v61, %v97_v62  ;;  %v2802_v10 = vcombine.low %v89_v61, %v97_v62  ;;  %v209_v61 = vld [vmem:[%s4462_s1 + $0x5d0] sm:$0xff] }
  0x25   :  { %v303_v17 = vld [vmem:[%s4462_s1 + $0x8c0] sm:$0xff]  ;;  %v2990_v18 = vcombine.low %v279_v6, %v287_v7  ;;  %v304_v20 = vld [vmem:[%s4462_s1 + $0x8c8] sm:$0xff]  ;;  %v202_v62 = vld [vmem:[%s4462_s1 + $0x598] sm:$0xff] }
  0x26   :  { %1829 = vmatpush1.bf16.msra.mxu0 %v2862_v13  ;;  %1935 = vmatpush1.bf16.msra.mxu1 %v2864_v14  ;;  %v2991_v13 = vcombine.high %v279_v6, %v287_v7  ;;  %v2993_v14 = vcombine.high %v280_v8, %v288_v9  ;;  %v3009_v26 = vcombine.high %v296_v19, %v304_v20  ;;  %v3470_v33 = vld [vmem:[%s4463_s0 + $0x18] ss:$12 sps:$4 sm:$0xff]   ;;  %v3485_v36 = vld [vmem:[%s4463_s0 + $0x8] ss:$12 sps:$4 sm:$0xff]  }
  0x27   :  { %1830 = vmatprep.subr.bf16.mxu0 %v2879_v15  ;;  %1936 = vmatprep.subr.bf16.mxu1 %v2881_v16  ;;  %v3432_v15 = vld [vmem:[%s4463_s0] ss:$12 sps:$4 sm:$0xff]   ;;  %v105_v6 = vld [vmem:[%s4462_s1 + $0x290] sm:$0xff] }
  0x28   :  { %322 = vperm.xlu0 %3167, %v312_v0   ;;  %v295_v16 = vld [vmem:[%s4462_s1 + $0x880] sm:$0xff]  ;;  %v98_v0 = vld [vmem:[%s4462_s1 + $0x258] sm:$0xff]  ;;  %v113_v7 = vld [vmem:[%s4462_s1 + $0x2d0] sm:$0xff] }
  0x2a   :  { %1831 = vmatpush1.bf16.msra.mxu0 %v2878_v21  ;;  %1937 = vmatpush1.bf16.msra.mxu1 %v2880_v22  ;;  %v2992_v21 = vcombine.low %v280_v8, %v288_v9  ;;  %v3449_v22 = vld [vmem:[%s4463_s0 + $0x1c] ss:$12 sps:$4 sm:$0xff]  }
  0x2b   :  { %1832 = vmatprep.subr.bf16.mxu0 %v2895_v23  ;;  %1938 = vmatprep.subr.bf16.mxu1 %v2897_v24  ;;  %v3007_v23 = vcombine.high %v295_v16, %v303_v17  ;;  %v25_v24 = vld [vmem:[%s4462_s1 + $0x10] sm:$0xff]  ;;  %v106_v8 = vld [vmem:[%s4462_s1 + $0x298] sm:$0xff] }
  0x2c   :  { %v114_v9 = vld [vmem:[%s4462_s1 + $0x2d8] sm:$0xff] }
  0x2e   :  { %1833 = vmatpush1.bf16.msra.mxu0 %v2894_v29  ;;  %1939 = vmatpush1.bf16.msra.mxu1 %v2896_v30  ;;  %v3006_v29 = vcombine.low %v295_v16, %v303_v17  ;;  %v3008_v30 = vcombine.low %v296_v19, %v304_v20  ;;  %v129_v16 = vld [vmem:[%s4462_s1 + $0x350] sm:$0xff]  ;;  %v122_v17 = vld [vmem:[%s4462_s1 + $0x318] sm:$0xff]  ;;  %v2818_v19 = vcombine.low %v105_v6, %v113_v7 }
  0x2f   :  { %1834 = vmatprep.subr.bf16.mxu0 %v2911_v31  ;;  %1940 = vmatprep.subr.bf16.mxu1 %v2913_v32  ;;  %v2739_v31 = vcombine.high %v25_v24, %v33_v25  ;;  %v2741_v32 = vcombine.high %v26_v27, %v34_v28  ;;  %v2820_v20 = vcombine.low %v106_v8, %v114_v9 }
  0x32   :  { %1835 = vmatpush1.bf16.msra.mxu0 %v2910_v37  ;;  %1941 = vmatpush1.bf16.msra.mxu1 %v2912_v38  ;;  %v42_v37 = vld [vmem:[%s4462_s1 + $0x98] sm:$0xff] }
  0x33   :  { %1836 = vmatprep.subr.bf16.mxu0 %v2927_v39  ;;  %1942 = vmatprep.subr.bf16.mxu1 %v2929_v40  ;;  %v50_v38 = vld [vmem:[%s4462_s1 + $0xd8] sm:$0xff]  ;;  %v2738_v39 = vcombine.low %v25_v24, %v33_v25  ;;  %v2740_v40 = vcombine.low %v26_v27, %v34_v28  ;;  %v137_v24 = vld [vmem:[%s4462_s1 + $0x390] sm:$0xff] }
  0x34   :  { %v2757_v42 = vcombine.high %v42_v37, %v50_v38  ;;  %v145_v25 = vld [vmem:[%s4462_s1 + $0x3d0] sm:$0xff]  ;;  %v146_v27 = vld [vmem:[%s4462_s1 + $0x3d8] sm:$0xff] }
  0x36   :  { %1837 = vmatpush1.bf16.msra.mxu0 %v2926_v45  ;;  %1943 = vmatpush1.bf16.msra.mxu1 %v2928_v46  ;;  %v58_v45 = vld [vmem:[%s4462_s1 + $0x118] sm:$0xff] }
  0x37   :  { %1838 = vmatprep.subr.bf16.mxu0 %v2943_v47  ;;  %1944 = vmatprep.subr.bf16.mxu1 %v2945_v48  ;;  %v66_v46 = vld [vmem:[%s4462_s1 + $0x158] sm:$0xff]  ;;  %v2754_v47 = vcombine.low %v41_v34, %v49_v35  ;;  %v2756_v48 = vcombine.low %v42_v37, %v50_v38  ;;  %v161_v34 = vld [vmem:[%s4462_s1 + $0x450] sm:$0xff]  ;;  %v2850_v38 = vcombine.low %v137_v24, %v145_v25 }
  0x38   :  { %v2773_v50 = vcombine.high %v58_v45, %v66_v46  ;;  %v2772_v58 = vcombine.low %v58_v45, %v66_v46  ;;  %v154_v35 = vld [vmem:[%s4462_s1 + $0x418] sm:$0xff] }
  0x39   :  { %v162_v37 = vld [vmem:[%s4462_s1 + $0x458] sm:$0xff] }
  0x3a   :  { %1839 = vmatpush1.bf16.msra.mxu0 %v2942_v53  ;;  %1945 = vmatpush1.bf16.msra.mxu1 %v2944_v54  ;;  %v3520_v53 = vld [vmem:[%s4463_s0 + $0x20] ss:$12 sps:$4 sm:$0xff]   ;;  %v74_v54 = vld [vmem:[%s4462_s1 + $0x198] sm:$0xff] }
  0x3b   :  { %1840 = vmatprep.subr.bf16.mxu0 %v2959_v55  ;;  %1946 = vmatprep.subr.bf16.mxu1 %v2961_v56  ;;  %v82_v55 = vld [vmem:[%s4462_s1 + $0x1d8] sm:$0xff]  ;;  %v2770_v56 = vcombine.low %v57_v43, %v65_v44  ;;  %v177_v43 = vld [vmem:[%s4462_s1 + $0x4d0] sm:$0xff] }
  0x3c   :  { %v2789_v60 = vcombine.high %v74_v54, %v82_v55  ;;  %v170_v44 = vld [vmem:[%s4462_s1 + $0x498] sm:$0xff] }
  0x3d   :  { %v178_v45 = vld [vmem:[%s4462_s1 + $0x4d8] sm:$0xff] }
  0x3e   :  { %1841 = vmatpush1.bf16.msra.mxu0 %v2958_v63  ;;  %1947 = vmatpush1.bf16.msra.mxu1 %v2960_v1  ;;  %v90_v63 = vld [vmem:[%s4462_s1 + $0x218] sm:$0xff]  ;;  %v2786_v1 = vcombine.low %v73_v51, %v81_v52  ;;  %v193_v51 = vld [vmem:[%s4462_s1 + $0x550] sm:$0xff] }
  0x3f   :  { %1842 = vmatprep.subr.bf16.mxu0 %v2975_v2  ;;  %1948 = vmatprep.subr.bf16.mxu1 %v2977_v5  ;;  %v2788_v2 = vcombine.low %v74_v54, %v82_v55  ;;  %v2805_v5 = vcombine.high %v90_v63, %v98_v0  ;;  %v186_v52 = vld [vmem:[%s4462_s1 + $0x518] sm:$0xff] }
  0x40   :  { %v194_v54 = vld [vmem:[%s4462_s1 + $0x558] sm:$0xff] }
  0x42   :  { %1843 = vmatpush1.bf16.msra.mxu0 %v2974_v11  ;;  %1949 = vmatpush1.bf16.msra.mxu1 %v2976_v12  ;;  %v2804_v11 = vcombine.low %v90_v63, %v98_v0  ;;  %v2819_v12 = vcombine.high %v105_v6, %v113_v7  ;;  %v210_v63 = vld [vmem:[%s4462_s1 + $0x5d8] sm:$0xff]  ;;  %v225_v6 = vld [vmem:[%s4462_s1 + $0x650] sm:$0xff] }
  0x43   :  { %1865 = vmatprep.subr.bf16.mxu0 %v2991_v13  ;;  %1971 = vmatprep.subr.bf16.mxu1 %v2993_v14  ;;  %v2821_v13 = vcombine.high %v106_v8, %v114_v9  ;;  %v121_v14 = vld [vmem:[%s4462_s1 + $0x310] sm:$0xff]  ;;  %v218_v7 = vld [vmem:[%s4462_s1 + $0x618] sm:$0xff] }
  0x44   :  { %v2834_v28 = vcombine.low %v121_v14, %v129_v16  ;;  %v226_v8 = vld [vmem:[%s4462_s1 + $0x658] sm:$0xff] }
  0x45   :  { %1845 = vmatmul.mubr.bf16.vlgmr.msra.gmra.mrb[0].mxu0 %v3432_v15  ;;  %1951 = vmatmul.mubr.bf16.vlgmr.msra.gmra.mrb[0].mxu1 %v3432_v15 }
  0x46   :  { %1866 = vmatpush1.bf16.msra.mxu0 %v2990_v18  ;;  %1972 = vmatpush1.bf16.msra.mxu1 %v2992_v21  ;;  %v130_v18 = vld [vmem:[%s4462_s1 + $0x358] sm:$0xff]  ;;  %v2835_v21 = vcombine.high %v121_v14, %v129_v16  ;;  %v241_v14 = vld [vmem:[%s4462_s1 + $0x6d0] sm:$0xff] }
  0x47   :  { %1854 = vmatprep.mubr.bf16.mxu0 %v3449_v22  ;;  %1960 = vmatprep.mubr.bf16.mxu1 %v3449_v22  ;;  %v234_v16 = vld [vmem:[%s4462_s1 + $0x698] sm:$0xff] }
  0x48   :  { %1867 = vmatprep.subr.bf16.mxu0 %v3007_v23  ;;  %1973 = vmatprep.subr.bf16.mxu1 %v3009_v26  ;;  %v2837_v23 = vcombine.high %v122_v17, %v130_v18  ;;  %v138_v26 = vld [vmem:[%s4462_s1 + $0x398] sm:$0xff] }
  0x4a   :  { %1868 = vmatpush1.bf16.msra.mxu0 %v3006_v29  ;;  %1974 = vmatpush1.bf16.msra.mxu1 %v3008_v30  ;;  %v2836_v29 = vcombine.low %v122_v17, %v130_v18  ;;  %v2851_v30 = vcombine.high %v137_v24, %v145_v25  ;;  %v242_v17 = vld [vmem:[%s4462_s1 + $0x6d8] sm:$0xff]  ;;  %v257_v24 = vld [vmem:[%s4462_s1 + $0x750] sm:$0xff] }
  0x4b   :  { %2024 = vmatprep.subr.bf16.mxu0 %v2739_v31  ;;  %2130 = vmatprep.subr.bf16.mxu1 %v2741_v32  ;;  %v2853_v31 = vcombine.high %v138_v26, %v146_v27  ;;  %v153_v32 = vld [vmem:[%s4462_s1 + $0x410] sm:$0xff]  ;;  %v250_v25 = vld [vmem:[%s4462_s1 + $0x718] sm:$0xff] }
  0x4c   :  { %v2866_v46 = vcombine.low %v153_v32, %v161_v34 }
  0x4d   :  { %1855 = vmatmul.mubr.bf16.gmra.mrb[4].mxu0 %v3470_v33  ;;  %1961 = vmatmul.mubr.bf16.gmra.mrb[4].mxu1 %v3470_v33 }
  0x4e   :  { %1897 = vmatprep.mubr.bf16.mxu0 %v3183_v3  ;;  %2003 = vmatprep.mubr.bf16.mxu1 %v3183_v3 }
  0x55   :  { %3022 = vmatmul.mubr.msk.bf16.vlgmr.msra.gmra.mrb[0].mxu0 %vm1805_vm0, %v3485_v36  ;;  %3024 = vmatmul.mubr.msk.bf16.vlgmr.msra.gmra.mrb[0].mxu1 %vm1805_vm0, %v3485_v36 }
  0x56   :  { %2025 = vmatpush1.bf16.msra.mxu0 %v2738_v39  ;;  %2131 = vmatpush1.bf16.msra.mxu1 %v2740_v40  ;;  %v2852_v39 = vcombine.low %v138_v26, %v146_v27  ;;  %v2867_v40 = vcombine.high %v153_v32, %v161_v34  ;;  %v258_v26 = vld [vmem:[%s4462_s1 + $0x758] sm:$0xff]  ;;  %v273_v32 = vld [vmem:[%s4462_s1 + $0x7d0] sm:$0xff] }
  0x57   :  { %2026 = vmatprep.subr.bf16.mxu0 %v2755_v41  ;;  %2132 = vmatprep.subr.bf16.mxu1 %v2757_v42  ;;  %v2869_v41 = vcombine.high %v154_v35, %v162_v37  ;;  %v169_v42 = vld [vmem:[%s4462_s1 + $0x490] sm:$0xff]  ;;  %v266_v34 = vld [vmem:[%s4462_s1 + $0x798] sm:$0xff] }
  0x58   :  { %1907 = vmatprep.mubr.bf16.mxu0 %v3183_v3  ;;  %2013 = vmatprep.mubr.bf16.mxu1 %v3183_v3  ;;  %v2882_v55 = vcombine.low %v169_v42, %v177_v43 }
  0x5a   :  { %2027 = vmatpush1.bf16.msra.mxu0 %v2754_v47  ;;  %2133 = vmatpush1.bf16.msra.mxu1 %v2756_v48  ;;  %v2868_v47 = vcombine.low %v154_v35, %v162_v37  ;;  %v2883_v48 = vcombine.high %v169_v42, %v177_v43  ;;  %v274_v35 = vld [vmem:[%s4462_s1 + $0x7d8] sm:$0xff]  ;;  %v289_v42 = vld [vmem:[%s4462_s1 + $0x850] sm:$0xff] }
  0x5b   :  { %2028 = vmatprep.subr.bf16.mxu0 %v2771_v49  ;;  %2134 = vmatprep.subr.bf16.mxu1 %v2773_v50  ;;  %v2885_v49 = vcombine.high %v170_v44, %v178_v45  ;;  %v185_v50 = vld [vmem:[%s4462_s1 + $0x510] sm:$0xff]  ;;  %v282_v43 = vld [vmem:[%s4462_s1 + $0x818] sm:$0xff] }
  0x5c   :  { %v2898_v0 = vcombine.low %v185_v50, %v193_v51 }
  0x5d   :  { %3023 = vmatmul.mubr.msk.bf16.gmra.mrb[4].mxu0 %vm1805_vm0, %v3520_v53  ;;  %3025 = vmatmul.mubr.msk.bf16.gmra.mrb[4].mxu1 %vm1805_vm0, %v3520_v53 }
  0x5e   :  { %2029 = vmatpush1.bf16.msra.mxu0 %v2770_v56  ;;  %2135 = vmatpush1.bf16.msra.mxu1 %v2772_v58  ;;  %v2884_v56 = vcombine.low %v170_v44, %v178_v45  ;;  %v2899_v58 = vcombine.high %v185_v50, %v193_v51  ;;  %v290_v44 = vld [vmem:[%s4462_s1 + $0x858] sm:$0xff]  ;;  %v305_v50 = vld [vmem:[%s4462_s1 + $0x8d0] sm:$0xff] }
  0x5f   :  { %2030 = vmatprep.subr.bf16.mxu0 %v2787_v59  ;;  %2136 = vmatprep.subr.bf16.mxu1 %v2789_v60  ;;  %v2901_v59 = vcombine.high %v186_v52, %v194_v54  ;;  %v201_v60 = vld [vmem:[%s4462_s1 + $0x590] sm:$0xff] }
  0x60   :  { %2056 = vmatprep.mubr.bf16.mxu0 %v3299_v57  ;;  %2162 = vmatprep.mubr.bf16.mxu1 %v3299_v57  ;;  %v2914_v9 = vcombine.low %v201_v60, %v209_v61 }
  0x62   :  { %2031 = vmatpush1.bf16.msra.mxu0 %v2786_v1  ;;  %2137 = vmatpush1.bf16.msra.mxu1 %v2788_v2  ;;  %v2900_v1 = vcombine.low %v186_v52, %v194_v54  ;;  %v2915_v2 = vcombine.high %v201_v60, %v209_v61  ;;  %v298_v52 = vld [vmem:[%s4462_s1 + $0x898] sm:$0xff]  ;;  %v28_v61 = vld [vmem:[%s4462_s1 + $0x28] sm:$0xff] }
  0x63   :  { %2032 = vmatprep.subr.bf16.mxu0 %v2803_v4  ;;  %2138 = vmatprep.subr.bf16.mxu1 %v2805_v5  ;;  %v2917_v4 = vcombine.high %v202_v62, %v210_v63  ;;  %v217_v5 = vld [vmem:[%s4462_s1 + $0x610] sm:$0xff]  ;;  %v306_v54 = vld [vmem:[%s4462_s1 + $0x8d8] sm:$0xff] }
  0x64   :  { %v2930_v18 = vcombine.low %v217_v5, %v225_v6  ;;  %v3013_v60 = vcombine.high %v298_v52, %v306_v54 }
  0x66   :  { %2033 = vmatpush1.bf16.msra.mxu0 %v2802_v10  ;;  %2139 = vmatpush1.bf16.msra.mxu1 %v2804_v11  ;;  %v2916_v10 = vcombine.low %v202_v62, %v210_v63  ;;  %v2931_v11 = vcombine.high %v217_v5, %v225_v6  ;;  %v36_v62 = vld [vmem:[%s4462_s1 + $0x68] sm:$0xff]  ;;  %v51_v5 = vld [vmem:[%s4462_s1 + $0xe0] sm:$0xff] }
  0x67   :  { %2034 = vmatprep.subr.bf16.mxu0 %v2819_v12  ;;  %2140 = vmatprep.subr.bf16.mxu1 %v2821_v13  ;;  %v2933_v12 = vcombine.high %v218_v7, %v226_v8  ;;  %v233_v13 = vld [vmem:[%s4462_s1 + $0x690] sm:$0xff]  ;;  %v44_v6 = vld [vmem:[%s4462_s1 + $0xa8] sm:$0xff] }
  0x68   :  { %v2946_v27 = vcombine.low %v233_v13, %v241_v14 }
  0x6a   :  { %2035 = vmatpush1.bf16.msra.mxu0 %v2818_v19  ;;  %2141 = vmatpush1.bf16.msra.mxu1 %v2820_v20  ;;  %v2932_v19 = vcombine.low %v218_v7, %v226_v8  ;;  %v2947_v20 = vcombine.high %v233_v13, %v241_v14  ;;  %v52_v7 = vld [vmem:[%s4462_s1 + $0xe8] sm:$0xff]  ;;  %v67_v13 = vld [vmem:[%s4462_s1 + $0x160] sm:$0xff] }
  0x6b   :  { %2036 = vmatprep.subr.bf16.mxu0 %v2835_v21  ;;  %2142 = vmatprep.subr.bf16.mxu1 %v2837_v23  ;;  %v2949_v21 = vcombine.high %v234_v16, %v242_v17  ;;  %v249_v23 = vld [vmem:[%s4462_s1 + $0x710] sm:$0xff]  ;;  %v60_v14 = vld [vmem:[%s4462_s1 + $0x128] sm:$0xff] }
  0x6c   :  { %v2962_v37 = vcombine.low %v249_v23, %v257_v24 }
  0x6e   :  { %2037 = vmatpush1.bf16.msra.mxu0 %v2834_v28  ;;  %2143 = vmatpush1.bf16.msra.mxu1 %v2836_v29  ;;  %v2948_v28 = vcombine.low %v234_v16, %v242_v17  ;;  %v2963_v29 = vcombine.high %v249_v23, %v257_v24  ;;  %v68_v16 = vld [vmem:[%s4462_s1 + $0x168] sm:$0xff]  ;;  %v83_v23 = vld [vmem:[%s4462_s1 + $0x1e0] sm:$0xff] }
  0x6f   :  { %2038 = vmatprep.subr.bf16.mxu0 %v2851_v30  ;;  %2144 = vmatprep.subr.bf16.mxu1 %v2853_v31  ;;  %v2965_v30 = vcombine.high %v250_v25, %v258_v26  ;;  %v265_v31 = vld [vmem:[%s4462_s1 + $0x790] sm:$0xff]  ;;  %v76_v24 = vld [vmem:[%s4462_s1 + $0x1a8] sm:$0xff] }
  0x70   :  { %v2978_v45 = vcombine.low %v265_v31, %v273_v32 }
  0x72   :  { %2039 = vmatpush1.bf16.msra.mxu0 %v2850_v38  ;;  %2145 = vmatpush1.bf16.msra.mxu1 %v2852_v39  ;;  %v2964_v38 = vcombine.low %v250_v25, %v258_v26  ;;  %v2979_v39 = vcombine.high %v265_v31, %v273_v32  ;;  %v84_v25 = vld [vmem:[%s4462_s1 + $0x1e8] sm:$0xff]  ;;  %v99_v31 = vld [vmem:[%s4462_s1 + $0x260] sm:$0xff] }
  0x73   :  { %2040 = vmatprep.subr.bf16.mxu0 %v2867_v40  ;;  %2146 = vmatprep.subr.bf16.mxu1 %v2869_v41  ;;  %v2981_v40 = vcombine.high %v266_v34, %v274_v35  ;;  %v281_v41 = vld [vmem:[%s4462_s1 + $0x810] sm:$0xff]  ;;  %v92_v32 = vld [vmem:[%s4462_s1 + $0x228] sm:$0xff] }
  0x74   :  { %v2994_v51 = vcombine.low %v281_v41, %v289_v42 }
  0x76   :  { %2041 = vmatpush1.bf16.msra.mxu0 %v2866_v46  ;;  %2147 = vmatpush1.bf16.msra.mxu1 %v2868_v47  ;;  %v2980_v46 = vcombine.low %v266_v34, %v274_v35  ;;  %v2995_v47 = vcombine.high %v281_v41, %v289_v42  ;;  %v100_v34 = vld [vmem:[%s4462_s1 + $0x268] sm:$0xff]  ;;  %v115_v41 = vld [vmem:[%s4462_s1 + $0x2e0] sm:$0xff] }
  0x77   :  { %2042 = vmatprep.subr.bf16.mxu0 %v2883_v48  ;;  %2148 = vmatprep.subr.bf16.mxu1 %v2885_v49  ;;  %v2997_v48 = vcombine.high %v282_v43, %v290_v44  ;;  %v297_v49 = vld [vmem:[%s4462_s1 + $0x890] sm:$0xff]  ;;  %v108_v42 = vld [vmem:[%s4462_s1 + $0x2a8] sm:$0xff] }
  0x78   :  { %v3010_v63 = vcombine.low %v297_v49, %v305_v50 }
  0x7a   :  { %2043 = vmatpush1.bf16.msra.mxu0 %v2882_v55  ;;  %2149 = vmatpush1.bf16.msra.mxu1 %v2884_v56  ;;  %v2996_v55 = vcombine.low %v282_v43, %v290_v44  ;;  %v3011_v56 = vcombine.high %v297_v49, %v305_v50  ;;  %v116_v43 = vld [vmem:[%s4462_s1 + $0x2e8] sm:$0xff]  ;;  %v131_v49 = vld [vmem:[%s4462_s1 + $0x360] sm:$0xff] }
  0x7b   :  { %2044 = vmatprep.subr.bf16.mxu0 %v2899_v58  ;;  %2150 = vmatprep.subr.bf16.mxu1 %v2901_v59  ;;  %v27_v58 = vld [vmem:[%s4462_s1 + $0x20] sm:$0xff]  ;;  %v132_v50 = vld [vmem:[%s4462_s1 + $0x368] sm:$0xff] }
  0x7c   :  { %v35_v59 = vld [vmem:[%s4462_s1 + $0x60] sm:$0xff] }
  0x7d   :  { %v2742_v8 = vcombine.low %v27_v58, %v35_v59 }
  0x7e   :  { %2045 = vmatpush1.bf16.msra.mxu0 %v2898_v0  ;;  %2151 = vmatpush1.bf16.msra.mxu1 %v2900_v1  ;;  %v3012_v0 = vcombine.low %v298_v52, %v306_v54  ;;  %v2743_v1 = vcombine.high %v27_v58, %v35_v59  ;;  %v2824_v52 = vcombine.low %v108_v42, %v116_v43  ;;  %v147_v58 = vld [vmem:[%s4462_s1 + $0x3e0] sm:$0xff]  ;;  %v140_v59 = vld [vmem:[%s4462_s1 + $0x3a8] sm:$0xff] }
  0x7f   :  { %2046 = vmatprep.subr.bf16.mxu0 %v2915_v2  ;;  %2152 = vmatprep.subr.bf16.mxu1 %v2917_v4  ;;  %v2745_v2 = vcombine.high %v28_v61, %v36_v62  ;;  %v43_v4 = vld [vmem:[%s4462_s1 + $0xa0] sm:$0xff] }
  0x80   :  { %v2758_v17 = vcombine.low %v43_v4, %v51_v5 }
  0x82   :  { %2047 = vmatpush1.bf16.msra.mxu0 %v2914_v9  ;;  %2153 = vmatpush1.bf16.msra.mxu1 %v2916_v10  ;;  %v2744_v9 = vcombine.low %v28_v61, %v36_v62  ;;  %v2759_v10 = vcombine.high %v43_v4, %v51_v5  ;;  %v156_v4 = vld [vmem:[%s4462_s1 + $0x428] sm:$0xff] }
  0x83   :  { %2048 = vmatprep.subr.bf16.mxu0 %v2931_v11  ;;  %2154 = vmatprep.subr.bf16.mxu1 %v2933_v12  ;;  %v2761_v11 = vcombine.high %v44_v6, %v52_v7  ;;  %v59_v12 = vld [vmem:[%s4462_s1 + $0x120] sm:$0xff]  ;;  %v164_v5 = vld [vmem:[%s4462_s1 + $0x468] sm:$0xff] }
  0x84   :  { %v2774_v26 = vcombine.low %v59_v12, %v67_v13 }
  0x86   :  { %2049 = vmatpush1.bf16.msra.mxu0 %v2930_v18  ;;  %2155 = vmatpush1.bf16.msra.mxu1 %v2932_v19  ;;  %v2760_v18 = vcombine.low %v44_v6, %v52_v7  ;;  %v2775_v19 = vcombine.high %v59_v12, %v67_v13  ;;  %v172_v12 = vld [vmem:[%s4462_s1 + $0x4a8] sm:$0xff] }
  0x87   :  { %2050 = vmatprep.subr.bf16.mxu0 %v2947_v20  ;;  %2156 = vmatprep.subr.bf16.mxu1 %v2949_v21  ;;  %v2777_v20 = vcombine.high %v60_v14, %v68_v16  ;;  %v75_v21 = vld [vmem:[%s4462_s1 + $0x1a0] sm:$0xff]  ;;  %v180_v13 = vld [vmem:[%s4462_s1 + $0x4e8] sm:$0xff] }
  0x88   :  { %v2790_v35 = vcombine.low %v75_v21, %v83_v23 }
  0x8a   :  { %2051 = vmatpush1.bf16.msra.mxu0 %v2946_v27  ;;  %2157 = vmatpush1.bf16.msra.mxu1 %v2948_v28  ;;  %v2776_v27 = vcombine.low %v60_v14, %v68_v16  ;;  %v2791_v28 = vcombine.high %v75_v21, %v83_v23  ;;  %v2872_v16 = vcombine.low %v156_v4, %v164_v5  ;;  %v188_v21 = vld [vmem:[%s4462_s1 + $0x528] sm:$0xff] }
  0x8b   :  { %2052 = vmatprep.subr.bf16.mxu0 %v2963_v29  ;;  %2158 = vmatprep.subr.bf16.mxu1 %v2965_v30  ;;  %v2793_v29 = vcombine.high %v76_v24, %v84_v25  ;;  %v91_v30 = vld [vmem:[%s4462_s1 + $0x220] sm:$0xff]  ;;  %v196_v23 = vld [vmem:[%s4462_s1 + $0x568] sm:$0xff] }
  0x8c   :  { %v2806_v44 = vcombine.low %v91_v30, %v99_v31 }
  0x8e   :  { %2053 = vmatpush1.bf16.msra.mxu0 %v2962_v37  ;;  %2159 = vmatpush1.bf16.msra.mxu1 %v2964_v38  ;;  %v2792_v37 = vcombine.low %v76_v24, %v84_v25  ;;  %v2807_v38 = vcombine.high %v91_v30, %v99_v31  ;;  %v2888_v25 = vcombine.low %v172_v12, %v180_v13  ;;  %v204_v30 = vld [vmem:[%s4462_s1 + $0x5a8] sm:$0xff] }
  0x8f   :  { %2054 = vmatprep.subr.bf16.mxu0 %v2979_v39  ;;  %2160 = vmatprep.subr.bf16.mxu1 %v2981_v40  ;;  %v2809_v39 = vcombine.high %v92_v32, %v100_v34  ;;  %v107_v40 = vld [vmem:[%s4462_s1 + $0x2a0] sm:$0xff]  ;;  %v212_v31 = vld [vmem:[%s4462_s1 + $0x5e8] sm:$0xff] }
  0x92   :  { %2055 = vmatpush1.bf16.msra.mxu0 %v2978_v45  ;;  %2161 = vmatpush1.bf16.msra.mxu1 %v2980_v46  ;;  %v2808_v45 = vcombine.low %v92_v32, %v100_v34  ;;  %v2823_v46 = vcombine.high %v107_v40, %v115_v41  ;;  %v2904_v34 = vcombine.low %v188_v21, %v196_v23 }
  0x93   :  { %2077 = vmatprep.subr.bf16.mxu0 %v2995_v47  ;;  %2183 = vmatprep.subr.bf16.mxu1 %v2997_v48  ;;  %v2825_v47 = vcombine.high %v108_v42, %v116_v43  ;;  %v123_v48 = vld [vmem:[%s4462_s1 + $0x320] sm:$0xff]  ;;  %v2920_v43 = vcombine.low %v204_v30, %v212_v31 }
  0x94   :  { %v2839_v54 = vcombine.high %v123_v48, %v131_v49  ;;  %v2838_v61 = vcombine.low %v123_v48, %v131_v49  ;;  %v236_v48 = vld [vmem:[%s4462_s1 + $0x6a8] sm:$0xff] }
  0x95   :  { %2057 = vmatmul.mubr.bf16.vlgmr.msra.gmra.mrb[8].mxu0 %v3432_v15  ;;  %2163 = vmatmul.mubr.bf16.vlgmr.msra.gmra.mrb[8].mxu1 %v3432_v15  ;;  %v244_v49 = vld [vmem:[%s4462_s1 + $0x6e8] sm:$0xff] }
  0x96   :  { %2078 = vmatpush1.bf16.msra.mxu0 %v2994_v51  ;;  %2184 = vmatpush1.bf16.msra.mxu1 %v2996_v55  ;;  %v2822_v51 = vcombine.low %v107_v40, %v115_v41  ;;  %v220_v40 = vld [vmem:[%s4462_s1 + $0x628] sm:$0xff] }
  0x97   :  { %2066 = vmatprep.mubr.bf16.mxu0 %v3449_v22  ;;  %2172 = vmatprep.mubr.bf16.mxu1 %v3449_v22  ;;  %v228_v41 = vld [vmem:[%s4462_s1 + $0x668] sm:$0xff] }
  0x98   :  { %2079 = vmatprep.subr.bf16.mxu0 %v3011_v56  ;;  %2185 = vmatprep.subr.bf16.mxu1 %v3013_v60  ;;  %v139_v56 = vld [vmem:[%s4462_s1 + $0x3a0] sm:$0xff]  ;;  %v148_v60 = vld [vmem:[%s4462_s1 + $0x3e8] sm:$0xff] }
  0x99   :  { %v2854_v6 = vcombine.low %v139_v56, %v147_v58  ;;  %v2856_v7 = vcombine.low %v140_v59, %v148_v60 }
  0x9a   :  { %2080 = vmatpush1.bf16.msra.mxu0 %v3010_v63  ;;  %2186 = vmatpush1.bf16.msra.mxu1 %v3012_v0  ;;  %v2855_v63 = vcombine.high %v139_v56, %v147_v58  ;;  %v2857_v0 = vcombine.high %v140_v59, %v148_v60  ;;  %v252_v56 = vld [vmem:[%s4462_s1 + $0x728] sm:$0xff]  ;;  %v2952_v60 = vcombine.low %v236_v48, %v244_v49 }
  0x9b   :  { %2236 = vmatprep.subr.bf16.mxu0 %v2743_v1  ;;  %2342 = vmatprep.subr.bf16.mxu1 %v2745_v2  ;;  %v155_v1 = vld [vmem:[%s4462_s1 + $0x420] sm:$0xff]  ;;  %v260_v58 = vld [vmem:[%s4462_s1 + $0x768] sm:$0xff] }
  0x9c   :  { %v163_v2 = vld [vmem:[%s4462_s1 + $0x460] sm:$0xff] }
  0x9d   :  { %2067 = vmatmul.mubr.bf16.gmra.mrb[12].mxu0 %v3470_v33  ;;  %2173 = vmatmul.mubr.bf16.gmra.mrb[12].mxu1 %v3470_v33  ;;  %v2870_v14 = vcombine.low %v155_v1, %v163_v2 }
  0x9e   :  { %2109 = vmatprep.mubr.bf16.mxu0 %v3183_v3  ;;  %2215 = vmatprep.mubr.bf16.mxu1 %v3183_v3 }
  0xa5   :  { %3026 = vmatmul.mubr.msk.bf16.vlgmr.msra.gmra.mrb[8].mxu0 %vm1805_vm0, %v3485_v36  ;;  %3028 = vmatmul.mubr.msk.bf16.vlgmr.msra.gmra.mrb[8].mxu1 %vm1805_vm0, %v3485_v36 }
  0xa6   :  { %2237 = vmatpush1.bf16.msra.mxu0 %v2742_v8  ;;  %2343 = vmatpush1.bf16.msra.mxu1 %v2744_v9  ;;  %v2871_v8 = vcombine.high %v155_v1, %v163_v2  ;;  %v2873_v9 = vcombine.high %v156_v4, %v164_v5  ;;  %v268_v1 = vld [vmem:[%s4462_s1 + $0x7a8] sm:$0xff]  ;;  %v2968_v5 = vcombine.low %v252_v56, %v260_v58 }
  0xa7   :  { %2238 = vmatprep.subr.bf16.mxu0 %v2759_v10  ;;  %2344 = vmatprep.subr.bf16.mxu1 %v2761_v11  ;;  %v171_v10 = vld [vmem:[%s4462_s1 + $0x4a0] sm:$0xff]  ;;  %v276_v2 = vld [vmem:[%s4462_s1 + $0x7e8] sm:$0xff] }
  0xa8   :  { %2119 = vmatprep.mubr.bf16.mxu0 %v3183_v3  ;;  %2225 = vmatprep.mubr.bf16.mxu1 %v3183_v3  ;;  %v179_v11 = vld [vmem:[%s4462_s1 + $0x4e0] sm:$0xff] }
  0xa9   :  { %v2886_v24 = vcombine.low %v171_v10, %v179_v11 }
  0xaa   :  { %2239 = vmatpush1.bf16.msra.mxu0 %v2758_v17  ;;  %2345 = vmatpush1.bf16.msra.mxu1 %v2760_v18  ;;  %v2887_v17 = vcombine.high %v171_v10, %v179_v11  ;;  %v2889_v18 = vcombine.high %v172_v12, %v180_v13  ;;  %v284_v10 = vld [vmem:[%s4462_s1 + $0x828] sm:$0xff]  ;;  %v2984_v13 = vcombine.low %v268_v1, %v276_v2 }
  0xab   :  { %2240 = vmatprep.subr.bf16.mxu0 %v2775_v19  ;;  %2346 = vmatprep.subr.bf16.mxu1 %v2777_v20  ;;  %v187_v19 = vld [vmem:[%s4462_s1 + $0x520] sm:$0xff]  ;;  %v292_v11 = vld [vmem:[%s4462_s1 + $0x868] sm:$0xff] }
  0xac   :  { %v195_v20 = vld [vmem:[%s4462_s1 + $0x560] sm:$0xff] }
  0xad   :  { %3027 = vmatmul.mubr.msk.bf16.gmra.mrb[12].mxu0 %vm1805_vm0, %v3520_v53  ;;  %3029 = vmatmul.mubr.msk.bf16.gmra.mrb[12].mxu1 %vm1805_vm0, %v3520_v53  ;;  %v2902_v32 = vcombine.low %v187_v19, %v195_v20 }
  0xae   :  { %2241 = vmatpush1.bf16.msra.mxu0 %v2774_v26  ;;  %2347 = vmatpush1.bf16.msra.mxu1 %v2776_v27  ;;  %v2903_v26 = vcombine.high %v187_v19, %v195_v20  ;;  %v2905_v27 = vcombine.high %v188_v21, %v196_v23  ;;  %v300_v20 = vld [vmem:[%s4462_s1 + $0x8a8] sm:$0xff]  ;;  %v3000_v23 = vcombine.low %v284_v10, %v292_v11 }
  0xaf   :  { %2242 = vmatprep.subr.bf16.mxu0 %v2791_v28  ;;  %2348 = vmatprep.subr.bf16.mxu1 %v2793_v29  ;;  %v203_v28 = vld [vmem:[%s4462_s1 + $0x5a0] sm:$0xff]  ;;  %v308_v21 = vld [vmem:[%s4462_s1 + $0x8e8] sm:$0xff] }
  0xb0   :  { %2268 = vmatprep.mubr.bf16.mxu0 %v3299_v57  ;;  %2374 = vmatprep.mubr.bf16.mxu1 %v3299_v57  ;;  %v124_v57 = vld [vmem:[%s4462_s1 + $0x328] sm:$0xff]  ;;  %v211_v29 = vld [vmem:[%s4462_s1 + $0x5e0] sm:$0xff] }
  0xb1   :  { %v2841_v55 = vcombine.high %v124_v57, %v132_v50  ;;  %v2840_v62 = vcombine.low %v124_v57, %v132_v50  ;;  %v2918_v42 = vcombine.low %v203_v28, %v211_v29  ;;  %v2936_v50 = vcombine.low %v220_v40, %v228_v41 }
  0xb2   :  { %2243 = vmatpush1.bf16.msra.mxu0 %v2790_v35  ;;  %2349 = vmatpush1.bf16.msra.mxu1 %v2792_v37  ;;  %v2919_v35 = vcombine.high %v203_v28, %v211_v29  ;;  %v2921_v37 = vcombine.high %v204_v30, %v212_v31  ;;  %v30_v28 = vld [vmem:[%s4462_s1 + $0x38] sm:$0xff]  ;;  %v3016_v31 = vcombine.low %v300_v20, %v308_v21 }
  0xb3   :  { %2244 = vmatprep.subr.bf16.mxu0 %v2807_v38  ;;  %2350 = vmatprep.subr.bf16.mxu1 %v2809_v39  ;;  %v219_v38 = vld [vmem:[%s4462_s1 + $0x620] sm:$0xff]  ;;  %v38_v29 = vld [vmem:[%s4462_s1 + $0x78] sm:$0xff] }
  0xb4   :  { %v227_v39 = vld [vmem:[%s4462_s1 + $0x660] sm:$0xff] }
  0xb5   :  { %v2934_v57 = vcombine.low %v219_v38, %v227_v39 }
  0xb6   :  { %2245 = vmatpush1.bf16.msra.mxu0 %v2806_v44  ;;  %2351 = vmatpush1.bf16.msra.mxu1 %v2808_v45  ;;  %v2935_v44 = vcombine.high %v219_v38, %v227_v39  ;;  %v2937_v45 = vcombine.high %v220_v40, %v228_v41  ;;  %v2748_v38 = vcombine.low %v30_v28, %v38_v29  ;;  %v61_v41 = vld [vmem:[%s4462_s1 + $0x130] sm:$0xff] }
  0xb7   :  { %2246 = vmatprep.subr.bf16.mxu0 %v2823_v46  ;;  %2352 = vmatprep.subr.bf16.mxu1 %v2825_v47  ;;  %v235_v46 = vld [vmem:[%s4462_s1 + $0x6a0] sm:$0xff] }
  0xb8   :  { %v243_v47 = vld [vmem:[%s4462_s1 + $0x6e0] sm:$0xff] }
  0xb9   :  { %v2950_v59 = vcombine.low %v235_v46, %v243_v47 }
  0xba   :  { %2247 = vmatpush1.bf16.msra.mxu0 %v2822_v51  ;;  %2353 = vmatpush1.bf16.msra.mxu1 %v2824_v52  ;;  %v2951_v51 = vcombine.high %v235_v46, %v243_v47  ;;  %v2953_v52 = vcombine.high %v236_v48, %v244_v49  ;;  %v77_v49 = vld [vmem:[%s4462_s1 + $0x1b0] sm:$0xff] }
  0xbb   :  { %2248 = vmatprep.subr.bf16.mxu0 %v2839_v54  ;;  %2354 = vmatprep.subr.bf16.mxu1 %v2841_v55  ;;  %v251_v54 = vld [vmem:[%s4462_s1 + $0x720] sm:$0xff] }
  0xbc   :  { %v259_v55 = vld [vmem:[%s4462_s1 + $0x760] sm:$0xff] }
  0xbd   :  { %v2966_v4 = vcombine.low %v251_v54, %v259_v55 }
  0xbe   :  { %2249 = vmatpush1.bf16.msra.mxu0 %v2838_v61  ;;  %2355 = vmatpush1.bf16.msra.mxu1 %v2840_v62  ;;  %v2967_v61 = vcombine.high %v251_v54, %v259_v55  ;;  %v2969_v62 = vcombine.high %v252_v56, %v260_v58  ;;  %v93_v56 = vld [vmem:[%s4462_s1 + $0x230] sm:$0xff] }
  0xbf   :  { %2250 = vmatprep.subr.bf16.mxu0 %v2855_v63  ;;  %2356 = vmatprep.subr.bf16.mxu1 %v2857_v0  ;;  %v267_v63 = vld [vmem:[%s4462_s1 + $0x7a0] sm:$0xff]  ;;  %v101_v58 = vld [vmem:[%s4462_s1 + $0x270] sm:$0xff] }
  0xc0   :  { %v275_v0 = vld [vmem:[%s4462_s1 + $0x7e0] sm:$0xff] }
  0xc1   :  { %v2982_v12 = vcombine.low %v267_v63, %v275_v0 }
  0xc2   :  { %2251 = vmatpush1.bf16.msra.mxu0 %v2854_v6  ;;  %2357 = vmatpush1.bf16.msra.mxu1 %v2856_v7  ;;  %v2983_v6 = vcombine.high %v267_v63, %v275_v0  ;;  %v2985_v7 = vcombine.high %v268_v1, %v276_v2  ;;  %v2811_v63 = vcombine.high %v93_v56, %v101_v58  ;;  %v109_v1 = vld [vmem:[%s4462_s1 + $0x2b0] sm:$0xff] }
  0xc3   :  { %2252 = vmatprep.subr.bf16.mxu0 %v2871_v8  ;;  %2358 = vmatprep.subr.bf16.mxu1 %v2873_v9  ;;  %v283_v8 = vld [vmem:[%s4462_s1 + $0x820] sm:$0xff]  ;;  %v117_v2 = vld [vmem:[%s4462_s1 + $0x2f0] sm:$0xff] }
  0xc4   :  { %v291_v9 = vld [vmem:[%s4462_s1 + $0x860] sm:$0xff] }
  0xc5   :  { %v2998_v19 = vcombine.low %v283_v8, %v291_v9 }
  0xc6   :  { %2253 = vmatpush1.bf16.msra.mxu0 %v2870_v14  ;;  %2359 = vmatpush1.bf16.msra.mxu1 %v2872_v16  ;;  %v2999_v14 = vcombine.high %v283_v8, %v291_v9  ;;  %v3001_v16 = vcombine.high %v284_v10, %v292_v11  ;;  %v2827_v8 = vcombine.high %v109_v1, %v117_v2  ;;  %v125_v10 = vld [vmem:[%s4462_s1 + $0x330] sm:$0xff] }
  0xc7   :  { %2254 = vmatprep.subr.bf16.mxu0 %v2887_v17  ;;  %2360 = vmatprep.subr.bf16.mxu1 %v2889_v18  ;;  %v299_v17 = vld [vmem:[%s4462_s1 + $0x8a0] sm:$0xff]  ;;  %v133_v11 = vld [vmem:[%s4462_s1 + $0x370] sm:$0xff] }
  0xc8   :  { %v307_v18 = vld [vmem:[%s4462_s1 + $0x8e0] sm:$0xff] }
  0xc9   :  { %v3014_v30 = vcombine.low %v299_v17, %v307_v18 }
  0xca   :  { %2255 = vmatpush1.bf16.msra.mxu0 %v2886_v24  ;;  %2361 = vmatpush1.bf16.msra.mxu1 %v2888_v25  ;;  %v3015_v24 = vcombine.high %v299_v17, %v307_v18  ;;  %v29_v25 = vld [vmem:[%s4462_s1 + $0x30] sm:$0xff]  ;;  %v2843_v17 = vcombine.high %v125_v10, %v133_v11 }
  0xcb   :  { %2256 = vmatprep.subr.bf16.mxu0 %v2903_v26  ;;  %2362 = vmatprep.subr.bf16.mxu1 %v2905_v27  ;;  %v37_v26 = vld [vmem:[%s4462_s1 + $0x70] sm:$0xff]  ;;  %v3017_v27 = vcombine.high %v300_v20, %v308_v21  ;;  %v142_v21 = vld [vmem:[%s4462_s1 + $0x3b8] sm:$0xff] }
  0xcc   :  { %v149_v20 = vld [vmem:[%s4462_s1 + $0x3f0] sm:$0xff] }
  0xce   :  { %2257 = vmatpush1.bf16.msra.mxu0 %v2902_v32  ;;  %2363 = vmatpush1.bf16.msra.mxu1 %v2904_v34  ;;  %v2747_v32 = vcombine.high %v29_v25, %v37_v26  ;;  %v2749_v34 = vcombine.high %v30_v28, %v38_v29  ;;  %v157_v28 = vld [vmem:[%s4462_s1 + $0x430] sm:$0xff] }
  0xcf   :  { %2258 = vmatprep.subr.bf16.mxu0 %v2919_v35  ;;  %2364 = vmatprep.subr.bf16.mxu1 %v2921_v37  ;;  %v46_v35 = vld [vmem:[%s4462_s1 + $0xb8] sm:$0xff]  ;;  %v2746_v37 = vcombine.low %v29_v25, %v37_v26  ;;  %v165_v29 = vld [vmem:[%s4462_s1 + $0x470] sm:$0xff] }
  0xd2   :  { %2259 = vmatpush1.bf16.msra.mxu0 %v2918_v42  ;;  %2365 = vmatpush1.bf16.msra.mxu1 %v2920_v43  ;;  %v69_v42 = vld [vmem:[%s4462_s1 + $0x170] sm:$0xff]  ;;  %v62_v43 = vld [vmem:[%s4462_s1 + $0x138] sm:$0xff] }
  0xd3   :  { %2260 = vmatprep.subr.bf16.mxu0 %v2935_v44  ;;  %2366 = vmatprep.subr.bf16.mxu1 %v2937_v45  ;;  %v70_v44 = vld [vmem:[%s4462_s1 + $0x178] sm:$0xff]  ;;  %v2779_v47 = vcombine.high %v61_v41, %v69_v42 }
  0xd4   :  { %v2781_v48 = vcombine.high %v62_v43, %v70_v44 }
  0xd6   :  { %2261 = vmatpush1.bf16.msra.mxu0 %v2934_v57  ;;  %2367 = vmatpush1.bf16.msra.mxu1 %v2936_v50  ;;  %v85_v57 = vld [vmem:[%s4462_s1 + $0x1f0] sm:$0xff]  ;;  %v86_v50 = vld [vmem:[%s4462_s1 + $0x1f8] sm:$0xff] }
  0xd7   :  { %2262 = vmatprep.subr.bf16.mxu0 %v2951_v51  ;;  %2368 = vmatprep.subr.bf16.mxu1 %v2953_v52  ;;  %v2778_v51 = vcombine.low %v61_v41, %v69_v42  ;;  %v2780_v52 = vcombine.low %v62_v43, %v70_v44  ;;  %v2795_v54 = vcombine.high %v77_v49, %v85_v57  ;;  %v189_v43 = vld [vmem:[%s4462_s1 + $0x530] sm:$0xff] }
  0xd8   :  { %v197_v44 = vld [vmem:[%s4462_s1 + $0x570] sm:$0xff] }
  0xda   :  { %2263 = vmatpush1.bf16.msra.mxu0 %v2950_v59  ;;  %2369 = vmatpush1.bf16.msra.mxu1 %v2952_v60  ;;  %v94_v59 = vld [vmem:[%s4462_s1 + $0x238] sm:$0xff] }
  0xdb   :  { %2264 = vmatprep.subr.bf16.mxu0 %v2967_v61  ;;  %2370 = vmatprep.subr.bf16.mxu1 %v2969_v62  ;;  %v102_v60 = vld [vmem:[%s4462_s1 + $0x278] sm:$0xff]  ;;  %v2794_v61 = vcombine.low %v77_v49, %v85_v57  ;;  %v2907_v49 = vcombine.high %v189_v43, %v197_v44 }
  0xdc   :  { %v2813_v0 = vcombine.high %v94_v59, %v102_v60 }
  0xde   :  { %2265 = vmatpush1.bf16.msra.mxu0 %v2966_v4  ;;  %2371 = vmatpush1.bf16.msra.mxu1 %v2968_v5  ;;  %v110_v4 = vld [vmem:[%s4462_s1 + $0x2b8] sm:$0xff] }
  0xdf   :  { %2266 = vmatprep.subr.bf16.mxu0 %v2983_v6  ;;  %2372 = vmatprep.subr.bf16.mxu1 %v2985_v7  ;;  %v118_v5 = vld [vmem:[%s4462_s1 + $0x2f8] sm:$0xff]  ;;  %v2810_v6 = vcombine.low %v93_v56, %v101_v58  ;;  %v2812_v7 = vcombine.low %v94_v59, %v102_v60  ;;  %v221_v59 = vld [vmem:[%s4462_s1 + $0x630] sm:$0xff] }
  0xe0   :  { %v2829_v9 = vcombine.high %v110_v4, %v118_v5  ;;  %v229_v60 = vld [vmem:[%s4462_s1 + $0x670] sm:$0xff] }
  0xe2   :  { %2267 = vmatpush1.bf16.msra.mxu0 %v2982_v12  ;;  %2373 = vmatpush1.bf16.msra.mxu1 %v2984_v13  ;;  %v126_v12 = vld [vmem:[%s4462_s1 + $0x338] sm:$0xff] }
  0xe3   :  { %2289 = vmatprep.subr.bf16.mxu0 %v2999_v14  ;;  %2395 = vmatprep.subr.bf16.mxu1 %v3001_v16  ;;  %v134_v13 = vld [vmem:[%s4462_s1 + $0x378] sm:$0xff]  ;;  %v2826_v14 = vcombine.low %v109_v1, %v117_v2  ;;  %v2828_v16 = vcombine.low %v110_v4, %v118_v5  ;;  %v2939_v1 = vcombine.high %v221_v59, %v229_v60  ;;  %v245_v4 = vld [vmem:[%s4462_s1 + $0x6f0] sm:$0xff] }
  0xe4   :  { %v2845_v18 = vcombine.high %v126_v12, %v134_v13  ;;  %v2844_v25 = vcombine.low %v126_v12, %v134_v13  ;;  %v238_v5 = vld [vmem:[%s4462_s1 + $0x6b8] sm:$0xff]  ;;  %v253_v12 = vld [vmem:[%s4462_s1 + $0x730] sm:$0xff] }
  0xe5   :  { %2269 = vmatmul.mubr.bf16.vlgmr.msra.gmra.mrb[16].mxu0 %v3432_v15  ;;  %2375 = vmatmul.mubr.bf16.vlgmr.msra.gmra.mrb[16].mxu1 %v3432_v15  ;;  %v45_v15 = vld [vmem:[%s4462_s1 + $0xb0] sm:$0xff] }
  0xe6   :  { %2290 = vmatpush1.bf16.msra.mxu0 %v2998_v19  ;;  %2396 = vmatpush1.bf16.msra.mxu1 %v3000_v23  ;;  %v141_v19 = vld [vmem:[%s4462_s1 + $0x3b0] sm:$0xff]  ;;  %v150_v23 = vld [vmem:[%s4462_s1 + $0x3f8] sm:$0xff] }
  0xe7   :  { %2278 = vmatprep.mubr.bf16.mxu0 %v3449_v22  ;;  %2384 = vmatprep.mubr.bf16.mxu1 %v3449_v22  ;;  %v53_v22 = vld [vmem:[%s4462_s1 + $0xf0] sm:$0xff]  ;;  %v2859_v26 = vcombine.high %v141_v19, %v149_v20 }
  0xe8   :  { %2291 = vmatprep.subr.bf16.mxu0 %v3015_v24  ;;  %2397 = vmatprep.subr.bf16.mxu1 %v3017_v27  ;;  %v2763_v39 = vcombine.high %v45_v15, %v53_v22  ;;  %v2762_v45 = vcombine.low %v45_v15, %v53_v22  ;;  %v2842_v24 = vcombine.low %v125_v10, %v133_v11  ;;  %v261_v13 = vld [vmem:[%s4462_s1 + $0x770] sm:$0xff] }
  0xe9   :  { %v2861_v27 = vcombine.high %v142_v21, %v150_v23  ;;  %v2875_v15 = vcombine.high %v157_v28, %v165_v29 }
  0xea   :  { %2292 = vmatpush1.bf16.msra.mxu0 %v3014_v30  ;;  %2398 = vmatpush1.bf16.msra.mxu1 %v3016_v31  ;;  %v158_v30 = vld [vmem:[%s4462_s1 + $0x438] sm:$0xff] }
  0xeb   :  { %2448 = vmatprep.subr.bf16.mxu0 %v2747_v32  ;;  %2554 = vmatprep.subr.bf16.mxu1 %v2749_v34  ;;  %v166_v31 = vld [vmem:[%s4462_s1 + $0x478] sm:$0xff]  ;;  %v2858_v32 = vcombine.low %v141_v19, %v149_v20  ;;  %v2860_v34 = vcombine.low %v142_v21, %v150_v23  ;;  %v2971_v19 = vcombine.high %v253_v12, %v261_v13  ;;  %v4141_v20 = vpop.permute.xlu1 %327 }
  0xec   :  { %v2877_v22 = vcombine.high %v158_v30, %v166_v31 }
  0xed   :  { %2279 = vmatmul.mubr.bf16.gmra.mrb[20].mxu0 %v3470_v33  ;;  %2385 = vmatmul.mubr.bf16.gmra.mrb[20].mxu1 %v3470_v33  ;;  %v54_v33 = vld [vmem:[%s4462_s1 + $0xf8] sm:$0xff] }
  0xee   :  { %2321 = vmatprep.mubr.bf16.mxu0 %v3183_v3  ;;  %2427 = vmatprep.mubr.bf16.mxu1 %v3183_v3  ;;  %v2765_v40 = vcombine.high %v46_v35, %v54_v33  ;;  %v2764_v46 = vcombine.low %v46_v35, %v54_v33  ;;  %v173_v35 = vld [vmem:[%s4462_s1 + $0x4b0] sm:$0xff] }
  0xef   :  { %v181_v33 = vld [vmem:[%s4462_s1 + $0x4f0] sm:$0xff] }
  0xf0   :  { %v2891_v41 = vcombine.high %v173_v35, %v181_v33 }
  0xf5   :  { %3030 = vmatmul.mubr.msk.bf16.vlgmr.msra.gmra.mrb[16].mxu0 %vm1805_vm0, %v3485_v36  ;;  %3032 = vmatmul.mubr.msk.bf16.vlgmr.msra.gmra.mrb[16].mxu1 %vm1805_vm0, %v3485_v36  ;;  %v78_v36 = vld [vmem:[%s4462_s1 + $0x1b8] sm:$0xff] }
  0xf6   :  { %2449 = vmatpush1.bf16.msra.mxu0 %v2746_v37  ;;  %2555 = vmatpush1.bf16.msra.mxu1 %v2748_v38  ;;  %v2797_v55 = vcombine.high %v78_v36, %v86_v50  ;;  %v2796_v62 = vcombine.low %v78_v36, %v86_v50  ;;  %v174_v37 = vld [vmem:[%s4462_s1 + $0x4b8] sm:$0xff]  ;;  %v205_v36 = vld [vmem:[%s4462_s1 + $0x5b0] sm:$0xff] }
  0xf7   :  { %2450 = vmatprep.subr.bf16.mxu0 %v2763_v39  ;;  %2556 = vmatprep.subr.bf16.mxu1 %v2765_v40  ;;  %v182_v38 = vld [vmem:[%s4462_s1 + $0x4f8] sm:$0xff]  ;;  %v2874_v39 = vcombine.low %v157_v28, %v165_v29  ;;  %v2876_v40 = vcombine.low %v158_v30, %v166_v31  ;;  %v213_v50 = vld [vmem:[%s4462_s1 + $0x5f0] sm:$0xff] }
  0xf8   :  { %2331 = vmatprep.mubr.bf16.mxu0 %v3183_v3  ;;  %2437 = vmatprep.mubr.bf16.mxu1 %v3183_v3  ;;  %v2893_v42 = vcombine.high %v174_v37, %v182_v38  ;;  %v2923_v56 = vcombine.high %v205_v36, %v213_v50  ;;  %v270_v30 = vld [vmem:[%s4462_s1 + $0x7b8] sm:$0xff] }
  0xf9   :  { %v278_v31 = vld [vmem:[%s4462_s1 + $0x7f8] sm:$0xff] }
  0xfa   :  { %2451 = vmatpush1.bf16.msra.mxu0 %v2762_v45  ;;  %2557 = vmatpush1.bf16.msra.mxu1 %v2764_v46  ;;  %v190_v45 = vld [vmem:[%s4462_s1 + $0x538] sm:$0xff] }
  0xfb   :  { %2452 = vmatprep.subr.bf16.mxu0 %v2779_v47  ;;  %2558 = vmatprep.subr.bf16.mxu1 %v2781_v48  ;;  %v198_v46 = vld [vmem:[%s4462_s1 + $0x578] sm:$0xff]  ;;  %v2890_v47 = vcombine.low %v173_v35, %v181_v33  ;;  %v2892_v48 = vcombine.low %v174_v37, %v182_v38  ;;  %v2970_v35 = vcombine.low %v253_v12, %v261_v13 }
  0xfc   :  { %v2909_v57 = vcombine.high %v190_v45, %v198_v46 }
  0xfd   :  { %3031 = vmatmul.mubr.msk.bf16.gmra.mrb[20].mxu0 %vm1805_vm0, %v3520_v53  ;;  %3033 = vmatmul.mubr.msk.bf16.gmra.mrb[20].mxu1 %vm1805_vm0, %v3520_v53  ;;  %v3177_v53 = vld [vmem:[%s4463_s0 + $0x4] ss:$12 sps:$4 sm:$0xff]  }
  0xfe   :  { %2453 = vmatpush1.bf16.msra.mxu0 %v2778_v51  ;;  %2559 = vmatpush1.bf16.msra.mxu1 %v2780_v52  ;;  %v206_v51 = vld [vmem:[%s4462_s1 + $0x5b8] sm:$0xff] }
  0xff   :  { %2454 = vmatprep.subr.bf16.mxu0 %v2795_v54  ;;  %2560 = vmatprep.subr.bf16.mxu1 %v2797_v55  ;;  %v214_v52 = vld [vmem:[%s4462_s1 + $0x5f8] sm:$0xff]  ;;  %v2906_v54 = vcombine.low %v189_v43, %v197_v44  ;;  %v2908_v55 = vcombine.low %v190_v45, %v198_v46  ;;  %v2989_v45 = vcombine.high %v270_v30, %v278_v31  ;;  %v285_v46 = vld [vmem:[%s4462_s1 + $0x830] sm:$0xff] }
 0x100   :  { %2480 = vmatprep.mubr.bf16.mxu0 %v3177_v53  ;;  %2586 = vmatprep.mubr.bf16.mxu1 %v3177_v53  ;;  %v2925_v58 = vcombine.high %v206_v51, %v214_v52  ;;  %v237_v53 = vld [vmem:[%s4462_s1 + $0x6b0] sm:$0xff] }
 0x101   :  { %v2955_v10 = vcombine.high %v237_v53, %v245_v4 }
 0x102   :  { %2455 = vmatpush1.bf16.msra.mxu0 %v2794_v61  ;;  %2561 = vmatpush1.bf16.msra.mxu1 %v2796_v62  ;;  %v222_v61 = vld [vmem:[%s4462_s1 + $0x638] sm:$0xff] }
 0x103   :  { %2456 = vmatprep.subr.bf16.mxu0 %v2811_v63  ;;  %2562 = vmatprep.subr.bf16.mxu1 %v2813_v0  ;;  %v230_v62 = vld [vmem:[%s4462_s1 + $0x678] sm:$0xff]  ;;  %v2922_v63 = vcombine.low %v205_v36, %v213_v50  ;;  %v2924_v0 = vcombine.low %v206_v51, %v214_v52  ;;  %v2988_v50 = vcombine.low %v270_v30, %v278_v31 }
 0x104   :  { %v2941_v2 = vcombine.high %v222_v61, %v230_v62 }
 0x106   :  { %2457 = vmatpush1.bf16.msra.mxu0 %v2810_v6  ;;  %2563 = vmatpush1.bf16.msra.mxu1 %v2812_v7  ;;  %v246_v6 = vld [vmem:[%s4462_s1 + $0x6f8] sm:$0xff]  ;;  %v2938_v7 = vcombine.low %v221_v59, %v229_v60  ;;  %v301_v60 = vld [vmem:[%s4462_s1 + $0x8b0] sm:$0xff] }
 0x107   :  { %2458 = vmatprep.subr.bf16.mxu0 %v2827_v8  ;;  %2564 = vmatprep.subr.bf16.mxu1 %v2829_v9  ;;  %v4127_v8 = vpop.permute.xlu0 %317  ;;  %v2940_v9 = vcombine.low %v222_v61, %v230_v62  ;;  %v2957_v11 = vcombine.high %v238_v5, %v246_v6  ;;  %v309_v61 = vld [vmem:[%s4462_s1 + $0x8f0] sm:$0xff] }
 0x10a   :  { %2459 = vmatpush1.bf16.msra.mxu0 %v2826_v14  ;;  %2565 = vmatpush1.bf16.msra.mxu1 %v2828_v16  ;;  %v254_v14 = vld [vmem:[%s4462_s1 + $0x738] sm:$0xff] }
 0x10b   :  { %2460 = vmatprep.subr.bf16.mxu0 %v2843_v17  ;;  %2566 = vmatprep.subr.bf16.mxu1 %v2845_v18  ;;  %v262_v16 = vld [vmem:[%s4462_s1 + $0x778] sm:$0xff]  ;;  %v2954_v17 = vcombine.low %v237_v53, %v245_v4  ;;  %v2956_v18 = vcombine.low %v238_v5, %v246_v6  ;;  %v4143_v23 = vpop.permute.xlu0 %322 }
 0x10c   :  { %v2972_v33 = vcombine.low %v254_v14, %v262_v16  ;;  %v302_v53 = vld [vmem:[%s4462_s1 + $0x8b8] sm:$0xff] }
 0x10d   :  { %v310_v4 = vld [vmem:[%s4462_s1 + $0x8f8] sm:$0xff] }
 0x10e   :  { %2461 = vmatpush1.bf16.msra.mxu0 %v2842_v24  ;;  %2567 = vmatpush1.bf16.msra.mxu1 %v2844_v25  ;;  %v2973_v24 = vcombine.high %v254_v14, %v262_v16  ;;  %v269_v25 = vld [vmem:[%s4462_s1 + $0x7b0] sm:$0xff]  ;;  %v3019_v14 = vcombine.high %v301_v60, %v309_v61  ;;  %v3178_v16 = vld [vmem:[%s4463_s0] ss:$12 sps:$4 sm:$0xff]  }
 0x10f   :  { %2462 = vmatprep.subr.bf16.mxu0 %v2859_v26  ;;  %2568 = vmatprep.subr.bf16.mxu1 %v2861_v27  ;;  %v277_v26 = vld [vmem:[%s4462_s1 + $0x7f0] sm:$0xff] }
 0x110   :  { %v2986_v36 = vcombine.low %v269_v25, %v277_v26 }
 0x112   :  { %2463 = vmatpush1.bf16.msra.mxu0 %v2858_v32  ;;  %2569 = vmatpush1.bf16.msra.mxu1 %v2860_v34 }
 0x113   :  { %2464 = vmatprep.subr.bf16.mxu0 %v2875_v15  ;;  %2570 = vmatprep.subr.bf16.mxu1 %v2877_v22 }
 0x116   :  { %2465 = vmatpush1.bf16.msra.mxu0 %v2874_v39  ;;  %2571 = vmatpush1.bf16.msra.mxu1 %v2876_v40 }
 0x117   :  { %2466 = vmatprep.subr.bf16.mxu0 %v2891_v41  ;;  %2572 = vmatprep.subr.bf16.mxu1 %v2893_v42  ;;  %v2987_v41 = vcombine.high %v269_v25, %v277_v26  ;;  %v3180_v25 = vld [vmem:[%s4463_s0 + $0x18] ss:$12 sps:$4 sm:$0xff]   ;;  %v3181_v26 = vld [vmem:[%s4463_s0 + $0x8] ss:$12 sps:$4 sm:$0xff]  }
 0x11a   :  { %2467 = vmatpush1.bf16.msra.mxu0 %v2890_v47  ;;  %2573 = vmatpush1.bf16.msra.mxu1 %v2892_v48  ;;  %v293_v47 = vld [vmem:[%s4462_s1 + $0x870] sm:$0xff] }
 0x11b   :  { %2468 = vmatprep.subr.bf16.mxu0 %v2907_v49  ;;  %2574 = vmatprep.subr.bf16.mxu1 %v2909_v57  ;;  %v286_v49 = vld [vmem:[%s4462_s1 + $0x838] sm:$0xff]  ;;  %v3003_v51 = vcombine.high %v285_v46, %v293_v47 }
 0x11c   :  { %v294_v57 = vld [vmem:[%s4462_s1 + $0x878] sm:$0xff] }
 0x11e   :  { %2469 = vmatpush1.bf16.msra.mxu0 %v2906_v54  ;;  %2575 = vmatpush1.bf16.msra.mxu1 %v2908_v55  ;;  %v4201_v54 = vpop.permute.xlu1 %332  ;;  %v3005_v55 = vcombine.high %v286_v49, %v294_v57 }
 0x11f   :  { %2470 = vmatprep.subr.bf16.mxu0 %v2923_v56  ;;  %2576 = vmatprep.subr.bf16.mxu1 %v2925_v58 }
 0x122   :  { %2471 = vmatpush1.bf16.msra.mxu0 %v2922_v63  ;;  %2577 = vmatpush1.bf16.msra.mxu1 %v2924_v0 }
 0x123   :  { %2472 = vmatprep.subr.bf16.mxu0 %v2939_v1  ;;  %2578 = vmatprep.subr.bf16.mxu1 %v2941_v2  ;;  %v3002_v2 = vcombine.low %v285_v46, %v293_v47 }
 0x126   :  { %2473 = vmatpush1.bf16.msra.mxu0 %v2938_v7  ;;  %2579 = vmatpush1.bf16.msra.mxu1 %v2940_v9  ;;  %v3004_v9 = vcombine.low %v286_v49, %v294_v57 }
 0x127   :  { %2474 = vmatprep.subr.bf16.mxu0 %v2955_v10  ;;  %2580 = vmatprep.subr.bf16.mxu1 %v2957_v11 }
 0x128   :  { %v1899_v21 = vpop.f32.mrb[0].mxu0  ;;  %v2005_v28 = vpop.f32.mrb[0].mxu1 }
 0x129   :  { %v3038_v27 = vadd.f32 %v1899_v21, %v4127_v8  ;;  %v1901_v29 = vpop.f32.mrb[1].mxu0  ;;  %v3046_v32 = vadd.f32 %v2005_v28, %v4127_v8  ;;  %v2007_v15 = vpop.f32.mrb[1].mxu1  ;;  %v3179_v21 = vld [vmem:[%s4463_s0 + $0x1c] ss:$12 sps:$4 sm:$0xff]  }
 0x12a   :  { %2475 = vmatpush1.bf16.msra.mxu0 %v2954_v17  ;;  %v3039_v34 = vadd.f32 %v1901_v29, %v4127_v8  ;;  %v1903_v22 = vpop.f32.mrb[2].mxu0  ;;  %2581 = vmatpush1.bf16.msra.mxu1 %v2956_v18  ;;  %v3047_v37 = vadd.f32 %v2007_v15, %v4127_v8  ;;  %v2009_v39 = vpop.f32.mrb[2].mxu1  ;;  %v3021_v18 = vcombine.high %v302_v53, %v310_v4 }
 0x12b   :  { %2660 = vst [vmem:[%s4465_s3] sm:$0xff] %v3038_v27  ;;  %v3040_v38 = vadd.f32 %v1903_v22, %v4143_v23  ;;  %2476 = vmatprep.subr.bf16.mxu0 %v2971_v19  ;;  %v1905_v40 = vpop.f32.mrb[3].mxu0  ;;  %2662 = vst [vmem:[%s4465_s3 + $0x10] sm:$0xff] %v3046_v32  ;;  %v3048_v42 = vadd.f32 %v2009_v39, %v4143_v23  ;;  %2582 = vmatprep.subr.bf16.mxu1 %v2973_v24  ;;  %v2011_v44 = vpop.f32.mrb[3].mxu1  ;;  %v3182_v27 = vld [vmem:[%s4463_s0 + $0x20] ss:$12 sps:$4 sm:$0xff]  }
 0x12c   :  { %2661 = vst [vmem:[%s4465_s3 + $0x8] sm:$0xff] %v3039_v34  ;;  %v3041_v43 = vadd.f32 %v1905_v40, %v4143_v23  ;;  %2663 = vst [vmem:[%s4465_s3 + $0x18] sm:$0xff] %v3047_v37  ;;  %v3049_v48 = vadd.f32 %v2011_v44, %v4143_v23  ;;  %v3018_v19 = vcombine.low %v301_v60, %v309_v61 }
 0x12d   :  { %2676 = vst [vmem:[%s4465_s3 + $0x80] sm:$0xff] %v3040_v38  ;;  %2678 = vst [vmem:[%s4465_s3 + $0x90] sm:$0xff] %v3048_v42  ;;  %v3020_v24 = vcombine.low %v302_v53, %v310_v4 }
 0x12e   :  { %2677 = vst [vmem:[%s4465_s3 + $0x88] sm:$0xff] %v3041_v43  ;;  %2477 = vmatpush1.bf16.msra.mxu0 %v2970_v35  ;;  %2679 = vst [vmem:[%s4465_s3 + $0x98] sm:$0xff] %v3049_v48  ;;  %2583 = vmatpush1.bf16.msra.mxu1 %v2972_v33 }
 0x12f   :  { %2478 = vmatprep.subr.bf16.mxu0 %v2987_v41  ;;  %2584 = vmatprep.subr.bf16.mxu1 %v2989_v45 }
 0x130   :  { %v1909_v52 = vpop.f32.mrb[4].mxu0  ;;  %v2015_v58 = vpop.f32.mrb[4].mxu1 }
 0x131   :  { %v3042_v56 = vadd.f32 %v1909_v52, %v4141_v20  ;;  %v1911_v59 = vpop.f32.mrb[5].mxu0  ;;  %v3050_v62 = vadd.f32 %v2015_v58, %v4141_v20  ;;  %v2017_v0 = vpop.f32.mrb[5].mxu1 }
 0x132   :  { %2479 = vmatpush1.bf16.msra.mxu0 %v2986_v36  ;;  %v3043_v63 = vadd.f32 %v1911_v59, %v4141_v20  ;;  %v1913_v1 = vpop.f32.mrb[6].mxu0  ;;  %2585 = vmatpush1.bf16.msra.mxu1 %v2988_v50  ;;  %v3051_v5 = vadd.f32 %v2017_v0, %v4141_v20  ;;  %v2019_v7 = vpop.f32.mrb[6].mxu1 }
 0x133   :  { %2692 = vst [vmem:[%s4465_s3 + $0x100] sm:$0xff] %v3042_v56  ;;  %v3044_v6 = vadd.f32 %v1913_v1, %v4201_v54  ;;  %2501 = vmatprep.subr.bf16.mxu0 %v3003_v51  ;;  %v1915_v10 = vpop.f32.mrb[7].mxu0  ;;  %2694 = vst [vmem:[%s4465_s3 + $0x110] sm:$0xff] %v3050_v62  ;;  %v3052_v11 = vadd.f32 %v2019_v7, %v4201_v54  ;;  %2607 = vmatprep.subr.bf16.mxu1 %v3005_v55  ;;  %v2021_v13 = vpop.f32.mrb[7].mxu1 }
 0x134   :  { %2693 = vst [vmem:[%s4465_s3 + $0x108] sm:$0xff] %v3043_v63  ;;  %v3045_v12 = vadd.f32 %v1915_v10, %v4201_v54  ;;  %2695 = vst [vmem:[%s4465_s3 + $0x118] sm:$0xff] %v3051_v5  ;;  %v3053_v17 = vadd.f32 %v2021_v13, %v4201_v54 }
 0x135   :  { %2708 = vst [vmem:[%s4465_s3 + $0x180] sm:$0xff] %v3044_v6  ;;  %2481 = vmatmul.mubr.bf16.vlgmr.msra.gmra.mrb[24].mxu0 %v3178_v16  ;;  %2710 = vst [vmem:[%s4465_s3 + $0x190] sm:$0xff] %v3052_v11  ;;  %2587 = vmatmul.mubr.bf16.vlgmr.msra.gmra.mrb[24].mxu1 %v3178_v16 }
 0x136   :  { %2709 = vst [vmem:[%s4465_s3 + $0x188] sm:$0xff] %v3045_v12  ;;  %2502 = vmatpush1.bf16.msra.mxu0 %v3002_v2  ;;  %2711 = vst [vmem:[%s4465_s3 + $0x198] sm:$0xff] %v3053_v17  ;;  %2608 = vmatpush1.bf16.msra.mxu1 %v3004_v9 }
 0x137   :  { %2490 = vmatprep.mubr.bf16.mxu0 %v3179_v21  ;;  %2596 = vmatprep.mubr.bf16.mxu1 %v3179_v21 }
 0x138   :  { %2503 = vmatprep.subr.bf16.mxu0 %v3019_v14  ;;  %2609 = vmatprep.subr.bf16.mxu1 %v3021_v18 }
 0x13a   :  { %2504 = vmatpush1.bf16.msra.mxu0 %v3018_v19  ;;  %2610 = vmatpush1.bf16.msra.mxu1 %v3020_v24 }
 0x13d   :  { %2491 = vmatmul.mubr.bf16.gmra.mrb[28].mxu0 %v3180_v25  ;;  %2597 = vmatmul.mubr.bf16.gmra.mrb[28].mxu1 %v3180_v25 }
 0x13e   :  { %2533 = vmatprep.mubr.bf16.mxu0 %v3183_v3  ;;  %2639 = vmatprep.mubr.bf16.mxu1 %v3183_v3 }
 0x145   :  { %3034 = vmatmul.mubr.msk.bf16.vlgmr.msra.gmra.mrb[24].mxu0 %vm1805_vm0, %v3181_v26  ;;  %3036 = vmatmul.mubr.msk.bf16.vlgmr.msra.gmra.mrb[24].mxu1 %vm1805_vm0, %v3181_v26 }
 0x146   :  { %2543 = vmatprep.mubr.bf16.mxu0 %v3183_v3  ;;  %2649 = vmatprep.mubr.bf16.mxu1 %v3183_v3 }
 0x14d   :  { %3035 = vmatmul.mubr.msk.bf16.gmra.mrb[28].mxu0 %vm1805_vm0, %v3182_v27  ;;  %3037 = vmatmul.mubr.msk.bf16.gmra.mrb[28].mxu1 %vm1805_vm0, %v3182_v27 }
 0x178   :  { %v2111_v28 = vpop.f32.mrb[8].mxu0  ;;  %v2217_v30 = vpop.f32.mrb[8].mxu1 }
 0x179   :  { %v3054_v29 = vadd.f32 %v2111_v28, %v4127_v8  ;;  %v2113_v31 = vpop.f32.mrb[9].mxu0  ;;  %v3062_v32 = vadd.f32 %v2217_v30, %v4127_v8  ;;  %v2219_v15 = vpop.f32.mrb[9].mxu1 }
 0x17a   :  { %v3055_v34 = vadd.f32 %v2113_v31, %v4127_v8  ;;  %v2115_v22 = vpop.f32.mrb[10].mxu0  ;;  %v3063_v3 = vadd.f32 %v2219_v15, %v4127_v8  ;;  %v2221_v33 = vpop.f32.mrb[10].mxu1 }
 0x17b   :  { %2664 = vst [vmem:[%s4465_s3 + $0x20] sm:$0xff] %v3054_v29  ;;  %v3056_v35 = vadd.f32 %v2115_v22, %v4143_v23  ;;  %v2117_v37 = vpop.f32.mrb[11].mxu0  ;;  %2666 = vst [vmem:[%s4465_s3 + $0x30] sm:$0xff] %v3062_v32  ;;  %v3064_v38 = vadd.f32 %v2221_v33, %v4143_v23  ;;  %v2223_v40 = vpop.f32.mrb[11].mxu1 }
 0x17c   :  { %2665 = vst [vmem:[%s4465_s3 + $0x28] sm:$0xff] %v3055_v34  ;;  %v3057_v39 = vadd.f32 %v2117_v37, %v4143_v23  ;;  %2667 = vst [vmem:[%s4465_s3 + $0x38] sm:$0xff] %v3063_v3  ;;  %v3065_v41 = vadd.f32 %v2223_v40, %v4143_v23 }
 0x17d   :  { %2680 = vst [vmem:[%s4465_s3 + $0xa0] sm:$0xff] %v3056_v35  ;;  %2682 = vst [vmem:[%s4465_s3 + $0xb0] sm:$0xff] %v3064_v38 }
 0x17e   :  { %2681 = vst [vmem:[%s4465_s3 + $0xa8] sm:$0xff] %v3057_v39  ;;  %2683 = vst [vmem:[%s4465_s3 + $0xb8] sm:$0xff] %v3065_v41 }
 0x180   :  { %v2121_v42 = vpop.f32.mrb[12].mxu0  ;;  %v2227_v44 = vpop.f32.mrb[12].mxu1 }
 0x181   :  { %v3058_v43 = vadd.f32 %v2121_v42, %v4141_v20  ;;  %v2123_v45 = vpop.f32.mrb[13].mxu0  ;;  %v3066_v46 = vadd.f32 %v2227_v44, %v4141_v20  ;;  %v2229_v48 = vpop.f32.mrb[13].mxu1 }
 0x182   :  { %v3059_v47 = vadd.f32 %v2123_v45, %v4141_v20  ;;  %v2125_v49 = vpop.f32.mrb[14].mxu0  ;;  %v3067_v57 = vadd.f32 %v2229_v48, %v4141_v20  ;;  %v2231_v50 = vpop.f32.mrb[14].mxu1 }
 0x183   :  { %2696 = vst [vmem:[%s4465_s3 + $0x120] sm:$0xff] %v3058_v43  ;;  %v3060_v36 = vadd.f32 %v2125_v49, %v4201_v54  ;;  %v2127_v51 = vpop.f32.mrb[15].mxu0  ;;  %2698 = vst [vmem:[%s4465_s3 + $0x130] sm:$0xff] %v3066_v46  ;;  %v3068_v52 = vadd.f32 %v2231_v50, %v4201_v54  ;;  %v2233_v56 = vpop.f32.mrb[15].mxu1 }
 0x184   :  { %2697 = vst [vmem:[%s4465_s3 + $0x128] sm:$0xff] %v3059_v47  ;;  %v3061_v55 = vadd.f32 %v2127_v51, %v4201_v54  ;;  %2699 = vst [vmem:[%s4465_s3 + $0x138] sm:$0xff] %v3067_v57  ;;  %v3069_v58 = vadd.f32 %v2233_v56, %v4201_v54 }
 0x185   :  { %2712 = vst [vmem:[%s4465_s3 + $0x1a0] sm:$0xff] %v3060_v36  ;;  %2714 = vst [vmem:[%s4465_s3 + $0x1b0] sm:$0xff] %v3068_v52 }
 0x186   :  { %2713 = vst [vmem:[%s4465_s3 + $0x1a8] sm:$0xff] %v3061_v55  ;;  %2715 = vst [vmem:[%s4465_s3 + $0x1b8] sm:$0xff] %v3069_v58 }
 0x1c8   :  { %v2323_v59 = vpop.f32.mrb[16].mxu0  ;;  %v2429_v61 = vpop.f32.mrb[16].mxu1 }
 0x1c9   :  { %v3070_v60 = vadd.f32 %v2323_v59, %v4127_v8  ;;  %v2325_v62 = vpop.f32.mrb[17].mxu0  ;;  %v3078_v63 = vadd.f32 %v2429_v61, %v4127_v8  ;;  %v2431_v1 = vpop.f32.mrb[17].mxu1 }
 0x1ca   :  { %v3071_v0 = vadd.f32 %v2325_v62, %v4127_v8  ;;  %v2327_v2 = vpop.f32.mrb[18].mxu0  ;;  %v3079_v53 = vadd.f32 %v2431_v1, %v4127_v8  ;;  %v2433_v5 = vpop.f32.mrb[18].mxu1 }
 0x1cb   :  { %2668 = vst [vmem:[%s4465_s3 + $0x40] sm:$0xff] %v3070_v60  ;;  %v3072_v4 = vadd.f32 %v2327_v2, %v4143_v23  ;;  %v2329_v6 = vpop.f32.mrb[19].mxu0  ;;  %2670 = vst [vmem:[%s4465_s3 + $0x50] sm:$0xff] %v3078_v63  ;;  %v3080_v7 = vadd.f32 %v2433_v5, %v4143_v23  ;;  %v2435_v10 = vpop.f32.mrb[19].mxu1 }
 0x1cc   :  { %2669 = vst [vmem:[%s4465_s3 + $0x48] sm:$0xff] %v3071_v0  ;;  %v3073_v9 = vadd.f32 %v2329_v6, %v4143_v23  ;;  %2671 = vst [vmem:[%s4465_s3 + $0x58] sm:$0xff] %v3079_v53  ;;  %v3081_v11 = vadd.f32 %v2435_v10, %v4143_v23 }
 0x1cd   :  { %2684 = vst [vmem:[%s4465_s3 + $0xc0] sm:$0xff] %v3072_v4  ;;  %2686 = vst [vmem:[%s4465_s3 + $0xd0] sm:$0xff] %v3080_v7 }
 0x1ce   :  { %2685 = vst [vmem:[%s4465_s3 + $0xc8] sm:$0xff] %v3073_v9  ;;  %2687 = vst [vmem:[%s4465_s3 + $0xd8] sm:$0xff] %v3081_v11 }
 0x1d0   :  { %v2333_v12 = vpop.f32.mrb[20].mxu0  ;;  %v2439_v14 = vpop.f32.mrb[20].mxu1 }
 0x1d1   :  { %v3074_v13 = vadd.f32 %v2333_v12, %v4141_v20  ;;  %v2335_v16 = vpop.f32.mrb[21].mxu0  ;;  %v3082_v17 = vadd.f32 %v2439_v14, %v4141_v20  ;;  %v2441_v19 = vpop.f32.mrb[21].mxu1 }
 0x1d2   :  { %v3075_v18 = vadd.f32 %v2335_v16, %v4141_v20  ;;  %v2337_v21 = vpop.f32.mrb[22].mxu0  ;;  %v3083_v24 = vadd.f32 %v2441_v19, %v4141_v20  ;;  %v2443_v26 = vpop.f32.mrb[22].mxu1 }
 0x1d3   :  { %2700 = vst [vmem:[%s4465_s3 + $0x140] sm:$0xff] %v3074_v13  ;;  %v3076_v25 = vadd.f32 %v2337_v21, %v4201_v54  ;;  %v2339_v27 = vpop.f32.mrb[23].mxu0  ;;  %2702 = vst [vmem:[%s4465_s3 + $0x150] sm:$0xff] %v3082_v17  ;;  %v3084_v28 = vadd.f32 %v2443_v26, %v4201_v54  ;;  %v2445_v30 = vpop.f32.mrb[23].mxu1 }
 0x1d4   :  { %2701 = vst [vmem:[%s4465_s3 + $0x148] sm:$0xff] %v3075_v18  ;;  %v3077_v29 = vadd.f32 %v2339_v27, %v4201_v54  ;;  %2703 = vst [vmem:[%s4465_s3 + $0x158] sm:$0xff] %v3083_v24  ;;  %v3085_v31 = vadd.f32 %v2445_v30, %v4201_v54 }
 0x1d5   :  { %2716 = vst [vmem:[%s4465_s3 + $0x1c0] sm:$0xff] %v3076_v25  ;;  %2718 = vst [vmem:[%s4465_s3 + $0x1d0] sm:$0xff] %v3084_v28 }
 0x1d6   :  { %2717 = vst [vmem:[%s4465_s3 + $0x1c8] sm:$0xff] %v3077_v29  ;;  %2719 = vst [vmem:[%s4465_s3 + $0x1d8] sm:$0xff] %v3085_v31 }
 0x218   :  { %v2535_v32 = vpop.f32.mrb[24].mxu0  ;;  %v2641_v15 = vpop.f32.mrb[24].mxu1 }
 0x219   :  { %v3086_v34 = vadd.f32 %v2535_v32, %v4127_v8  ;;  %v2537_v22 = vpop.f32.mrb[25].mxu0  ;;  %v3094_v3 = vadd.f32 %v2641_v15, %v4127_v8  ;;  %v2643_v33 = vpop.f32.mrb[25].mxu1 }
 0x21a   :  { %v3087_v35 = vadd.f32 %v2537_v22, %v4127_v8  ;;  %v2539_v37 = vpop.f32.mrb[26].mxu0  ;;  %v3095_v38 = vadd.f32 %v2643_v33, %v4127_v8  ;;  %v2645_v40 = vpop.f32.mrb[26].mxu1 }
 0x21b   :  { %2672 = vst [vmem:[%s4465_s3 + $0x60] sm:$0xff] %v3086_v34  ;;  %v3088_v39 = vadd.f32 %v2539_v37, %v4143_v23  ;;  %v2541_v41 = vpop.f32.mrb[27].mxu0  ;;  %2674 = vst [vmem:[%s4465_s3 + $0x70] sm:$0xff] %v3094_v3  ;;  %v3096_v42 = vadd.f32 %v2645_v40, %v4143_v23  ;;  %v2647_v44 = vpop.f32.mrb[27].mxu1 }
 0x21c   :  { %2673 = vst [vmem:[%s4465_s3 + $0x68] sm:$0xff] %v3087_v35  ;;  %v3089_v43 = vadd.f32 %v2541_v41, %v4143_v23  ;;  %2675 = vst [vmem:[%s4465_s3 + $0x78] sm:$0xff] %v3095_v38  ;;  %v3097_v8 = vadd.f32 %v2647_v44, %v4143_v23 }
 0x21d   :  { %2688 = vst [vmem:[%s4465_s3 + $0xe0] sm:$0xff] %v3088_v39  ;;  %2690 = vst [vmem:[%s4465_s3 + $0xf0] sm:$0xff] %v3096_v42 }
 0x21e   :  { %2689 = vst [vmem:[%s4465_s3 + $0xe8] sm:$0xff] %v3089_v43  ;;  %2691 = vst [vmem:[%s4465_s3 + $0xf8] sm:$0xff] %v3097_v8 }
 0x220   :  { %v2545_v45 = vpop.f32.mrb[28].mxu0  ;;  %v2651_v47 = vpop.f32.mrb[28].mxu1 }
 0x221   :  { %v3090_v46 = vadd.f32 %v2545_v45, %v4141_v20  ;;  %v2547_v48 = vpop.f32.mrb[29].mxu0  ;;  %v3098_v49 = vadd.f32 %v2651_v47, %v4141_v20  ;;  %v2653_v57 = vpop.f32.mrb[29].mxu1 }
 0x222   :  { %v3091_v23 = vadd.f32 %v2547_v48, %v4141_v20  ;;  %v2549_v36 = vpop.f32.mrb[30].mxu0  ;;  %v3099_v50 = vadd.f32 %v2653_v57, %v4141_v20  ;;  %v2655_v52 = vpop.f32.mrb[30].mxu1 }
 0x223   :  { %2704 = vst [vmem:[%s4465_s3 + $0x160] sm:$0xff] %v3090_v46  ;;  %v3092_v51 = vadd.f32 %v2549_v36, %v4201_v54  ;;  %v2551_v55 = vpop.f32.mrb[31].mxu0  ;;  %2706 = vst [vmem:[%s4465_s3 + $0x170] sm:$0xff] %v3098_v49  ;;  %v3100_v56 = vadd.f32 %v2655_v52, %v4201_v54  ;;  %v2657_v59 = vpop.f32.mrb[31].mxu1 }
 0x224   :  { %2705 = vst [vmem:[%s4465_s3 + $0x168] sm:$0xff] %v3091_v23  ;;  %v3093_v58 = vadd.f32 %v2551_v55, %v4201_v54  ;;  %2707 = vst [vmem:[%s4465_s3 + $0x178] sm:$0xff] %v3099_v50  ;;  %v3101_v20 = vadd.f32 %v2657_v59, %v4201_v54 }
 0x225   :  { %2720 = vst [vmem:[%s4465_s3 + $0x1e0] sm:$0xff] %v3092_v51  ;;  %2722 = vst [vmem:[%s4465_s3 + $0x1f0] sm:$0xff] %v3100_v56 }
 0x226   :  { %2721 = vst [vmem:[%s4465_s3 + $0x1e8] sm:$0xff] %v3093_v58  ;;  %2723 = vst [vmem:[%s4465_s3 + $0x1f8] sm:$0xff] %v3101_v20 }

// kernel: earthfarseer_forward.77
= control target key start
LH: loop header
LB: loop body
LE: loop exit
PB: predicated region body
PF: predicated region fallthrough
CT: control target
= control target key end

     0   :  { %v5727_v50 = vmov 0   ;;  %vm3557_vm0 = vcmask 523264   ;;  %s8010_s1 = inlined_call_operand.vmem [shape: bf16[1,576,2048], index: 1, kind: input, shape index: {}]   ;;  %s8011_s0 = inlined_call_operand.vmem [shape: bf16[1,32,576], index: 0, kind: input, shape index: {}]   ;;  %s8012_s2 = inlined_call_operand.vmem [shape: f32[1,32,1], index: 2, kind: input, shape index: {}]   ;;  %s8013_s3 = inlined_call_operand.vmem [shape: f32[1,32,2048], index: 3, kind: output, shape index: {}]  }
   0x1   :  { %v27_v0 = vld [vmem:[%s8010_s1] sm:$0xff]  ;;  %v28_v2 = vld [vmem:[%s8010_s1 + $0x8] sm:$0xff]  ;;  %5699 = vset.pattern.permute.xlu0 %v5727_v50  ;;  %5700 = vset.pattern.permute.xlu1 %v5727_v50 }
   0x2   :  { %v35_v1 = vld [vmem:[%s8010_s1 + $0x40] sm:$0xff]  ;;  %v36_v4 = vld [vmem:[%s8010_s1 + $0x48] sm:$0xff] }
   0x3   :  { %v4915_v3 = vcombine.high %v27_v0, %v35_v1  ;;  %v4914_v5 = vcombine.low %v27_v0, %v35_v1  ;;  %v43_v6 = vld [vmem:[%s8010_s1 + $0x80] sm:$0xff]  ;;  %v4917_v8 = vcombine.high %v28_v2, %v36_v4  ;;  %v4916_v9 = vcombine.low %v28_v2, %v36_v4  ;;  %v44_v11 = vld [vmem:[%s8010_s1 + $0x88] sm:$0xff] }
   0x4   :  { %v51_v7 = vld [vmem:[%s8010_s1 + $0xc0] sm:$0xff]  ;;  %v52_v12 = vld [vmem:[%s8010_s1 + $0xc8] sm:$0xff] }
   0x5   :  { %v4931_v10 = vcombine.high %v43_v6, %v51_v7  ;;  %v59_v13 = vld [vmem:[%s8010_s1 + $0x100] sm:$0xff]  ;;  %3564 = vmatprep.subr.bf16.mxu0 %v4915_v3  ;;  %v4933_v14 = vcombine.high %v44_v11, %v52_v12  ;;  %v60_v16 = vld [vmem:[%s8010_s1 + $0x108] sm:$0xff]  ;;  %3723 = vmatprep.subr.bf16.mxu1 %v4917_v8  ;;  %v4930_v18 = vcombine.low %v43_v6, %v51_v7 }
   0x6   :  { %v67_v15 = vld [vmem:[%s8010_s1 + $0x140] sm:$0xff]  ;;  %v68_v17 = vld [vmem:[%s8010_s1 + $0x148] sm:$0xff]  ;;  %3565 = vmatpush1.bf16.msra.mxu0 %v4914_v5  ;;  %3724 = vmatpush1.bf16.msra.mxu1 %v4916_v9  ;;  %v4932_v19 = vcombine.low %v44_v11, %v52_v12 }
   0x7   :  { %3566 = vmatprep.subr.bf16.mxu0 %v4931_v10  ;;  %v4947_v20 = vcombine.high %v59_v13, %v67_v15  ;;  %3725 = vmatprep.subr.bf16.mxu1 %v4933_v14  ;;  %v4949_v21 = vcombine.high %v60_v16, %v68_v17  ;;  %v75_v22 = vld [vmem:[%s8010_s1 + $0x180] sm:$0xff]  ;;  %v76_v24 = vld [vmem:[%s8010_s1 + $0x188] sm:$0xff]  ;;  %v4946_v26 = vcombine.low %v59_v13, %v67_v15 }
   0x8   :  { %v83_v23 = vld [vmem:[%s8010_s1 + $0x1c0] sm:$0xff]  ;;  %v84_v25 = vld [vmem:[%s8010_s1 + $0x1c8] sm:$0xff]  ;;  %v4948_v27 = vcombine.low %v60_v16, %v68_v17 }
   0x9   :  { %v4963_v28 = vcombine.high %v75_v22, %v83_v23  ;;  %v4965_v29 = vcombine.high %v76_v24, %v84_v25  ;;  %v91_v30 = vld [vmem:[%s8010_s1 + $0x200] sm:$0xff]  ;;  %v92_v32 = vld [vmem:[%s8010_s1 + $0x208] sm:$0xff]  ;;  %v4962_v34 = vcombine.low %v75_v22, %v83_v23  ;;  %v4964_v35 = vcombine.low %v76_v24, %v84_v25 }
   0xa   :  { %3567 = vmatpush1.bf16.msra.mxu0 %v4930_v18  ;;  %3726 = vmatpush1.bf16.msra.mxu1 %v4932_v19  ;;  %v99_v31 = vld [vmem:[%s8010_s1 + $0x240] sm:$0xff]  ;;  %v100_v33 = vld [vmem:[%s8010_s1 + $0x248] sm:$0xff] }
   0xb   :  { %3568 = vmatprep.subr.bf16.mxu0 %v4947_v20  ;;  %3727 = vmatprep.subr.bf16.mxu1 %v4949_v21  ;;  %v4979_v36 = vcombine.high %v91_v30, %v99_v31  ;;  %v4981_v37 = vcombine.high %v92_v32, %v100_v33  ;;  %v107_v38 = vld [vmem:[%s8010_s1 + $0x280] sm:$0xff]  ;;  %v108_v40 = vld [vmem:[%s8010_s1 + $0x288] sm:$0xff]  ;;  %v4978_v42 = vcombine.low %v91_v30, %v99_v31 }
   0xc   :  { %v115_v39 = vld [vmem:[%s8010_s1 + $0x2c0] sm:$0xff]  ;;  %v116_v41 = vld [vmem:[%s8010_s1 + $0x2c8] sm:$0xff]  ;;  %v4980_v43 = vcombine.low %v92_v32, %v100_v33 }
   0xd   :  { %v4995_v44 = vcombine.high %v107_v38, %v115_v39  ;;  %v4997_v45 = vcombine.high %v108_v40, %v116_v41  ;;  %v123_v46 = vld [vmem:[%s8010_s1 + $0x300] sm:$0xff]  ;;  %v124_v48 = vld [vmem:[%s8010_s1 + $0x308] sm:$0xff]  ;;  %v4994_v51 = vcombine.low %v107_v38, %v115_v39  ;;  %v4996_v52 = vcombine.low %v108_v40, %v116_v41 }
   0xe   :  { %3569 = vmatpush1.bf16.msra.mxu0 %v4946_v26  ;;  %3728 = vmatpush1.bf16.msra.mxu1 %v4948_v27  ;;  %v131_v47 = vld [vmem:[%s8010_s1 + $0x340] sm:$0xff]  ;;  %v132_v49 = vld [vmem:[%s8010_s1 + $0x348] sm:$0xff] }
   0xf   :  { %3570 = vmatprep.subr.bf16.mxu0 %v4963_v28  ;;  %3729 = vmatprep.subr.bf16.mxu1 %v4965_v29  ;;  %v5011_v53 = vcombine.high %v123_v46, %v131_v47  ;;  %v5013_v54 = vcombine.high %v124_v48, %v132_v49  ;;  %v139_v55 = vld [vmem:[%s8010_s1 + $0x380] sm:$0xff]  ;;  %v140_v58 = vld [vmem:[%s8010_s1 + $0x388] sm:$0xff]  ;;  %v5010_v60 = vcombine.low %v123_v46, %v131_v47 }
  0x10   :  { %v147_v56 = vld [vmem:[%s8010_s1 + $0x3c0] sm:$0xff]  ;;  %v148_v59 = vld [vmem:[%s8010_s1 + $0x3c8] sm:$0xff]  ;;  %v5012_v61 = vcombine.low %v124_v48, %v132_v49 }
  0x11   :  { %v5843_v57 = vld [vmem:[%s8011_s0 + $0x4] ss:$20 sps:$4 sm:$0xff]   ;;  %v5027_v62 = vcombine.high %v139_v55, %v147_v56  ;;  %v5029_v63 = vcombine.high %v140_v58, %v148_v59  ;;  %v156_v2 = vld [vmem:[%s8010_s1 + $0x408] sm:$0xff]  ;;  %v5026_v4 = vcombine.low %v139_v55, %v147_v56  ;;  %v5028_v5 = vcombine.low %v140_v58, %v148_v59 }
  0x12   :  { %3571 = vmatpush1.bf16.msra.mxu0 %v4962_v34  ;;  %3730 = vmatpush1.bf16.msra.mxu1 %v4964_v35  ;;  %v155_v0 = vld [vmem:[%s8010_s1 + $0x400] sm:$0xff]  ;;  %v164_v3 = vld [vmem:[%s8010_s1 + $0x448] sm:$0xff] }
  0x13   :  { %3572 = vmatprep.subr.bf16.mxu0 %v4979_v36  ;;  %3731 = vmatprep.subr.bf16.mxu1 %v4981_v37  ;;  %v163_v1 = vld [vmem:[%s8010_s1 + $0x440] sm:$0xff]  ;;  %v5045_v7 = vcombine.high %v156_v2, %v164_v3  ;;  %v172_v10 = vld [vmem:[%s8010_s1 + $0x488] sm:$0xff]  ;;  %v5044_v13 = vcombine.low %v156_v2, %v164_v3 }
  0x14   :  { %3596 = vmatprep.mubr.bf16.mxu0 %v5843_v57  ;;  %3755 = vmatprep.mubr.bf16.mxu1 %v5843_v57  ;;  %v5043_v6 = vcombine.high %v155_v0, %v163_v1  ;;  %v171_v8 = vld [vmem:[%s8010_s1 + $0x480] sm:$0xff]  ;;  %v180_v11 = vld [vmem:[%s8010_s1 + $0x4c8] sm:$0xff]  ;;  %v5042_v12 = vcombine.low %v155_v0, %v163_v1 }
  0x15   :  { %v179_v9 = vld [vmem:[%s8010_s1 + $0x4c0] sm:$0xff]  ;;  %v5061_v15 = vcombine.high %v172_v10, %v180_v11  ;;  %v188_v18 = vld [vmem:[%s8010_s1 + $0x508] sm:$0xff]  ;;  %v5060_v21 = vcombine.low %v172_v10, %v180_v11 }
  0x16   :  { %3573 = vmatpush1.bf16.msra.mxu0 %v4978_v42  ;;  %3732 = vmatpush1.bf16.msra.mxu1 %v4980_v43  ;;  %v5059_v14 = vcombine.high %v171_v8, %v179_v9  ;;  %v187_v16 = vld [vmem:[%s8010_s1 + $0x500] sm:$0xff]  ;;  %v196_v19 = vld [vmem:[%s8010_s1 + $0x548] sm:$0xff]  ;;  %v5058_v20 = vcombine.low %v171_v8, %v179_v9 }
  0x17   :  { %3574 = vmatprep.subr.bf16.mxu0 %v4995_v44  ;;  %3733 = vmatprep.subr.bf16.mxu1 %v4997_v45  ;;  %v195_v17 = vld [vmem:[%s8010_s1 + $0x540] sm:$0xff]  ;;  %v5077_v23 = vcombine.high %v188_v18, %v196_v19  ;;  %v204_v26 = vld [vmem:[%s8010_s1 + $0x588] sm:$0xff]  ;;  %v5076_v29 = vcombine.low %v188_v18, %v196_v19 }
  0x18   :  { %v5075_v22 = vcombine.high %v187_v16, %v195_v17  ;;  %v203_v24 = vld [vmem:[%s8010_s1 + $0x580] sm:$0xff]  ;;  %v212_v27 = vld [vmem:[%s8010_s1 + $0x5c8] sm:$0xff]  ;;  %v5074_v28 = vcombine.low %v187_v16, %v195_v17 }
  0x19   :  { %v211_v25 = vld [vmem:[%s8010_s1 + $0x5c0] sm:$0xff]  ;;  %v5093_v31 = vcombine.high %v204_v26, %v212_v27  ;;  %v220_v34 = vld [vmem:[%s8010_s1 + $0x608] sm:$0xff]  ;;  %v5092_v37 = vcombine.low %v204_v26, %v212_v27 }
  0x1a   :  { %3575 = vmatpush1.bf16.msra.mxu0 %v4994_v51  ;;  %3734 = vmatpush1.bf16.msra.mxu1 %v4996_v52  ;;  %v5091_v30 = vcombine.high %v203_v24, %v211_v25  ;;  %v219_v32 = vld [vmem:[%s8010_s1 + $0x600] sm:$0xff]  ;;  %v228_v35 = vld [vmem:[%s8010_s1 + $0x648] sm:$0xff]  ;;  %v5090_v36 = vcombine.low %v203_v24, %v211_v25 }
  0x1b   :  { %3576 = vmatprep.subr.bf16.mxu0 %v5011_v53  ;;  %3735 = vmatprep.subr.bf16.mxu1 %v5013_v54  ;;  %v227_v33 = vld [vmem:[%s8010_s1 + $0x640] sm:$0xff]  ;;  %v5109_v39 = vcombine.high %v220_v34, %v228_v35  ;;  %v236_v42 = vld [vmem:[%s8010_s1 + $0x688] sm:$0xff]  ;;  %v5108_v45 = vcombine.low %v220_v34, %v228_v35 }
  0x1c   :  { %v5107_v38 = vcombine.high %v219_v32, %v227_v33  ;;  %v235_v40 = vld [vmem:[%s8010_s1 + $0x680] sm:$0xff]  ;;  %v244_v43 = vld [vmem:[%s8010_s1 + $0x6c8] sm:$0xff]  ;;  %v5106_v44 = vcombine.low %v219_v32, %v227_v33 }
  0x1d   :  { %v243_v41 = vld [vmem:[%s8010_s1 + $0x6c0] sm:$0xff]  ;;  %v5125_v47 = vcombine.high %v236_v42, %v244_v43  ;;  %v252_v51 = vld [vmem:[%s8010_s1 + $0x708] sm:$0xff]  ;;  %v5124_v54 = vcombine.low %v236_v42, %v244_v43 }
  0x1e   :  { %3577 = vmatpush1.bf16.msra.mxu0 %v5010_v60  ;;  %3736 = vmatpush1.bf16.msra.mxu1 %v5012_v61  ;;  %v5123_v46 = vcombine.high %v235_v40, %v243_v41  ;;  %v251_v48 = vld [vmem:[%s8010_s1 + $0x700] sm:$0xff]  ;;  %v260_v52 = vld [vmem:[%s8010_s1 + $0x748] sm:$0xff]  ;;  %v5122_v53 = vcombine.low %v235_v40, %v243_v41 }
  0x1f   :  { %3578 = vmatprep.subr.bf16.mxu0 %v5027_v62  ;;  %3737 = vmatprep.subr.bf16.mxu1 %v5029_v63  ;;  %v259_v49 = vld [vmem:[%s8010_s1 + $0x740] sm:$0xff]  ;;  %v5141_v56 = vcombine.high %v252_v51, %v260_v52  ;;  %v268_v60 = vld [vmem:[%s8010_s1 + $0x788] sm:$0xff]  ;;  %v5140_v63 = vcombine.low %v252_v51, %v260_v52 }
  0x20   :  { %v5139_v55 = vcombine.high %v251_v48, %v259_v49  ;;  %v267_v58 = vld [vmem:[%s8010_s1 + $0x780] sm:$0xff]  ;;  %v276_v61 = vld [vmem:[%s8010_s1 + $0x7c8] sm:$0xff]  ;;  %v5138_v62 = vcombine.low %v251_v48, %v259_v49 }
  0x21   :  { %v275_v59 = vld [vmem:[%s8010_s1 + $0x7c0] sm:$0xff]  ;;  %v5157_v1 = vcombine.high %v268_v60, %v276_v61  ;;  %v6014_v32 = vld [vmem:[%s8011_s0 + $0x28] ss:$20 sps:$4 sm:$0xff]  }
  0x22   :  { %3579 = vmatpush1.bf16.msra.mxu0 %v5026_v4  ;;  %3738 = vmatpush1.bf16.msra.mxu1 %v5028_v5  ;;  %v5155_v0 = vcombine.high %v267_v58, %v275_v59  ;;  %v283_v2 = vld [vmem:[%s8010_s1 + $0x800] sm:$0xff]  ;;  %v284_v4 = vld [vmem:[%s8010_s1 + $0x808] sm:$0xff] }
  0x23   :  { %3580 = vmatprep.subr.bf16.mxu0 %v5043_v6  ;;  %3739 = vmatprep.subr.bf16.mxu1 %v5045_v7  ;;  %v291_v3 = vld [vmem:[%s8010_s1 + $0x840] sm:$0xff]  ;;  %v292_v5 = vld [vmem:[%s8010_s1 + $0x848] sm:$0xff]  ;;  %v5154_v6 = vcombine.low %v267_v58, %v275_v59  ;;  %v5156_v7 = vcombine.low %v268_v60, %v276_v61 }
  0x24   :  { %v5171_v8 = vcombine.high %v283_v2, %v291_v3  ;;  %v5173_v9 = vcombine.high %v284_v4, %v292_v5  ;;  %v299_v10 = vld [vmem:[%s8010_s1 + $0x880] sm:$0xff]  ;;  %v5172_v16 = vcombine.low %v284_v4, %v292_v5  ;;  %v348_v40 = vld [vmem:[%s8010_s1 + $0xa08] sm:$0xff] }
  0x25   :  { %v307_v11 = vld [vmem:[%s8010_s1 + $0x8c0] sm:$0xff]  ;;  %v356_v41 = vld [vmem:[%s8010_s1 + $0xa48] sm:$0xff] }
  0x26   :  { %3581 = vmatpush1.bf16.msra.mxu0 %v5042_v12  ;;  %3740 = vmatpush1.bf16.msra.mxu1 %v5044_v13  ;;  %v5970_v12 = vld [vmem:[%s8011_s0] ss:$20 sps:$4 sm:$0xff]   ;;  %v300_v13 = vld [vmem:[%s8010_s1 + $0x888] sm:$0xff]  ;;  %v5187_v17 = vcombine.high %v299_v10, %v307_v11  ;;  %v5186_v24 = vcombine.low %v299_v10, %v307_v11  ;;  %v5236_v52 = vcombine.low %v348_v40, %v356_v41 }
  0x27   :  { %3582 = vmatprep.subr.bf16.mxu0 %v5059_v14  ;;  %3741 = vmatprep.subr.bf16.mxu1 %v5061_v15  ;;  %v308_v14 = vld [vmem:[%s8010_s1 + $0x8c8] sm:$0xff]  ;;  %v5170_v15 = vcombine.low %v283_v2, %v291_v3  ;;  %v315_v19 = vld [vmem:[%s8010_s1 + $0x900] sm:$0xff] }
  0x28   :  { %v5189_v18 = vcombine.high %v300_v13, %v308_v14  ;;  %v5188_v25 = vcombine.low %v300_v13, %v308_v14  ;;  %v364_v48 = vld [vmem:[%s8010_s1 + $0xa88] sm:$0xff] }
  0x29   :  { %v372_v49 = vld [vmem:[%s8010_s1 + $0xac8] sm:$0xff] }
  0x2a   :  { %3583 = vmatpush1.bf16.msra.mxu0 %v5058_v20  ;;  %3742 = vmatpush1.bf16.msra.mxu1 %v5060_v21  ;;  %v323_v20 = vld [vmem:[%s8010_s1 + $0x940] sm:$0xff]  ;;  %v380_v58 = vld [vmem:[%s8010_s1 + $0xb08] sm:$0xff]  ;;  %v5252_v61 = vcombine.low %v364_v48, %v372_v49 }
  0x2b   :  { %3584 = vmatprep.subr.bf16.mxu0 %v5075_v22  ;;  %3743 = vmatprep.subr.bf16.mxu1 %v5077_v23  ;;  %v5987_v21 = vld [vmem:[%s8011_s0 + $0x2c] ss:$20 sps:$4 sm:$0xff]   ;;  %v5203_v26 = vcombine.high %v315_v19, %v323_v20  ;;  %v5202_v33 = vcombine.low %v315_v19, %v323_v20 }
  0x2c   :  { %v316_v22 = vld [vmem:[%s8010_s1 + $0x908] sm:$0xff] }
  0x2d   :  { %v324_v23 = vld [vmem:[%s8010_s1 + $0x948] sm:$0xff] }
  0x2e   :  { %3585 = vmatpush1.bf16.msra.mxu0 %v5074_v28  ;;  %3744 = vmatpush1.bf16.msra.mxu1 %v5076_v29  ;;  %v5205_v27 = vcombine.high %v316_v22, %v324_v23  ;;  %v331_v28 = vld [vmem:[%s8010_s1 + $0x980] sm:$0xff]  ;;  %v5204_v34 = vcombine.low %v316_v22, %v324_v23  ;;  %v388_v59 = vld [vmem:[%s8010_s1 + $0xb48] sm:$0xff] }
  0x2f   :  { %3586 = vmatprep.subr.bf16.mxu0 %v5091_v30  ;;  %3745 = vmatprep.subr.bf16.mxu1 %v5093_v31  ;;  %v339_v29 = vld [vmem:[%s8010_s1 + $0x9c0] sm:$0xff]  ;;  %v332_v30 = vld [vmem:[%s8010_s1 + $0x988] sm:$0xff]  ;;  %v5268_v5 = vcombine.low %v380_v58, %v388_v59 }
  0x30   :  { %v340_v31 = vld [vmem:[%s8010_s1 + $0x9c8] sm:$0xff]  ;;  %v5219_v35 = vcombine.high %v331_v28, %v339_v29  ;;  %v5218_v42 = vcombine.low %v331_v28, %v339_v29 }
  0x31   :  { %v5220_v43 = vcombine.low %v332_v30, %v340_v31  ;;  %v396_v2 = vld [vmem:[%s8010_s1 + $0xb88] sm:$0xff] }
  0x32   :  { %3587 = vmatpush1.bf16.msra.mxu0 %v5090_v36  ;;  %3746 = vmatpush1.bf16.msra.mxu1 %v5092_v37  ;;  %v5221_v36 = vcombine.high %v332_v30, %v340_v31  ;;  %v347_v37 = vld [vmem:[%s8010_s1 + $0xa00] sm:$0xff]  ;;  %v404_v3 = vld [vmem:[%s8010_s1 + $0xbc8] sm:$0xff] }
  0x33   :  { %3588 = vmatprep.subr.bf16.mxu0 %v5107_v38  ;;  %3747 = vmatprep.subr.bf16.mxu1 %v5109_v39  ;;  %v355_v38 = vld [vmem:[%s8010_s1 + $0xa40] sm:$0xff]  ;;  %v412_v10 = vld [vmem:[%s8010_s1 + $0xc08] sm:$0xff]  ;;  %v5284_v14 = vcombine.low %v396_v2, %v404_v3 }
  0x34   :  { %v6025_v39 = vld [vmem:[%s8011_s0 + $0xc] ss:$20 sps:$4 sm:$0xff]   ;;  %v5234_v51 = vcombine.low %v347_v37, %v355_v38 }
  0x35   :  { %v420_v11 = vld [vmem:[%s8010_s1 + $0xc48] sm:$0xff] }
  0x36   :  { %3589 = vmatpush1.bf16.msra.mxu0 %v5106_v44  ;;  %3748 = vmatpush1.bf16.msra.mxu1 %v5108_v45  ;;  %v5235_v44 = vcombine.high %v347_v37, %v355_v38  ;;  %v5237_v45 = vcombine.high %v348_v40, %v356_v41  ;;  %v428_v19 = vld [vmem:[%s8010_s1 + $0xc88] sm:$0xff]  ;;  %v5300_v23 = vcombine.low %v412_v10, %v420_v11  ;;  %v467_v37 = vld [vmem:[%s8010_s1 + $0xdc0] sm:$0xff] }
  0x37   :  { %3590 = vmatprep.subr.bf16.mxu0 %v5123_v46  ;;  %3749 = vmatprep.subr.bf16.mxu1 %v5125_v47  ;;  %v363_v46 = vld [vmem:[%s8010_s1 + $0xa80] sm:$0xff]  ;;  %v436_v20 = vld [vmem:[%s8010_s1 + $0xcc8] sm:$0xff] }
  0x38   :  { %v371_v47 = vld [vmem:[%s8010_s1 + $0xac0] sm:$0xff]  ;;  %v444_v28 = vld [vmem:[%s8010_s1 + $0xd08] sm:$0xff]  ;;  %v5316_v31 = vcombine.low %v428_v19, %v436_v20 }
  0x39   :  { %v5250_v60 = vcombine.low %v363_v46, %v371_v47  ;;  %v452_v29 = vld [vmem:[%s8010_s1 + $0xd48] sm:$0xff] }
  0x3a   :  { %3591 = vmatpush1.bf16.msra.mxu0 %v5122_v53  ;;  %3750 = vmatpush1.bf16.msra.mxu1 %v5124_v54  ;;  %v5251_v53 = vcombine.high %v363_v46, %v371_v47  ;;  %v5253_v54 = vcombine.high %v364_v48, %v372_v49  ;;  %v460_v38 = vld [vmem:[%s8010_s1 + $0xd88] sm:$0xff]  ;;  %v475_v46 = vld [vmem:[%s8010_s1 + $0xe00] sm:$0xff] }
  0x3b   :  { %3592 = vmatprep.subr.bf16.mxu0 %v5139_v55  ;;  %3751 = vmatprep.subr.bf16.mxu1 %v5141_v56  ;;  %v379_v55 = vld [vmem:[%s8010_s1 + $0xb00] sm:$0xff]  ;;  %v468_v40 = vld [vmem:[%s8010_s1 + $0xdc8] sm:$0xff] }
  0x3c   :  { %v387_v56 = vld [vmem:[%s8010_s1 + $0xb40] sm:$0xff]  ;;  %v476_v48 = vld [vmem:[%s8010_s1 + $0xe08] sm:$0xff] }
  0x3d   :  { %v5266_v4 = vcombine.low %v379_v55, %v387_v56  ;;  %v483_v47 = vld [vmem:[%s8010_s1 + $0xe40] sm:$0xff]  ;;  %v484_v49 = vld [vmem:[%s8010_s1 + $0xe48] sm:$0xff] }
  0x3e   :  { %3593 = vmatpush1.bf16.msra.mxu0 %v5138_v62  ;;  %3752 = vmatpush1.bf16.msra.mxu1 %v5140_v63  ;;  %v5267_v62 = vcombine.high %v379_v55, %v387_v56  ;;  %v5269_v63 = vcombine.high %v380_v58, %v388_v59  ;;  %v5365_v55 = vcombine.high %v476_v48, %v484_v49  ;;  %v491_v56 = vld [vmem:[%s8010_s1 + $0xe80] sm:$0xff]  ;;  %v492_v59 = vld [vmem:[%s8010_s1 + $0xe88] sm:$0xff] }
  0x3f   :  { %3594 = vmatprep.subr.bf16.mxu0 %v5155_v0  ;;  %3753 = vmatprep.subr.bf16.mxu1 %v5157_v1  ;;  %v395_v0 = vld [vmem:[%s8010_s1 + $0xb80] sm:$0xff] }
  0x40   :  { %v403_v1 = vld [vmem:[%s8010_s1 + $0xbc0] sm:$0xff] }
  0x41   :  { %v5282_v13 = vcombine.low %v395_v0, %v403_v1  ;;  %v499_v58 = vld [vmem:[%s8010_s1 + $0xec0] sm:$0xff] }
  0x42   :  { %3595 = vmatpush1.bf16.msra.mxu0 %v5154_v6  ;;  %3754 = vmatpush1.bf16.msra.mxu1 %v5156_v7  ;;  %v5283_v6 = vcombine.high %v395_v0, %v403_v1  ;;  %v5285_v7 = vcombine.high %v396_v2, %v404_v3  ;;  %v606_v0 = vld [vmem:[%s8012_s2 + $0x18] sm:$0xff]  ;;  %v507_v2 = vld [vmem:[%s8010_s1 + $0xf00] sm:$0xff] }
  0x43   :  { %3617 = vmatprep.subr.bf16.mxu0 %v5171_v8  ;;  %3776 = vmatprep.subr.bf16.mxu1 %v5173_v9  ;;  %v411_v8 = vld [vmem:[%s8010_s1 + $0xc00] sm:$0xff] }
  0x44   :  { %v419_v9 = vld [vmem:[%s8010_s1 + $0xc40] sm:$0xff] }
  0x45   :  { %3597 = vmatmul.mubr.bf16.vlgmr.msra.gmra.mrb[0].mxu0 %v5970_v12  ;;  %3756 = vmatmul.mubr.bf16.vlgmr.msra.gmra.mrb[0].mxu1 %v5970_v12  ;;  %v5298_v22 = vcombine.low %v411_v8, %v419_v9  ;;  %v515_v3 = vld [vmem:[%s8010_s1 + $0xf40] sm:$0xff] }
  0x46   :  { %3618 = vmatpush1.bf16.msra.mxu0 %v5170_v15  ;;  %3777 = vmatpush1.bf16.msra.mxu1 %v5172_v16  ;;  %v5299_v15 = vcombine.high %v411_v8, %v419_v9  ;;  %v5301_v16 = vcombine.high %v412_v10, %v420_v11  ;;  %v5395_v8 = vcombine.high %v507_v2, %v515_v3  ;;  %v523_v10 = vld [vmem:[%s8010_s1 + $0xf80] sm:$0xff] }
  0x47   :  { %3619 = vmatprep.subr.bf16.mxu0 %v5187_v17  ;;  %3778 = vmatprep.subr.bf16.mxu1 %v5189_v18  ;;  %v427_v17 = vld [vmem:[%s8010_s1 + $0xc80] sm:$0xff] }
  0x48   :  { %3606 = vmatprep.mubr.bf16.mxu0 %v5987_v21  ;;  %3765 = vmatprep.mubr.bf16.mxu1 %v5987_v21  ;;  %v435_v18 = vld [vmem:[%s8010_s1 + $0xcc0] sm:$0xff] }
  0x49   :  { %v5314_v30 = vcombine.low %v427_v17, %v435_v18  ;;  %v531_v11 = vld [vmem:[%s8010_s1 + $0xfc0] sm:$0xff] }
  0x4a   :  { %3620 = vmatpush1.bf16.msra.mxu0 %v5186_v24  ;;  %3779 = vmatpush1.bf16.msra.mxu1 %v5188_v25  ;;  %v5315_v24 = vcombine.high %v427_v17, %v435_v18  ;;  %v5317_v25 = vcombine.high %v428_v19, %v436_v20  ;;  %v5411_v17 = vcombine.high %v523_v10, %v531_v11  ;;  %v539_v19 = vld [vmem:[%s8010_s1 + $0x1000] sm:$0xff] }
  0x4b   :  { %3621 = vmatprep.subr.bf16.mxu0 %v5203_v26  ;;  %3780 = vmatprep.subr.bf16.mxu1 %v5205_v27  ;;  %v443_v26 = vld [vmem:[%s8010_s1 + $0xd00] sm:$0xff] }
  0x4c   :  { %v451_v27 = vld [vmem:[%s8010_s1 + $0xd40] sm:$0xff] }
  0x4d   :  { %3607 = vmatmul.mubr.bf16.gmra.mrb[4].mxu0 %v6014_v32  ;;  %3766 = vmatmul.mubr.bf16.gmra.mrb[4].mxu1 %v6014_v32  ;;  %v5330_v41 = vcombine.low %v443_v26, %v451_v27  ;;  %v547_v20 = vld [vmem:[%s8010_s1 + $0x1040] sm:$0xff] }
  0x4e   :  { %3622 = vmatpush1.bf16.msra.mxu0 %v5202_v33  ;;  %3781 = vmatpush1.bf16.msra.mxu1 %v5204_v34  ;;  %v5331_v33 = vcombine.high %v443_v26, %v451_v27  ;;  %v603_v34 = vld [vmem:[%s8012_s2] sm:$0xff]  ;;  %v5427_v26 = vcombine.high %v539_v19, %v547_v20 }
  0x4f   :  { %3623 = vmatprep.subr.bf16.mxu0 %v5219_v35  ;;  %3782 = vmatprep.subr.bf16.mxu1 %v5221_v36  ;;  %v5333_v35 = vcombine.high %v444_v28, %v452_v29  ;;  %v459_v36 = vld [vmem:[%s8010_s1 + $0xd80] sm:$0xff] }
  0x50   :  { %3649 = vmatprep.mubr.bf16.mxu0 %v6025_v39  ;;  %3808 = vmatprep.mubr.bf16.mxu1 %v6025_v39 }
  0x51   :  { %609 = vperm.xlu0 %5699, %v603_v34   ;;  %v5426_v34 = vcombine.low %v539_v19, %v547_v20 }
  0x52   :  { %3624 = vmatpush1.bf16.msra.mxu0 %v5218_v42  ;;  %3783 = vmatpush1.bf16.msra.mxu1 %v5220_v43  ;;  %v5332_v42 = vcombine.low %v444_v28, %v452_v29  ;;  %v5347_v43 = vcombine.high %v459_v36, %v467_v37  ;;  %v555_v28 = vld [vmem:[%s8010_s1 + $0x1080] sm:$0xff] }
  0x53   :  { %3625 = vmatprep.subr.bf16.mxu0 %v5235_v44  ;;  %3784 = vmatprep.subr.bf16.mxu1 %v5237_v45  ;;  %v604_v44 = vld [vmem:[%s8012_s2 + $0x8] sm:$0xff]  ;;  %v5349_v45 = vcombine.high %v460_v38, %v468_v40  ;;  %v563_v29 = vld [vmem:[%s8010_s1 + $0x10c0] sm:$0xff] }
  0x55   :  { %614 = vperm.xlu0 %5699, %v604_v44   ;;  %v5442_v44 = vcombine.low %v555_v28, %v563_v29 }
  0x56   :  { %3626 = vmatpush1.bf16.msra.mxu0 %v5234_v51  ;;  %3785 = vmatpush1.bf16.msra.mxu1 %v5236_v52  ;;  %v5346_v51 = vcombine.low %v459_v36, %v467_v37  ;;  %v5348_v52 = vcombine.low %v460_v38, %v468_v40  ;;  %v5443_v36 = vcombine.high %v555_v28, %v563_v29  ;;  %v6213_v38 = vld [vmem:[%s8011_s0 + $0x34] ss:$20 sps:$4 sm:$0xff]   ;;  %v571_v40 = vld [vmem:[%s8010_s1 + $0x1100] sm:$0xff] }
  0x57   :  { %3627 = vmatprep.subr.bf16.mxu0 %v5251_v53  ;;  %3786 = vmatprep.subr.bf16.mxu1 %v5253_v54  ;;  %v5363_v53 = vcombine.high %v475_v46, %v483_v47  ;;  %v605_v54 = vld [vmem:[%s8012_s2 + $0x10] sm:$0xff] }
  0x58   :  { %619 = vperm.xlu1 %5700, %v605_v54  }
  0x5a   :  { %3628 = vmatpush1.bf16.msra.mxu0 %v5250_v60  ;;  %3787 = vmatpush1.bf16.msra.mxu1 %v5252_v61  ;;  %v500_v60 = vld [vmem:[%s8010_s1 + $0xec8] sm:$0xff]  ;;  %v5362_v61 = vcombine.low %v475_v46, %v483_v47 }
  0x5b   :  { %3629 = vmatprep.subr.bf16.mxu0 %v5267_v62  ;;  %3788 = vmatprep.subr.bf16.mxu1 %v5269_v63  ;;  %v5364_v62 = vcombine.low %v476_v48, %v484_v49  ;;  %v5379_v63 = vcombine.high %v491_v56, %v499_v58  ;;  %v5381_v1 = vcombine.high %v492_v59, %v500_v60  ;;  %v587_v48 = vld [vmem:[%s8010_s1 + $0x1180] sm:$0xff] }
  0x5c   :  { %624 = vperm.xlu1 %5700, %v606_v0   ;;  %v595_v49 = vld [vmem:[%s8010_s1 + $0x11c0] sm:$0xff] }
  0x5e   :  { %3630 = vmatpush1.bf16.msra.mxu0 %v5266_v4  ;;  %3789 = vmatpush1.bf16.msra.mxu1 %v5268_v5  ;;  %v508_v4 = vld [vmem:[%s8010_s1 + $0xf08] sm:$0xff] }
  0x5f   :  { %3631 = vmatprep.subr.bf16.mxu0 %v5283_v6  ;;  %3790 = vmatprep.subr.bf16.mxu1 %v5285_v7  ;;  %v516_v5 = vld [vmem:[%s8010_s1 + $0xf48] sm:$0xff]  ;;  %v5378_v6 = vcombine.low %v491_v56, %v499_v58  ;;  %v5380_v7 = vcombine.low %v492_v59, %v500_v60  ;;  %v5475_v56 = vcombine.high %v587_v48, %v595_v49  ;;  %v29_v59 = vld [vmem:[%s8010_s1 + $0x10] sm:$0xff] }
  0x60   :  { %v5397_v9 = vcombine.high %v508_v4, %v516_v5  ;;  %v37_v60 = vld [vmem:[%s8010_s1 + $0x50] sm:$0xff] }
  0x62   :  { %3632 = vmatpush1.bf16.msra.mxu0 %v5282_v13  ;;  %3791 = vmatpush1.bf16.msra.mxu1 %v5284_v14  ;;  %v524_v13 = vld [vmem:[%s8010_s1 + $0xf88] sm:$0xff] }
  0x63   :  { %3633 = vmatprep.subr.bf16.mxu0 %v5299_v15  ;;  %3792 = vmatprep.subr.bf16.mxu1 %v5301_v16  ;;  %v532_v14 = vld [vmem:[%s8010_s1 + $0xfc8] sm:$0xff]  ;;  %v5394_v15 = vcombine.low %v507_v2, %v515_v3  ;;  %v5396_v16 = vcombine.low %v508_v4, %v516_v5  ;;  %v45_v3 = vld [vmem:[%s8010_s1 + $0x90] sm:$0xff] }
  0x64   :  { %v5413_v18 = vcombine.high %v524_v13, %v532_v14  ;;  %v53_v4 = vld [vmem:[%s8010_s1 + $0xd0] sm:$0xff] }
  0x65   :  { %v6273_v5 = vld [vmem:[%s8011_s0 + $0x10] ss:$20 sps:$4 sm:$0xff]  }
  0x66   :  { %3634 = vmatpush1.bf16.msra.mxu0 %v5298_v22  ;;  %3793 = vmatpush1.bf16.msra.mxu1 %v5300_v23  ;;  %v540_v22 = vld [vmem:[%s8010_s1 + $0x1008] sm:$0xff] }
  0x67   :  { %3635 = vmatprep.subr.bf16.mxu0 %v5315_v24  ;;  %3794 = vmatprep.subr.bf16.mxu1 %v5317_v25  ;;  %v548_v23 = vld [vmem:[%s8010_s1 + $0x1048] sm:$0xff]  ;;  %v5410_v24 = vcombine.low %v523_v10, %v531_v11  ;;  %v5412_v25 = vcombine.low %v524_v13, %v532_v14  ;;  %v4935_v10 = vcombine.high %v45_v3, %v53_v4  ;;  %v61_v13 = vld [vmem:[%s8010_s1 + $0x110] sm:$0xff] }
  0x68   :  { %v5429_v27 = vcombine.high %v540_v22, %v548_v23  ;;  %v69_v14 = vld [vmem:[%s8010_s1 + $0x150] sm:$0xff] }
  0x69   :  { %v4951_v19 = vcombine.high %v61_v13, %v69_v14 }
  0x6a   :  { %3636 = vmatpush1.bf16.msra.mxu0 %v5314_v30  ;;  %3795 = vmatpush1.bf16.msra.mxu1 %v5316_v31  ;;  %v6202_v30 = vld [vmem:[%s8011_s0 + $0x8] ss:$20 sps:$4 sm:$0xff]  }
  0x6b   :  { %3637 = vmatprep.subr.bf16.mxu0 %v5331_v33  ;;  %3796 = vmatprep.subr.bf16.mxu1 %v5333_v35  ;;  %v556_v31 = vld [vmem:[%s8010_s1 + $0x1088] sm:$0xff]  ;;  %v5428_v35 = vcombine.low %v540_v22, %v548_v23  ;;  %v77_v22 = vld [vmem:[%s8010_s1 + $0x190] sm:$0xff] }
  0x6c   :  { %v564_v33 = vld [vmem:[%s8010_s1 + $0x10c8] sm:$0xff]  ;;  %v85_v23 = vld [vmem:[%s8010_s1 + $0x1d0] sm:$0xff] }
  0x6d   :  { %v5445_v37 = vcombine.high %v556_v31, %v564_v33  ;;  %v4967_v29 = vcombine.high %v77_v22, %v85_v23 }
  0x6e   :  { %3638 = vmatpush1.bf16.msra.mxu0 %v5330_v41  ;;  %3797 = vmatpush1.bf16.msra.mxu1 %v5332_v42  ;;  %v579_v41 = vld [vmem:[%s8010_s1 + $0x1140] sm:$0xff]  ;;  %v572_v42 = vld [vmem:[%s8010_s1 + $0x1108] sm:$0xff] }
  0x6f   :  { %3639 = vmatprep.subr.bf16.mxu0 %v5347_v43  ;;  %3798 = vmatprep.subr.bf16.mxu1 %v5349_v45  ;;  %v580_v43 = vld [vmem:[%s8010_s1 + $0x1148] sm:$0xff]  ;;  %v5444_v45 = vcombine.low %v556_v31, %v564_v33  ;;  %v5459_v46 = vcombine.high %v571_v40, %v579_v41  ;;  %v5458_v54 = vcombine.low %v571_v40, %v579_v41  ;;  %v93_v33 = vld [vmem:[%s8010_s1 + $0x210] sm:$0xff] }
  0x70   :  { %v5461_v47 = vcombine.high %v572_v42, %v580_v43 }
  0x72   :  { %3640 = vmatpush1.bf16.msra.mxu0 %v5346_v51  ;;  %3799 = vmatpush1.bf16.msra.mxu1 %v5348_v52  ;;  %v6240_v51 = vld [vmem:[%s8011_s0 + $0x30] ss:$20 sps:$4 sm:$0xff]   ;;  %v588_v52 = vld [vmem:[%s8010_s1 + $0x1188] sm:$0xff] }
  0x73   :  { %3641 = vmatprep.subr.bf16.mxu0 %v5363_v53  ;;  %3800 = vmatprep.subr.bf16.mxu1 %v5365_v55  ;;  %v596_v53 = vld [vmem:[%s8010_s1 + $0x11c8] sm:$0xff]  ;;  %v5460_v55 = vcombine.low %v572_v42, %v580_v43  ;;  %v109_v43 = vld [vmem:[%s8010_s1 + $0x290] sm:$0xff] }
  0x74   :  { %v5477_v58 = vcombine.high %v588_v52, %v596_v53  ;;  %v5476_v0 = vcombine.low %v588_v52, %v596_v53  ;;  %v125_v53 = vld [vmem:[%s8010_s1 + $0x310] sm:$0xff] }
  0x76   :  { %3642 = vmatpush1.bf16.msra.mxu0 %v5362_v61  ;;  %3801 = vmatpush1.bf16.msra.mxu1 %v5364_v62  ;;  %v30_v61 = vld [vmem:[%s8010_s1 + $0x18] sm:$0xff] }
  0x77   :  { %3643 = vmatprep.subr.bf16.mxu0 %v5379_v63  ;;  %3802 = vmatprep.subr.bf16.mxu1 %v5381_v1  ;;  %v38_v62 = vld [vmem:[%s8010_s1 + $0x58] sm:$0xff]  ;;  %v5474_v63 = vcombine.low %v587_v48, %v595_v49  ;;  %v4919_v1 = vcombine.high %v29_v59, %v37_v60 }
  0x78   :  { %v4921_v2 = vcombine.high %v30_v61, %v38_v62 }
  0x7a   :  { %3644 = vmatpush1.bf16.msra.mxu0 %v5378_v6  ;;  %3803 = vmatpush1.bf16.msra.mxu1 %v5380_v7  ;;  %v46_v6 = vld [vmem:[%s8010_s1 + $0x98] sm:$0xff] }
  0x7b   :  { %3645 = vmatprep.subr.bf16.mxu0 %v5395_v8  ;;  %3804 = vmatprep.subr.bf16.mxu1 %v5397_v9  ;;  %v54_v7 = vld [vmem:[%s8010_s1 + $0xd8] sm:$0xff]  ;;  %v4918_v8 = vcombine.low %v29_v59, %v37_v60  ;;  %v4920_v9 = vcombine.low %v30_v61, %v38_v62  ;;  %v141_v61 = vld [vmem:[%s8010_s1 + $0x390] sm:$0xff] }
  0x7c   :  { %v4937_v11 = vcombine.high %v46_v6, %v54_v7  ;;  %v149_v62 = vld [vmem:[%s8010_s1 + $0x3d0] sm:$0xff] }
  0x7e   :  { %3646 = vmatpush1.bf16.msra.mxu0 %v5394_v15  ;;  %3805 = vmatpush1.bf16.msra.mxu1 %v5396_v16  ;;  %v62_v15 = vld [vmem:[%s8010_s1 + $0x118] sm:$0xff] }
  0x7f   :  { %3647 = vmatprep.subr.bf16.mxu0 %v5411_v17  ;;  %3806 = vmatprep.subr.bf16.mxu1 %v5413_v18  ;;  %v70_v16 = vld [vmem:[%s8010_s1 + $0x158] sm:$0xff]  ;;  %v4934_v17 = vcombine.low %v45_v3, %v53_v4  ;;  %v4936_v18 = vcombine.low %v46_v6, %v54_v7  ;;  %v5031_v3 = vcombine.high %v141_v61, %v149_v62  ;;  %v157_v6 = vld [vmem:[%s8010_s1 + $0x410] sm:$0xff] }
  0x80   :  { %v4953_v20 = vcombine.high %v62_v15, %v70_v16  ;;  %v4952_v28 = vcombine.low %v62_v15, %v70_v16  ;;  %v165_v7 = vld [vmem:[%s8010_s1 + $0x450] sm:$0xff] }
  0x81   :  { %v173_v15 = vld [vmem:[%s8010_s1 + $0x490] sm:$0xff] }
  0x82   :  { %3648 = vmatpush1.bf16.msra.mxu0 %v5410_v24  ;;  %3807 = vmatpush1.bf16.msra.mxu1 %v5412_v25  ;;  %v6308_v24 = vld [vmem:[%s8011_s0 + $0x38] ss:$20 sps:$4 sm:$0xff]   ;;  %v181_v16 = vld [vmem:[%s8010_s1 + $0x4d0] sm:$0xff] }
  0x83   :  { %3670 = vmatprep.subr.bf16.mxu0 %v5427_v26  ;;  %3829 = vmatprep.subr.bf16.mxu1 %v5429_v27  ;;  %v78_v25 = vld [vmem:[%s8010_s1 + $0x198] sm:$0xff]  ;;  %v4950_v27 = vcombine.low %v61_v13, %v69_v14  ;;  %v5047_v13 = vcombine.high %v157_v6, %v165_v7 }
  0x84   :  { %v86_v26 = vld [vmem:[%s8010_s1 + $0x1d8] sm:$0xff] }
  0x85   :  { %3650 = vmatmul.mubr.bf16.vlgmr.msra.gmra.mrb[0].mxu0 %v6202_v30  ;;  %3809 = vmatmul.mubr.bf16.vlgmr.msra.gmra.mrb[0].mxu1 %v6202_v30  ;;  %v4969_v31 = vcombine.high %v78_v25, %v86_v26  ;;  %v4968_v40 = vcombine.low %v78_v25, %v86_v26  ;;  %v189_v25 = vld [vmem:[%s8010_s1 + $0x510] sm:$0xff] }
  0x86   :  { %3671 = vmatpush1.bf16.msra.mxu0 %v5426_v34  ;;  %3830 = vmatpush1.bf16.msra.mxu1 %v5428_v35  ;;  %v101_v34 = vld [vmem:[%s8010_s1 + $0x250] sm:$0xff]  ;;  %v94_v35 = vld [vmem:[%s8010_s1 + $0x218] sm:$0xff] }
  0x87   :  { %3672 = vmatprep.subr.bf16.mxu0 %v5443_v36  ;;  %3831 = vmatprep.subr.bf16.mxu1 %v5445_v37  ;;  %v102_v36 = vld [vmem:[%s8010_s1 + $0x258] sm:$0xff]  ;;  %v4966_v37 = vcombine.low %v77_v22, %v85_v23  ;;  %v4983_v41 = vcombine.high %v93_v33, %v101_v34  ;;  %v5063_v22 = vcombine.high %v173_v15, %v181_v16  ;;  %v197_v26 = vld [vmem:[%s8010_s1 + $0x550] sm:$0xff] }
  0x88   :  { %3659 = vmatprep.mubr.bf16.mxu0 %v6213_v38  ;;  %3818 = vmatprep.mubr.bf16.mxu1 %v6213_v38  ;;  %v4985_v42 = vcombine.high %v94_v35, %v102_v36  ;;  %v4984_v48 = vcombine.low %v94_v35, %v102_v36  ;;  %v205_v35 = vld [vmem:[%s8010_s1 + $0x590] sm:$0xff] }
  0x89   :  { %v213_v36 = vld [vmem:[%s8010_s1 + $0x5d0] sm:$0xff] }
  0x8a   :  { %3673 = vmatpush1.bf16.msra.mxu0 %v5442_v44  ;;  %3832 = vmatpush1.bf16.msra.mxu1 %v5444_v45  ;;  %v117_v44 = vld [vmem:[%s8010_s1 + $0x2d0] sm:$0xff]  ;;  %v110_v45 = vld [vmem:[%s8010_s1 + $0x298] sm:$0xff] }
  0x8b   :  { %3674 = vmatprep.subr.bf16.mxu0 %v5459_v46  ;;  %3833 = vmatprep.subr.bf16.mxu1 %v5461_v47  ;;  %v118_v46 = vld [vmem:[%s8010_s1 + $0x2d8] sm:$0xff]  ;;  %v4982_v47 = vcombine.low %v93_v33, %v101_v34  ;;  %v4999_v49 = vcombine.high %v109_v43, %v117_v44  ;;  %v5079_v33 = vcombine.high %v189_v25, %v197_v26 }
  0x8c   :  { %v5001_v52 = vcombine.high %v110_v45, %v118_v46 }
  0x8d   :  { %3660 = vmatmul.mubr.bf16.gmra.mrb[4].mxu0 %v6240_v51  ;;  %3819 = vmatmul.mubr.bf16.gmra.mrb[4].mxu1 %v6240_v51 }
  0x8e   :  { %3675 = vmatpush1.bf16.msra.mxu0 %v5458_v54  ;;  %3834 = vmatpush1.bf16.msra.mxu1 %v5460_v55  ;;  %v133_v54 = vld [vmem:[%s8010_s1 + $0x350] sm:$0xff]  ;;  %v134_v55 = vld [vmem:[%s8010_s1 + $0x358] sm:$0xff] }
  0x8f   :  { %3676 = vmatprep.subr.bf16.mxu0 %v5475_v56  ;;  %3835 = vmatprep.subr.bf16.mxu1 %v5477_v58  ;;  %v4998_v56 = vcombine.low %v109_v43, %v117_v44  ;;  %v5000_v58 = vcombine.low %v110_v45, %v118_v46  ;;  %v5015_v59 = vcombine.high %v125_v53, %v133_v54  ;;  %v221_v45 = vld [vmem:[%s8010_s1 + $0x610] sm:$0xff] }
  0x90   :  { %3702 = vmatprep.mubr.bf16.mxu0 %v5727_v50  ;;  %3861 = vmatprep.mubr.bf16.mxu1 %v5727_v50  ;;  %v5095_v43 = vcombine.high %v205_v35, %v213_v36  ;;  %v229_v46 = vld [vmem:[%s8010_s1 + $0x650] sm:$0xff] }
  0x92   :  { %3677 = vmatpush1.bf16.msra.mxu0 %v5474_v63  ;;  %3836 = vmatpush1.bf16.msra.mxu1 %v5476_v0  ;;  %v142_v63 = vld [vmem:[%s8010_s1 + $0x398] sm:$0xff] }
  0x93   :  { %3882 = vmatprep.subr.bf16.mxu0 %v4919_v1  ;;  %4041 = vmatprep.subr.bf16.mxu1 %v4921_v2  ;;  %v150_v0 = vld [vmem:[%s8010_s1 + $0x3d8] sm:$0xff]  ;;  %v5014_v1 = vcombine.low %v125_v53, %v133_v54  ;;  %v5111_v53 = vcombine.high %v221_v45, %v229_v46 }
  0x94   :  { %v5033_v4 = vcombine.high %v142_v63, %v150_v0 }
  0x95   :  { %5490 = vmatmul.mubr.msk.bf16.vlgmr.msra.gmra.mrb[0].mxu0 %vm3557_vm0, %v6273_v5  ;;  %5492 = vmatmul.mubr.msk.bf16.vlgmr.msra.gmra.mrb[0].mxu1 %vm3557_vm0, %v6273_v5 }
  0x96   :  { %3883 = vmatpush1.bf16.msra.mxu0 %v4918_v8  ;;  %4042 = vmatpush1.bf16.msra.mxu1 %v4920_v9  ;;  %v158_v8 = vld [vmem:[%s8010_s1 + $0x418] sm:$0xff] }
  0x97   :  { %3884 = vmatprep.subr.bf16.mxu0 %v4935_v10  ;;  %4043 = vmatprep.subr.bf16.mxu1 %v4937_v11  ;;  %v166_v9 = vld [vmem:[%s8010_s1 + $0x458] sm:$0xff]  ;;  %v5030_v10 = vcombine.low %v141_v61, %v149_v62  ;;  %v5032_v11 = vcombine.low %v142_v63, %v150_v0  ;;  %v253_v63 = vld [vmem:[%s8010_s1 + $0x710] sm:$0xff] }
  0x98   :  { %3712 = vmatprep.mubr.bf16.mxu0 %v5727_v50  ;;  %3871 = vmatprep.mubr.bf16.mxu1 %v5727_v50  ;;  %v5049_v14 = vcombine.high %v158_v8, %v166_v9  ;;  %v261_v0 = vld [vmem:[%s8010_s1 + $0x750] sm:$0xff] }
  0x9a   :  { %3885 = vmatpush1.bf16.msra.mxu0 %v4934_v17  ;;  %4044 = vmatpush1.bf16.msra.mxu1 %v4936_v18  ;;  %v174_v17 = vld [vmem:[%s8010_s1 + $0x498] sm:$0xff] }
  0x9b   :  { %3886 = vmatprep.subr.bf16.mxu0 %v4951_v19  ;;  %4045 = vmatprep.subr.bf16.mxu1 %v4953_v20  ;;  %v182_v18 = vld [vmem:[%s8010_s1 + $0x4d8] sm:$0xff]  ;;  %v5046_v19 = vcombine.low %v157_v6, %v165_v7  ;;  %v5048_v20 = vcombine.low %v158_v8, %v166_v9  ;;  %v5143_v6 = vcombine.high %v253_v63, %v261_v0  ;;  %v269_v8 = vld [vmem:[%s8010_s1 + $0x790] sm:$0xff] }
  0x9c   :  { %v5065_v23 = vcombine.high %v174_v17, %v182_v18  ;;  %v277_v9 = vld [vmem:[%s8010_s1 + $0x7d0] sm:$0xff] }
  0x9d   :  { %5491 = vmatmul.mubr.msk.bf16.gmra.mrb[4].mxu0 %vm3557_vm0, %v6308_v24  ;;  %5493 = vmatmul.mubr.msk.bf16.gmra.mrb[4].mxu1 %vm3557_vm0, %v6308_v24 }
  0x9e   :  { %3887 = vmatpush1.bf16.msra.mxu0 %v4950_v27  ;;  %4046 = vmatpush1.bf16.msra.mxu1 %v4952_v28  ;;  %v190_v27 = vld [vmem:[%s8010_s1 + $0x518] sm:$0xff] }
  0x9f   :  { %3888 = vmatprep.subr.bf16.mxu0 %v4967_v29  ;;  %4047 = vmatprep.subr.bf16.mxu1 %v4969_v31  ;;  %v198_v28 = vld [vmem:[%s8010_s1 + $0x558] sm:$0xff]  ;;  %v5062_v29 = vcombine.low %v173_v15, %v181_v16  ;;  %v5064_v31 = vcombine.low %v174_v17, %v182_v18  ;;  %v5159_v15 = vcombine.high %v269_v8, %v277_v9  ;;  %v285_v17 = vld [vmem:[%s8010_s1 + $0x810] sm:$0xff] }
  0xa0   :  { %3914 = vmatprep.mubr.bf16.mxu0 %v5843_v57  ;;  %4073 = vmatprep.mubr.bf16.mxu1 %v5843_v57  ;;  %v126_v57 = vld [vmem:[%s8010_s1 + $0x318] sm:$0xff]  ;;  %v5081_v34 = vcombine.high %v190_v27, %v198_v28  ;;  %v293_v18 = vld [vmem:[%s8010_s1 + $0x850] sm:$0xff] }
  0xa1   :  { %v5017_v60 = vcombine.high %v126_v57, %v134_v55  ;;  %v5016_v2 = vcombine.low %v126_v57, %v134_v55  ;;  %v237_v57 = vld [vmem:[%s8010_s1 + $0x690] sm:$0xff] }
  0xa2   :  { %3889 = vmatpush1.bf16.msra.mxu0 %v4966_v37  ;;  %4048 = vmatpush1.bf16.msra.mxu1 %v4968_v40  ;;  %v206_v37 = vld [vmem:[%s8010_s1 + $0x598] sm:$0xff]  ;;  %v245_v55 = vld [vmem:[%s8010_s1 + $0x6d0] sm:$0xff] }
  0xa3   :  { %3890 = vmatprep.subr.bf16.mxu0 %v4983_v41  ;;  %4049 = vmatprep.subr.bf16.mxu1 %v4985_v42  ;;  %v214_v40 = vld [vmem:[%s8010_s1 + $0x5d8] sm:$0xff]  ;;  %v5078_v41 = vcombine.low %v189_v25, %v197_v26  ;;  %v5080_v42 = vcombine.low %v190_v27, %v198_v28  ;;  %v5127_v61 = vcombine.high %v237_v57, %v245_v55  ;;  %v301_v27 = vld [vmem:[%s8010_s1 + $0x890] sm:$0xff] }
  0xa4   :  { %v5097_v44 = vcombine.high %v206_v37, %v214_v40  ;;  %v5175_v25 = vcombine.high %v285_v17, %v293_v18  ;;  %v309_v28 = vld [vmem:[%s8010_s1 + $0x8d0] sm:$0xff] }
  0xa6   :  { %3891 = vmatpush1.bf16.msra.mxu0 %v4982_v47  ;;  %4050 = vmatpush1.bf16.msra.mxu1 %v4984_v48  ;;  %v222_v47 = vld [vmem:[%s8010_s1 + $0x618] sm:$0xff] }
  0xa7   :  { %3892 = vmatprep.subr.bf16.mxu0 %v4999_v49  ;;  %4051 = vmatprep.subr.bf16.mxu1 %v5001_v52  ;;  %v230_v48 = vld [vmem:[%s8010_s1 + $0x658] sm:$0xff]  ;;  %v5094_v49 = vcombine.low %v205_v35, %v213_v36  ;;  %v5096_v52 = vcombine.low %v206_v37, %v214_v40  ;;  %v5191_v35 = vcombine.high %v301_v27, %v309_v28  ;;  %v317_v37 = vld [vmem:[%s8010_s1 + $0x910] sm:$0xff] }
  0xa8   :  { %v5113_v54 = vcombine.high %v222_v47, %v230_v48  ;;  %v325_v40 = vld [vmem:[%s8010_s1 + $0x950] sm:$0xff] }
  0xaa   :  { %3893 = vmatpush1.bf16.msra.mxu0 %v4998_v56  ;;  %4052 = vmatpush1.bf16.msra.mxu1 %v5000_v58  ;;  %v238_v56 = vld [vmem:[%s8010_s1 + $0x698] sm:$0xff] }
  0xab   :  { %3894 = vmatprep.subr.bf16.mxu0 %v5015_v59  ;;  %4053 = vmatprep.subr.bf16.mxu1 %v5017_v60  ;;  %v246_v58 = vld [vmem:[%s8010_s1 + $0x6d8] sm:$0xff]  ;;  %v5110_v59 = vcombine.low %v221_v45, %v229_v46  ;;  %v5112_v60 = vcombine.low %v222_v47, %v230_v48  ;;  %v5207_v45 = vcombine.high %v317_v37, %v325_v40  ;;  %v333_v47 = vld [vmem:[%s8010_s1 + $0x990] sm:$0xff] }
  0xac   :  { %v5129_v62 = vcombine.high %v238_v56, %v246_v58  ;;  %v341_v48 = vld [vmem:[%s8010_s1 + $0x9d0] sm:$0xff] }
  0xae   :  { %3895 = vmatpush1.bf16.msra.mxu0 %v5014_v1  ;;  %4054 = vmatpush1.bf16.msra.mxu1 %v5016_v2  ;;  %v254_v1 = vld [vmem:[%s8010_s1 + $0x718] sm:$0xff] }
  0xaf   :  { %3896 = vmatprep.subr.bf16.mxu0 %v5031_v3  ;;  %4055 = vmatprep.subr.bf16.mxu1 %v5033_v4  ;;  %v262_v2 = vld [vmem:[%s8010_s1 + $0x758] sm:$0xff]  ;;  %v5126_v3 = vcombine.low %v237_v57, %v245_v55  ;;  %v5128_v4 = vcombine.low %v238_v56, %v246_v58  ;;  %v349_v55 = vld [vmem:[%s8010_s1 + $0xa10] sm:$0xff] }
  0xb0   :  { %v5145_v7 = vcombine.high %v254_v1, %v262_v2  ;;  %v357_v56 = vld [vmem:[%s8010_s1 + $0xa50] sm:$0xff]  ;;  %v358_v58 = vld [vmem:[%s8010_s1 + $0xa58] sm:$0xff] }
  0xb2   :  { %3897 = vmatpush1.bf16.msra.mxu0 %v5030_v10  ;;  %4056 = vmatpush1.bf16.msra.mxu1 %v5032_v11  ;;  %v270_v10 = vld [vmem:[%s8010_s1 + $0x798] sm:$0xff] }
  0xb3   :  { %3898 = vmatprep.subr.bf16.mxu0 %v5047_v13  ;;  %4057 = vmatprep.subr.bf16.mxu1 %v5049_v14  ;;  %v278_v11 = vld [vmem:[%s8010_s1 + $0x7d8] sm:$0xff]  ;;  %v5142_v13 = vcombine.low %v253_v63, %v261_v0  ;;  %v5144_v14 = vcombine.low %v254_v1, %v262_v2  ;;  %v365_v63 = vld [vmem:[%s8010_s1 + $0xa90] sm:$0xff]  ;;  %v5238_v2 = vcombine.low %v349_v55, %v357_v56 }
  0xb4   :  { %v5161_v16 = vcombine.high %v270_v10, %v278_v11  ;;  %v373_v0 = vld [vmem:[%s8010_s1 + $0xad0] sm:$0xff]  ;;  %v374_v1 = vld [vmem:[%s8010_s1 + $0xad8] sm:$0xff] }
  0xb6   :  { %3899 = vmatpush1.bf16.msra.mxu0 %v5046_v19  ;;  %4058 = vmatpush1.bf16.msra.mxu1 %v5048_v20  ;;  %v286_v19 = vld [vmem:[%s8010_s1 + $0x818] sm:$0xff] }
  0xb7   :  { %3900 = vmatprep.subr.bf16.mxu0 %v5063_v22  ;;  %4059 = vmatprep.subr.bf16.mxu1 %v5065_v23  ;;  %v294_v20 = vld [vmem:[%s8010_s1 + $0x858] sm:$0xff]  ;;  %v5158_v22 = vcombine.low %v269_v8, %v277_v9  ;;  %v5160_v23 = vcombine.low %v270_v10, %v278_v11  ;;  %v389_v8 = vld [vmem:[%s8010_s1 + $0xb50] sm:$0xff]  ;;  %v5254_v10 = vcombine.low %v365_v63, %v373_v0 }
  0xb8   :  { %v5177_v26 = vcombine.high %v286_v19, %v294_v20  ;;  %v390_v9 = vld [vmem:[%s8010_s1 + $0xb58] sm:$0xff] }
  0xba   :  { %3901 = vmatpush1.bf16.msra.mxu0 %v5062_v29  ;;  %4060 = vmatpush1.bf16.msra.mxu1 %v5064_v31  ;;  %v302_v29 = vld [vmem:[%s8010_s1 + $0x898] sm:$0xff] }
  0xbb   :  { %3902 = vmatprep.subr.bf16.mxu0 %v5079_v33  ;;  %4061 = vmatprep.subr.bf16.mxu1 %v5081_v34  ;;  %v310_v31 = vld [vmem:[%s8010_s1 + $0x8d8] sm:$0xff]  ;;  %v5174_v33 = vcombine.low %v285_v17, %v293_v18  ;;  %v5176_v34 = vcombine.low %v286_v19, %v294_v20 }
  0xbc   :  { %v5193_v36 = vcombine.high %v302_v29, %v310_v31  ;;  %v398_v17 = vld [vmem:[%s8010_s1 + $0xb98] sm:$0xff] }
  0xbd   :  { %v406_v18 = vld [vmem:[%s8010_s1 + $0xbd8] sm:$0xff] }
  0xbe   :  { %3903 = vmatpush1.bf16.msra.mxu0 %v5078_v41  ;;  %4062 = vmatpush1.bf16.msra.mxu1 %v5080_v42  ;;  %v318_v41 = vld [vmem:[%s8010_s1 + $0x918] sm:$0xff] }
  0xbf   :  { %3904 = vmatprep.subr.bf16.mxu0 %v5095_v43  ;;  %4063 = vmatprep.subr.bf16.mxu1 %v5097_v44  ;;  %v326_v42 = vld [vmem:[%s8010_s1 + $0x958] sm:$0xff]  ;;  %v5190_v43 = vcombine.low %v301_v27, %v309_v28  ;;  %v5192_v44 = vcombine.low %v302_v29, %v310_v31  ;;  %v5288_v31 = vcombine.low %v398_v17, %v406_v18 }
  0xc0   :  { %v5209_v46 = vcombine.high %v318_v41, %v326_v42  ;;  %v414_v27 = vld [vmem:[%s8010_s1 + $0xc18] sm:$0xff] }
  0xc1   :  { %v422_v28 = vld [vmem:[%s8010_s1 + $0xc58] sm:$0xff] }
  0xc2   :  { %3905 = vmatpush1.bf16.msra.mxu0 %v5094_v49  ;;  %4064 = vmatpush1.bf16.msra.mxu1 %v5096_v52  ;;  %v342_v49 = vld [vmem:[%s8010_s1 + $0x9d8] sm:$0xff]  ;;  %v5206_v52 = vcombine.low %v317_v37, %v325_v40 }
  0xc3   :  { %3906 = vmatprep.subr.bf16.mxu0 %v5111_v53  ;;  %4065 = vmatprep.subr.bf16.mxu1 %v5113_v54  ;;  %v5208_v53 = vcombine.low %v318_v41, %v326_v42  ;;  %v5223_v54 = vcombine.high %v333_v47, %v341_v48  ;;  %v430_v37 = vld [vmem:[%s8010_s1 + $0xc98] sm:$0xff]  ;;  %v5304_v42 = vcombine.low %v414_v27, %v422_v28 }
  0xc4   :  { %v438_v40 = vld [vmem:[%s8010_s1 + $0xcd8] sm:$0xff] }
  0xc6   :  { %3907 = vmatpush1.bf16.msra.mxu0 %v5110_v59  ;;  %4066 = vmatpush1.bf16.msra.mxu1 %v5112_v60  ;;  %v5222_v59 = vcombine.low %v333_v47, %v341_v48  ;;  %v446_v47 = vld [vmem:[%s8010_s1 + $0xd18] sm:$0xff] }
  0xc7   :  { %3908 = vmatprep.subr.bf16.mxu0 %v5127_v61  ;;  %4067 = vmatprep.subr.bf16.mxu1 %v5129_v62  ;;  %v5239_v61 = vcombine.high %v349_v55, %v357_v56  ;;  %v454_v48 = vld [vmem:[%s8010_s1 + $0xd58] sm:$0xff] }
  0xc8   :  { %v462_v55 = vld [vmem:[%s8010_s1 + $0xd98] sm:$0xff] }
  0xc9   :  { %v470_v56 = vld [vmem:[%s8010_s1 + $0xdd8] sm:$0xff] }
  0xca   :  { %3909 = vmatpush1.bf16.msra.mxu0 %v5126_v3  ;;  %4068 = vmatpush1.bf16.msra.mxu1 %v5128_v4  ;;  %v5255_v4 = vcombine.high %v365_v63, %v373_v0  ;;  %v478_v63 = vld [vmem:[%s8010_s1 + $0xe18] sm:$0xff] }
  0xcb   :  { %3910 = vmatprep.subr.bf16.mxu0 %v5143_v6  ;;  %4069 = vmatprep.subr.bf16.mxu1 %v5145_v7  ;;  %v381_v7 = vld [vmem:[%s8010_s1 + $0xb10] sm:$0xff]  ;;  %v486_v0 = vld [vmem:[%s8010_s1 + $0xe58] sm:$0xff] }
  0xcc   :  { %v5270_v19 = vcombine.low %v381_v7, %v389_v8 }
  0xce   :  { %3911 = vmatpush1.bf16.msra.mxu0 %v5142_v13  ;;  %4070 = vmatpush1.bf16.msra.mxu1 %v5144_v14  ;;  %v5271_v13 = vcombine.high %v381_v7, %v389_v8  ;;  %v494_v7 = vld [vmem:[%s8010_s1 + $0xe98] sm:$0xff] }
  0xcf   :  { %3912 = vmatprep.subr.bf16.mxu0 %v5159_v15  ;;  %4071 = vmatprep.subr.bf16.mxu1 %v5161_v16  ;;  %v397_v15 = vld [vmem:[%s8010_s1 + $0xb90] sm:$0xff]  ;;  %v502_v8 = vld [vmem:[%s8010_s1 + $0xed8] sm:$0xff] }
  0xd0   :  { %v405_v16 = vld [vmem:[%s8010_s1 + $0xbd0] sm:$0xff] }
  0xd1   :  { %v5286_v29 = vcombine.low %v397_v15, %v405_v16 }
  0xd2   :  { %3913 = vmatpush1.bf16.msra.mxu0 %v5158_v22  ;;  %4072 = vmatpush1.bf16.msra.mxu1 %v5160_v23  ;;  %v5287_v22 = vcombine.high %v397_v15, %v405_v16  ;;  %v5289_v23 = vcombine.high %v398_v17, %v406_v18  ;;  %v510_v15 = vld [vmem:[%s8010_s1 + $0xf18] sm:$0xff]  ;;  %v5384_v18 = vcombine.low %v494_v7, %v502_v8 }
  0xd3   :  { %3935 = vmatprep.subr.bf16.mxu0 %v5175_v25  ;;  %4094 = vmatprep.subr.bf16.mxu1 %v5177_v26  ;;  %v413_v25 = vld [vmem:[%s8010_s1 + $0xc10] sm:$0xff]  ;;  %v518_v16 = vld [vmem:[%s8010_s1 + $0xf58] sm:$0xff] }
  0xd4   :  { %v421_v26 = vld [vmem:[%s8010_s1 + $0xc50] sm:$0xff] }
  0xd5   :  { %3915 = vmatmul.mubr.bf16.vlgmr.msra.gmra.mrb[8].mxu0 %v5970_v12  ;;  %4074 = vmatmul.mubr.bf16.vlgmr.msra.gmra.mrb[8].mxu1 %v5970_v12  ;;  %v334_v12 = vld [vmem:[%s8010_s1 + $0x998] sm:$0xff]  ;;  %v5302_v41 = vcombine.low %v413_v25, %v421_v26 }
  0xd6   :  { %3936 = vmatpush1.bf16.msra.mxu0 %v5174_v33  ;;  %4095 = vmatpush1.bf16.msra.mxu1 %v5176_v34  ;;  %v5225_v57 = vcombine.high %v334_v12, %v342_v49  ;;  %v5224_v60 = vcombine.low %v334_v12, %v342_v49  ;;  %v5303_v33 = vcombine.high %v413_v25, %v421_v26  ;;  %v526_v25 = vld [vmem:[%s8010_s1 + $0xf98] sm:$0xff] }
  0xd7   :  { %3937 = vmatprep.subr.bf16.mxu0 %v5191_v35  ;;  %4096 = vmatprep.subr.bf16.mxu1 %v5193_v36  ;;  %v5305_v34 = vcombine.high %v414_v27, %v422_v28  ;;  %v429_v35 = vld [vmem:[%s8010_s1 + $0xc90] sm:$0xff]  ;;  %v5320_v49 = vcombine.low %v430_v37, %v438_v40  ;;  %v534_v26 = vld [vmem:[%s8010_s1 + $0xfd8] sm:$0xff]  ;;  %v5400_v28 = vcombine.low %v510_v15, %v518_v16 }
  0xd8   :  { %3924 = vmatprep.mubr.bf16.mxu0 %v5987_v21  ;;  %4083 = vmatprep.mubr.bf16.mxu1 %v5987_v21  ;;  %v350_v21 = vld [vmem:[%s8010_s1 + $0xa18] sm:$0xff]  ;;  %v437_v36 = vld [vmem:[%s8010_s1 + $0xcd0] sm:$0xff] }
  0xd9   :  { %v5241_v62 = vcombine.high %v350_v21, %v358_v58  ;;  %v5240_v3 = vcombine.low %v350_v21, %v358_v58  ;;  %v5318_v12 = vcombine.low %v429_v35, %v437_v36  ;;  %v5336_v58 = vcombine.low %v446_v47, %v454_v48 }
  0xda   :  { %3938 = vmatpush1.bf16.msra.mxu0 %v5190_v43  ;;  %4097 = vmatpush1.bf16.msra.mxu1 %v5192_v44  ;;  %v5319_v43 = vcombine.high %v429_v35, %v437_v36  ;;  %v5321_v44 = vcombine.high %v430_v37, %v438_v40  ;;  %v542_v35 = vld [vmem:[%s8010_s1 + $0x1018] sm:$0xff]  ;;  %v5416_v40 = vcombine.low %v526_v25, %v534_v26 }
  0xdb   :  { %3939 = vmatprep.subr.bf16.mxu0 %v5207_v45  ;;  %4098 = vmatprep.subr.bf16.mxu1 %v5209_v46  ;;  %v445_v45 = vld [vmem:[%s8010_s1 + $0xd10] sm:$0xff]  ;;  %v550_v36 = vld [vmem:[%s8010_s1 + $0x1058] sm:$0xff] }
  0xdc   :  { %v453_v46 = vld [vmem:[%s8010_s1 + $0xd50] sm:$0xff] }
  0xdd   :  { %3925 = vmatmul.mubr.bf16.gmra.mrb[12].mxu0 %v6014_v32  ;;  %4084 = vmatmul.mubr.bf16.gmra.mrb[12].mxu1 %v6014_v32  ;;  %v366_v32 = vld [vmem:[%s8010_s1 + $0xa98] sm:$0xff]  ;;  %v5334_v21 = vcombine.low %v445_v45, %v453_v46 }
  0xde   :  { %3940 = vmatpush1.bf16.msra.mxu0 %v5206_v52  ;;  %4099 = vmatpush1.bf16.msra.mxu1 %v5208_v53  ;;  %v5257_v6 = vcombine.high %v366_v32, %v374_v1  ;;  %v5256_v11 = vcombine.low %v366_v32, %v374_v1  ;;  %v5335_v52 = vcombine.high %v445_v45, %v453_v46  ;;  %v558_v45 = vld [vmem:[%s8010_s1 + $0x1098] sm:$0xff] }
  0xdf   :  { %3941 = vmatprep.subr.bf16.mxu0 %v5223_v54  ;;  %4100 = vmatprep.subr.bf16.mxu1 %v5225_v57  ;;  %v5337_v53 = vcombine.high %v446_v47, %v454_v48  ;;  %v461_v54 = vld [vmem:[%s8010_s1 + $0xd90] sm:$0xff]  ;;  %v5352_v1 = vcombine.low %v462_v55, %v470_v56  ;;  %v566_v46 = vld [vmem:[%s8010_s1 + $0x10d8] sm:$0xff]  ;;  %v5432_v48 = vcombine.low %v542_v35, %v550_v36 }
  0xe0   :  { %3967 = vmatprep.mubr.bf16.mxu0 %v6025_v39  ;;  %4126 = vmatprep.mubr.bf16.mxu1 %v6025_v39  ;;  %v382_v39 = vld [vmem:[%s8010_s1 + $0xb18] sm:$0xff]  ;;  %v469_v57 = vld [vmem:[%s8010_s1 + $0xdd0] sm:$0xff] }
  0xe1   :  { %v5273_v14 = vcombine.high %v382_v39, %v390_v9  ;;  %v5272_v20 = vcombine.low %v382_v39, %v390_v9  ;;  %v5350_v32 = vcombine.low %v461_v54, %v469_v57  ;;  %v5368_v9 = vcombine.low %v478_v63, %v486_v0 }
  0xe2   :  { %3942 = vmatpush1.bf16.msra.mxu0 %v5222_v59  ;;  %4101 = vmatpush1.bf16.msra.mxu1 %v5224_v60  ;;  %v5351_v59 = vcombine.high %v461_v54, %v469_v57  ;;  %v5353_v60 = vcombine.high %v462_v55, %v470_v56  ;;  %v574_v54 = vld [vmem:[%s8010_s1 + $0x1118] sm:$0xff]  ;;  %v5448_v56 = vcombine.low %v558_v45, %v566_v46 }
  0xe3   :  { %3943 = vmatprep.subr.bf16.mxu0 %v5239_v61  ;;  %4102 = vmatprep.subr.bf16.mxu1 %v5241_v62  ;;  %v477_v61 = vld [vmem:[%s8010_s1 + $0xe10] sm:$0xff]  ;;  %v582_v57 = vld [vmem:[%s8010_s1 + $0x1158] sm:$0xff] }
  0xe4   :  { %v485_v62 = vld [vmem:[%s8010_s1 + $0xe50] sm:$0xff] }
  0xe5   :  { %v5366_v39 = vcombine.low %v477_v61, %v485_v62 }
  0xe6   :  { %3944 = vmatpush1.bf16.msra.mxu0 %v5238_v2  ;;  %4103 = vmatpush1.bf16.msra.mxu1 %v5240_v3  ;;  %v5367_v2 = vcombine.high %v477_v61, %v485_v62  ;;  %v5369_v3 = vcombine.high %v478_v63, %v486_v0  ;;  %v598_v61 = vld [vmem:[%s8010_s1 + $0x11d8] sm:$0xff]  ;;  %v5464_v63 = vcombine.low %v574_v54, %v582_v57 }
  0xe7   :  { %3945 = vmatprep.subr.bf16.mxu0 %v5255_v4  ;;  %4104 = vmatprep.subr.bf16.mxu1 %v5257_v6  ;;  %v493_v4 = vld [vmem:[%s8010_s1 + $0xe90] sm:$0xff] }
  0xe8   :  { %v501_v6 = vld [vmem:[%s8010_s1 + $0xed0] sm:$0xff] }
  0xe9   :  { %v5382_v17 = vcombine.low %v493_v4, %v501_v6 }
  0xea   :  { %3946 = vmatpush1.bf16.msra.mxu0 %v5254_v10  ;;  %4105 = vmatpush1.bf16.msra.mxu1 %v5256_v11  ;;  %v5383_v10 = vcombine.high %v493_v4, %v501_v6  ;;  %v5385_v11 = vcombine.high %v494_v7, %v502_v8 }
  0xeb   :  { %3947 = vmatprep.subr.bf16.mxu0 %v5271_v13  ;;  %4106 = vmatprep.subr.bf16.mxu1 %v5273_v14  ;;  %v509_v13 = vld [vmem:[%s8010_s1 + $0xf10] sm:$0xff] }
  0xec   :  { %v517_v14 = vld [vmem:[%s8010_s1 + $0xf50] sm:$0xff] }
  0xed   :  { %v5398_v27 = vcombine.low %v509_v13, %v517_v14 }
  0xee   :  { %3948 = vmatpush1.bf16.msra.mxu0 %v5270_v19  ;;  %4107 = vmatpush1.bf16.msra.mxu1 %v5272_v20  ;;  %v5399_v19 = vcombine.high %v509_v13, %v517_v14  ;;  %v5401_v20 = vcombine.high %v510_v15, %v518_v16  ;;  %v63_v16 = vld [vmem:[%s8010_s1 + $0x120] sm:$0xff] }
  0xef   :  { %3949 = vmatprep.subr.bf16.mxu0 %v5287_v22  ;;  %4108 = vmatprep.subr.bf16.mxu1 %v5289_v23  ;;  %v525_v22 = vld [vmem:[%s8010_s1 + $0xf90] sm:$0xff] }
  0xf0   :  { %v533_v23 = vld [vmem:[%s8010_s1 + $0xfd0] sm:$0xff] }
  0xf1   :  { %v5414_v37 = vcombine.low %v525_v22, %v533_v23 }
  0xf2   :  { %3950 = vmatpush1.bf16.msra.mxu0 %v5286_v29  ;;  %4109 = vmatpush1.bf16.msra.mxu1 %v5288_v31  ;;  %v5415_v29 = vcombine.high %v525_v22, %v533_v23  ;;  %v5417_v31 = vcombine.high %v526_v25, %v534_v26  ;;  %v79_v26 = vld [vmem:[%s8010_s1 + $0x1a0] sm:$0xff] }
  0xf3   :  { %3951 = vmatprep.subr.bf16.mxu0 %v5303_v33  ;;  %4110 = vmatprep.subr.bf16.mxu1 %v5305_v34  ;;  %v541_v33 = vld [vmem:[%s8010_s1 + $0x1010] sm:$0xff] }
  0xf4   :  { %v549_v34 = vld [vmem:[%s8010_s1 + $0x1050] sm:$0xff] }
  0xf5   :  { %v5430_v47 = vcombine.low %v541_v33, %v549_v34 }
  0xf6   :  { %3952 = vmatpush1.bf16.msra.mxu0 %v5302_v41  ;;  %4111 = vmatpush1.bf16.msra.mxu1 %v5304_v42  ;;  %v5431_v41 = vcombine.high %v541_v33, %v549_v34  ;;  %v5433_v42 = vcombine.high %v542_v35, %v550_v36  ;;  %v95_v35 = vld [vmem:[%s8010_s1 + $0x220] sm:$0xff] }
  0xf7   :  { %3953 = vmatprep.subr.bf16.mxu0 %v5319_v43  ;;  %4112 = vmatprep.subr.bf16.mxu1 %v5321_v44  ;;  %v557_v43 = vld [vmem:[%s8010_s1 + $0x1090] sm:$0xff]  ;;  %v103_v36 = vld [vmem:[%s8010_s1 + $0x260] sm:$0xff] }
  0xf8   :  { %v565_v44 = vld [vmem:[%s8010_s1 + $0x10d0] sm:$0xff] }
  0xf9   :  { %v5446_v55 = vcombine.low %v557_v43, %v565_v44 }
  0xfa   :  { %3954 = vmatpush1.bf16.msra.mxu0 %v5318_v12  ;;  %4113 = vmatpush1.bf16.msra.mxu1 %v5320_v49  ;;  %v5447_v12 = vcombine.high %v557_v43, %v565_v44  ;;  %v5449_v49 = vcombine.high %v558_v45, %v566_v46  ;;  %v4987_v43 = vcombine.high %v95_v35, %v103_v36  ;;  %v111_v45 = vld [vmem:[%s8010_s1 + $0x2a0] sm:$0xff] }
  0xfb   :  { %3955 = vmatprep.subr.bf16.mxu0 %v5335_v52  ;;  %4114 = vmatprep.subr.bf16.mxu1 %v5337_v53  ;;  %v573_v52 = vld [vmem:[%s8010_s1 + $0x1110] sm:$0xff]  ;;  %v119_v46 = vld [vmem:[%s8010_s1 + $0x2e0] sm:$0xff] }
  0xfc   :  { %v581_v53 = vld [vmem:[%s8010_s1 + $0x1150] sm:$0xff] }
  0xfd   :  { %v5462_v62 = vcombine.low %v573_v52, %v581_v53 }
  0xfe   :  { %3956 = vmatpush1.bf16.msra.mxu0 %v5334_v21  ;;  %4115 = vmatpush1.bf16.msra.mxu1 %v5336_v58  ;;  %v5463_v21 = vcombine.high %v573_v52, %v581_v53  ;;  %v5465_v58 = vcombine.high %v574_v54, %v582_v57  ;;  %v5003_v52 = vcombine.high %v111_v45, %v119_v46  ;;  %v127_v54 = vld [vmem:[%s8010_s1 + $0x320] sm:$0xff] }
  0xff   :  { %3957 = vmatprep.subr.bf16.mxu0 %v5351_v59  ;;  %4116 = vmatprep.subr.bf16.mxu1 %v5353_v60  ;;  %v589_v59 = vld [vmem:[%s8010_s1 + $0x1190] sm:$0xff]  ;;  %v135_v57 = vld [vmem:[%s8010_s1 + $0x360] sm:$0xff] }
 0x100   :  { %v597_v60 = vld [vmem:[%s8010_s1 + $0x11d0] sm:$0xff] }
 0x101   :  { %v5479_v0 = vcombine.high %v589_v59, %v597_v60  ;;  %v5478_v4 = vcombine.low %v589_v59, %v597_v60  ;;  %v5019_v59 = vcombine.high %v127_v54, %v135_v57 }
 0x102   :  { %3958 = vmatpush1.bf16.msra.mxu0 %v5350_v32  ;;  %4117 = vmatpush1.bf16.msra.mxu1 %v5352_v1  ;;  %v39_v1 = vld [vmem:[%s8010_s1 + $0x60] sm:$0xff] }
 0x103   :  { %3959 = vmatprep.subr.bf16.mxu0 %v5367_v2  ;;  %4118 = vmatprep.subr.bf16.mxu1 %v5369_v3  ;;  %v32_v2 = vld [vmem:[%s8010_s1 + $0x28] sm:$0xff] }
 0x104   :  { %v40_v3 = vld [vmem:[%s8010_s1 + $0x68] sm:$0xff] }
 0x105   :  { %v4925_v8 = vcombine.high %v32_v2, %v40_v3  ;;  %v4924_v13 = vcombine.low %v32_v2, %v40_v3  ;;  %v159_v2 = vld [vmem:[%s8010_s1 + $0x420] sm:$0xff] }
 0x106   :  { %3960 = vmatpush1.bf16.msra.mxu0 %v5366_v39  ;;  %4119 = vmatpush1.bf16.msra.mxu1 %v5368_v9  ;;  %v47_v39 = vld [vmem:[%s8010_s1 + $0xa0] sm:$0xff] }
 0x107   :  { %3961 = vmatprep.subr.bf16.mxu0 %v5383_v10  ;;  %4120 = vmatprep.subr.bf16.mxu1 %v5385_v11  ;;  %v55_v9 = vld [vmem:[%s8010_s1 + $0xe0] sm:$0xff]  ;;  %v56_v10 = vld [vmem:[%s8010_s1 + $0xe8] sm:$0xff] }
 0x108   :  { %v4939_v14 = vcombine.high %v47_v39, %v55_v9  ;;  %v167_v3 = vld [vmem:[%s8010_s1 + $0x460] sm:$0xff] }
 0x10a   :  { %3962 = vmatpush1.bf16.msra.mxu0 %v5382_v17  ;;  %4121 = vmatpush1.bf16.msra.mxu1 %v5384_v18  ;;  %v71_v17 = vld [vmem:[%s8010_s1 + $0x160] sm:$0xff]  ;;  %v64_v18 = vld [vmem:[%s8010_s1 + $0x128] sm:$0xff] }
 0x10b   :  { %3963 = vmatprep.subr.bf16.mxu0 %v5399_v19  ;;  %4122 = vmatprep.subr.bf16.mxu1 %v5401_v20  ;;  %v72_v19 = vld [vmem:[%s8010_s1 + $0x168] sm:$0xff]  ;;  %v4938_v20 = vcombine.low %v47_v39, %v55_v9  ;;  %v4955_v23 = vcombine.high %v63_v16, %v71_v17  ;;  %v5051_v39 = vcombine.high %v159_v2, %v167_v3 }
 0x10c   :  { %v4957_v25 = vcombine.high %v64_v18, %v72_v19 }
 0x10e   :  { %3964 = vmatpush1.bf16.msra.mxu0 %v5398_v27  ;;  %4123 = vmatpush1.bf16.msra.mxu1 %v5400_v28  ;;  %v87_v27 = vld [vmem:[%s8010_s1 + $0x1e0] sm:$0xff]  ;;  %v88_v28 = vld [vmem:[%s8010_s1 + $0x1e8] sm:$0xff] }
 0x10f   :  { %3965 = vmatprep.subr.bf16.mxu0 %v5415_v29  ;;  %4124 = vmatprep.subr.bf16.mxu1 %v5417_v31  ;;  %v4954_v29 = vcombine.low %v63_v16, %v71_v17  ;;  %v4956_v31 = vcombine.low %v64_v18, %v72_v19  ;;  %v4971_v33 = vcombine.high %v79_v26, %v87_v27  ;;  %v191_v18 = vld [vmem:[%s8010_s1 + $0x520] sm:$0xff] }
 0x110   :  { %v199_v19 = vld [vmem:[%s8010_s1 + $0x560] sm:$0xff] }
 0x112   :  { %3966 = vmatpush1.bf16.msra.mxu0 %v5414_v37  ;;  %4125 = vmatpush1.bf16.msra.mxu1 %v5416_v40  ;;  %v96_v37 = vld [vmem:[%s8010_s1 + $0x228] sm:$0xff] }
 0x113   :  { %3988 = vmatprep.subr.bf16.mxu0 %v5431_v41  ;;  %4147 = vmatprep.subr.bf16.mxu1 %v5433_v42  ;;  %v104_v40 = vld [vmem:[%s8010_s1 + $0x268] sm:$0xff]  ;;  %v4970_v41 = vcombine.low %v79_v26, %v87_v27  ;;  %v5083_v26 = vcombine.high %v191_v18, %v199_v19 }
 0x114   :  { %v4989_v44 = vcombine.high %v96_v37, %v104_v40 }
 0x115   :  { %3968 = vmatmul.mubr.bf16.vlgmr.msra.gmra.mrb[8].mxu0 %v6202_v30  ;;  %4127 = vmatmul.mubr.bf16.vlgmr.msra.gmra.mrb[8].mxu1 %v6202_v30  ;;  %v590_v30 = vld [vmem:[%s8010_s1 + $0x1198] sm:$0xff] }
 0x116   :  { %3989 = vmatpush1.bf16.msra.mxu0 %v5430_v47  ;;  %4148 = vmatpush1.bf16.msra.mxu1 %v5432_v48  ;;  %v5481_v32 = vcombine.high %v590_v30, %v598_v61  ;;  %v5480_v6 = vcombine.low %v590_v30, %v598_v61  ;;  %v112_v47 = vld [vmem:[%s8010_s1 + $0x2a8] sm:$0xff]  ;;  %v143_v30 = vld [vmem:[%s8010_s1 + $0x3a0] sm:$0xff] }
 0x117   :  { %3990 = vmatprep.subr.bf16.mxu0 %v5447_v12  ;;  %4149 = vmatprep.subr.bf16.mxu1 %v5449_v49  ;;  %v120_v48 = vld [vmem:[%s8010_s1 + $0x2e8] sm:$0xff]  ;;  %v4986_v12 = vcombine.low %v95_v35, %v103_v36  ;;  %v4988_v49 = vcombine.low %v96_v37, %v104_v40  ;;  %v151_v61 = vld [vmem:[%s8010_s1 + $0x3e0] sm:$0xff] }
 0x118   :  { %3977 = vmatprep.mubr.bf16.mxu0 %v6213_v38  ;;  %4136 = vmatprep.mubr.bf16.mxu1 %v6213_v38  ;;  %v31_v38 = vld [vmem:[%s8010_s1 + $0x20] sm:$0xff]  ;;  %v5005_v53 = vcombine.high %v112_v47, %v120_v48 }
 0x119   :  { %v4923_v7 = vcombine.high %v31_v38, %v39_v1  ;;  %v4922_v11 = vcombine.low %v31_v38, %v39_v1  ;;  %v5035_v38 = vcombine.high %v143_v30, %v151_v61  ;;  %v223_v37 = vld [vmem:[%s8010_s1 + $0x620] sm:$0xff] }
 0x11a   :  { %3991 = vmatpush1.bf16.msra.mxu0 %v5446_v55  ;;  %4150 = vmatpush1.bf16.msra.mxu1 %v5448_v56  ;;  %v128_v55 = vld [vmem:[%s8010_s1 + $0x328] sm:$0xff]  ;;  %v231_v40 = vld [vmem:[%s8010_s1 + $0x660] sm:$0xff] }
 0x11b   :  { %3992 = vmatprep.subr.bf16.mxu0 %v5463_v21  ;;  %4151 = vmatprep.subr.bf16.mxu1 %v5465_v58  ;;  %v136_v56 = vld [vmem:[%s8010_s1 + $0x368] sm:$0xff]  ;;  %v5002_v21 = vcombine.low %v111_v45, %v119_v46  ;;  %v5004_v58 = vcombine.low %v112_v47, %v120_v48  ;;  %v5115_v45 = vcombine.high %v223_v37, %v231_v40  ;;  %v239_v47 = vld [vmem:[%s8010_s1 + $0x6a0] sm:$0xff] }
 0x11c   :  { %v5021_v60 = vcombine.high %v128_v55, %v136_v56  ;;  %v247_v48 = vld [vmem:[%s8010_s1 + $0x6e0] sm:$0xff] }
 0x11d   :  { %3978 = vmatmul.mubr.bf16.gmra.mrb[12].mxu0 %v6240_v51  ;;  %4137 = vmatmul.mubr.bf16.gmra.mrb[12].mxu1 %v6240_v51  ;;  %v48_v51 = vld [vmem:[%s8010_s1 + $0xa8] sm:$0xff] }
 0x11e   :  { %3993 = vmatpush1.bf16.msra.mxu0 %v5462_v62  ;;  %4152 = vmatpush1.bf16.msra.mxu1 %v5464_v63  ;;  %v4941_v15 = vcombine.high %v48_v51, %v56_v10  ;;  %v4940_v22 = vcombine.low %v48_v51, %v56_v10  ;;  %v144_v62 = vld [vmem:[%s8010_s1 + $0x3a8] sm:$0xff]  ;;  %v175_v51 = vld [vmem:[%s8010_s1 + $0x4a0] sm:$0xff] }
 0x11f   :  { %3994 = vmatprep.subr.bf16.mxu0 %v5479_v0  ;;  %4153 = vmatprep.subr.bf16.mxu1 %v5481_v32  ;;  %v152_v63 = vld [vmem:[%s8010_s1 + $0x3e8] sm:$0xff]  ;;  %v5018_v0 = vcombine.low %v127_v54, %v135_v57  ;;  %v5020_v32 = vcombine.low %v128_v55, %v136_v56  ;;  %v183_v10 = vld [vmem:[%s8010_s1 + $0x4e0] sm:$0xff]  ;;  %v5131_v54 = vcombine.high %v239_v47, %v247_v48 }
 0x120   :  { %4020 = vmatprep.mubr.bf16.mxu0 %v5727_v50  ;;  %4179 = vmatprep.mubr.bf16.mxu1 %v5727_v50  ;;  %v5037_v1 = vcombine.high %v144_v62, %v152_v63  ;;  %v5067_v16 = vcombine.high %v175_v51, %v183_v10  ;;  %v255_v55 = vld [vmem:[%s8010_s1 + $0x720] sm:$0xff] }
 0x121   :  { %v263_v56 = vld [vmem:[%s8010_s1 + $0x760] sm:$0xff] }
 0x122   :  { %3995 = vmatpush1.bf16.msra.mxu0 %v5478_v4  ;;  %4154 = vmatpush1.bf16.msra.mxu1 %v5480_v6  ;;  %v160_v4 = vld [vmem:[%s8010_s1 + $0x428] sm:$0xff] }
 0x123   :  { %4200 = vmatprep.subr.bf16.mxu0 %v4923_v7  ;;  %4359 = vmatprep.subr.bf16.mxu1 %v4925_v8  ;;  %v168_v6 = vld [vmem:[%s8010_s1 + $0x468] sm:$0xff]  ;;  %v5034_v7 = vcombine.low %v143_v30, %v151_v61  ;;  %v5036_v8 = vcombine.low %v144_v62, %v152_v63  ;;  %v5147_v30 = vcombine.high %v255_v55, %v263_v56  ;;  %v271_v62 = vld [vmem:[%s8010_s1 + $0x7a0] sm:$0xff] }
 0x124   :  { %v5053_v9 = vcombine.high %v160_v4, %v168_v6  ;;  %v279_v63 = vld [vmem:[%s8010_s1 + $0x7e0] sm:$0xff] }
 0x125   :  { %5494 = vmatmul.mubr.msk.bf16.vlgmr.msra.gmra.mrb[8].mxu0 %vm3557_vm0, %v6273_v5  ;;  %5496 = vmatmul.mubr.msk.bf16.vlgmr.msra.gmra.mrb[8].mxu1 %vm3557_vm0, %v6273_v5  ;;  %v80_v5 = vld [vmem:[%s8010_s1 + $0x1a8] sm:$0xff] }
 0x126   :  { %4201 = vmatpush1.bf16.msra.mxu0 %v4922_v11  ;;  %4360 = vmatpush1.bf16.msra.mxu1 %v4924_v13  ;;  %v4973_v34 = vcombine.high %v80_v5, %v88_v28  ;;  %v4972_v42 = vcombine.low %v80_v5, %v88_v28  ;;  %v176_v11 = vld [vmem:[%s8010_s1 + $0x4a8] sm:$0xff]  ;;  %v207_v5 = vld [vmem:[%s8010_s1 + $0x5a0] sm:$0xff] }
 0x127   :  { %4202 = vmatprep.subr.bf16.mxu0 %v4939_v14  ;;  %4361 = vmatprep.subr.bf16.mxu1 %v4941_v15  ;;  %v184_v13 = vld [vmem:[%s8010_s1 + $0x4e8] sm:$0xff]  ;;  %v5050_v14 = vcombine.low %v159_v2, %v167_v3  ;;  %v5052_v15 = vcombine.low %v160_v4, %v168_v6  ;;  %v215_v28 = vld [vmem:[%s8010_s1 + $0x5e0] sm:$0xff]  ;;  %v5163_v2 = vcombine.high %v271_v62, %v279_v63 }
 0x128   :  { %4030 = vmatprep.mubr.bf16.mxu0 %v5727_v50  ;;  %4189 = vmatprep.mubr.bf16.mxu1 %v5727_v50  ;;  %v5069_v17 = vcombine.high %v176_v11, %v184_v13  ;;  %v5099_v35 = vcombine.high %v207_v5, %v215_v28  ;;  %v287_v4 = vld [vmem:[%s8010_s1 + $0x820] sm:$0xff] }
 0x129   :  { %v295_v6 = vld [vmem:[%s8010_s1 + $0x860] sm:$0xff] }
 0x12a   :  { %4203 = vmatpush1.bf16.msra.mxu0 %v4938_v20  ;;  %4362 = vmatpush1.bf16.msra.mxu1 %v4940_v22  ;;  %v192_v20 = vld [vmem:[%s8010_s1 + $0x528] sm:$0xff] }
 0x12b   :  { %4204 = vmatprep.subr.bf16.mxu0 %v4955_v23  ;;  %4363 = vmatprep.subr.bf16.mxu1 %v4957_v25  ;;  %v200_v22 = vld [vmem:[%s8010_s1 + $0x568] sm:$0xff]  ;;  %v5066_v23 = vcombine.low %v175_v51, %v183_v10  ;;  %v5068_v25 = vcombine.low %v176_v11, %v184_v13  ;;  %v5179_v51 = vcombine.high %v287_v4, %v295_v6  ;;  %v303_v11 = vld [vmem:[%s8010_s1 + $0x8a0] sm:$0xff] }
 0x12c   :  { %v5085_v27 = vcombine.high %v192_v20, %v200_v22  ;;  %v311_v13 = vld [vmem:[%s8010_s1 + $0x8e0] sm:$0xff] }
 0x12d   :  { %5495 = vmatmul.mubr.msk.bf16.gmra.mrb[12].mxu0 %vm3557_vm0, %v6308_v24  ;;  %5497 = vmatmul.mubr.msk.bf16.gmra.mrb[12].mxu1 %vm3557_vm0, %v6308_v24  ;;  %v6801_v24 = vld [vmem:[%s8011_s0 + $0x4] ss:$20 sps:$4 sm:$0xff]  }
 0x12e   :  { %4205 = vmatpush1.bf16.msra.mxu0 %v4954_v29  ;;  %4364 = vmatpush1.bf16.msra.mxu1 %v4956_v31  ;;  %v208_v29 = vld [vmem:[%s8010_s1 + $0x5a8] sm:$0xff] }
 0x12f   :  { %4206 = vmatprep.subr.bf16.mxu0 %v4971_v33  ;;  %4365 = vmatprep.subr.bf16.mxu1 %v4973_v34  ;;  %v216_v31 = vld [vmem:[%s8010_s1 + $0x5e8] sm:$0xff]  ;;  %v5082_v33 = vcombine.low %v191_v18, %v199_v19  ;;  %v5084_v34 = vcombine.low %v192_v20, %v200_v22  ;;  %v5195_v19 = vcombine.high %v303_v11, %v311_v13  ;;  %v319_v22 = vld [vmem:[%s8010_s1 + $0x920] sm:$0xff] }
 0x130   :  { %4232 = vmatprep.mubr.bf16.mxu0 %v6801_v24  ;;  %4391 = vmatprep.mubr.bf16.mxu1 %v6801_v24  ;;  %v5101_v36 = vcombine.high %v208_v29, %v216_v31 }
 0x132   :  { %4207 = vmatpush1.bf16.msra.mxu0 %v4970_v41  ;;  %4366 = vmatpush1.bf16.msra.mxu1 %v4972_v42  ;;  %v224_v41 = vld [vmem:[%s8010_s1 + $0x628] sm:$0xff] }
 0x133   :  { %4208 = vmatprep.subr.bf16.mxu0 %v4987_v43  ;;  %4367 = vmatprep.subr.bf16.mxu1 %v4989_v44  ;;  %v232_v42 = vld [vmem:[%s8010_s1 + $0x668] sm:$0xff]  ;;  %v5098_v43 = vcombine.low %v207_v5, %v215_v28  ;;  %v5100_v44 = vcombine.low %v208_v29, %v216_v31  ;;  %v5194_v5 = vcombine.low %v303_v11, %v311_v13 }
 0x134   :  { %v5117_v46 = vcombine.high %v224_v41, %v232_v42  ;;  %v368_v11 = vld [vmem:[%s8010_s1 + $0xaa8] sm:$0xff] }
 0x135   :  { %v376_v13 = vld [vmem:[%s8010_s1 + $0xae8] sm:$0xff] }
 0x136   :  { %4209 = vmatpush1.bf16.msra.mxu0 %v4986_v12  ;;  %4368 = vmatpush1.bf16.msra.mxu1 %v4988_v49  ;;  %v240_v12 = vld [vmem:[%s8010_s1 + $0x6a8] sm:$0xff] }
 0x137   :  { %4210 = vmatprep.subr.bf16.mxu0 %v5003_v52  ;;  %4369 = vmatprep.subr.bf16.mxu1 %v5005_v53  ;;  %v248_v49 = vld [vmem:[%s8010_s1 + $0x6e8] sm:$0xff]  ;;  %v5114_v52 = vcombine.low %v223_v37, %v231_v40  ;;  %v5116_v53 = vcombine.low %v224_v41, %v232_v42  ;;  %v6988_v37 = vld [vmem:[%s8010_s1 + $0x9e0] sm:$0xff] }
 0x138   :  { %v5133_v57 = vcombine.high %v240_v12, %v248_v49  ;;  %v6993_v40 = vld [vmem:[%s8011_s0 + $0x2c] ss:$20 sps:$4 sm:$0xff]  }
 0x13a   :  { %4211 = vmatpush1.bf16.msra.mxu0 %v5002_v21  ;;  %4370 = vmatpush1.bf16.msra.mxu1 %v5004_v58  ;;  %v256_v21 = vld [vmem:[%s8010_s1 + $0x728] sm:$0xff] }
 0x13b   :  { %4212 = vmatprep.subr.bf16.mxu0 %v5019_v59  ;;  %4371 = vmatprep.subr.bf16.mxu1 %v5021_v60  ;;  %v264_v58 = vld [vmem:[%s8010_s1 + $0x768] sm:$0xff]  ;;  %v5130_v59 = vcombine.low %v239_v47, %v247_v48  ;;  %v5132_v60 = vcombine.low %v240_v12, %v248_v49 }
 0x13c   :  { %v5149_v61 = vcombine.high %v256_v21, %v264_v58 }
 0x13e   :  { %4213 = vmatpush1.bf16.msra.mxu0 %v5018_v0  ;;  %4372 = vmatpush1.bf16.msra.mxu1 %v5020_v32  ;;  %v272_v0 = vld [vmem:[%s8010_s1 + $0x7a8] sm:$0xff] }
 0x13f   :  { %4214 = vmatprep.subr.bf16.mxu0 %v5035_v38  ;;  %4373 = vmatprep.subr.bf16.mxu1 %v5037_v1  ;;  %v280_v32 = vld [vmem:[%s8010_s1 + $0x7e8] sm:$0xff]  ;;  %v5146_v38 = vcombine.low %v255_v55, %v263_v56  ;;  %v5148_v1 = vcombine.low %v256_v21, %v264_v58 }
 0x140   :  { %v5165_v3 = vcombine.high %v272_v0, %v280_v32 }
 0x142   :  { %4215 = vmatpush1.bf16.msra.mxu0 %v5034_v7  ;;  %4374 = vmatpush1.bf16.msra.mxu1 %v5036_v8  ;;  %v288_v7 = vld [vmem:[%s8010_s1 + $0x828] sm:$0xff] }
 0x143   :  { %4216 = vmatprep.subr.bf16.mxu0 %v5051_v39  ;;  %4375 = vmatprep.subr.bf16.mxu1 %v5053_v9  ;;  %v296_v8 = vld [vmem:[%s8010_s1 + $0x868] sm:$0xff]  ;;  %v5162_v39 = vcombine.low %v271_v62, %v279_v63  ;;  %v5164_v9 = vcombine.low %v272_v0, %v280_v32 }
 0x144   :  { %v5181_v10 = vcombine.high %v288_v7, %v296_v8  ;;  %v5180_v18 = vcombine.low %v288_v7, %v296_v8  ;;  %v352_v63 = vld [vmem:[%s8010_s1 + $0xa28] sm:$0xff]  ;;  %v367_v7 = vld [vmem:[%s8010_s1 + $0xaa0] sm:$0xff] }
 0x145   :  { %v360_v0 = vld [vmem:[%s8010_s1 + $0xa68] sm:$0xff]  ;;  %v375_v8 = vld [vmem:[%s8010_s1 + $0xae0] sm:$0xff] }
 0x146   :  { %4217 = vmatpush1.bf16.msra.mxu0 %v5050_v14  ;;  %4376 = vmatpush1.bf16.msra.mxu1 %v5052_v15  ;;  %v6949_v14 = vpop.permute.xlu0 %609  ;;  %v304_v15 = vld [vmem:[%s8010_s1 + $0x8a8] sm:$0xff] }
 0x147   :  { %4218 = vmatprep.subr.bf16.mxu0 %v5067_v16  ;;  %4377 = vmatprep.subr.bf16.mxu1 %v5069_v17  ;;  %v312_v16 = vld [vmem:[%s8010_s1 + $0x8e8] sm:$0xff]  ;;  %v5178_v17 = vcombine.low %v287_v4, %v295_v6  ;;  %v5245_v6 = vcombine.high %v352_v63, %v360_v0 }
 0x148   :  { %v5197_v20 = vcombine.high %v304_v15, %v312_v16  ;;  %v5196_v28 = vcombine.low %v304_v15, %v312_v16  ;;  %v7053_v32 = vld [vmem:[%s8011_s0 + $0x28] ss:$20 sps:$4 sm:$0xff]  }
 0x14a   :  { %4219 = vmatpush1.bf16.msra.mxu0 %v5066_v23  ;;  %4378 = vmatpush1.bf16.msra.mxu1 %v5068_v25  ;;  %v327_v23 = vld [vmem:[%s8010_s1 + $0x960] sm:$0xff]  ;;  %v6976_v29 = vpop.permute.xlu0 %614 }
 0x14b   :  { %4220 = vmatprep.subr.bf16.mxu0 %v5083_v26  ;;  %4379 = vmatprep.subr.bf16.mxu1 %v5085_v27  ;;  %v6966_v25 = vld [vmem:[%s8011_s0] ss:$20 sps:$4 sm:$0xff]   ;;  %v320_v26 = vld [vmem:[%s8010_s1 + $0x928] sm:$0xff]  ;;  %v5211_v31 = vcombine.high %v319_v22, %v327_v23  ;;  %v5210_v49 = vcombine.low %v319_v22, %v327_v23 }
 0x14c   :  { %v328_v27 = vld [vmem:[%s8010_s1 + $0x968] sm:$0xff] }
 0x14e   :  { %4221 = vmatpush1.bf16.msra.mxu0 %v5082_v33  ;;  %4380 = vmatpush1.bf16.msra.mxu1 %v5084_v34  ;;  %v5213_v34 = vcombine.high %v320_v26, %v328_v27 }
 0x14f   :  { %4222 = vmatprep.subr.bf16.mxu0 %v5099_v35  ;;  %4381 = vmatprep.subr.bf16.mxu1 %v5101_v36  ;;  %v6978_v35 = vpop.permute.xlu1 %619  ;;  %v6983_v36 = vld [vmem:[%s8010_s1 + $0x9a0] sm:$0xff] }
 0x150   :  { %v5227_v56 = vcombine.high %v6983_v36, %v6988_v37 }
 0x152   :  { %4223 = vmatpush1.bf16.msra.mxu0 %v5098_v43  ;;  %4382 = vmatpush1.bf16.msra.mxu1 %v5100_v44  ;;  %v7000_v44 = vld [vmem:[%s8010_s1 + $0x9a8] sm:$0xff] }
 0x153   :  { %4224 = vmatprep.subr.bf16.mxu0 %v5115_v45  ;;  %4383 = vmatprep.subr.bf16.mxu1 %v5117_v46  ;;  %v7005_v45 = vld [vmem:[%s8010_s1 + $0x9e8] sm:$0xff]  ;;  %v7072_v4 = vpop.permute.xlu1 %624 }
 0x156   :  { %4225 = vmatpush1.bf16.msra.mxu0 %v5114_v52  ;;  %4384 = vmatpush1.bf16.msra.mxu1 %v5116_v53  ;;  %v5212_v52 = vcombine.low %v320_v26, %v328_v27 }
 0x157   :  { %4226 = vmatprep.subr.bf16.mxu0 %v5131_v54  ;;  %4385 = vmatprep.subr.bf16.mxu1 %v5133_v57 }
 0x15a   :  { %4227 = vmatpush1.bf16.msra.mxu0 %v5130_v59  ;;  %4386 = vmatpush1.bf16.msra.mxu1 %v5132_v60  ;;  %v5229_v60 = vcombine.high %v7000_v44, %v7005_v45 }
 0x15b   :  { %4228 = vmatprep.subr.bf16.mxu0 %v5147_v30  ;;  %4387 = vmatprep.subr.bf16.mxu1 %v5149_v61  ;;  %v7030_v30 = vld [vmem:[%s8010_s1 + $0xa20] sm:$0xff] }
 0x15c   :  { %v7035_v61 = vld [vmem:[%s8010_s1 + $0xa60] sm:$0xff] }
 0x15e   :  { %4229 = vmatpush1.bf16.msra.mxu0 %v5146_v38  ;;  %4388 = vmatpush1.bf16.msra.mxu1 %v5148_v1  ;;  %v5226_v38 = vcombine.low %v6983_v36, %v6988_v37  ;;  %v5228_v1 = vcombine.low %v7000_v44, %v7005_v45  ;;  %v383_v36 = vld [vmem:[%s8010_s1 + $0xb20] sm:$0xff]  ;;  %v5258_v44 = vcombine.low %v367_v7, %v375_v8 }
 0x15f   :  { %4230 = vmatprep.subr.bf16.mxu0 %v5163_v2  ;;  %4389 = vmatprep.subr.bf16.mxu1 %v5165_v3  ;;  %v5243_v2 = vcombine.high %v7030_v30, %v7035_v61  ;;  %v391_v37 = vld [vmem:[%s8010_s1 + $0xb60] sm:$0xff]  ;;  %v5260_v45 = vcombine.low %v368_v11, %v376_v13 }
 0x162   :  { %4231 = vmatpush1.bf16.msra.mxu0 %v5162_v39  ;;  %4390 = vmatpush1.bf16.msra.mxu1 %v5164_v9  ;;  %v7083_v39 = vld [vmem:[%s8011_s0 + $0xc] ss:$20 sps:$4 sm:$0xff]  }
 0x163   :  { %4253 = vmatprep.subr.bf16.mxu0 %v5179_v51  ;;  %4412 = vmatprep.subr.bf16.mxu1 %v5181_v10 }
 0x165   :  { %4233 = vmatmul.mubr.bf16.vlgmr.msra.gmra.mrb[16].mxu0 %v6966_v25  ;;  %4392 = vmatmul.mubr.bf16.vlgmr.msra.gmra.mrb[16].mxu1 %v6966_v25 }
 0x166   :  { %4254 = vmatpush1.bf16.msra.mxu0 %v5178_v17  ;;  %4413 = vmatpush1.bf16.msra.mxu1 %v5180_v18 }
 0x167   :  { %4255 = vmatprep.subr.bf16.mxu0 %v5195_v19  ;;  %4414 = vmatprep.subr.bf16.mxu1 %v5197_v20  ;;  %v5242_v19 = vcombine.low %v7030_v30, %v7035_v61  ;;  %v5244_v20 = vcombine.low %v352_v63, %v360_v0  ;;  %v431_v63 = vld [vmem:[%s8010_s1 + $0xca0] sm:$0xff] }
 0x168   :  { %v3704_v33 = vpop.f32.mrb[0].mxu0  ;;  %4242 = vmatprep.mubr.bf16.mxu0 %v6993_v40  ;;  %v3863_v42 = vpop.f32.mrb[0].mxu1  ;;  %4401 = vmatprep.mubr.bf16.mxu1 %v6993_v40  ;;  %v439_v0 = vld [vmem:[%s8010_s1 + $0xce0] sm:$0xff] }
 0x169   :  { %v5506_v41 = vadd.f32 %v3704_v33, %v6949_v14  ;;  %v3706_v43 = vpop.f32.mrb[1].mxu0  ;;  %v5514_v46 = vadd.f32 %v3863_v42, %v6949_v14  ;;  %v3865_v48 = vpop.f32.mrb[1].mxu1  ;;  %v384_v42 = vld [vmem:[%s8010_s1 + $0xb28] sm:$0xff] }
 0x16a   :  { %v5507_v47 = vadd.f32 %v3706_v43, %v6949_v14  ;;  %v3708_v12 = vpop.f32.mrb[2].mxu0  ;;  %4256 = vmatpush1.bf16.msra.mxu0 %v5194_v5  ;;  %v5515_v53 = vadd.f32 %v3865_v48, %v6949_v14  ;;  %v3867_v57 = vpop.f32.mrb[2].mxu1  ;;  %4415 = vmatpush1.bf16.msra.mxu1 %v5196_v28  ;;  %v5259_v5 = vcombine.high %v367_v7, %v375_v8  ;;  %v392_v43 = vld [vmem:[%s8010_s1 + $0xb68] sm:$0xff]  ;;  %v399_v48 = vld [vmem:[%s8010_s1 + $0xba0] sm:$0xff] }
 0x16b   :  { %4836 = vst [vmem:[%s8013_s3] sm:$0xff] %v5506_v41  ;;  %v5508_v54 = vadd.f32 %v3708_v12, %v6976_v29  ;;  %v3710_v55 = vpop.f32.mrb[3].mxu0  ;;  %4257 = vmatprep.subr.bf16.mxu0 %v5211_v31  ;;  %4838 = vst [vmem:[%s8013_s3 + $0x10] sm:$0xff] %v5514_v46  ;;  %v5516_v21 = vadd.f32 %v3867_v57, %v6976_v29  ;;  %v3869_v59 = vpop.f32.mrb[3].mxu1  ;;  %4416 = vmatprep.subr.bf16.mxu1 %v5213_v34  ;;  %v407_v12 = vld [vmem:[%s8010_s1 + $0xbe0] sm:$0xff] }
 0x16c   :  { %4837 = vst [vmem:[%s8013_s3 + $0x8] sm:$0xff] %v5507_v47  ;;  %v5509_v58 = vadd.f32 %v3710_v55, %v6976_v29  ;;  %4839 = vst [vmem:[%s8013_s3 + $0x18] sm:$0xff] %v5515_v53  ;;  %v5517_v62 = vadd.f32 %v3869_v59, %v6976_v29  ;;  %v5261_v34 = vcombine.high %v368_v11, %v376_v13  ;;  %v424_v59 = vld [vmem:[%s8010_s1 + $0xc68] sm:$0xff]  ;;  %v447_v8 = vld [vmem:[%s8010_s1 + $0xd20] sm:$0xff] }
 0x16d   :  { %4852 = vst [vmem:[%s8013_s3 + $0x80] sm:$0xff] %v5508_v54  ;;  %4243 = vmatmul.mubr.bf16.gmra.mrb[20].mxu0 %v7053_v32  ;;  %4854 = vst [vmem:[%s8013_s3 + $0x90] sm:$0xff] %v5516_v21  ;;  %4402 = vmatmul.mubr.bf16.gmra.mrb[20].mxu1 %v7053_v32  ;;  %v5275_v46 = vcombine.high %v383_v36, %v391_v37  ;;  %v5277_v47 = vcombine.high %v384_v42, %v392_v43  ;;  %v423_v21 = vld [vmem:[%s8010_s1 + $0xc60] sm:$0xff] }
 0x16e   :  { %4853 = vst [vmem:[%s8013_s3 + $0x88] sm:$0xff] %v5509_v58  ;;  %4258 = vmatpush1.bf16.msra.mxu0 %v5210_v49  ;;  %4855 = vst [vmem:[%s8013_s3 + $0x98] sm:$0xff] %v5517_v62  ;;  %4417 = vmatpush1.bf16.msra.mxu1 %v5212_v52  ;;  %v400_v49 = vld [vmem:[%s8010_s1 + $0xba8] sm:$0xff]  ;;  %v5274_v53 = vcombine.low %v383_v36, %v391_v37  ;;  %v5276_v54 = vcombine.low %v384_v42, %v392_v43  ;;  %v495_v42 = vld [vmem:[%s8010_s1 + $0xea0] sm:$0xff] }
 0x16f   :  { %4259 = vmatprep.subr.bf16.mxu0 %v5227_v56  ;;  %4418 = vmatprep.subr.bf16.mxu1 %v5229_v60  ;;  %v408_v52 = vld [vmem:[%s8010_s1 + $0xbe8] sm:$0xff]  ;;  %v5291_v57 = vcombine.high %v399_v48, %v407_v12  ;;  %v415_v56 = vld [vmem:[%s8010_s1 + $0xc20] sm:$0xff]  ;;  %v5290_v60 = vcombine.low %v399_v48, %v407_v12  ;;  %v5322_v11 = vcombine.low %v431_v63, %v439_v0 }
 0x170   :  { %v3714_v3 = vpop.f32.mrb[4].mxu0  ;;  %4285 = vmatprep.mubr.bf16.mxu0 %v7083_v39  ;;  %v3873_v51 = vpop.f32.mrb[4].mxu1  ;;  %4444 = vmatprep.mubr.bf16.mxu1 %v7083_v39  ;;  %v5293_v55 = vcombine.high %v400_v49, %v408_v52  ;;  %v416_v58 = vld [vmem:[%s8010_s1 + $0xc28] sm:$0xff]  ;;  %v5292_v30 = vcombine.low %v400_v49, %v408_v52  ;;  %v5307_v61 = vcombine.high %v415_v56, %v423_v21  ;;  %v503_v43 = vld [vmem:[%s8010_s1 + $0xee0] sm:$0xff] }
 0x171   :  { %v5510_v9 = vadd.f32 %v3714_v3, %v6978_v35  ;;  %v3716_v10 = vpop.f32.mrb[5].mxu0  ;;  %v5518_v15 = vadd.f32 %v3873_v51, %v6978_v35  ;;  %v3875_v17 = vpop.f32.mrb[5].mxu1  ;;  %v5309_v62 = vcombine.high %v416_v58, %v424_v59  ;;  %v5308_v3 = vcombine.low %v416_v58, %v424_v59  ;;  %v448_v51 = vld [vmem:[%s8010_s1 + $0xd28] sm:$0xff]  ;;  %v511_v49 = vld [vmem:[%s8010_s1 + $0xf20] sm:$0xff] }
 0x172   :  { %v5511_v16 = vadd.f32 %v3716_v10, %v6978_v35  ;;  %v3718_v18 = vpop.f32.mrb[6].mxu0  ;;  %4260 = vmatpush1.bf16.msra.mxu0 %v5226_v38  ;;  %v5519_v22 = vadd.f32 %v3875_v17, %v6978_v35  ;;  %v3877_v26 = vpop.f32.mrb[6].mxu1  ;;  %4419 = vmatpush1.bf16.msra.mxu1 %v5228_v1  ;;  %v432_v38 = vld [vmem:[%s8010_s1 + $0xca8] sm:$0xff]  ;;  %v463_v17 = vld [vmem:[%s8010_s1 + $0xda0] sm:$0xff]  ;;  %v5387_v48 = vcombine.high %v495_v42, %v503_v43 }
 0x173   :  { %4868 = vst [vmem:[%s8013_s3 + $0x100] sm:$0xff] %v5510_v9  ;;  %v5512_v23 = vadd.f32 %v3718_v18, %v7072_v4  ;;  %v3720_v27 = vpop.f32.mrb[7].mxu0  ;;  %4261 = vmatprep.subr.bf16.mxu0 %v5243_v2  ;;  %4870 = vst [vmem:[%s8013_s3 + $0x110] sm:$0xff] %v5518_v15  ;;  %v5520_v28 = vadd.f32 %v3877_v26, %v7072_v4  ;;  %v3879_v33 = vpop.f32.mrb[7].mxu1  ;;  %4420 = vmatprep.subr.bf16.mxu1 %v5245_v6  ;;  %v440_v1 = vld [vmem:[%s8010_s1 + $0xce8] sm:$0xff]  ;;  %v455_v9 = vld [vmem:[%s8010_s1 + $0xd60] sm:$0xff] }
 0x174   :  { %4869 = vst [vmem:[%s8013_s3 + $0x108] sm:$0xff] %v5511_v16  ;;  %v5513_v31 = vadd.f32 %v3720_v27, %v7072_v4  ;;  %4871 = vst [vmem:[%s8013_s3 + $0x118] sm:$0xff] %v5519_v22  ;;  %v5521_v41 = vadd.f32 %v3879_v33, %v7072_v4  ;;  %v5306_v2 = vcombine.low %v415_v56, %v423_v21  ;;  %v456_v10 = vld [vmem:[%s8010_s1 + $0xd68] sm:$0xff]  ;;  %v471_v18 = vld [vmem:[%s8010_s1 + $0xde0] sm:$0xff] }
 0x175   :  { %4884 = vst [vmem:[%s8013_s3 + $0x180] sm:$0xff] %v5512_v23  ;;  %4886 = vst [vmem:[%s8013_s3 + $0x190] sm:$0xff] %v5520_v28  ;;  %v5323_v6 = vcombine.high %v431_v63, %v439_v0  ;;  %v5325_v7 = vcombine.high %v432_v38, %v440_v1  ;;  %v5324_v13 = vcombine.low %v432_v38, %v440_v1  ;;  %v487_v28 = vld [vmem:[%s8010_s1 + $0xe60] sm:$0xff]  ;;  %v488_v33 = vld [vmem:[%s8010_s1 + $0xe68] sm:$0xff] }
 0x176   :  { %4885 = vst [vmem:[%s8013_s3 + $0x188] sm:$0xff] %v5513_v31  ;;  %4262 = vmatpush1.bf16.msra.mxu0 %v5242_v19  ;;  %4887 = vst [vmem:[%s8013_s3 + $0x198] sm:$0xff] %v5521_v41  ;;  %4421 = vmatpush1.bf16.msra.mxu1 %v5244_v20  ;;  %v5339_v15 = vcombine.high %v447_v8, %v455_v9  ;;  %v5341_v16 = vcombine.high %v448_v51, %v456_v10  ;;  %v464_v19 = vld [vmem:[%s8010_s1 + $0xda8] sm:$0xff]  ;;  %v519_v52 = vld [vmem:[%s8010_s1 + $0xf60] sm:$0xff] }
 0x177   :  { %4263 = vmatprep.subr.bf16.mxu0 %v5259_v5  ;;  %4422 = vmatprep.subr.bf16.mxu1 %v5261_v34  ;;  %v472_v20 = vld [vmem:[%s8010_s1 + $0xde8] sm:$0xff]  ;;  %v5338_v22 = vcombine.low %v447_v8, %v455_v9  ;;  %v5340_v23 = vcombine.low %v448_v51, %v456_v10  ;;  %v5355_v26 = vcombine.high %v463_v17, %v471_v18  ;;  %v479_v5 = vld [vmem:[%s8010_s1 + $0xe20] sm:$0xff] }
 0x178   :  { %v5357_v27 = vcombine.high %v464_v19, %v472_v20  ;;  %v480_v31 = vld [vmem:[%s8010_s1 + $0xe28] sm:$0xff]  ;;  %v5354_v34 = vcombine.low %v463_v17, %v471_v18  ;;  %v5356_v36 = vcombine.low %v464_v19, %v472_v20  ;;  %v5371_v37 = vcombine.high %v479_v5, %v487_v28  ;;  %v527_v58 = vld [vmem:[%s8010_s1 + $0xfa0] sm:$0xff] }
 0x179   :  { %v5373_v41 = vcombine.high %v480_v31, %v488_v33  ;;  %v5403_v56 = vcombine.high %v511_v49, %v519_v52  ;;  %v535_v59 = vld [vmem:[%s8010_s1 + $0xfe0] sm:$0xff] }
 0x17a   :  { %4264 = vmatpush1.bf16.msra.mxu0 %v5258_v44  ;;  %4423 = vmatpush1.bf16.msra.mxu1 %v5260_v45  ;;  %v496_v44 = vld [vmem:[%s8010_s1 + $0xea8] sm:$0xff]  ;;  %v5419_v63 = vcombine.high %v527_v58, %v535_v59  ;;  %v543_v38 = vld [vmem:[%s8010_s1 + $0x1020] sm:$0xff] }
 0x17b   :  { %4265 = vmatprep.subr.bf16.mxu0 %v5275_v46  ;;  %4424 = vmatprep.subr.bf16.mxu1 %v5277_v47  ;;  %v504_v45 = vld [vmem:[%s8010_s1 + $0xee8] sm:$0xff]  ;;  %v5370_v46 = vcombine.low %v479_v5, %v487_v28  ;;  %v5372_v47 = vcombine.low %v480_v31, %v488_v33  ;;  %v551_v1 = vld [vmem:[%s8010_s1 + $0x1060] sm:$0xff] }
 0x17c   :  { %v5389_v12 = vcombine.high %v496_v44, %v504_v45  ;;  %v5435_v8 = vcombine.high %v543_v38, %v551_v1  ;;  %v559_v51 = vld [vmem:[%s8010_s1 + $0x10a0] sm:$0xff]  ;;  %v7293_v31 = vld [vmem:[%s8011_s0 + $0x34] ss:$20 sps:$4 sm:$0xff]  }
 0x17d   :  { %v567_v10 = vld [vmem:[%s8010_s1 + $0x10e0] sm:$0xff] }
 0x17e   :  { %4266 = vmatpush1.bf16.msra.mxu0 %v5274_v53  ;;  %4425 = vmatpush1.bf16.msra.mxu1 %v5276_v54  ;;  %v512_v53 = vld [vmem:[%s8010_s1 + $0xf28] sm:$0xff]  ;;  %v5451_v17 = vcombine.high %v559_v51, %v567_v10  ;;  %v575_v19 = vld [vmem:[%s8010_s1 + $0x1120] sm:$0xff] }
 0x17f   :  { %4267 = vmatprep.subr.bf16.mxu0 %v5291_v57  ;;  %4426 = vmatprep.subr.bf16.mxu1 %v5293_v55  ;;  %v520_v54 = vld [vmem:[%s8010_s1 + $0xf68] sm:$0xff]  ;;  %v5386_v57 = vcombine.low %v495_v42, %v503_v43  ;;  %v5388_v55 = vcombine.low %v496_v44, %v504_v45  ;;  %v583_v20 = vld [vmem:[%s8010_s1 + $0x1160] sm:$0xff] }
 0x180   :  { %v5405_v21 = vcombine.high %v512_v53, %v520_v54  ;;  %v5467_v28 = vcombine.high %v575_v19, %v583_v20  ;;  %v5466_v42 = vcombine.low %v575_v19, %v583_v20  ;;  %v7386_v19 = vld [vmem:[%s8011_s0 + $0x38] ss:$20 sps:$4 sm:$0xff]  }
 0x181   :  { %v98_v20 = vld [vmem:[%s8010_s1 + $0x238] sm:$0xff] }
 0x182   :  { %4268 = vmatpush1.bf16.msra.mxu0 %v5290_v60  ;;  %4427 = vmatpush1.bf16.msra.mxu1 %v5292_v30  ;;  %v528_v60 = vld [vmem:[%s8010_s1 + $0xfa8] sm:$0xff] }
 0x183   :  { %4269 = vmatprep.subr.bf16.mxu0 %v5307_v61  ;;  %4428 = vmatprep.subr.bf16.mxu1 %v5309_v62  ;;  %v536_v30 = vld [vmem:[%s8010_s1 + $0xfe8] sm:$0xff]  ;;  %v5402_v61 = vcombine.low %v511_v49, %v519_v52  ;;  %v5404_v62 = vcombine.low %v512_v53, %v520_v54  ;;  %v42_v49 = vld [vmem:[%s8010_s1 + $0x78] sm:$0xff] }
 0x184   :  { %v5421_v0 = vcombine.high %v528_v60, %v536_v30 }
 0x186   :  { %4270 = vmatpush1.bf16.msra.mxu0 %v5306_v2  ;;  %4429 = vmatpush1.bf16.msra.mxu1 %v5308_v3  ;;  %v544_v2 = vld [vmem:[%s8010_s1 + $0x1028] sm:$0xff] }
 0x187   :  { %4271 = vmatprep.subr.bf16.mxu0 %v5323_v6  ;;  %4430 = vmatprep.subr.bf16.mxu1 %v5325_v7  ;;  %v552_v3 = vld [vmem:[%s8010_s1 + $0x1068] sm:$0xff]  ;;  %v5418_v6 = vcombine.low %v527_v58, %v535_v59  ;;  %v5420_v7 = vcombine.low %v528_v60, %v536_v30  ;;  %v58_v58 = vld [vmem:[%s8010_s1 + $0xf8] sm:$0xff] }
 0x188   :  { %v5437_v9 = vcombine.high %v544_v2, %v552_v3 }
 0x18a   :  { %4272 = vmatpush1.bf16.msra.mxu0 %v5322_v11  ;;  %4431 = vmatpush1.bf16.msra.mxu1 %v5324_v13  ;;  %v560_v11 = vld [vmem:[%s8010_s1 + $0x10a8] sm:$0xff] }
 0x18b   :  { %4273 = vmatprep.subr.bf16.mxu0 %v5339_v15  ;;  %4432 = vmatprep.subr.bf16.mxu1 %v5341_v16  ;;  %v568_v13 = vld [vmem:[%s8010_s1 + $0x10e8] sm:$0xff]  ;;  %v5434_v15 = vcombine.low %v543_v38, %v551_v1  ;;  %v5436_v16 = vcombine.low %v544_v2, %v552_v3  ;;  %v66_v38 = vld [vmem:[%s8010_s1 + $0x138] sm:$0xff] }
 0x18c   :  { %v5453_v18 = vcombine.high %v560_v11, %v568_v13  ;;  %v5452_v5 = vcombine.low %v560_v11, %v568_v13  ;;  %v74_v1 = vld [vmem:[%s8010_s1 + $0x178] sm:$0xff] }
 0x18d   :  { %v4960_v13 = vcombine.low %v66_v38, %v74_v1 }
 0x18e   :  { %4274 = vmatpush1.bf16.msra.mxu0 %v5338_v22  ;;  %4433 = vmatpush1.bf16.msra.mxu1 %v5340_v23  ;;  %v7280_v22 = vld [vmem:[%s8011_s0 + $0x8] ss:$20 sps:$4 sm:$0xff]  }
 0x18f   :  { %4275 = vmatprep.subr.bf16.mxu0 %v5355_v26  ;;  %4434 = vmatprep.subr.bf16.mxu1 %v5357_v27  ;;  %v576_v23 = vld [vmem:[%s8010_s1 + $0x1128] sm:$0xff]  ;;  %v5450_v27 = vcombine.low %v559_v51, %v567_v10  ;;  %v82_v51 = vld [vmem:[%s8010_s1 + $0x1b8] sm:$0xff] }
 0x190   :  { %v584_v26 = vld [vmem:[%s8010_s1 + $0x1168] sm:$0xff]  ;;  %v90_v10 = vld [vmem:[%s8010_s1 + $0x1f8] sm:$0xff] }
 0x191   :  { %v5469_v33 = vcombine.high %v576_v23, %v584_v26  ;;  %v5468_v43 = vcombine.low %v576_v23, %v584_v26  ;;  %v106_v23 = vld [vmem:[%s8010_s1 + $0x278] sm:$0xff] }
 0x192   :  { %4276 = vmatpush1.bf16.msra.mxu0 %v5354_v34  ;;  %4435 = vmatpush1.bf16.msra.mxu1 %v5356_v36  ;;  %v591_v34 = vld [vmem:[%s8010_s1 + $0x11a0] sm:$0xff] }
 0x193   :  { %4277 = vmatprep.subr.bf16.mxu0 %v5371_v37  ;;  %4436 = vmatprep.subr.bf16.mxu1 %v5373_v41  ;;  %v599_v36 = vld [vmem:[%s8010_s1 + $0x11e0] sm:$0xff]  ;;  %v592_v37 = vld [vmem:[%s8010_s1 + $0x11a8] sm:$0xff] }
 0x194   :  { %v600_v41 = vld [vmem:[%s8010_s1 + $0x11e8] sm:$0xff]  ;;  %v5483_v44 = vcombine.high %v591_v34, %v599_v36  ;;  %v5482_v52 = vcombine.low %v591_v34, %v599_v36  ;;  %v121_v34 = vld [vmem:[%s8010_s1 + $0x2f0] sm:$0xff]  ;;  %v114_v36 = vld [vmem:[%s8010_s1 + $0x2b8] sm:$0xff] }
 0x195   :  { %v5485_v45 = vcombine.high %v592_v37, %v600_v41  ;;  %v5484_v53 = vcombine.low %v592_v37, %v600_v41  ;;  %v122_v37 = vld [vmem:[%s8010_s1 + $0x2f8] sm:$0xff] }
 0x196   :  { %4278 = vmatpush1.bf16.msra.mxu0 %v5370_v46  ;;  %4437 = vmatpush1.bf16.msra.mxu1 %v5372_v47  ;;  %v33_v46 = vld [vmem:[%s8010_s1 + $0x30] sm:$0xff]  ;;  %v5725_v41 = vld [vmem:[%s8011_s0 + $0x4] ss:$20 sps:$4 sm:$0xff]  }
 0x197   :  { %4279 = vmatprep.subr.bf16.mxu0 %v5387_v48  ;;  %4438 = vmatprep.subr.bf16.mxu1 %v5389_v12  ;;  %v41_v47 = vld [vmem:[%s8010_s1 + $0x70] sm:$0xff]  ;;  %v34_v12 = vld [vmem:[%s8010_s1 + $0x38] sm:$0xff] }
 0x198   :  { %v7318_v48 = vld [vmem:[%s8011_s0 + $0x30] ss:$20 sps:$4 sm:$0xff]   ;;  %v4927_v54 = vcombine.high %v33_v46, %v41_v47  ;;  %v4926_v59 = vcombine.low %v33_v46, %v41_v47  ;;  %v4928_v60 = vcombine.low %v34_v12, %v42_v49  ;;  %v130_v47 = vld [vmem:[%s8010_s1 + $0x338] sm:$0xff] }
 0x199   :  { %v137_v46 = vld [vmem:[%s8010_s1 + $0x370] sm:$0xff] }
 0x19a   :  { %4280 = vmatpush1.bf16.msra.mxu0 %v5386_v57  ;;  %4439 = vmatpush1.bf16.msra.mxu1 %v5388_v55  ;;  %v4929_v57 = vcombine.high %v34_v12, %v42_v49  ;;  %v49_v55 = vld [vmem:[%s8010_s1 + $0xb0] sm:$0xff]  ;;  %v138_v12 = vld [vmem:[%s8010_s1 + $0x378] sm:$0xff] }
 0x19b   :  { %4281 = vmatprep.subr.bf16.mxu0 %v5403_v56  ;;  %4440 = vmatprep.subr.bf16.mxu1 %v5405_v21  ;;  %v57_v56 = vld [vmem:[%s8010_s1 + $0xf0] sm:$0xff]  ;;  %v50_v21 = vld [vmem:[%s8010_s1 + $0xb8] sm:$0xff] }
 0x19c   :  { %v4943_v30 = vcombine.high %v49_v55, %v57_v56  ;;  %v4942_v2 = vcombine.low %v49_v55, %v57_v56  ;;  %v4944_v3 = vcombine.low %v50_v21, %v58_v58  ;;  %v153_v55 = vld [vmem:[%s8010_s1 + $0x3f0] sm:$0xff]  ;;  %v146_v56 = vld [vmem:[%s8010_s1 + $0x3b8] sm:$0xff] }
 0x19e   :  { %4282 = vmatpush1.bf16.msra.mxu0 %v5402_v61  ;;  %4441 = vmatpush1.bf16.msra.mxu1 %v5404_v62  ;;  %v4945_v61 = vcombine.high %v50_v21, %v58_v58  ;;  %v65_v62 = vld [vmem:[%s8010_s1 + $0x130] sm:$0xff]  ;;  %v154_v21 = vld [vmem:[%s8010_s1 + $0x3f8] sm:$0xff] }
 0x19f   :  { %4283 = vmatprep.subr.bf16.mxu0 %v5419_v63  ;;  %4442 = vmatprep.subr.bf16.mxu1 %v5421_v0  ;;  %v73_v63 = vld [vmem:[%s8010_s1 + $0x170] sm:$0xff] }
 0x1a0   :  { %v7351_v0 = vld [vmem:[%s8011_s0 + $0x10] ss:$20 sps:$4 sm:$0xff]   ;;  %v4958_v11 = vcombine.low %v65_v62, %v73_v63 }
 0x1a2   :  { %4284 = vmatpush1.bf16.msra.mxu0 %v5418_v6  ;;  %4443 = vmatpush1.bf16.msra.mxu1 %v5420_v7  ;;  %v4959_v6 = vcombine.high %v65_v62, %v73_v63  ;;  %v4961_v7 = vcombine.high %v66_v38, %v74_v1  ;;  %v169_v62 = vld [vmem:[%s8010_s1 + $0x470] sm:$0xff]  ;;  %v162_v63 = vld [vmem:[%s8010_s1 + $0x438] sm:$0xff] }
 0x1a3   :  { %4306 = vmatprep.subr.bf16.mxu0 %v5435_v8  ;;  %4465 = vmatprep.subr.bf16.mxu1 %v5437_v9  ;;  %v81_v8 = vld [vmem:[%s8010_s1 + $0x1b0] sm:$0xff]  ;;  %v170_v38 = vld [vmem:[%s8010_s1 + $0x478] sm:$0xff] }
 0x1a4   :  { %v89_v9 = vld [vmem:[%s8010_s1 + $0x1f0] sm:$0xff] }
 0x1a5   :  { %4286 = vmatmul.mubr.bf16.vlgmr.msra.gmra.mrb[16].mxu0 %v7280_v22  ;;  %4445 = vmatmul.mubr.bf16.vlgmr.msra.gmra.mrb[16].mxu1 %v7280_v22  ;;  %v4974_v26 = vcombine.low %v81_v8, %v89_v9 }
 0x1a6   :  { %4307 = vmatpush1.bf16.msra.mxu0 %v5434_v15  ;;  %4466 = vmatpush1.bf16.msra.mxu1 %v5436_v16  ;;  %v4975_v15 = vcombine.high %v81_v8, %v89_v9  ;;  %v4977_v16 = vcombine.high %v82_v51, %v90_v10  ;;  %v185_v8 = vld [vmem:[%s8010_s1 + $0x4f0] sm:$0xff]  ;;  %v178_v9 = vld [vmem:[%s8010_s1 + $0x4b8] sm:$0xff] }
 0x1a7   :  { %4308 = vmatprep.subr.bf16.mxu0 %v5451_v17  ;;  %4467 = vmatprep.subr.bf16.mxu1 %v5453_v18  ;;  %v97_v17 = vld [vmem:[%s8010_s1 + $0x230] sm:$0xff] }
 0x1a8   :  { %4295 = vmatprep.mubr.bf16.mxu0 %v7293_v31  ;;  %4454 = vmatprep.mubr.bf16.mxu1 %v7293_v31  ;;  %v105_v18 = vld [vmem:[%s8010_s1 + $0x270] sm:$0xff] }
 0x1aa   :  { %4309 = vmatpush1.bf16.msra.mxu0 %v5450_v27  ;;  %4468 = vmatpush1.bf16.msra.mxu1 %v5452_v5  ;;  %v4976_v27 = vcombine.low %v82_v51, %v90_v10  ;;  %v4991_v5 = vcombine.high %v97_v17, %v105_v18  ;;  %v186_v51 = vld [vmem:[%s8010_s1 + $0x4f8] sm:$0xff] }
 0x1ab   :  { %4310 = vmatprep.subr.bf16.mxu0 %v5467_v28  ;;  %4469 = vmatprep.subr.bf16.mxu1 %v5469_v33  ;;  %v4993_v28 = vcombine.high %v98_v20, %v106_v23  ;;  %v113_v33 = vld [vmem:[%s8010_s1 + $0x2b0] sm:$0xff] }
 0x1ac   :  { %v5006_v49 = vcombine.low %v113_v33, %v121_v34 }
 0x1ad   :  { %4296 = vmatmul.mubr.bf16.gmra.mrb[20].mxu0 %v7318_v48  ;;  %4455 = vmatmul.mubr.bf16.gmra.mrb[20].mxu1 %v7318_v48 }
 0x1ae   :  { %4311 = vmatpush1.bf16.msra.mxu0 %v5466_v42  ;;  %4470 = vmatpush1.bf16.msra.mxu1 %v5468_v43  ;;  %v4990_v42 = vcombine.low %v97_v17, %v105_v18  ;;  %v4992_v43 = vcombine.low %v98_v20, %v106_v23  ;;  %v201_v17 = vld [vmem:[%s8010_s1 + $0x570] sm:$0xff]  ;;  %v194_v18 = vld [vmem:[%s8010_s1 + $0x538] sm:$0xff] }
 0x1af   :  { %4312 = vmatprep.subr.bf16.mxu0 %v5483_v44  ;;  %4471 = vmatprep.subr.bf16.mxu1 %v5485_v45  ;;  %v5007_v44 = vcombine.high %v113_v33, %v121_v34  ;;  %v129_v45 = vld [vmem:[%s8010_s1 + $0x330] sm:$0xff]  ;;  %v202_v20 = vld [vmem:[%s8010_s1 + $0x578] sm:$0xff] }
 0x1b0   :  { %4338 = vmatprep.mubr.bf16.mxu0 %v5727_v50  ;;  %4497 = vmatprep.mubr.bf16.mxu1 %v5727_v50  ;;  %v5022_v58 = vcombine.low %v129_v45, %v137_v46  ;;  %v217_v33 = vld [vmem:[%s8010_s1 + $0x5f0] sm:$0xff]  ;;  %v210_v34 = vld [vmem:[%s8010_s1 + $0x5b8] sm:$0xff] }
 0x1b2   :  { %4313 = vmatpush1.bf16.msra.mxu0 %v5482_v52  ;;  %4472 = vmatpush1.bf16.msra.mxu1 %v5484_v53  ;;  %v5008_v52 = vcombine.low %v114_v36, %v122_v37  ;;  %v5023_v53 = vcombine.high %v129_v45, %v137_v46  ;;  %v226_v45 = vld [vmem:[%s8010_s1 + $0x638] sm:$0xff] }
 0x1b3   :  { %4518 = vmatprep.subr.bf16.mxu0 %v4927_v54  ;;  %4677 = vmatprep.subr.bf16.mxu1 %v4929_v57  ;;  %v5025_v54 = vcombine.high %v130_v47, %v138_v12  ;;  %v145_v57 = vld [vmem:[%s8010_s1 + $0x3b0] sm:$0xff]  ;;  %v234_v46 = vld [vmem:[%s8010_s1 + $0x678] sm:$0xff] }
 0x1b4   :  { %v5038_v1 = vcombine.low %v145_v57, %v153_v55 }
 0x1b5   :  { %5498 = vmatmul.mubr.msk.bf16.vlgmr.msra.gmra.mrb[16].mxu0 %vm3557_vm0, %v7351_v0  ;;  %5500 = vmatmul.mubr.msk.bf16.vlgmr.msra.gmra.mrb[16].mxu1 %vm3557_vm0, %v7351_v0 }
 0x1b6   :  { %4519 = vmatpush1.bf16.msra.mxu0 %v4926_v59  ;;  %4678 = vmatpush1.bf16.msra.mxu1 %v4928_v60  ;;  %v5024_v59 = vcombine.low %v130_v47, %v138_v12  ;;  %v5039_v60 = vcombine.high %v145_v57, %v153_v55  ;;  %v242_v57 = vld [vmem:[%s8010_s1 + $0x6b8] sm:$0xff] }
 0x1b7   :  { %4520 = vmatprep.subr.bf16.mxu0 %v4943_v30  ;;  %4679 = vmatprep.subr.bf16.mxu1 %v4945_v61  ;;  %v5041_v30 = vcombine.high %v146_v56, %v154_v21  ;;  %v161_v61 = vld [vmem:[%s8010_s1 + $0x430] sm:$0xff]  ;;  %v250_v55 = vld [vmem:[%s8010_s1 + $0x6f8] sm:$0xff] }
 0x1b8   :  { %4348 = vmatprep.mubr.bf16.mxu0 %v5727_v50  ;;  %4507 = vmatprep.mubr.bf16.mxu1 %v5727_v50  ;;  %v5054_v10 = vcombine.low %v161_v61, %v169_v62 }
 0x1ba   :  { %4521 = vmatpush1.bf16.msra.mxu0 %v4942_v2  ;;  %4680 = vmatpush1.bf16.msra.mxu1 %v4944_v3  ;;  %v5040_v2 = vcombine.low %v146_v56, %v154_v21  ;;  %v5055_v3 = vcombine.high %v161_v61, %v169_v62  ;;  %v5120_v21 = vcombine.low %v226_v45, %v234_v46  ;;  %v258_v61 = vld [vmem:[%s8010_s1 + $0x738] sm:$0xff] }
 0x1bb   :  { %4522 = vmatprep.subr.bf16.mxu0 %v4959_v6  ;;  %4681 = vmatprep.subr.bf16.mxu1 %v4961_v7  ;;  %v5057_v6 = vcombine.high %v162_v63, %v170_v38  ;;  %v177_v7 = vld [vmem:[%s8010_s1 + $0x4b0] sm:$0xff]  ;;  %v266_v62 = vld [vmem:[%s8010_s1 + $0x778] sm:$0xff] }
 0x1bc   :  { %v5070_v23 = vcombine.low %v177_v7, %v185_v8 }
 0x1bd   :  { %5499 = vmatmul.mubr.msk.bf16.gmra.mrb[20].mxu0 %vm3557_vm0, %v7386_v19  ;;  %5501 = vmatmul.mubr.msk.bf16.gmra.mrb[20].mxu1 %vm3557_vm0, %v7386_v19 }
 0x1be   :  { %4523 = vmatpush1.bf16.msra.mxu0 %v4958_v11  ;;  %4682 = vmatpush1.bf16.msra.mxu1 %v4960_v13  ;;  %v5056_v11 = vcombine.low %v162_v63, %v170_v38  ;;  %v5071_v13 = vcombine.high %v177_v7, %v185_v8  ;;  %v5136_v38 = vcombine.low %v242_v57, %v250_v55  ;;  %v274_v7 = vld [vmem:[%s8010_s1 + $0x7b8] sm:$0xff] }
 0x1bf   :  { %4524 = vmatprep.subr.bf16.mxu0 %v4975_v15  ;;  %4683 = vmatprep.subr.bf16.mxu1 %v4977_v16  ;;  %v5073_v15 = vcombine.high %v178_v9, %v186_v51  ;;  %v193_v16 = vld [vmem:[%s8010_s1 + $0x530] sm:$0xff]  ;;  %v282_v8 = vld [vmem:[%s8010_s1 + $0x7f8] sm:$0xff] }
 0x1c0   :  { %4550 = vmatprep.mubr.bf16.mxu0 %v6801_v24  ;;  %4709 = vmatprep.mubr.bf16.mxu1 %v5725_v41  ;;  %v5009_v24 = vcombine.high %v114_v36, %v122_v37  ;;  %v218_v36 = vld [vmem:[%s8010_s1 + $0x5f8] sm:$0xff]  ;;  %v5086_v37 = vcombine.low %v193_v16, %v201_v17  ;;  %v5088_v41 = vcombine.low %v194_v18, %v202_v20 }
 0x1c1   :  { %v5104_v12 = vcombine.low %v210_v34, %v218_v36 }
 0x1c2   :  { %4525 = vmatpush1.bf16.msra.mxu0 %v4974_v26  ;;  %4684 = vmatpush1.bf16.msra.mxu1 %v4976_v27  ;;  %v5072_v26 = vcombine.low %v178_v9, %v186_v51  ;;  %v5087_v27 = vcombine.high %v193_v16, %v201_v17  ;;  %v5152_v51 = vcombine.low %v258_v61, %v266_v62  ;;  %v290_v16 = vld [vmem:[%s8010_s1 + $0x838] sm:$0xff] }
 0x1c3   :  { %4526 = vmatprep.subr.bf16.mxu0 %v4991_v5  ;;  %4685 = vmatprep.subr.bf16.mxu1 %v4993_v28  ;;  %v5089_v5 = vcombine.high %v194_v18, %v202_v20  ;;  %v209_v28 = vld [vmem:[%s8010_s1 + $0x5b0] sm:$0xff]  ;;  %v298_v17 = vld [vmem:[%s8010_s1 + $0x878] sm:$0xff]  ;;  %v5168_v20 = vcombine.low %v274_v7, %v282_v8 }
 0x1c4   :  { %v5102_v47 = vcombine.low %v209_v28, %v217_v33 }
 0x1c6   :  { %4527 = vmatpush1.bf16.msra.mxu0 %v4990_v42  ;;  %4686 = vmatpush1.bf16.msra.mxu1 %v4992_v43  ;;  %v5103_v42 = vcombine.high %v209_v28, %v217_v33  ;;  %v5105_v43 = vcombine.high %v210_v34, %v218_v36  ;;  %v306_v28 = vld [vmem:[%s8010_s1 + $0x8b8] sm:$0xff]  ;;  %v5184_v36 = vcombine.low %v290_v16, %v298_v17 }
 0x1c7   :  { %4528 = vmatprep.subr.bf16.mxu0 %v5007_v44  ;;  %4687 = vmatprep.subr.bf16.mxu1 %v5009_v24  ;;  %v225_v44 = vld [vmem:[%s8010_s1 + $0x630] sm:$0xff]  ;;  %v314_v33 = vld [vmem:[%s8010_s1 + $0x8f8] sm:$0xff] }
 0x1c8   :  { %v233_v24 = vld [vmem:[%s8010_s1 + $0x670] sm:$0xff] }
 0x1c9   :  { %v5118_v56 = vcombine.low %v225_v44, %v233_v24 }
 0x1ca   :  { %4529 = vmatpush1.bf16.msra.mxu0 %v5006_v49  ;;  %4688 = vmatpush1.bf16.msra.mxu1 %v5008_v52  ;;  %v5119_v49 = vcombine.high %v225_v44, %v233_v24  ;;  %v5121_v52 = vcombine.high %v226_v45, %v234_v46  ;;  %v322_v44 = vld [vmem:[%s8010_s1 + $0x938] sm:$0xff]  ;;  %v5726_v45 = vld [vmem:[%s8011_s0] ss:$20 sps:$4 sm:$0xff]  }
 0x1cb   :  { %4530 = vmatprep.subr.bf16.mxu0 %v5023_v53  ;;  %4689 = vmatprep.subr.bf16.mxu1 %v5025_v54  ;;  %v241_v53 = vld [vmem:[%s8010_s1 + $0x6b0] sm:$0xff]  ;;  %v330_v24 = vld [vmem:[%s8010_s1 + $0x978] sm:$0xff] }
 0x1cc   :  { %v249_v54 = vld [vmem:[%s8010_s1 + $0x6f0] sm:$0xff] }
 0x1cd   :  { %v5134_v63 = vcombine.low %v241_v53, %v249_v54 }
 0x1ce   :  { %4531 = vmatpush1.bf16.msra.mxu0 %v5022_v58  ;;  %4690 = vmatpush1.bf16.msra.mxu1 %v5024_v59  ;;  %v5135_v58 = vcombine.high %v241_v53, %v249_v54  ;;  %v5137_v59 = vcombine.high %v242_v57, %v250_v55  ;;  %v7582_v53 = vld [vmem:[%s8010_s1 + $0x9f0] sm:$0xff] }
 0x1cf   :  { %4532 = vmatprep.subr.bf16.mxu0 %v5039_v60  ;;  %4691 = vmatprep.subr.bf16.mxu1 %v5041_v30  ;;  %v257_v60 = vld [vmem:[%s8010_s1 + $0x730] sm:$0xff] }
 0x1d0   :  { %v265_v30 = vld [vmem:[%s8010_s1 + $0x770] sm:$0xff] }
 0x1d1   :  { %v5150_v9 = vcombine.low %v257_v60, %v265_v30 }
 0x1d2   :  { %4533 = vmatpush1.bf16.msra.mxu0 %v5038_v1  ;;  %4692 = vmatpush1.bf16.msra.mxu1 %v5040_v2  ;;  %v5151_v1 = vcombine.high %v257_v60, %v265_v30  ;;  %v5153_v2 = vcombine.high %v258_v61, %v266_v62  ;;  %v5216_v62 = vcombine.low %v322_v44, %v330_v24 }
 0x1d3   :  { %4534 = vmatprep.subr.bf16.mxu0 %v5055_v3  ;;  %4693 = vmatprep.subr.bf16.mxu1 %v5057_v6  ;;  %v273_v3 = vld [vmem:[%s8010_s1 + $0x7b0] sm:$0xff] }
 0x1d4   :  { %v281_v6 = vld [vmem:[%s8010_s1 + $0x7f0] sm:$0xff] }
 0x1d5   :  { %v5166_v18 = vcombine.low %v273_v3, %v281_v6 }
 0x1d6   :  { %4535 = vmatpush1.bf16.msra.mxu0 %v5054_v10  ;;  %4694 = vmatpush1.bf16.msra.mxu1 %v5056_v11  ;;  %v5167_v10 = vcombine.high %v273_v3, %v281_v6  ;;  %v5169_v11 = vcombine.high %v274_v7, %v282_v8 }
 0x1d7   :  { %4536 = vmatprep.subr.bf16.mxu0 %v5071_v13  ;;  %4695 = vmatprep.subr.bf16.mxu1 %v5073_v15  ;;  %v289_v13 = vld [vmem:[%s8010_s1 + $0x830] sm:$0xff] }
 0x1d8   :  { %v297_v15 = vld [vmem:[%s8010_s1 + $0x870] sm:$0xff] }
 0x1d9   :  { %v5182_v34 = vcombine.low %v289_v13, %v297_v15 }
 0x1da   :  { %4537 = vmatpush1.bf16.msra.mxu0 %v5070_v23  ;;  %4696 = vmatpush1.bf16.msra.mxu1 %v5072_v26  ;;  %v5183_v23 = vcombine.high %v289_v13, %v297_v15  ;;  %v5185_v26 = vcombine.high %v290_v16, %v298_v17  ;;  %v362_v13 = vld [vmem:[%s8010_s1 + $0xa78] sm:$0xff] }
 0x1db   :  { %4538 = vmatprep.subr.bf16.mxu0 %v5087_v27  ;;  %4697 = vmatprep.subr.bf16.mxu1 %v5089_v5  ;;  %v305_v27 = vld [vmem:[%s8010_s1 + $0x8b0] sm:$0xff] }
 0x1dc   :  { %v313_v5 = vld [vmem:[%s8010_s1 + $0x8f0] sm:$0xff] }
 0x1dd   :  { %v5198_v46 = vcombine.low %v305_v27, %v313_v5 }
 0x1de   :  { %4539 = vmatpush1.bf16.msra.mxu0 %v5086_v37  ;;  %4698 = vmatpush1.bf16.msra.mxu1 %v5088_v41  ;;  %v5199_v37 = vcombine.high %v305_v27, %v313_v5  ;;  %v5201_v41 = vcombine.high %v306_v28, %v314_v33 }
 0x1df   :  { %4540 = vmatprep.subr.bf16.mxu0 %v5103_v42  ;;  %4699 = vmatprep.subr.bf16.mxu1 %v5105_v43  ;;  %v321_v42 = vld [vmem:[%s8010_s1 + $0x930] sm:$0xff] }
 0x1e0   :  { %v329_v43 = vld [vmem:[%s8010_s1 + $0x970] sm:$0xff] }
 0x1e1   :  { %v5214_v61 = vcombine.low %v321_v42, %v329_v43 }
 0x1e2   :  { %4541 = vmatpush1.bf16.msra.mxu0 %v5102_v47  ;;  %4700 = vmatpush1.bf16.msra.mxu1 %v5104_v12  ;;  %v5200_v47 = vcombine.low %v306_v28, %v314_v33  ;;  %v5215_v12 = vcombine.high %v321_v42, %v329_v43  ;;  %v370_v28 = vld [vmem:[%s8010_s1 + $0xab8] sm:$0xff] }
 0x1e3   :  { %4542 = vmatprep.subr.bf16.mxu0 %v5119_v49  ;;  %4701 = vmatprep.subr.bf16.mxu1 %v5121_v52  ;;  %v5217_v49 = vcombine.high %v322_v44, %v330_v24  ;;  %v7577_v52 = vld [vmem:[%s8010_s1 + $0x9b0] sm:$0xff]  ;;  %v378_v33 = vld [vmem:[%s8010_s1 + $0xaf8] sm:$0xff] }
 0x1e4   :  { %v5230_v15 = vcombine.low %v7577_v52, %v7582_v53 }
 0x1e6   :  { %4543 = vmatpush1.bf16.msra.mxu0 %v5118_v56  ;;  %4702 = vmatpush1.bf16.msra.mxu1 %v5120_v21  ;;  %v7589_v56 = vld [vmem:[%s8010_s1 + $0x9b8] sm:$0xff] }
 0x1e7   :  { %4544 = vmatprep.subr.bf16.mxu0 %v5135_v58  ;;  %4703 = vmatprep.subr.bf16.mxu1 %v5137_v59  ;;  %v7594_v21 = vld [vmem:[%s8010_s1 + $0x9f8] sm:$0xff] }
 0x1e8   :  { %v5233_v8 = vcombine.high %v7589_v56, %v7594_v21  ;;  %v5232_v16 = vcombine.low %v7589_v56, %v7594_v21  ;;  %v5264_v21 = vcombine.low %v370_v28, %v378_v33 }
 0x1ea   :  { %4545 = vmatpush1.bf16.msra.mxu0 %v5134_v63  ;;  %4704 = vmatpush1.bf16.msra.mxu1 %v5136_v38 }
 0x1eb   :  { %4546 = vmatprep.subr.bf16.mxu0 %v5151_v1  ;;  %4705 = vmatprep.subr.bf16.mxu1 %v5153_v2  ;;  %v5231_v2 = vcombine.high %v7577_v52, %v7582_v53  ;;  %v385_v52 = vld [vmem:[%s8010_s1 + $0xb30] sm:$0xff] }
 0x1ec   :  { %v393_v53 = vld [vmem:[%s8010_s1 + $0xb70] sm:$0xff] }
 0x1ee   :  { %4547 = vmatpush1.bf16.msra.mxu0 %v5150_v9  ;;  %4706 = vmatpush1.bf16.msra.mxu1 %v5152_v51  ;;  %v353_v9 = vld [vmem:[%s8010_s1 + $0xa30] sm:$0xff] }
 0x1ef   :  { %4548 = vmatprep.subr.bf16.mxu0 %v5167_v10  ;;  %4707 = vmatprep.subr.bf16.mxu1 %v5169_v11  ;;  %v361_v51 = vld [vmem:[%s8010_s1 + $0xa70] sm:$0xff]  ;;  %v354_v11 = vld [vmem:[%s8010_s1 + $0xa38] sm:$0xff] }
 0x1f0   :  { %v5247_v17 = vcombine.high %v353_v9, %v361_v51  ;;  %v5246_v42 = vcombine.low %v353_v9, %v361_v51  ;;  %v5248_v43 = vcombine.low %v354_v11, %v362_v13 }
 0x1f2   :  { %4549 = vmatpush1.bf16.msra.mxu0 %v5166_v18  ;;  %4708 = vmatpush1.bf16.msra.mxu1 %v5168_v20  ;;  %v5249_v20 = vcombine.high %v354_v11, %v362_v13  ;;  %v433_v11 = vld [vmem:[%s8010_s1 + $0xcb0] sm:$0xff] }
 0x1f3   :  { %4571 = vmatprep.subr.bf16.mxu0 %v5183_v23  ;;  %4730 = vmatprep.subr.bf16.mxu1 %v5185_v26  ;;  %v369_v23 = vld [vmem:[%s8010_s1 + $0xab0] sm:$0xff] }
 0x1f4   :  { %v441_v13 = vld [vmem:[%s8010_s1 + $0xcf0] sm:$0xff] }
 0x1f5   :  { %4551 = vmatmul.mubr.bf16.vlgmr.msra.gmra.mrb[24].mxu0 %v6966_v25  ;;  %4710 = vmatmul.mubr.bf16.vlgmr.msra.gmra.mrb[24].mxu1 %v5726_v45 }
 0x1f6   :  { %4572 = vmatpush1.bf16.msra.mxu0 %v5182_v34  ;;  %4731 = vmatpush1.bf16.msra.mxu1 %v5184_v36 }
 0x1f7   :  { %4573 = vmatprep.subr.bf16.mxu0 %v5199_v37  ;;  %4732 = vmatprep.subr.bf16.mxu1 %v5201_v41 }
 0x1f8   :  { %v4022_v25 = vpop.f32.mrb[8].mxu0  ;;  %4560 = vmatprep.mubr.bf16.mxu0 %v6993_v40  ;;  %v4181_v57 = vpop.f32.mrb[8].mxu1  ;;  %4719 = vmatprep.mubr.bf16.mxu1 %v6993_v40 }
 0x1f9   :  { %v5522_v54 = vadd.f32 %v4022_v25, %v6949_v14  ;;  %v4024_v55 = vpop.f32.mrb[9].mxu0  ;;  %v5530_v58 = vadd.f32 %v4181_v57, %v6949_v14  ;;  %v4183_v60 = vpop.f32.mrb[9].mxu1  ;;  %v386_v57 = vld [vmem:[%s8010_s1 + $0xb38] sm:$0xff] }
 0x1fa   :  { %v5523_v59 = vadd.f32 %v4024_v55, %v6949_v14  ;;  %v4026_v30 = vpop.f32.mrb[10].mxu0  ;;  %4574 = vmatpush1.bf16.msra.mxu0 %v5198_v46  ;;  %v5531_v63 = vadd.f32 %v4183_v60, %v6949_v14  ;;  %v4185_v1 = vpop.f32.mrb[10].mxu1  ;;  %4733 = vmatpush1.bf16.msra.mxu1 %v5200_v47  ;;  %v394_v55 = vld [vmem:[%s8010_s1 + $0xb78] sm:$0xff]  ;;  %v401_v60 = vld [vmem:[%s8010_s1 + $0xbb0] sm:$0xff] }
 0x1fb   :  { %4840 = vst [vmem:[%s8013_s3 + $0x20] sm:$0xff] %v5522_v54  ;;  %v5524_v38 = vadd.f32 %v4026_v30, %v6976_v29  ;;  %v4028_v40 = vpop.f32.mrb[11].mxu0  ;;  %4575 = vmatprep.subr.bf16.mxu0 %v5215_v12  ;;  %4842 = vst [vmem:[%s8013_s3 + $0x30] sm:$0xff] %v5530_v58  ;;  %v5532_v3 = vadd.f32 %v4185_v1, %v6976_v29  ;;  %v4187_v7 = vpop.f32.mrb[11].mxu1  ;;  %4734 = vmatprep.subr.bf16.mxu1 %v5217_v49  ;;  %v409_v30 = vld [vmem:[%s8010_s1 + $0xbf0] sm:$0xff] }
 0x1fc   :  { %4841 = vst [vmem:[%s8013_s3 + $0x28] sm:$0xff] %v5523_v59  ;;  %v5525_v6 = vadd.f32 %v4028_v40, %v6976_v29  ;;  %4843 = vst [vmem:[%s8013_s3 + $0x38] sm:$0xff] %v5531_v63  ;;  %v5533_v10 = vadd.f32 %v4187_v7, %v6976_v29  ;;  %v5265_v49 = vcombine.high %v370_v28, %v378_v33  ;;  %v426_v7 = vld [vmem:[%s8010_s1 + $0xc78] sm:$0xff] }
 0x1fd   :  { %4856 = vst [vmem:[%s8013_s3 + $0xa0] sm:$0xff] %v5524_v38  ;;  %4561 = vmatmul.mubr.bf16.gmra.mrb[28].mxu0 %v7053_v32  ;;  %4858 = vst [vmem:[%s8013_s3 + $0xb0] sm:$0xff] %v5532_v3  ;;  %4720 = vmatmul.mubr.bf16.gmra.mrb[28].mxu1 %v7053_v32  ;;  %v377_v32 = vld [vmem:[%s8010_s1 + $0xaf0] sm:$0xff]  ;;  %v5279_v58 = vcombine.high %v385_v52, %v393_v53  ;;  %v5281_v59 = vcombine.high %v386_v57, %v394_v55 }
 0x1fe   :  { %4857 = vst [vmem:[%s8013_s3 + $0xa8] sm:$0xff] %v5525_v6  ;;  %4576 = vmatpush1.bf16.msra.mxu0 %v5214_v61  ;;  %4859 = vst [vmem:[%s8013_s3 + $0xb8] sm:$0xff] %v5533_v10  ;;  %4735 = vmatpush1.bf16.msra.mxu1 %v5216_v62  ;;  %v5263_v46 = vcombine.high %v369_v23, %v377_v32  ;;  %v5262_v56 = vcombine.low %v369_v23, %v377_v32  ;;  %v402_v61 = vld [vmem:[%s8010_s1 + $0xbb8] sm:$0xff]  ;;  %v425_v3 = vld [vmem:[%s8010_s1 + $0xc70] sm:$0xff] }
 0x1ff   :  { %4577 = vmatprep.subr.bf16.mxu0 %v5231_v2  ;;  %4736 = vmatprep.subr.bf16.mxu1 %v5233_v8  ;;  %v410_v62 = vld [vmem:[%s8010_s1 + $0xbf8] sm:$0xff]  ;;  %v5278_v63 = vcombine.low %v385_v52, %v393_v53  ;;  %v5280_v38 = vcombine.low %v386_v57, %v394_v55  ;;  %v5295_v1 = vcombine.high %v401_v60, %v409_v30  ;;  %v417_v2 = vld [vmem:[%s8010_s1 + $0xc30] sm:$0xff] }
 0x200   :  { %v4032_v18 = vpop.f32.mrb[12].mxu0  ;;  %4603 = vmatprep.mubr.bf16.mxu0 %v7083_v39  ;;  %v4191_v27 = vpop.f32.mrb[12].mxu1  ;;  %4762 = vmatprep.mubr.bf16.mxu1 %v7083_v39  ;;  %v5297_v40 = vcombine.high %v402_v61, %v410_v62  ;;  %v418_v6 = vld [vmem:[%s8010_s1 + $0xc38] sm:$0xff]  ;;  %v5294_v8 = vcombine.low %v401_v60, %v409_v30  ;;  %v5296_v9 = vcombine.low %v402_v61, %v410_v62  ;;  %v449_v32 = vld [vmem:[%s8010_s1 + $0xd30] sm:$0xff] }
 0x201   :  { %v5526_v26 = vadd.f32 %v4032_v18, %v6978_v35  ;;  %v4034_v5 = vpop.f32.mrb[13].mxu0  ;;  %v5534_v34 = vadd.f32 %v4191_v27, %v6978_v35  ;;  %v4193_v37 = vpop.f32.mrb[13].mxu1  ;;  %v5311_v51 = vcombine.high %v417_v2, %v425_v3  ;;  %v5313_v10 = vcombine.high %v418_v6, %v426_v7  ;;  %v450_v27 = vld [vmem:[%s8010_s1 + $0xd38] sm:$0xff]  ;;  %v497_v57 = vld [vmem:[%s8010_s1 + $0xeb0] sm:$0xff] }
 0x202   :  { %v5527_v36 = vadd.f32 %v4034_v5, %v6978_v35  ;;  %v4036_v41 = vpop.f32.mrb[14].mxu0  ;;  %4578 = vmatpush1.bf16.msra.mxu0 %v5230_v15  ;;  %v5535_v44 = vadd.f32 %v4193_v37, %v6978_v35  ;;  %v4195_v45 = vpop.f32.mrb[14].mxu1  ;;  %4737 = vmatpush1.bf16.msra.mxu1 %v5232_v16  ;;  %v434_v15 = vld [vmem:[%s8010_s1 + $0xcb8] sm:$0xff]  ;;  %v5312_v18 = vcombine.low %v418_v6, %v426_v7  ;;  %v465_v37 = vld [vmem:[%s8010_s1 + $0xdb0] sm:$0xff] }
 0x203   :  { %4872 = vst [vmem:[%s8013_s3 + $0x120] sm:$0xff] %v5526_v26  ;;  %v5528_v24 = vadd.f32 %v4036_v41, %v7072_v4  ;;  %v4038_v39 = vpop.f32.mrb[15].mxu0  ;;  %4579 = vmatprep.subr.bf16.mxu0 %v5247_v17  ;;  %4874 = vst [vmem:[%s8013_s3 + $0x130] sm:$0xff] %v5534_v34  ;;  %v5536_v47 = vadd.f32 %v4195_v45, %v7072_v4  ;;  %v4197_v25 = vpop.f32.mrb[15].mxu1  ;;  %4738 = vmatprep.subr.bf16.mxu1 %v5249_v20  ;;  %v442_v16 = vld [vmem:[%s8010_s1 + $0xcf8] sm:$0xff]  ;;  %v457_v26 = vld [vmem:[%s8010_s1 + $0xd70] sm:$0xff] }
 0x204   :  { %4873 = vst [vmem:[%s8013_s3 + $0x128] sm:$0xff] %v5527_v36  ;;  %v5529_v12 = vadd.f32 %v4038_v39, %v7072_v4  ;;  %4875 = vst [vmem:[%s8013_s3 + $0x138] sm:$0xff] %v5535_v44  ;;  %v5537_v54 = vadd.f32 %v4197_v25, %v7072_v4  ;;  %v5310_v17 = vcombine.low %v417_v2, %v425_v3  ;;  %v458_v5 = vld [vmem:[%s8010_s1 + $0xd78] sm:$0xff]  ;;  %v473_v41 = vld [vmem:[%s8010_s1 + $0xdf0] sm:$0xff] }
 0x205   :  { %4888 = vst [vmem:[%s8013_s3 + $0x1a0] sm:$0xff] %v5528_v24  ;;  %4890 = vst [vmem:[%s8013_s3 + $0x1b0] sm:$0xff] %v5536_v47  ;;  %v5327_v20 = vcombine.high %v433_v11, %v441_v13  ;;  %v5329_v23 = vcombine.high %v434_v15, %v442_v16  ;;  %v5326_v28 = vcombine.low %v433_v11, %v441_v13  ;;  %v489_v47 = vld [vmem:[%s8010_s1 + $0xe70] sm:$0xff]  ;;  %v490_v25 = vld [vmem:[%s8010_s1 + $0xe78] sm:$0xff] }
 0x206   :  { %4889 = vst [vmem:[%s8013_s3 + $0x1a8] sm:$0xff] %v5529_v12  ;;  %4580 = vmatpush1.bf16.msra.mxu0 %v5246_v42  ;;  %4891 = vst [vmem:[%s8013_s3 + $0x1b8] sm:$0xff] %v5537_v54  ;;  %4739 = vmatpush1.bf16.msra.mxu1 %v5248_v43  ;;  %v5328_v33 = vcombine.low %v434_v15, %v442_v16  ;;  %v5343_v34 = vcombine.high %v449_v32, %v457_v26  ;;  %v466_v42 = vld [vmem:[%s8010_s1 + $0xdb8] sm:$0xff]  ;;  %v505_v55 = vld [vmem:[%s8010_s1 + $0xef0] sm:$0xff] }
 0x207   :  { %4581 = vmatprep.subr.bf16.mxu0 %v5263_v46  ;;  %4740 = vmatprep.subr.bf16.mxu1 %v5265_v49  ;;  %v5345_v36 = vcombine.high %v450_v27, %v458_v5  ;;  %v474_v43 = vld [vmem:[%s8010_s1 + $0xdf8] sm:$0xff]  ;;  %v5342_v44 = vcombine.low %v449_v32, %v457_v26  ;;  %v5344_v24 = vcombine.low %v450_v27, %v458_v5  ;;  %v481_v46 = vld [vmem:[%s8010_s1 + $0xe30] sm:$0xff] }
 0x208   :  { %v5359_v45 = vcombine.high %v465_v37, %v473_v41  ;;  %v5361_v39 = vcombine.high %v466_v42, %v474_v43  ;;  %v482_v12 = vld [vmem:[%s8010_s1 + $0xe38] sm:$0xff]  ;;  %v5358_v49 = vcombine.low %v465_v37, %v473_v41  ;;  %v5360_v52 = vcombine.low %v466_v42, %v474_v43  ;;  %v513_v61 = vld [vmem:[%s8010_s1 + $0xf30] sm:$0xff] }
 0x209   :  { %v5375_v53 = vcombine.high %v481_v46, %v489_v47  ;;  %v5377_v54 = vcombine.high %v482_v12, %v490_v25  ;;  %v5391_v60 = vcombine.high %v497_v57, %v505_v55  ;;  %v521_v62 = vld [vmem:[%s8010_s1 + $0xf70] sm:$0xff] }
 0x20a   :  { %4582 = vmatpush1.bf16.msra.mxu0 %v5262_v56  ;;  %4741 = vmatpush1.bf16.msra.mxu1 %v5264_v21  ;;  %v498_v56 = vld [vmem:[%s8010_s1 + $0xeb8] sm:$0xff]  ;;  %v5407_v2 = vcombine.high %v513_v61, %v521_v62  ;;  %v529_v6 = vld [vmem:[%s8010_s1 + $0xfb0] sm:$0xff] }
 0x20b   :  { %4583 = vmatprep.subr.bf16.mxu0 %v5279_v58  ;;  %4742 = vmatprep.subr.bf16.mxu1 %v5281_v59  ;;  %v506_v21 = vld [vmem:[%s8010_s1 + $0xef8] sm:$0xff]  ;;  %v5374_v58 = vcombine.low %v481_v46, %v489_v47  ;;  %v5376_v59 = vcombine.low %v482_v12, %v490_v25  ;;  %v537_v7 = vld [vmem:[%s8010_s1 + $0xff0] sm:$0xff] }
 0x20c   :  { %v5393_v30 = vcombine.high %v498_v56, %v506_v21  ;;  %v5423_v11 = vcombine.high %v529_v6, %v537_v7  ;;  %v545_v15 = vld [vmem:[%s8010_s1 + $0x1030] sm:$0xff] }
 0x20d   :  { %v553_v16 = vld [vmem:[%s8010_s1 + $0x1070] sm:$0xff] }
 0x20e   :  { %4584 = vmatpush1.bf16.msra.mxu0 %v5278_v63  ;;  %4743 = vmatpush1.bf16.msra.mxu1 %v5280_v38  ;;  %v514_v63 = vld [vmem:[%s8010_s1 + $0xf38] sm:$0xff]  ;;  %v5439_v32 = vcombine.high %v545_v15, %v553_v16  ;;  %v561_v27 = vld [vmem:[%s8010_s1 + $0x10b0] sm:$0xff] }
 0x20f   :  { %4585 = vmatprep.subr.bf16.mxu0 %v5295_v1  ;;  %4744 = vmatprep.subr.bf16.mxu1 %v5297_v40  ;;  %v522_v38 = vld [vmem:[%s8010_s1 + $0xf78] sm:$0xff]  ;;  %v5390_v1 = vcombine.low %v497_v57, %v505_v55  ;;  %v5392_v40 = vcombine.low %v498_v56, %v506_v21  ;;  %v569_v5 = vld [vmem:[%s8010_s1 + $0x10f0] sm:$0xff] }
 0x210   :  { %v5409_v3 = vcombine.high %v514_v63, %v522_v38  ;;  %v5455_v37 = vcombine.high %v561_v27, %v569_v5  ;;  %v577_v42 = vld [vmem:[%s8010_s1 + $0x1130] sm:$0xff] }
 0x211   :  { %v585_v43 = vld [vmem:[%s8010_s1 + $0x1170] sm:$0xff] }
 0x212   :  { %4586 = vmatpush1.bf16.msra.mxu0 %v5294_v8  ;;  %4745 = vmatpush1.bf16.msra.mxu1 %v5296_v9  ;;  %v530_v8 = vld [vmem:[%s8010_s1 + $0xfb8] sm:$0xff]  ;;  %v5471_v46 = vcombine.high %v577_v42, %v585_v43  ;;  %v593_v12 = vld [vmem:[%s8010_s1 + $0x11b0] sm:$0xff] }
 0x213   :  { %4587 = vmatprep.subr.bf16.mxu0 %v5311_v51  ;;  %4746 = vmatprep.subr.bf16.mxu1 %v5313_v10  ;;  %v538_v9 = vld [vmem:[%s8010_s1 + $0xff8] sm:$0xff]  ;;  %v5406_v51 = vcombine.low %v513_v61, %v521_v62  ;;  %v5408_v10 = vcombine.low %v514_v63, %v522_v38  ;;  %v601_v25 = vld [vmem:[%s8010_s1 + $0x11f0] sm:$0xff] }
 0x214   :  { %v5425_v13 = vcombine.high %v530_v8, %v538_v9 }
 0x216   :  { %4588 = vmatpush1.bf16.msra.mxu0 %v5310_v17  ;;  %4747 = vmatpush1.bf16.msra.mxu1 %v5312_v18  ;;  %v546_v17 = vld [vmem:[%s8010_s1 + $0x1038] sm:$0xff] }
 0x217   :  { %4589 = vmatprep.subr.bf16.mxu0 %v5327_v20  ;;  %4748 = vmatprep.subr.bf16.mxu1 %v5329_v23  ;;  %v554_v18 = vld [vmem:[%s8010_s1 + $0x1078] sm:$0xff]  ;;  %v5422_v20 = vcombine.low %v529_v6, %v537_v7  ;;  %v5424_v23 = vcombine.low %v530_v8, %v538_v9 }
 0x218   :  { %v5441_v26 = vcombine.high %v546_v17, %v554_v18 }
 0x21a   :  { %4590 = vmatpush1.bf16.msra.mxu0 %v5326_v28  ;;  %4749 = vmatpush1.bf16.msra.mxu1 %v5328_v33  ;;  %v562_v28 = vld [vmem:[%s8010_s1 + $0x10b8] sm:$0xff] }
 0x21b   :  { %4591 = vmatprep.subr.bf16.mxu0 %v5343_v34  ;;  %4750 = vmatprep.subr.bf16.mxu1 %v5345_v36  ;;  %v570_v33 = vld [vmem:[%s8010_s1 + $0x10f8] sm:$0xff]  ;;  %v5438_v34 = vcombine.low %v545_v15, %v553_v16  ;;  %v5440_v36 = vcombine.low %v546_v17, %v554_v18 }
 0x21c   :  { %v5457_v41 = vcombine.high %v562_v28, %v570_v33 }
 0x21e   :  { %4592 = vmatpush1.bf16.msra.mxu0 %v5342_v44  ;;  %4751 = vmatpush1.bf16.msra.mxu1 %v5344_v24  ;;  %v578_v44 = vld [vmem:[%s8010_s1 + $0x1138] sm:$0xff] }
 0x21f   :  { %4593 = vmatprep.subr.bf16.mxu0 %v5359_v45  ;;  %4752 = vmatprep.subr.bf16.mxu1 %v5361_v39  ;;  %v586_v24 = vld [vmem:[%s8010_s1 + $0x1178] sm:$0xff]  ;;  %v5454_v45 = vcombine.low %v561_v27, %v569_v5  ;;  %v5456_v39 = vcombine.low %v562_v28, %v570_v33 }
 0x220   :  { %v5473_v47 = vcombine.high %v578_v44, %v586_v24 }
 0x222   :  { %4594 = vmatpush1.bf16.msra.mxu0 %v5358_v49  ;;  %4753 = vmatpush1.bf16.msra.mxu1 %v5360_v52  ;;  %v602_v49 = vld [vmem:[%s8010_s1 + $0x11f8] sm:$0xff]  ;;  %v5470_v52 = vcombine.low %v577_v42, %v585_v43 }
 0x223   :  { %4595 = vmatprep.subr.bf16.mxu0 %v5375_v53  ;;  %4754 = vmatprep.subr.bf16.mxu1 %v5377_v54  ;;  %v5472_v53 = vcombine.low %v578_v44, %v586_v24  ;;  %v5487_v54 = vcombine.high %v593_v12, %v601_v25 }
 0x226   :  { %4596 = vmatpush1.bf16.msra.mxu0 %v5374_v58  ;;  %4755 = vmatpush1.bf16.msra.mxu1 %v5376_v59 }
 0x227   :  { %4597 = vmatprep.subr.bf16.mxu0 %v5391_v60  ;;  %4756 = vmatprep.subr.bf16.mxu1 %v5393_v30 }
 0x22a   :  { %4598 = vmatpush1.bf16.msra.mxu0 %v5390_v1  ;;  %4757 = vmatpush1.bf16.msra.mxu1 %v5392_v40 }
 0x22b   :  { %4599 = vmatprep.subr.bf16.mxu0 %v5407_v2  ;;  %4758 = vmatprep.subr.bf16.mxu1 %v5409_v3 }
 0x22e   :  { %4600 = vmatpush1.bf16.msra.mxu0 %v5406_v51  ;;  %4759 = vmatpush1.bf16.msra.mxu1 %v5408_v10 }
 0x22f   :  { %4601 = vmatprep.subr.bf16.mxu0 %v5423_v11  ;;  %4760 = vmatprep.subr.bf16.mxu1 %v5425_v13 }
 0x232   :  { %4602 = vmatpush1.bf16.msra.mxu0 %v5422_v20  ;;  %4761 = vmatpush1.bf16.msra.mxu1 %v5424_v23 }
 0x233   :  { %4624 = vmatprep.subr.bf16.mxu0 %v5439_v32  ;;  %4783 = vmatprep.subr.bf16.mxu1 %v5441_v26 }
 0x235   :  { %4604 = vmatmul.mubr.bf16.vlgmr.msra.gmra.mrb[24].mxu0 %v7280_v22  ;;  %4763 = vmatmul.mubr.bf16.vlgmr.msra.gmra.mrb[24].mxu1 %v7280_v22  ;;  %v594_v22 = vld [vmem:[%s8010_s1 + $0x11b8] sm:$0xff] }
 0x236   :  { %4625 = vmatpush1.bf16.msra.mxu0 %v5438_v34  ;;  %4784 = vmatpush1.bf16.msra.mxu1 %v5440_v36  ;;  %v5489_v57 = vcombine.high %v594_v22, %v602_v49  ;;  %v5488_v55 = vcombine.low %v594_v22, %v602_v49 }
 0x237   :  { %4626 = vmatprep.subr.bf16.mxu0 %v5455_v37  ;;  %4785 = vmatprep.subr.bf16.mxu1 %v5457_v41 }
 0x238   :  { %4613 = vmatprep.mubr.bf16.mxu0 %v7293_v31  ;;  %4772 = vmatprep.mubr.bf16.mxu1 %v7293_v31  ;;  %v5486_v31 = vcombine.low %v593_v12, %v601_v25 }
 0x23a   :  { %4627 = vmatpush1.bf16.msra.mxu0 %v5454_v45  ;;  %4786 = vmatpush1.bf16.msra.mxu1 %v5456_v39 }
 0x23b   :  { %4628 = vmatprep.subr.bf16.mxu0 %v5471_v46  ;;  %4787 = vmatprep.subr.bf16.mxu1 %v5473_v47 }
 0x23d   :  { %4614 = vmatmul.mubr.bf16.gmra.mrb[28].mxu0 %v7318_v48  ;;  %4773 = vmatmul.mubr.bf16.gmra.mrb[28].mxu1 %v7318_v48 }
 0x23e   :  { %4629 = vmatpush1.bf16.msra.mxu0 %v5470_v52  ;;  %4788 = vmatpush1.bf16.msra.mxu1 %v5472_v53 }
 0x23f   :  { %4630 = vmatprep.subr.bf16.mxu0 %v5487_v54  ;;  %4789 = vmatprep.subr.bf16.mxu1 %v5489_v57 }
 0x240   :  { %4656 = vmatprep.mubr.bf16.mxu0 %v5727_v50  ;;  %4815 = vmatprep.mubr.bf16.mxu1 %v5727_v50 }
 0x242   :  { %4631 = vmatpush1.bf16.msra.mxu0 %v5486_v31  ;;  %4790 = vmatpush1.bf16.msra.mxu1 %v5488_v55 }
 0x245   :  { %5502 = vmatmul.mubr.msk.bf16.vlgmr.msra.gmra.mrb[24].mxu0 %vm3557_vm0, %v7351_v0  ;;  %5504 = vmatmul.mubr.msk.bf16.vlgmr.msra.gmra.mrb[24].mxu1 %vm3557_vm0, %v7351_v0 }
 0x246   :  { %4666 = vmatprep.mubr.bf16.mxu0 %v5727_v50  ;;  %4825 = vmatprep.mubr.bf16.mxu1 %v5727_v50 }
 0x24d   :  { %5503 = vmatmul.mubr.msk.bf16.gmra.mrb[28].mxu0 %vm3557_vm0, %v7386_v19  ;;  %5505 = vmatmul.mubr.msk.bf16.gmra.mrb[28].mxu1 %vm3557_vm0, %v7386_v19 }
 0x288   :  { %v4340_v48 = vpop.f32.mrb[16].mxu0  ;;  %v4499_v21 = vpop.f32.mrb[16].mxu1 }
 0x289   :  { %v5538_v56 = vadd.f32 %v4340_v48, %v6949_v14  ;;  %v4342_v58 = vpop.f32.mrb[17].mxu0  ;;  %v5546_v59 = vadd.f32 %v4499_v21, %v6949_v14  ;;  %v4501_v0 = vpop.f32.mrb[17].mxu1 }
 0x28a   :  { %v5539_v60 = vadd.f32 %v4342_v58, %v6949_v14  ;;  %v4344_v30 = vpop.f32.mrb[18].mxu0  ;;  %v5547_v50 = vadd.f32 %v4501_v0, %v6949_v14  ;;  %v4503_v19 = vpop.f32.mrb[18].mxu1 }
 0x28b   :  { %4844 = vst [vmem:[%s8013_s3 + $0x40] sm:$0xff] %v5538_v56  ;;  %v5540_v61 = vadd.f32 %v4344_v30, %v6976_v29  ;;  %v4346_v62 = vpop.f32.mrb[19].mxu0  ;;  %4846 = vst [vmem:[%s8013_s3 + $0x50] sm:$0xff] %v5546_v59  ;;  %v5548_v63 = vadd.f32 %v4503_v19, %v6976_v29  ;;  %v4505_v1 = vpop.f32.mrb[19].mxu1 }
 0x28c   :  { %4845 = vst [vmem:[%s8013_s3 + $0x48] sm:$0xff] %v5539_v60  ;;  %v5541_v38 = vadd.f32 %v4346_v62, %v6976_v29  ;;  %4847 = vst [vmem:[%s8013_s3 + $0x58] sm:$0xff] %v5547_v50  ;;  %v5549_v40 = vadd.f32 %v4505_v1, %v6976_v29 }
 0x28d   :  { %4860 = vst [vmem:[%s8013_s3 + $0xc0] sm:$0xff] %v5540_v61  ;;  %4862 = vst [vmem:[%s8013_s3 + $0xd0] sm:$0xff] %v5548_v63 }
 0x28e   :  { %4861 = vst [vmem:[%s8013_s3 + $0xc8] sm:$0xff] %v5541_v38  ;;  %4863 = vst [vmem:[%s8013_s3 + $0xd8] sm:$0xff] %v5549_v40 }
 0x290   :  { %v4350_v2 = vpop.f32.mrb[20].mxu0  ;;  %v4509_v6 = vpop.f32.mrb[20].mxu1 }
 0x291   :  { %v5542_v3 = vadd.f32 %v4350_v2, %v6978_v35  ;;  %v4352_v7 = vpop.f32.mrb[21].mxu0  ;;  %v5550_v8 = vadd.f32 %v4509_v6, %v6978_v35  ;;  %v4511_v51 = vpop.f32.mrb[21].mxu1 }
 0x292   :  { %v5543_v9 = vadd.f32 %v4352_v7, %v6978_v35  ;;  %v4354_v10 = vpop.f32.mrb[22].mxu0  ;;  %v5551_v11 = vadd.f32 %v4511_v51, %v6978_v35  ;;  %v4513_v15 = vpop.f32.mrb[22].mxu1 }
 0x293   :  { %4876 = vst [vmem:[%s8013_s3 + $0x140] sm:$0xff] %v5542_v3  ;;  %v5544_v13 = vadd.f32 %v4354_v10, %v7072_v4  ;;  %v4356_v16 = vpop.f32.mrb[23].mxu0  ;;  %4878 = vst [vmem:[%s8013_s3 + $0x150] sm:$0xff] %v5550_v8  ;;  %v5552_v17 = vadd.f32 %v4513_v15, %v7072_v4  ;;  %v4515_v20 = vpop.f32.mrb[23].mxu1 }
 0x294   :  { %4877 = vst [vmem:[%s8013_s3 + $0x148] sm:$0xff] %v5543_v9  ;;  %v5545_v18 = vadd.f32 %v4356_v16, %v7072_v4  ;;  %4879 = vst [vmem:[%s8013_s3 + $0x158] sm:$0xff] %v5551_v11  ;;  %v5553_v23 = vadd.f32 %v4515_v20, %v7072_v4 }
 0x295   :  { %4892 = vst [vmem:[%s8013_s3 + $0x1c0] sm:$0xff] %v5544_v13  ;;  %4894 = vst [vmem:[%s8013_s3 + $0x1d0] sm:$0xff] %v5552_v17 }
 0x296   :  { %4893 = vst [vmem:[%s8013_s3 + $0x1c8] sm:$0xff] %v5545_v18  ;;  %4895 = vst [vmem:[%s8013_s3 + $0x1d8] sm:$0xff] %v5553_v23 }
 0x318   :  { %v4658_v32 = vpop.f32.mrb[24].mxu0  ;;  %v4817_v27 = vpop.f32.mrb[24].mxu1 }
 0x319   :  { %v5554_v26 = vadd.f32 %v4658_v32, %v6949_v14  ;;  %v4660_v5 = vpop.f32.mrb[25].mxu0  ;;  %v5562_v28 = vadd.f32 %v4817_v27, %v6949_v14  ;;  %v4819_v34 = vpop.f32.mrb[25].mxu1 }
 0x31a   :  { %v5555_v33 = vadd.f32 %v4660_v5, %v6949_v14  ;;  %v4662_v36 = vpop.f32.mrb[26].mxu0  ;;  %v5563_v37 = vadd.f32 %v4819_v34, %v6949_v14  ;;  %v4821_v42 = vpop.f32.mrb[26].mxu1 }
 0x31b   :  { %4848 = vst [vmem:[%s8013_s3 + $0x60] sm:$0xff] %v5554_v26  ;;  %v5556_v41 = vadd.f32 %v4662_v36, %v6976_v29  ;;  %v4664_v43 = vpop.f32.mrb[27].mxu0  ;;  %4850 = vst [vmem:[%s8013_s3 + $0x70] sm:$0xff] %v5562_v28  ;;  %v5564_v44 = vadd.f32 %v4821_v42, %v6976_v29  ;;  %v4823_v45 = vpop.f32.mrb[27].mxu1 }
 0x31c   :  { %4849 = vst [vmem:[%s8013_s3 + $0x68] sm:$0xff] %v5555_v33  ;;  %v5557_v24 = vadd.f32 %v4664_v43, %v6976_v29  ;;  %4851 = vst [vmem:[%s8013_s3 + $0x78] sm:$0xff] %v5563_v37  ;;  %v5565_v14 = vadd.f32 %v4823_v45, %v6976_v29 }
 0x31d   :  { %4864 = vst [vmem:[%s8013_s3 + $0xe0] sm:$0xff] %v5556_v41  ;;  %4866 = vst [vmem:[%s8013_s3 + $0xf0] sm:$0xff] %v5564_v44 }
 0x31e   :  { %4865 = vst [vmem:[%s8013_s3 + $0xe8] sm:$0xff] %v5557_v24  ;;  %4867 = vst [vmem:[%s8013_s3 + $0xf8] sm:$0xff] %v5565_v14 }
 0x320   :  { %v4668_v39 = vpop.f32.mrb[28].mxu0  ;;  %v4827_v47 = vpop.f32.mrb[28].mxu1 }
 0x321   :  { %v5558_v46 = vadd.f32 %v4668_v39, %v6978_v35  ;;  %v4670_v12 = vpop.f32.mrb[29].mxu0  ;;  %v5566_v25 = vadd.f32 %v4827_v47, %v6978_v35  ;;  %v4829_v22 = vpop.f32.mrb[29].mxu1 }
 0x322   :  { %v5559_v29 = vadd.f32 %v4670_v12, %v6978_v35  ;;  %v4672_v49 = vpop.f32.mrb[30].mxu0  ;;  %v5567_v52 = vadd.f32 %v4829_v22, %v6978_v35  ;;  %v4831_v54 = vpop.f32.mrb[30].mxu1 }
 0x323   :  { %4880 = vst [vmem:[%s8013_s3 + $0x160] sm:$0xff] %v5558_v46  ;;  %v5560_v53 = vadd.f32 %v4672_v49, %v7072_v4  ;;  %v4674_v57 = vpop.f32.mrb[31].mxu0  ;;  %4882 = vst [vmem:[%s8013_s3 + $0x170] sm:$0xff] %v5566_v25  ;;  %v5568_v31 = vadd.f32 %v4831_v54, %v7072_v4  ;;  %v4833_v48 = vpop.f32.mrb[31].mxu1 }
 0x324   :  { %4881 = vst [vmem:[%s8013_s3 + $0x168] sm:$0xff] %v5559_v29  ;;  %v5561_v55 = vadd.f32 %v4674_v57, %v7072_v4  ;;  %4883 = vst [vmem:[%s8013_s3 + $0x178] sm:$0xff] %v5567_v52  ;;  %v5569_v35 = vadd.f32 %v4833_v48, %v7072_v4 }
 0x325   :  { %4896 = vst [vmem:[%s8013_s3 + $0x1e0] sm:$0xff] %v5560_v53  ;;  %4898 = vst [vmem:[%s8013_s3 + $0x1f0] sm:$0xff] %v5568_v31 }
 0x326   :  { %4897 = vst [vmem:[%s8013_s3 + $0x1e8] sm:$0xff] %v5561_v55  ;;  %4899 = vst [vmem:[%s8013_s3 + $0x1f8] sm:$0xff] %v5569_v35 }

// kernel: earthfarseer_forward.79
= control target key start
LH: loop header
LB: loop body
LE: loop exit
PB: predicated region body
PF: predicated region fallthrough
CT: control target
= control target key end

     0   :  { %v632_v3 = vmov 0   ;;  %vm214_vm0 = vcmask 261120   ;;  %s806_s1 = inlined_call_operand.vmem [shape: bf16[1,32,2048], index: 1, kind: input, shape index: {}]   ;;  %s807_s0 = inlined_call_operand.vmem [shape: bf16[1,4,32], index: 0, kind: input, shape index: {}]   ;;  %s808_s2 = inlined_call_operand.vmem [shape: f32[1,4,1], index: 2, kind: input, shape index: {}]   ;;  %s809_s3 = inlined_call_operand.vmem [shape: f32[1,4,2048], index: 3, kind: output, shape index: {}]  }
   0x1   :  { %v16_v0 = vld [vmem:[%s806_s1] sm:$0xff]  ;;  %v17_v2 = vld [vmem:[%s806_s1 + $0x8] sm:$0xff]  ;;  %250 = vmatprep.mubr.bf16.mxu0 %v632_v3  ;;  %291 = vmatprep.mubr.bf16.mxu1 %v632_v3  ;;  %v18_v15 = vld [vmem:[%s806_s1 + $0x10] sm:$0xff] }
   0x2   :  { %v24_v1 = vld [vmem:[%s806_s1 + $0x40] sm:$0xff]  ;;  %v25_v5 = vld [vmem:[%s806_s1 + $0x48] sm:$0xff]  ;;  %631 = vset.pattern.permute.xlu0 %v632_v3  ;;  %v26_v16 = vld [vmem:[%s806_s1 + $0x50] sm:$0xff] }
   0x3   :  { %v591_v4 = vcombine.high %v16_v0, %v24_v1  ;;  %v590_v6 = vcombine.low %v16_v0, %v24_v1  ;;  %v32_v7 = vld [vmem:[%s806_s1 + $0x80] sm:$0xff]  ;;  %v593_v9 = vcombine.high %v17_v2, %v25_v5  ;;  %v592_v10 = vcombine.low %v17_v2, %v25_v5  ;;  %v33_v12 = vld [vmem:[%s806_s1 + $0x88] sm:$0xff]  ;;  %v19_v17 = vld [vmem:[%s806_s1 + $0x18] sm:$0xff] }
   0x4   :  { %v40_v8 = vld [vmem:[%s806_s1 + $0xc0] sm:$0xff]  ;;  %v41_v13 = vld [vmem:[%s806_s1 + $0xc8] sm:$0xff]  ;;  %v27_v19 = vld [vmem:[%s806_s1 + $0x58] sm:$0xff]  ;;  %v595_v21 = vcombine.high %v18_v15, %v26_v16  ;;  %v594_v28 = vcombine.low %v18_v15, %v26_v16 }
   0x5   :  { %v607_v11 = vcombine.high %v32_v7, %v40_v8  ;;  %218 = vmatprep.subr.bf16.mxu0 %v591_v4  ;;  %v609_v14 = vcombine.high %v33_v12, %v41_v13  ;;  %259 = vmatprep.subr.bf16.mxu1 %v593_v9  ;;  %v606_v18 = vcombine.low %v32_v7, %v40_v8  ;;  %v34_v23 = vld [vmem:[%s806_s1 + $0x90] sm:$0xff]  ;;  %v35_v25 = vld [vmem:[%s806_s1 + $0x98] sm:$0xff]  ;;  %v707_v27 = vld [vmem:[%s807_s0] sm:$0x3] }
   0x6   :  { %219 = vmatpush1.bf16.msra.mxu0 %v590_v6  ;;  %260 = vmatpush1.bf16.msra.mxu1 %v592_v10  ;;  %v608_v20 = vcombine.low %v33_v12, %v41_v13  ;;  %v597_v22 = vcombine.high %v19_v17, %v27_v19  ;;  %v42_v24 = vld [vmem:[%s806_s1 + $0xd0] sm:$0xff]  ;;  %v43_v26 = vld [vmem:[%s806_s1 + $0xd8] sm:$0xff]  ;;  %v596_v29 = vcombine.low %v19_v17, %v27_v19  ;;  %v20_v32 = vld [vmem:[%s806_s1 + $0x20] sm:$0xff] }
   0x7   :  { %220 = vmatprep.subr.bf16.mxu0 %v607_v11  ;;  %261 = vmatprep.subr.bf16.mxu1 %v609_v14  ;;  %v611_v30 = vcombine.high %v34_v23, %v42_v24  ;;  %v613_v31 = vcombine.high %v35_v25, %v43_v26  ;;  %v28_v33 = vld [vmem:[%s806_s1 + $0x60] sm:$0xff]  ;;  %v21_v34 = vld [vmem:[%s806_s1 + $0x28] sm:$0xff]  ;;  %v610_v36 = vcombine.low %v34_v23, %v42_v24  ;;  %v22_v49 = vld [vmem:[%s806_s1 + $0x30] sm:$0xff] }
   0x8   :  { %v29_v35 = vld [vmem:[%s806_s1 + $0x68] sm:$0xff]  ;;  %v48_v37 = vld [vmem:[%s808_s2] sm:$0xf]  ;;  %v612_v38 = vcombine.low %v35_v25, %v43_v26  ;;  %v599_v39 = vcombine.high %v20_v32, %v28_v33  ;;  %v598_v45 = vcombine.low %v20_v32, %v28_v33  ;;  %v30_v50 = vld [vmem:[%s806_s1 + $0x70] sm:$0xff] }
   0x9   :  { %v601_v40 = vcombine.high %v21_v34, %v29_v35  ;;  %v36_v41 = vld [vmem:[%s806_s1 + $0xa0] sm:$0xff]  ;;  %v37_v43 = vld [vmem:[%s806_s1 + $0xa8] sm:$0xff]  ;;  %51 = vperm.xlu0 %631, %v48_v37   ;;  %v600_v46 = vcombine.low %v21_v34, %v29_v35  ;;  %v23_v51 = vld [vmem:[%s806_s1 + $0x38] sm:$0xff]  ;;  %v603_v55 = vcombine.high %v22_v49, %v30_v50  ;;  %v602_v61 = vcombine.low %v22_v49, %v30_v50 }
   0xa   :  { %221 = vmatpush1.bf16.msra.mxu0 %v606_v18  ;;  %262 = vmatpush1.bf16.msra.mxu1 %v608_v20  ;;  %v44_v42 = vld [vmem:[%s806_s1 + $0xe0] sm:$0xff]  ;;  %v45_v44 = vld [vmem:[%s806_s1 + $0xe8] sm:$0xff]  ;;  %v31_v52 = vld [vmem:[%s806_s1 + $0x78] sm:$0xff] }
   0xb   :  { %300 = vmatprep.subr.bf16.mxu0 %v595_v21  ;;  %341 = vmatprep.subr.bf16.mxu1 %v597_v22  ;;  %v615_v47 = vcombine.high %v36_v41, %v44_v42  ;;  %v617_v48 = vcombine.high %v37_v43, %v45_v44  ;;  %v614_v53 = vcombine.low %v36_v41, %v44_v42  ;;  %v38_v57 = vld [vmem:[%s806_s1 + $0xb0] sm:$0xff]  ;;  %v39_v59 = vld [vmem:[%s806_s1 + $0xb8] sm:$0xff] }
   0xc   :  { %v616_v54 = vcombine.low %v37_v43, %v45_v44  ;;  %v605_v56 = vcombine.high %v23_v51, %v31_v52  ;;  %v46_v58 = vld [vmem:[%s806_s1 + $0xf0] sm:$0xff]  ;;  %v47_v60 = vld [vmem:[%s806_s1 + $0xf8] sm:$0xff]  ;;  %v604_v62 = vcombine.low %v23_v51, %v31_v52 }
   0xd   :  { %622 = vmatmul.mubr.msk.bf16.vlgmr.msra.gmra.mrb[0].mxu0 %vm214_vm0, %v707_v27  ;;  %623 = vmatmul.mubr.msk.bf16.vlgmr.msra.gmra.mrb[0].mxu1 %vm214_vm0, %v707_v27  ;;  %v619_v63 = vcombine.high %v38_v57, %v46_v58  ;;  %v621_v0 = vcombine.high %v39_v59, %v47_v60  ;;  %v618_v1 = vcombine.low %v38_v57, %v46_v58 }
   0xe   :  { %301 = vmatpush1.bf16.msra.mxu0 %v594_v28  ;;  %342 = vmatpush1.bf16.msra.mxu1 %v596_v29  ;;  %v620_v2 = vcombine.low %v39_v59, %v47_v60 }
   0xf   :  { %302 = vmatprep.subr.bf16.mxu0 %v611_v30  ;;  %343 = vmatprep.subr.bf16.mxu1 %v613_v31 }
  0x10   :  { %332 = vmatprep.mubr.bf16.mxu0 %v632_v3  ;;  %373 = vmatprep.mubr.bf16.mxu1 %v632_v3 }
  0x12   :  { %303 = vmatpush1.bf16.msra.mxu0 %v610_v36  ;;  %344 = vmatpush1.bf16.msra.mxu1 %v612_v38 }
  0x13   :  { %382 = vmatprep.subr.bf16.mxu0 %v599_v39  ;;  %423 = vmatprep.subr.bf16.mxu1 %v601_v40 }
  0x15   :  { %624 = vmatmul.mubr.msk.bf16.vlgmr.msra.gmra.mrb[4].mxu0 %vm214_vm0, %v707_v27  ;;  %625 = vmatmul.mubr.msk.bf16.vlgmr.msra.gmra.mrb[4].mxu1 %vm214_vm0, %v707_v27 }
  0x16   :  { %383 = vmatpush1.bf16.msra.mxu0 %v598_v45  ;;  %424 = vmatpush1.bf16.msra.mxu1 %v600_v46 }
  0x17   :  { %384 = vmatprep.subr.bf16.mxu0 %v615_v47  ;;  %425 = vmatprep.subr.bf16.mxu1 %v617_v48 }
  0x18   :  { %414 = vmatprep.mubr.bf16.mxu0 %v632_v3  ;;  %455 = vmatprep.mubr.bf16.mxu1 %v632_v3 }
  0x1a   :  { %385 = vmatpush1.bf16.msra.mxu0 %v614_v53  ;;  %426 = vmatpush1.bf16.msra.mxu1 %v616_v54 }
  0x1b   :  { %464 = vmatprep.subr.bf16.mxu0 %v603_v55  ;;  %505 = vmatprep.subr.bf16.mxu1 %v605_v56 }
  0x1d   :  { %626 = vmatmul.mubr.msk.bf16.vlgmr.msra.gmra.mrb[8].mxu0 %vm214_vm0, %v707_v27  ;;  %627 = vmatmul.mubr.msk.bf16.vlgmr.msra.gmra.mrb[8].mxu1 %vm214_vm0, %v707_v27 }
  0x1e   :  { %465 = vmatpush1.bf16.msra.mxu0 %v602_v61  ;;  %506 = vmatpush1.bf16.msra.mxu1 %v604_v62 }
  0x1f   :  { %466 = vmatprep.subr.bf16.mxu0 %v619_v63  ;;  %507 = vmatprep.subr.bf16.mxu1 %v621_v0 }
  0x20   :  { %496 = vmatprep.mubr.bf16.mxu0 %v632_v3  ;;  %537 = vmatprep.mubr.bf16.mxu1 %v632_v3 }
  0x22   :  { %467 = vmatpush1.bf16.msra.mxu0 %v618_v1  ;;  %508 = vmatpush1.bf16.msra.mxu1 %v620_v2 }
  0x25   :  { %628 = vmatmul.mubr.msk.bf16.vlgmr.msra.gmra.mrb[12].mxu0 %vm214_vm0, %v707_v27  ;;  %629 = vmatmul.mubr.msk.bf16.vlgmr.msra.gmra.mrb[12].mxu1 %vm214_vm0, %v707_v27 }
  0x88   :  { %v52_v4 = vpop.permute.xlu0 %51 }
  0xe0   :  { %v252_v5 = vpop.f32.mrb[0].mxu0  ;;  %v293_v6 = vpop.f32.mrb[0].mxu1 }
  0xe1   :  { %v253_v7 = vadd.f32 %v252_v5, %v52_v4  ;;  %v254_v8 = vpop.f32.mrb[1].mxu0  ;;  %v294_v10 = vadd.f32 %v293_v6, %v52_v4  ;;  %v295_v11 = vpop.f32.mrb[1].mxu1 }
  0xe2   :  { %v255_v9 = vadd.f32 %v254_v8, %v52_v4  ;;  %v256_v12 = vpop.f32.mrb[2].mxu0  ;;  %v296_v13 = vadd.f32 %v295_v11, %v52_v4  ;;  %v297_v14 = vpop.f32.mrb[2].mxu1 }
  0xe3   :  { %v257_v3 = vpop.f32.mrb[3].mxu0  ;;  %v298_v16 = vpop.f32.mrb[3].mxu1 }
  0xe4   :  { %v562_v15 = vcombine.low %v253_v7, %v255_v9  ;;  %v563_v17 = vcombine.low %v294_v10, %v296_v13 }
  0xe6   :  { %578 = vst [vmem:[%s809_s3] sm:$0xff] %v562_v15  ;;  %579 = vst [vmem:[%s809_s3 + $0x8] sm:$0xff] %v563_v17 }
  0xe8   :  { %v334_v18 = vpop.f32.mrb[4].mxu0  ;;  %v375_v20 = vpop.f32.mrb[4].mxu1 }
  0xe9   :  { %v335_v19 = vadd.f32 %v334_v18, %v52_v4  ;;  %v336_v21 = vpop.f32.mrb[5].mxu0  ;;  %v376_v22 = vadd.f32 %v375_v20, %v52_v4  ;;  %v377_v24 = vpop.f32.mrb[5].mxu1 }
  0xea   :  { %v337_v23 = vadd.f32 %v336_v21, %v52_v4  ;;  %v338_v25 = vpop.f32.mrb[6].mxu0  ;;  %v378_v26 = vadd.f32 %v377_v24, %v52_v4  ;;  %v379_v27 = vpop.f32.mrb[6].mxu1 }
  0xeb   :  { %v339_v28 = vpop.f32.mrb[7].mxu0  ;;  %v380_v30 = vpop.f32.mrb[7].mxu1 }
  0xec   :  { %v564_v29 = vcombine.low %v335_v19, %v337_v23  ;;  %v565_v31 = vcombine.low %v376_v22, %v378_v26 }
  0xee   :  { %580 = vst [vmem:[%s809_s3 + $0x10] sm:$0xff] %v564_v29  ;;  %581 = vst [vmem:[%s809_s3 + $0x18] sm:$0xff] %v565_v31 }
  0xf0   :  { %v416_v32 = vpop.f32.mrb[8].mxu0  ;;  %v457_v34 = vpop.f32.mrb[8].mxu1 }
  0xf1   :  { %v417_v33 = vadd.f32 %v416_v32, %v52_v4  ;;  %v418_v35 = vpop.f32.mrb[9].mxu0  ;;  %v458_v36 = vadd.f32 %v457_v34, %v52_v4  ;;  %v459_v38 = vpop.f32.mrb[9].mxu1 }
  0xf2   :  { %v419_v37 = vadd.f32 %v418_v35, %v52_v4  ;;  %v420_v39 = vpop.f32.mrb[10].mxu0  ;;  %v460_v40 = vadd.f32 %v459_v38, %v52_v4  ;;  %v461_v41 = vpop.f32.mrb[10].mxu1 }
  0xf3   :  { %v421_v42 = vpop.f32.mrb[11].mxu0  ;;  %v462_v44 = vpop.f32.mrb[11].mxu1 }
  0xf4   :  { %v566_v43 = vcombine.low %v417_v33, %v419_v37  ;;  %v567_v45 = vcombine.low %v458_v36, %v460_v40 }
  0xf6   :  { %582 = vst [vmem:[%s809_s3 + $0x20] sm:$0xff] %v566_v43  ;;  %583 = vst [vmem:[%s809_s3 + $0x28] sm:$0xff] %v567_v45 }
  0xf8   :  { %v498_v46 = vpop.f32.mrb[12].mxu0  ;;  %v539_v48 = vpop.f32.mrb[12].mxu1 }
  0xf9   :  { %v499_v47 = vadd.f32 %v498_v46, %v52_v4  ;;  %v500_v49 = vpop.f32.mrb[13].mxu0  ;;  %v540_v50 = vadd.f32 %v539_v48, %v52_v4  ;;  %v541_v52 = vpop.f32.mrb[13].mxu1 }
  0xfa   :  { %v501_v51 = vadd.f32 %v500_v49, %v52_v4  ;;  %v502_v53 = vpop.f32.mrb[14].mxu0  ;;  %v542_v54 = vadd.f32 %v541_v52, %v52_v4  ;;  %v543_v55 = vpop.f32.mrb[14].mxu1 }
  0xfb   :  { %v503_v56 = vpop.f32.mrb[15].mxu0  ;;  %v544_v58 = vpop.f32.mrb[15].mxu1 }
  0xfc   :  { %v568_v57 = vcombine.low %v499_v47, %v501_v51  ;;  %v569_v59 = vcombine.low %v540_v50, %v542_v54 }
  0xfe   :  { %584 = vst [vmem:[%s809_s3 + $0x30] sm:$0xff] %v568_v57  ;;  %585 = vst [vmem:[%s809_s3 + $0x38] sm:$0xff] %v569_v59 }

// kernel: earthfarseer_forward.80
= control target key start
LH: loop header
LB: loop body
LE: loop exit
PB: predicated region body
PF: predicated region fallthrough
CT: control target
= control target key end

     0   :  { %v769_v3 = vmov 0   ;;  %vm266_vm0 = vcmask 1041408   ;;  %vm262_vm1 = vcmask 293888   ;;  %s983_s1 = inlined_call_operand.vmem [shape: bf16[1,36,2048], index: 1, kind: input, shape index: {}]   ;;  %s984_s0 = inlined_call_operand.vmem [shape: bf16[1,4,36], index: 0, kind: input, shape index: {}]   ;;  %s985_s2 = inlined_call_operand.vmem [shape: f32[1,4,1], index: 2, kind: input, shape index: {}]   ;;  %s986_s3 = inlined_call_operand.vmem [shape: f32[1,4,2048], index: 3, kind: output, shape index: {}]  }
   0x1   :  { %v16_v0 = vld [vmem:[%s983_s1] sm:$0xff]  ;;  %v17_v2 = vld [vmem:[%s983_s1 + $0x8] sm:$0xff]  ;;  %347 = vmatprep.mubr.bf16.mxu0 %v769_v3  ;;  %388 = vmatprep.mubr.bf16.mxu1 %v769_v3  ;;  %v18_v23 = vld [vmem:[%s983_s1 + $0x10] sm:$0xff] }
   0x2   :  { %v24_v1 = vld [vmem:[%s983_s1 + $0x40] sm:$0xff]  ;;  %v25_v5 = vld [vmem:[%s983_s1 + $0x48] sm:$0xff]  ;;  %752 = vset.pattern.permute.xlu0 %v769_v3  ;;  %v26_v24 = vld [vmem:[%s983_s1 + $0x50] sm:$0xff] }
   0x3   :  { %v688_v4 = vcombine.high %v16_v0, %v24_v1  ;;  %v687_v6 = vcombine.low %v16_v0, %v24_v1  ;;  %v32_v7 = vld [vmem:[%s983_s1 + $0x80] sm:$0xff]  ;;  %v690_v9 = vcombine.high %v17_v2, %v25_v5  ;;  %v689_v10 = vcombine.low %v17_v2, %v25_v5  ;;  %v33_v12 = vld [vmem:[%s983_s1 + $0x88] sm:$0xff]  ;;  %v19_v25 = vld [vmem:[%s983_s1 + $0x18] sm:$0xff] }
   0x4   :  { %v40_v8 = vld [vmem:[%s983_s1 + $0xc0] sm:$0xff]  ;;  %v41_v13 = vld [vmem:[%s983_s1 + $0xc8] sm:$0xff]  ;;  %v27_v26 = vld [vmem:[%s983_s1 + $0x58] sm:$0xff]  ;;  %v692_v28 = vcombine.high %v18_v23, %v26_v24  ;;  %v691_v36 = vcombine.low %v18_v23, %v26_v24 }
   0x5   :  { %v704_v11 = vcombine.high %v32_v7, %v40_v8  ;;  %v48_v14 = vld [vmem:[%s983_s1 + $0x100] sm:$0x33]  ;;  %315 = vmatprep.subr.bf16.mxu0 %v688_v4  ;;  %v706_v15 = vcombine.high %v33_v12, %v41_v13  ;;  %v49_v16 = vld [vmem:[%s983_s1 + $0x108] sm:$0x33]  ;;  %356 = vmatprep.subr.bf16.mxu1 %v690_v9  ;;  %v703_v17 = vcombine.low %v32_v7, %v40_v8  ;;  %v34_v31 = vld [vmem:[%s983_s1 + $0x90] sm:$0xff] }
   0x6   :  { %316 = vmatpush1.bf16.msra.mxu0 %v687_v6  ;;  %357 = vmatpush1.bf16.msra.mxu1 %v689_v10  ;;  %v705_v18 = vcombine.low %v33_v12, %v41_v13  ;;  %v720_v19 = vcombine.high %v48_v14, %v48_v14  ;;  %v719_v20 = vcombine.low %v48_v14, %v48_v14  ;;  %v42_v32 = vld [vmem:[%s983_s1 + $0xd0] sm:$0xff]  ;;  %v35_v33 = vld [vmem:[%s983_s1 + $0x98] sm:$0xff]  ;;  %v854_v35 = vld [vmem:[%s984_s0] sm:$0x3] }
   0x7   :  { %317 = vmatprep.subr.bf16.mxu0 %v704_v11  ;;  %358 = vmatprep.subr.bf16.mxu1 %v706_v15  ;;  %v722_v21 = vcombine.high %v49_v16, %v49_v16  ;;  %v721_v22 = vcombine.low %v49_v16, %v49_v16  ;;  %v694_v30 = vcombine.high %v19_v25, %v27_v26  ;;  %v43_v34 = vld [vmem:[%s983_s1 + $0xd8] sm:$0xff]  ;;  %v50_v40 = vld [vmem:[%s983_s1 + $0x110] sm:$0x33]  ;;  %v56_v41 = vld [vmem:[%s985_s2] sm:$0xf] }
   0x8   :  { %v268_v27 = vsel %vm266_vm0, %v719_v20, 0  ;;  %v693_v37 = vcombine.low %v19_v25, %v27_v26  ;;  %v708_v38 = vcombine.high %v34_v31, %v42_v32  ;;  %v710_v39 = vcombine.high %v35_v33, %v43_v34  ;;  %v51_v42 = vld [vmem:[%s983_s1 + $0x118] sm:$0x33]  ;;  %59 = vperm.xlu0 %752, %v56_v41   ;;  %v20_v49 = vld [vmem:[%s983_s1 + $0x20] sm:$0xff]  ;;  %v21_v51 = vld [vmem:[%s983_s1 + $0x28] sm:$0xff] }
   0x9   :  { %v274_v29 = vsel %vm266_vm0, %v721_v22, 0  ;;  %v707_v43 = vcombine.low %v34_v31, %v42_v32  ;;  %v709_v44 = vcombine.low %v35_v33, %v43_v34  ;;  %v724_v45 = vcombine.high %v50_v40, %v50_v40  ;;  %v28_v50 = vld [vmem:[%s983_s1 + $0x60] sm:$0xff]  ;;  %v29_v52 = vld [vmem:[%s983_s1 + $0x68] sm:$0xff]  ;;  %v22_v10 = vld [vmem:[%s983_s1 + $0x30] sm:$0xff] }
   0xa   :  { %318 = vmatpush1.bf16.msra.mxu0 %v703_v17  ;;  %359 = vmatpush1.bf16.msra.mxu1 %v705_v18  ;;  %v723_v46 = vcombine.low %v50_v40, %v50_v40  ;;  %v726_v47 = vcombine.high %v51_v42, %v51_v42  ;;  %v725_v48 = vcombine.low %v51_v42, %v51_v42  ;;  %v36_v57 = vld [vmem:[%s983_s1 + $0xa0] sm:$0xff]  ;;  %v37_v59 = vld [vmem:[%s983_s1 + $0xa8] sm:$0xff]  ;;  %v30_v11 = vld [vmem:[%s983_s1 + $0x70] sm:$0xff] }
   0xb   :  { %735 = vmatprep.subr.msk.bf16.mxu0 %vm266_vm0, %v720_v19  ;;  %737 = vmatprep.subr.msk.bf16.mxu1 %vm266_vm0, %v722_v21  ;;  %v696_v54 = vcombine.high %v20_v49, %v28_v50  ;;  %v698_v56 = vcombine.high %v21_v51, %v29_v52  ;;  %v44_v58 = vld [vmem:[%s983_s1 + $0xe0] sm:$0xff]  ;;  %v45_v60 = vld [vmem:[%s983_s1 + $0xe8] sm:$0xff]  ;;  %v695_v61 = vcombine.low %v20_v49, %v28_v50  ;;  %v23_v12 = vld [vmem:[%s983_s1 + $0x38] sm:$0xff] }
   0xc   :  { %v280_v53 = vsel %vm266_vm0, %v723_v46, 0  ;;  %v286_v55 = vsel %vm266_vm0, %v725_v48, 0  ;;  %v697_v62 = vcombine.low %v21_v51, %v29_v52  ;;  %v712_v63 = vcombine.high %v36_v57, %v44_v58  ;;  %v52_v1 = vld [vmem:[%s983_s1 + $0x120] sm:$0x33]  ;;  %v53_v2 = vld [vmem:[%s983_s1 + $0x128] sm:$0x33] }
   0xd   :  { %v714_v0 = vcombine.high %v37_v59, %v45_v60  ;;  %v711_v4 = vcombine.low %v36_v57, %v44_v58  ;;  %v713_v5 = vcombine.low %v37_v59, %v45_v60  ;;  %v728_v6 = vcombine.high %v52_v1, %v52_v1  ;;  %v31_v13 = vld [vmem:[%s983_s1 + $0x78] sm:$0xff]  ;;  %v38_v18 = vld [vmem:[%s983_s1 + $0xb0] sm:$0xff] }
   0xe   :  { %320 = vmatpush1.bf16.msra.mxu0 %v268_v27  ;;  %361 = vmatpush1.bf16.msra.mxu1 %v274_v29  ;;  %v727_v7 = vcombine.low %v52_v1, %v52_v1  ;;  %v730_v8 = vcombine.high %v53_v2, %v53_v2  ;;  %v729_v9 = vcombine.low %v53_v2, %v53_v2  ;;  %v46_v19 = vld [vmem:[%s983_s1 + $0xf0] sm:$0xff]  ;;  %v39_v20 = vld [vmem:[%s983_s1 + $0xb8] sm:$0xff] }
   0xf   :  { %397 = vmatprep.subr.bf16.mxu0 %v692_v28  ;;  %438 = vmatprep.subr.bf16.mxu1 %v694_v30  ;;  %v700_v15 = vcombine.high %v22_v10, %v30_v11  ;;  %v702_v17 = vcombine.high %v23_v12, %v31_v13  ;;  %v47_v21 = vld [vmem:[%s983_s1 + $0xf8] sm:$0xff]  ;;  %v699_v22 = vcombine.low %v22_v10, %v30_v11  ;;  %v54_v26 = vld [vmem:[%s983_s1 + $0x130] sm:$0x33] }
  0x10   :  { %v292_v14 = vsel %vm266_vm0, %v727_v7, 0  ;;  %v298_v16 = vsel %vm266_vm0, %v729_v9, 0  ;;  %v701_v23 = vcombine.low %v23_v12, %v31_v13  ;;  %v716_v24 = vcombine.high %v38_v18, %v46_v19  ;;  %v55_v27 = vld [vmem:[%s983_s1 + $0x138] sm:$0x33] }
  0x11   :  { %736 = vmatmul.mubr.msk.bf16.vlgmr.msra.gmra.mrb[0].mxu0 %vm262_vm1, %v854_v35  ;;  %738 = vmatmul.mubr.msk.bf16.vlgmr.msra.gmra.mrb[0].mxu1 %vm262_vm1, %v854_v35  ;;  %v718_v25 = vcombine.high %v39_v20, %v47_v21  ;;  %v715_v28 = vcombine.low %v38_v18, %v46_v19  ;;  %v717_v29 = vcombine.low %v39_v20, %v47_v21 }
  0x12   :  { %398 = vmatpush1.bf16.msra.mxu0 %v691_v36  ;;  %439 = vmatpush1.bf16.msra.mxu1 %v693_v37  ;;  %v732_v30 = vcombine.high %v54_v26, %v54_v26  ;;  %v731_v31 = vcombine.low %v54_v26, %v54_v26  ;;  %v734_v32 = vcombine.high %v55_v27, %v55_v27 }
  0x13   :  { %399 = vmatprep.subr.bf16.mxu0 %v708_v38  ;;  %440 = vmatprep.subr.bf16.mxu1 %v710_v39  ;;  %v733_v33 = vcombine.low %v55_v27, %v55_v27 }
  0x14   :  { %429 = vmatprep.mubr.bf16.mxu0 %v769_v3  ;;  %470 = vmatprep.mubr.bf16.mxu1 %v769_v3  ;;  %v304_v34 = vsel %vm266_vm0, %v731_v31, 0 }
  0x15   :  { %v310_v36 = vsel %vm266_vm0, %v733_v33, 0 }
  0x16   :  { %400 = vmatpush1.bf16.msra.mxu0 %v707_v43  ;;  %441 = vmatpush1.bf16.msra.mxu1 %v709_v44 }
  0x17   :  { %739 = vmatprep.subr.msk.bf16.mxu0 %vm266_vm0, %v724_v45  ;;  %741 = vmatprep.subr.msk.bf16.mxu1 %vm266_vm0, %v726_v47 }
  0x1a   :  { %402 = vmatpush1.bf16.msra.mxu0 %v280_v53  ;;  %443 = vmatpush1.bf16.msra.mxu1 %v286_v55 }
  0x1b   :  { %479 = vmatprep.subr.bf16.mxu0 %v696_v54  ;;  %520 = vmatprep.subr.bf16.mxu1 %v698_v56 }
  0x1d   :  { %740 = vmatmul.mubr.msk.bf16.vlgmr.msra.gmra.mrb[4].mxu0 %vm262_vm1, %v854_v35  ;;  %742 = vmatmul.mubr.msk.bf16.vlgmr.msra.gmra.mrb[4].mxu1 %vm262_vm1, %v854_v35 }
  0x1e   :  { %480 = vmatpush1.bf16.msra.mxu0 %v695_v61  ;;  %521 = vmatpush1.bf16.msra.mxu1 %v697_v62 }
  0x1f   :  { %481 = vmatprep.subr.bf16.mxu0 %v712_v63  ;;  %522 = vmatprep.subr.bf16.mxu1 %v714_v0 }
  0x20   :  { %511 = vmatprep.mubr.bf16.mxu0 %v769_v3  ;;  %552 = vmatprep.mubr.bf16.mxu1 %v769_v3 }
  0x22   :  { %482 = vmatpush1.bf16.msra.mxu0 %v711_v4  ;;  %523 = vmatpush1.bf16.msra.mxu1 %v713_v5 }
  0x23   :  { %743 = vmatprep.subr.msk.bf16.mxu0 %vm266_vm0, %v728_v6  ;;  %745 = vmatprep.subr.msk.bf16.mxu1 %vm266_vm0, %v730_v8 }
  0x26   :  { %484 = vmatpush1.bf16.msra.mxu0 %v292_v14  ;;  %525 = vmatpush1.bf16.msra.mxu1 %v298_v16 }
  0x27   :  { %561 = vmatprep.subr.bf16.mxu0 %v700_v15  ;;  %602 = vmatprep.subr.bf16.mxu1 %v702_v17 }
  0x29   :  { %744 = vmatmul.mubr.msk.bf16.vlgmr.msra.gmra.mrb[8].mxu0 %vm262_vm1, %v854_v35  ;;  %746 = vmatmul.mubr.msk.bf16.vlgmr.msra.gmra.mrb[8].mxu1 %vm262_vm1, %v854_v35 }
  0x2a   :  { %562 = vmatpush1.bf16.msra.mxu0 %v699_v22  ;;  %603 = vmatpush1.bf16.msra.mxu1 %v701_v23 }
  0x2b   :  { %563 = vmatprep.subr.bf16.mxu0 %v716_v24  ;;  %604 = vmatprep.subr.bf16.mxu1 %v718_v25 }
  0x2c   :  { %593 = vmatprep.mubr.bf16.mxu0 %v769_v3  ;;  %634 = vmatprep.mubr.bf16.mxu1 %v769_v3 }
  0x2e   :  { %564 = vmatpush1.bf16.msra.mxu0 %v715_v28  ;;  %605 = vmatpush1.bf16.msra.mxu1 %v717_v29 }
  0x2f   :  { %747 = vmatprep.subr.msk.bf16.mxu0 %vm266_vm0, %v732_v30  ;;  %749 = vmatprep.subr.msk.bf16.mxu1 %vm266_vm0, %v734_v32 }
  0x32   :  { %566 = vmatpush1.bf16.msra.mxu0 %v304_v34  ;;  %607 = vmatpush1.bf16.msra.mxu1 %v310_v36 }
  0x35   :  { %748 = vmatmul.mubr.msk.bf16.vlgmr.msra.gmra.mrb[12].mxu0 %vm262_vm1, %v854_v35  ;;  %750 = vmatmul.mubr.msk.bf16.vlgmr.msra.gmra.mrb[12].mxu1 %vm262_vm1, %v854_v35 }
  0x87   :  { %v60_v37 = vpop.permute.xlu0 %59 }
  0xe4   :  { %v349_v3 = vpop.f32.mrb[0].mxu0  ;;  %v390_v38 = vpop.f32.mrb[0].mxu1 }
  0xe5   :  { %v350_v39 = vadd.f32 %v349_v3, %v60_v37  ;;  %v351_v40 = vpop.f32.mrb[1].mxu0  ;;  %v391_v42 = vadd.f32 %v390_v38, %v60_v37  ;;  %v392_v43 = vpop.f32.mrb[1].mxu1 }
  0xe6   :  { %v352_v41 = vadd.f32 %v351_v40, %v60_v37  ;;  %v353_v44 = vpop.f32.mrb[2].mxu0  ;;  %v393_v45 = vadd.f32 %v392_v43, %v60_v37  ;;  %v394_v46 = vpop.f32.mrb[2].mxu1 }
  0xe7   :  { %v354_v47 = vpop.f32.mrb[3].mxu0  ;;  %v395_v49 = vpop.f32.mrb[3].mxu1 }
  0xe8   :  { %v659_v48 = vcombine.low %v350_v39, %v352_v41  ;;  %v660_v50 = vcombine.low %v391_v42, %v393_v45 }
  0xea   :  { %675 = vst [vmem:[%s986_s3] sm:$0xff] %v659_v48  ;;  %676 = vst [vmem:[%s986_s3 + $0x8] sm:$0xff] %v660_v50 }
  0xf0   :  { %v431_v35 = vpop.f32.mrb[4].mxu0  ;;  %v472_v52 = vpop.f32.mrb[4].mxu1 }
  0xf1   :  { %v432_v51 = vadd.f32 %v431_v35, %v60_v37  ;;  %v433_v53 = vpop.f32.mrb[5].mxu0  ;;  %v473_v54 = vadd.f32 %v472_v52, %v60_v37  ;;  %v474_v56 = vpop.f32.mrb[5].mxu1 }
  0xf2   :  { %v434_v55 = vadd.f32 %v433_v53, %v60_v37  ;;  %v435_v57 = vpop.f32.mrb[6].mxu0  ;;  %v475_v58 = vadd.f32 %v474_v56, %v60_v37  ;;  %v476_v59 = vpop.f32.mrb[6].mxu1 }
  0xf3   :  { %v436_v60 = vpop.f32.mrb[7].mxu0  ;;  %v477_v62 = vpop.f32.mrb[7].mxu1 }
  0xf4   :  { %v661_v61 = vcombine.low %v432_v51, %v434_v55  ;;  %v662_v63 = vcombine.low %v473_v54, %v475_v58 }
  0xf6   :  { %677 = vst [vmem:[%s986_s3 + $0x10] sm:$0xff] %v661_v61  ;;  %678 = vst [vmem:[%s986_s3 + $0x18] sm:$0xff] %v662_v63 }
  0xfc   :  { %v513_v0 = vpop.f32.mrb[8].mxu0  ;;  %v554_v2 = vpop.f32.mrb[8].mxu1 }
  0xfd   :  { %v514_v1 = vadd.f32 %v513_v0, %v60_v37  ;;  %v515_v4 = vpop.f32.mrb[9].mxu0  ;;  %v555_v5 = vadd.f32 %v554_v2, %v60_v37  ;;  %v556_v7 = vpop.f32.mrb[9].mxu1 }
  0xfe   :  { %v516_v6 = vadd.f32 %v515_v4, %v60_v37  ;;  %v517_v8 = vpop.f32.mrb[10].mxu0  ;;  %v557_v9 = vadd.f32 %v556_v7, %v60_v37  ;;  %v558_v10 = vpop.f32.mrb[10].mxu1 }
  0xff   :  { %v518_v11 = vpop.f32.mrb[11].mxu0  ;;  %v559_v13 = vpop.f32.mrb[11].mxu1 }
 0x100   :  { %v663_v12 = vcombine.low %v514_v1, %v516_v6  ;;  %v664_v14 = vcombine.low %v555_v5, %v557_v9 }
 0x102   :  { %679 = vst [vmem:[%s986_s3 + $0x20] sm:$0xff] %v663_v12  ;;  %680 = vst [vmem:[%s986_s3 + $0x28] sm:$0xff] %v664_v14 }
 0x108   :  { %v595_v15 = vpop.f32.mrb[12].mxu0  ;;  %v636_v17 = vpop.f32.mrb[12].mxu1 }
 0x109   :  { %v596_v16 = vadd.f32 %v595_v15, %v60_v37  ;;  %v597_v18 = vpop.f32.mrb[13].mxu0  ;;  %v637_v19 = vadd.f32 %v636_v17, %v60_v37  ;;  %v638_v21 = vpop.f32.mrb[13].mxu1 }
 0x10a   :  { %v598_v20 = vadd.f32 %v597_v18, %v60_v37  ;;  %v599_v22 = vpop.f32.mrb[14].mxu0  ;;  %v639_v23 = vadd.f32 %v638_v21, %v60_v37  ;;  %v640_v24 = vpop.f32.mrb[14].mxu1 }
 0x10b   :  { %v600_v25 = vpop.f32.mrb[15].mxu0  ;;  %v641_v27 = vpop.f32.mrb[15].mxu1 }
 0x10c   :  { %v665_v26 = vcombine.low %v596_v16, %v598_v20  ;;  %v666_v28 = vcombine.low %v637_v19, %v639_v23 }
 0x10e   :  { %681 = vst [vmem:[%s986_s3 + $0x30] sm:$0xff] %v665_v26  ;;  %682 = vst [vmem:[%s986_s3 + $0x38] sm:$0xff] %v666_v28 }

// kernel: earthfarseer_forward.81
= control target key start
LH: loop header
LB: loop body
LE: loop exit
PB: predicated region body
PF: predicated region fallthrough
CT: control target
= control target key end

     0   :  { %s142_s0 = inlined_call_operand.vmem [shape: f32[32,256], index: 0, kind: input, shape index: {}]   ;;  %s143_s1 = inlined_call_operand.vmem [shape: f32[32,256], index: 1, kind: input, shape index: {}]   ;;  %s144_s2 = inlined_call_operand.vmem [shape: f32[32,256], index: 2, kind: output, shape index: {}]  }
   0x1   :  { %v11_v0 = vld [vmem:[%s142_s0] sm:$0xff]  ;;  %v12_v2 = vld [vmem:[%s142_s0 + $0x8] sm:$0xff]  ;;  %v13_v6 = vld [vmem:[%s142_s0 + $0x10] sm:$0xff] }
   0x2   :  { %v27_v1 = vld [vmem:[%s143_s1] sm:$0xff]  ;;  %v19_v3 = vmul.f32 0.05, %v11_v0  ;;  %v20_v4 = vmul.f32 0.05, %v12_v2  ;;  %v28_v5 = vld [vmem:[%s143_s1 + $0x8] sm:$0xff] }
   0x3   :  { %v21_v7 = vmul.f32 0.05, %v13_v6  ;;  %v29_v8 = vld [vmem:[%s143_s1 + $0x10] sm:$0xff]  ;;  %v14_v9 = vld [vmem:[%s142_s0 + $0x18] sm:$0xff]  ;;  %v15_v14 = vld [vmem:[%s142_s0 + $0x20] sm:$0xff] }
   0x4   :  { %v30_v10 = vld [vmem:[%s143_s1 + $0x18] sm:$0xff]  ;;  %v35_v11 = vadd.f32 %v27_v1, %v19_v3  ;;  %v36_v12 = vadd.f32 %v28_v5, %v20_v4  ;;  %v22_v13 = vmul.f32 0.05, %v14_v9  ;;  %v31_v15 = vld [vmem:[%s143_s1 + $0x20] sm:$0xff]  ;;  %v16_v16 = vld [vmem:[%s142_s0 + $0x28] sm:$0xff] }
   0x5   :  { %v37_v17 = vadd.f32 %v29_v8, %v21_v7  ;;  %v23_v18 = vmul.f32 0.05, %v15_v14  ;;  %v24_v19 = vmul.f32 0.05, %v16_v16  ;;  %v32_v20 = vld [vmem:[%s143_s1 + $0x28] sm:$0xff]  ;;  %v17_v21 = vld [vmem:[%s142_s0 + $0x30] sm:$0xff] }
   0x6   :  { %43 = vst [vmem:[%s144_s2] sm:$0xff] %v35_v11  ;;  %44 = vst [vmem:[%s144_s2 + $0x8] sm:$0xff] %v36_v12  ;;  %v38_v22 = vadd.f32 %v30_v10, %v22_v13  ;;  %v25_v23 = vmul.f32 0.05, %v17_v21  ;;  %v33_v24 = vld [vmem:[%s143_s1 + $0x30] sm:$0xff]  ;;  %v18_v25 = vld [vmem:[%s142_s0 + $0x38] sm:$0xff] }
   0x7   :  { %v34_v26 = vld [vmem:[%s143_s1 + $0x38] sm:$0xff]  ;;  %45 = vst [vmem:[%s144_s2 + $0x10] sm:$0xff] %v37_v17  ;;  %v39_v27 = vadd.f32 %v31_v15, %v23_v18  ;;  %v40_v28 = vadd.f32 %v32_v20, %v24_v19  ;;  %v26_v29 = vmul.f32 0.05, %v18_v25 }
   0x8   :  { %46 = vst [vmem:[%s144_s2 + $0x18] sm:$0xff] %v38_v22  ;;  %v41_v30 = vadd.f32 %v33_v24, %v25_v23 }
   0x9   :  { %47 = vst [vmem:[%s144_s2 + $0x20] sm:$0xff] %v39_v27  ;;  %48 = vst [vmem:[%s144_s2 + $0x28] sm:$0xff] %v40_v28  ;;  %v42_v31 = vadd.f32 %v34_v26, %v26_v29 }
   0xa   :  { %49 = vst [vmem:[%s144_s2 + $0x30] sm:$0xff] %v41_v30 }
   0xb   :  { %50 = vst [vmem:[%s144_s2 + $0x38] sm:$0xff] %v42_v31 }

</bundles_post_ra>
